<compile_context>
chip_gen: v5e
topology: v5e:2x2
jax: 0.10.0
libtpu: 0.0.40
codegen_flags: <defaults>
</compile_context>

<pallas_src>
import jax
import jax.numpy as jnp
import numpy as np
from jax.experimental import pallas as pl
from jax.experimental.pallas import tpu as pltpu

# Canonical instantiation of the abstract fe / ph pair.
CIN, COUT = 4, 8
KH = KW = 3
HIDDEN, PROJ = 32, 16


# ----------------------------------------------------------------------------
# Fused kernel: conv-as-matmul(+bias,ReLU) -> flatten -> Linear + ReLU + Linear
# ----------------------------------------------------------------------------
def _simclr_fused_kernel(x_ref, wc_ref, bc_ref, w1_ref, b1_ref, w2_ref, b2_ref,
                         f_ref, g_ref):
    """One batch tile, three chained lane-dense MXU matmuls.

    x_ref : (NB, Cin*HW)        f32   input images, pixels lane-dense
    wc_ref: (Cin*HW, Cout*HW)   bf16  conv embedded as a banded dense matrix
    bc_ref: (1, Cout*HW)        f32   conv bias broadcast over pixels
    w1_ref: (Cout*HW, HIDDEN)   bf16  fc1 weight (NCHW-flatten order)
    b1_ref: (1, HIDDEN)         f32
    w2_ref: (HIDDEN, PROJ)      bf16
    b2_ref: (1, PROJ)           f32
    f_ref : (NB, Cout*HW)       f32   feature map (== torch.nn.Flatten of NCHW)
    g_ref : (NB, PROJ)          f32   projection head output
    """
    # --- Conv 3x3 (pad=1, stride=1) + bias + ReLU: one MXU matmul -----------
    xb = x_ref[...].astype(jnp.bfloat16)
    conv = jnp.dot(xb, wc_ref[...], preferred_element_type=jnp.float32)
    f = jnp.maximum(conv + bc_ref[...], 0.0)          # (NB, Cout*HW) f32
    f_ref[...] = f                                     # write-only store

    # --- Projection head, fed from in-register activations ------------------
    h = jnp.dot(f.astype(jnp.bfloat16), w1_ref[...],
                preferred_element_type=jnp.float32)
    h = jnp.maximum(h + b1_ref[...], 0.0)              # (NB, HIDDEN) f32
    g_ref[...] = jnp.dot(h.astype(jnp.bfloat16), w2_ref[...],
                         preferred_element_type=jnp.float32) + b2_ref[...]


# ----------------------------------------------------------------------------
# One-time parameter repack (outside the per-forward hot path)
# ----------------------------------------------------------------------------
def _conv_as_matrix(conv_w, h, w):
    """Embed a KxK 'same' conv (stride 1, zero pad) into a dense
    (Cin*H*W, Cout*H*W) matrix M so that flatten_NCHW(conv(x)) == x_flat @ M."""
    conv_w = np.asarray(conv_w, np.float32)
    cout, cin, kh_sz, kw_sz = conv_w.shape
    hw = h * w
    m = np.zeros((cin * hw, cout * hw), np.float32)
    hp, wp = np.meshgrid(np.arange(h), np.arange(w), indexing="ij")
    p_out = (hp * w + wp).reshape(-1)                  # output pixel index
    for kh in range(kh_sz):
        for kw in range(kw_sz):
            hq = hp + kh - kh_sz // 2
            wq = wp + kw - kw_sz // 2
            valid = ((hq >= 0) & (hq < h) & (wq >= 0) & (wq < w)).reshape(-1)
            q_in = (hq * w + wq).reshape(-1)
            pv, qv = p_out[valid], q_in[valid]
            for ci in range(cin):
                for co in range(cout):
                    m[ci * hw + qv, co * hw + pv] = conv_w[co, ci, kh, kw]
    return m


def prepare_params(params, h, w):
    """Repack PyTorch-layout params into kernel layouts: conv lowered to a
    banded dense matmul operator, weights bf16, biases f32 row vectors."""
    hw = h * w
    wc = _conv_as_matrix(params["conv_w"], h, w)                 # (Cin*HW, Cout*HW)
    bc = np.repeat(np.asarray(params["conv_b"], np.float32), hw)[None, :]
    return {
        "wc": jnp.asarray(wc, jnp.bfloat16),
        "bc": jnp.asarray(bc, jnp.float32),
        "w1": jnp.asarray(params["fc1_w"], jnp.bfloat16),        # (Cout*HW, HIDDEN)
        "b1": jnp.asarray(params["fc1_b"], jnp.float32).reshape(1, -1),
        "w2": jnp.asarray(params["fc2_w"], jnp.bfloat16),        # (HIDDEN, PROJ)
        "b2": jnp.asarray(params["fc2_b"], jnp.float32).reshape(1, -1),
    }


# ----------------------------------------------------------------------------
# Wrapper
# ----------------------------------------------------------------------------
def _round_up(a, m):
    return -(-a // m) * m


def _batch_tiling(n):
    """(padded_n, tile_rows): tile rows are a multiple of 8 sublanes, capped at
    256, and the grid has >= 2 steps whenever n >= 2 (v7x: 2 TensorCores)."""
    grid = max(1, _round_up(n, 256) // 256)            # ceil(n / 256)
    if n >= 2:
        grid = max(grid, 2)
    nb = max(8, _round_up(_round_up(n, grid) // grid, 8))
    return grid * nb, nb


def simclr_forward(x_nchw, prep):
    """Returns (f_xi, ph(flatten(f_xi))) like the PyTorch module."""
    N, Cin, H, W = x_nchw.shape
    HW = H * W
    feat_in = prep["wc"].shape[0]                      # Cin*HW
    feat_out = prep["wc"].shape[1]                     # Cout*HW
    hidden = prep["w1"].shape[1]
    proj = prep["w2"].shape[1]
    Cout = feat_out // HW

    x_flat = x_nchw.reshape(N, Cin * HW)               # contiguous merge, free
    NP, NB = _batch_tiling(N)
    if NP != N:                                        # pad ragged/tiny batches
        x_flat = jnp.pad(x_flat, ((0, NP - N), (0, 0)))
    grid = (NP // NB,)

    f_flat, g_xi = pl.pallas_call(
        _simclr_fused_kernel,
        out_shape=(
            jax.ShapeDtypeStruct((NP, feat_out), jnp.float32),
            jax.ShapeDtypeStruct((NP, proj), jnp.float32),
        ),
        grid=grid,
        in_specs=[
            pl.BlockSpec((NB, feat_in), lambda b: (b, 0)),        # x
            pl.BlockSpec((feat_in, feat_out), lambda b: (0, 0)),  # conv matrix
            pl.BlockSpec((1, feat_out), lambda b: (0, 0)),        # conv bias
            pl.BlockSpec((feat_out, hidden), lambda b: (0, 0)),   # fc1 w
            pl.BlockSpec((1, hidden), lambda b: (0, 0)),          # fc1 b
            pl.BlockSpec((hidden, proj), lambda b: (0, 0)),       # fc2 w
            pl.BlockSpec((1, proj), lambda b: (0, 0)),            # fc2 b
        ],
        out_specs=(
            pl.BlockSpec((NB, feat_out), lambda b: (b, 0)),       # f_xi (flat)
            pl.BlockSpec((NB, proj), lambda b: (b, 0)),           # g_xi
        ),
        compiler_params=pltpu.CompilerParams(
            dimension_semantics=("parallel",),
            vmem_limit_bytes=32 * 1024 * 1024,
        ),
    )(x_flat, prep["wc"], prep["bc"], prep["w1"], prep["b1"],
      prep["w2"], prep["b2"])

    if NP != N:
        f_flat = f_flat[:N]
        g_xi = g_xi[:N]
    f_xi = f_flat.reshape(N, Cout, H, W)               # contiguous split, free
    return f_xi, g_xi


# ----------------------------------------------------------------------------
# Deterministic params + pure-JAX reference (correctness check)
# ----------------------------------------------------------------------------
def init_params(key, cin=CIN, cout=COUT, h=16, w=16, hidden=HIDDEN, proj=PROJ):
    k1, k2, k3 = jax.random.split(key, 3)
    feat = cout * h * w
    return {
        "conv_w": 0.1 * jax.random.normal(k1, (cout, cin, KH, KW), jnp.float32),
        "conv_b": 0.01 * jnp.arange(cout, dtype=jnp.float32),
        "fc1_w": 0.05 * jax.random.normal(k2, (feat, hidden), jnp.float32),
        "fc1_b": 0.01 * jnp.ones((hidden,), jnp.float32),
        "fc2_w": 0.05 * jax.random.normal(k3, (hidden, proj), jnp.float32),
        "fc2_b": jnp.zeros((proj,), jnp.float32),
    }


def reference_forward(x, params):
    f = jax.lax.conv_general_dilated(
        x, params["conv_w"], window_strides=(1, 1), padding=((1, 1), (1, 1)),
        dimension_numbers=("NCHW", "OIHW", "NCHW"))
    f = jnp.maximum(f + params["conv_b"][None, :, None, None], 0.0)
    flat = f.reshape(x.shape[0], -1)
    h = jnp.maximum(flat @ params["fc1_w"] + params["fc1_b"], 0.0)
    g = h @ params["fc2_w"] + params["fc2_b"]
    return f, g


if __name__ == "__main__":
    N, C, H, W = 2, 4, 16, 16
    kx, kp = jax.random.split(jax.random.PRNGKey(0))
    x = jax.random.normal(kx, (N, C, H, W), jnp.float32)
    params = init_params(kp, cin=C, h=H, w=W)

    prep = prepare_params(params, H, W)     # one-time repack, outside hot path
    fwd = jax.jit(simclr_forward)
    f_xi, g_xi = fwd(x, prep)
    jax.block_until_ready((f_xi, g_xi))

    assert f_xi.shape == (N, COUT, H, W), f_xi.shape
    assert g_xi.shape == (N, PROJ), g_xi.shape

    # Precision contract: matmul inputs are bf16 (MXU-native), accumulation in
    # f32; reference is pure f32, hence the 3e-2 tolerances.
    f_ref, g_ref = reference_forward(x, params)
    np.testing.assert_allclose(np.asarray(f_xi), np.asarray(f_ref),
                               rtol=3e-2, atol=3e-2)
    np.testing.assert_allclose(np.asarray(g_xi), np.asarray(g_ref),
                               rtol=3e-2, atol=3e-2)
    print("KERNEL_OK")
</pallas_src>

<mosaic_0001>
module attributes {stable_mosaic.version = 11 : i64} {
  func.func @_simclr_fused_kernel(%arg0: i32, %arg1: memref<8x1024xf32, #tpu.memory_space<vmem>>, %arg2: memref<1024x2048xbf16, #tpu.memory_space<vmem>>, %arg3: memref<1x2048xf32, #tpu.memory_space<vmem>>, %arg4: memref<2048x32xbf16, #tpu.memory_space<vmem>>, %arg5: memref<1x32xf32, #tpu.memory_space<vmem>>, %arg6: memref<32x16xbf16, #tpu.memory_space<vmem>>, %arg7: memref<1x16xf32, #tpu.memory_space<vmem>>, %arg8: memref<8x2048xf32, #tpu.memory_space<vmem>>, %arg9: memref<8x16xf32, #tpu.memory_space<vmem>>) attributes {dimension_semantics = [#tpu.dimension_semantics<parallel>], iteration_bounds = array<i64: 2>, scalar_prefetch = 0 : i64, scratch_operands = 0 : i64, tpu.core_type = #tpu.core_type<tc>, window_params = [{transform_indices = @transform_0, window_bounds = array<i64: 8, 1024>}, {pipeline_mode = #tpu.pipeline_mode<synchronous>, transform_indices = @transform_1, window_bounds = array<i64: 1024, 2048>}, {pipeline_mode = #tpu.pipeline_mode<synchronous>, transform_indices = @transform_2, window_bounds = array<i64: 1, 2048>}, {pipeline_mode = #tpu.pipeline_mode<synchronous>, transform_indices = @transform_3, window_bounds = array<i64: 2048, 32>}, {pipeline_mode = #tpu.pipeline_mode<synchronous>, transform_indices = @transform_4, window_bounds = array<i64: 1, 32>}, {pipeline_mode = #tpu.pipeline_mode<synchronous>, transform_indices = @transform_5, window_bounds = array<i64: 32, 16>}, {pipeline_mode = #tpu.pipeline_mode<synchronous>, transform_indices = @transform_6, window_bounds = array<i64: 1, 16>}, {transform_indices = @transform_7, window_bounds = array<i64: 8, 2048>}, {transform_indices = @transform_8, window_bounds = array<i64: 8, 16>}]} {
    %c0 = arith.constant 0 : index
    %c0_0 = arith.constant 0 : index
    %0 = vector.load %arg1[%c0, %c0_0] : memref<8x1024xf32, #tpu.memory_space<vmem>>, vector<8x1024xf32>
    %1 = arith.truncf %0 : vector<8x1024xf32> to vector<8x1024xbf16>
    %c0_1 = arith.constant 0 : index
    %c0_2 = arith.constant 0 : index
    %2 = vector.load %arg2[%c0_1, %c0_2] : memref<1024x2048xbf16, #tpu.memory_space<vmem>>, vector<1024x2048xbf16>
    %cst = arith.constant dense<0.000000e+00> : vector<8x2048xf32>
    %3 = tpu.matmul %1, %2, %cst {dimension_numbers = #tpu.dot_dimension_numbers<[1], [0], [0], [1], [0, 0, 1, 1], [], []>} : vector<8x1024xbf16>, vector<1024x2048xbf16>, vector<8x2048xf32> -> vector<8x2048xf32>
    %c0_3 = arith.constant 0 : index
    %c0_4 = arith.constant 0 : index
    %4 = vector.load %arg3[%c0_3, %c0_4] : memref<1x2048xf32, #tpu.memory_space<vmem>>, vector<1x2048xf32>
    %5 = vector.broadcast %4 : vector<1x2048xf32> to vector<8x2048xf32>
    %6 = arith.addf %3, %5 : vector<8x2048xf32>
    %cst_5 = arith.constant 0.000000e+00 : f32
    %7 = vector.broadcast %cst_5 : f32 to vector<8x2048xf32>
    %8 = arith.maximumf %6, %7 : vector<8x2048xf32>
    %c0_6 = arith.constant 0 : index
    %c0_7 = arith.constant 0 : index
    %9 = vector.load %arg8[%c0_6, %c0_7] : memref<8x2048xf32, #tpu.memory_space<vmem>>, vector<8x2048xf32>
    tpu.vector_store %arg8[%c0_6, %c0_7], %8 {strides = array<i32>} : memref<8x2048xf32, #tpu.memory_space<vmem>>, vector<8x2048xf32>,
    %10 = arith.truncf %8 : vector<8x2048xf32> to vector<8x2048xbf16>
    %c0_8 = arith.constant 0 : index
    %c0_9 = arith.constant 0 : index
    %11 = vector.load %arg4[%c0_8, %c0_9] : memref<2048x32xbf16, #tpu.memory_space<vmem>>, vector<2048x32xbf16>
    %cst_10 = arith.constant dense<0.000000e+00> : vector<8x32xf32>
    %12 = tpu.matmul %10, %11, %cst_10 {dimension_numbers = #tpu.dot_dimension_numbers<[1], [0], [0], [1], [0, 0, 1, 1], [], []>} : vector<8x2048xbf16>, vector<2048x32xbf16>, vector<8x32xf32> -> vector<8x32xf32>
    %c0_11 = arith.constant 0 : index
    %c0_12 = arith.constant 0 : index
    %13 = vector.load %arg5[%c0_11, %c0_12] : memref<1x32xf32, #tpu.memory_space<vmem>>, vector<1x32xf32>
    %14 = vector.broadcast %13 : vector<1x32xf32> to vector<8x32xf32>
    %15 = arith.addf %12, %14 : vector<8x32xf32>
    %cst_13 = arith.constant 0.000000e+00 : f32
    %16 = vector.broadcast %cst_13 : f32 to vector<8x32xf32>
    %17 = arith.maximumf %15, %16 : vector<8x32xf32>
    %18 = arith.truncf %17 : vector<8x32xf32> to vector<8x32xbf16>
    %c0_14 = arith.constant 0 : index
    %c0_15 = arith.constant 0 : index
    %19 = vector.load %arg6[%c0_14, %c0_15] : memref<32x16xbf16, #tpu.memory_space<vmem>>, vector<32x16xbf16>
    %cst_16 = arith.constant dense<0.000000e+00> : vector<8x16xf32>
    %20 = tpu.matmul %18, %19, %cst_16 {dimension_numbers = #tpu.dot_dimension_numbers<[1], [0], [0], [1], [0, 0, 1, 1], [], []>} : vector<8x32xbf16>, vector<32x16xbf16>, vector<8x16xf32> -> vector<8x16xf32>
    %c0_17 = arith.constant 0 : index
    %c0_18 = arith.constant 0 : index
    %21 = vector.load %arg7[%c0_17, %c0_18] : memref<1x16xf32, #tpu.memory_space<vmem>>, vector<1x16xf32>
    %22 = vector.broadcast %21 : vector<1x16xf32> to vector<8x16xf32>
    %23 = arith.addf %20, %22 : vector<8x16xf32>
    %c0_19 = arith.constant 0 : index
    %c0_20 = arith.constant 0 : index
    %24 = vector.load %arg9[%c0_19, %c0_20] : memref<8x16xf32, #tpu.memory_space<vmem>>, vector<8x16xf32>
    tpu.vector_store %arg9[%c0_19, %c0_20], %23 {strides = array<i32>} : memref<8x16xf32, #tpu.memory_space<vmem>>, vector<8x16xf32>,
    return
  }
  func.func @transform_0(%arg0: i32) -> (i32, i32) {
    %c0_i32 = arith.constant 0 : i32
    %c0_i32_0 = arith.constant 0 : i32
    return %arg0, %c0_i32 : i32, i32
  }
  func.func @transform_1(%arg0: i32) -> (i32, i32) {
    %c0_i32 = arith.constant 0 : i32
    %c0_i32_0 = arith.constant 0 : i32
    %c0_i32_1 = arith.constant 0 : i32
    return %c0_i32, %c0_i32_0 : i32, i32
  }
  func.func @transform_2(%arg0: i32) -> (i32, i32) {
    %c0_i32 = arith.constant 0 : i32
    %c0_i32_0 = arith.constant 0 : i32
    %c0_i32_1 = arith.constant 0 : i32
    return %c0_i32, %c0_i32_0 : i32, i32
  }
  func.func @transform_3(%arg0: i32) -> (i32, i32) {
    %c0_i32 = arith.constant 0 : i32
    %c0_i32_0 = arith.constant 0 : i32
    %c0_i32_1 = arith.constant 0 : i32
    return %c0_i32, %c0_i32_0 : i32, i32
  }
  func.func @transform_4(%arg0: i32) -> (i32, i32) {
    %c0_i32 = arith.constant 0 : i32
    %c0_i32_0 = arith.constant 0 : i32
    %c0_i32_1 = arith.constant 0 : i32
    return %c0_i32, %c0_i32_0 : i32, i32
  }
  func.func @transform_5(%arg0: i32) -> (i32, i32) {
    %c0_i32 = arith.constant 0 : i32
    %c0_i32_0 = arith.constant 0 : i32
    %c0_i32_1 = arith.constant 0 : i32
    return %c0_i32, %c0_i32_0 : i32, i32
  }
  func.func @transform_6(%arg0: i32) -> (i32, i32) {
    %c0_i32 = arith.constant 0 : i32
    %c0_i32_0 = arith.constant 0 : i32
    %c0_i32_1 = arith.constant 0 : i32
    return %c0_i32, %c0_i32_0 : i32, i32
  }
  func.func @transform_7(%arg0: i32) -> (i32, i32) {
    %c0_i32 = arith.constant 0 : i32
    %c0_i32_0 = arith.constant 0 : i32
    return %arg0, %c0_i32 : i32, i32
  }
  func.func @transform_8(%arg0: i32) -> (i32, i32) {
    %c0_i32 = arith.constant 0 : i32
    %c0_i32_0 = arith.constant 0 : i32
    return %arg0, %c0_i32 : i32, i32
  }
}

</mosaic_0001>

<bundles_post_ra>
// kernel: simclr_forward.1
= control target key start
LH: loop header
LB: loop body
LE: loop exit
PB: predicated region body
PF: predicated region fallthrough
CT: control target
= control target key end

     0   :  { %14 = vsyncpa [#allocation3], 0  ;;  %s16609_s0 = inlined_call_operand.vmem [shape: f32[16,1024], index: 0, kind: input, shape index: {}]   ;;  %s16610_s1 = inlined_call_operand.hbm [shape: bf16[1024,2048], index: 1, kind: input, shape index: {}]   ;;  %s16611_s2 = inlined_call_operand.hbm [shape: f32[1,2048], index: 2, kind: input, shape index: {}]   ;;  %s16612_s3 = inlined_call_operand.vmem [shape: bf16[2048,32], index: 3, kind: input, shape index: {}]   ;;  %s16613_s4 = inlined_call_operand.hbm [shape: f32[1,32], index: 4, kind: input, shape index: {}]   ;;  %s16614_s5 = inlined_call_operand.vmem [shape: bf16[32,16], index: 5, kind: input, shape index: {}]   ;;  %s16615_s6 = inlined_call_operand.hbm [shape: f32[1,16], index: 6, kind: input, shape index: {}]   ;;  %s16616_s7 = inlined_call_operand.vmem [shape: f32[16,2048], index: 7, kind: output, shape index: {0}]   ;;  %s16617_s8 = inlined_call_operand.vmem [shape: f32[16,16], index: 8, kind: output, shape index: {1}]  }
   0x1   :  { %15 = vsyncpa [#allocation5], 0 }
   0x2   :  { %16 = vsyncpa [#allocation8], 0  ;;  %s15746_s27 = smov 0  }
   0x3 LB: > { %s257_s30 = sshll.u32 %s16611_s2, 4  ;;  %s15755_s9 = sadd.s32 4294967295, %s15693_s27   ;;  %s15693_s27 = sphi %s15746_s27, %s22_s27   ;;  %s258_s30 = int_to_ptr.hbm [resolvable:$true] %s257_s30 }
   0x4   : > { %p9693_p0 = scmp.ge.s32.totalorder %s15693_s27, 1  ;;  %p231_p1 = scmp.lt.s32.totalorder %s15693_s27, 3 }
   0x5   : > { %p15513_p2 = scmp.eq.s32.totalorder %s15755_s9, 0  ;;  %s15695_s11 = smov [#allocation4]  }
   0x6   : > { %p15760_p3 = pnand %p9693_p0, %p231_p1  ;;  %s259_s12 = sshll.u32 %s15695_s11, 4  ;;  %s260_s12 = int_to_ptr.vmem [resolvable:$true] %s259_s12 }
   0x7   : > { %s242_s15 = sshll.u32 %s16610_s1, 4  ;;  %s15696_s17 = smov [#allocation2]   ;;  %s243_s15 = int_to_ptr.hbm [resolvable:$true] %s242_s15 }
   0x8   : > { %p15500_p4 = pneg %p15760_p3  ;;  %s244_s18 = sshll.u32 %s15696_s17, 4  ;;  %s245_s18 = int_to_ptr.vmem [resolvable:$true] %s244_s18 }
   0x9   : > { %s272_s21 = sshll.u32 %s16613_s4, 4  ;;  %s15697_s22 = smov 1024   ;;  %s273_s21 = int_to_ptr.hbm [resolvable:$true] %s272_s21 }
   0xa   : > { %p15771_p5 = pnand %p15513_p2, %p15500_p4  ;;  %s15698_s23 = smov 64  }
   0xb   : > { %s15699_s24 = smov [#allocation6]   ;;  %s287_s29 = sshll.u32 %s16615_s6, 4  ;;  %s288_s29 = int_to_ptr.hbm [resolvable:$true] %s287_s29 }
   0xc   : > { %15506 = dma.hbm_to_vmem [thread:$0]  (!%p15771_p5), %s258_s30, 256, %s260_s12, [#allocation5]  }
   0xd   : > { %15503 = dma.hbm_to_vmem [thread:$0]  (!%p15771_p5), %s243_s15, 131072, %s245_s18, [#allocation3], %s15697_s22, %s15697_s22, %s15698_s23  }
   0xe   : > { %s274_s25 = sshll.u32 %s15699_s24, 4  ;;  %s15700_s11 = smov [#allocation7]   ;;  %s275_s25 = int_to_ptr.vmem [resolvable:$true] %s274_s25 }
   0xf   : > { %15509 = dma.hbm_to_vmem [thread:$0]  (!%p15771_p5), %s273_s21, 16, %s275_s25, [#allocation5]  }
  0x10   : > { %s289_s13 = sshll.u32 %s15700_s11, 4  ;;  %310 = sbr.rel (%p15760_p3) target bundleno = 1971 (0x7b3), region = 48  ;;  %s290_s13 = int_to_ptr.vmem [resolvable:$true] %s289_s13 }
  0x11   : > { %15512 = dma.hbm_to_vmem [thread:$0]  (!%p15771_p5), %s288_s29, 16, %s290_s13, [#allocation8]  }
  0x15   : > { %15680 = dma.done.wait (%p15513_p2), [#allocation3], 131072  }
  0x16   : > { %15682 = vsyncadd (%p15513_p2), [#allocation3], 4294836224 }
  0x17   : > { %15684 = dma.done.wait (%p15513_p2), [#allocation5], 272  }
  0x18   : > { %15686 = vsyncadd (%p15513_p2), [#allocation5], 4294967024 }
  0x19   : > { %15688 = dma.done.wait (%p15513_p2), [#allocation8], 16  }
  0x1a   : > { %15690 = vsyncadd (%p15513_p2), [#allocation8], 4294967280  ;;  %v10159_v0 = vld [vmem:[#allocation2 + $0x380] sm:$0xf]  ;;  %p364_p6 = scmp.lt.s32.totalorder %s15755_s9, 1  ;;  %vm9545_vm0 = vcmask 261120  }
  0x1b   : > { %v14450_v1 = vld [vmem:[#allocation2 + $0x3bc] sm:$0xf0]  ;;  %vm9562_vm1 = vcmask 130048  }
  0x1c   : > { %v10671_v2 = vld [vmem:[#allocation2 + $0x780] sm:$0xf]  ;;  %v10160_v3 = vor.u32 %v14450_v1, %v10159_v0  ;;  %s16621_s9 = smov (!%p364_p6, %s15755_s9), 1 }
  0x1d   : > { %v14578_v4 = vld [vmem:[#allocation2 + $0x7bc] sm:$0xf0]  ;;  %s14328_s30 = sshll.u32 %s16621_s9, 6  ;;  %s14329_s15 = sshll.u32 %s16621_s9, 7 }
  0x1e   : > { %v11183_v5 = vld [vmem:[#allocation2 + $0xb80] sm:$0xf]  ;;  %v10672_v7 = vor.u32 %v14578_v4, %v10671_v2  ;;  %6575 = vmatpush.bf16.msra.mxu0 %v10160_v3  ;;  %s15813_s14 = scalar_lea.vmem %s16609_s0, %s14328_s30  ;;  %s15878_s18 = scalar_lea.vmem %s16616_s7, %s14329_s15 }
  0x1f   : > { %v14706_v6 = vld [vmem:[#allocation2 + $0xbbc] sm:$0xf0]  ;;  %s9708_s30 = sshll.u32 %s16621_s9, 3 }
  0x20   : > { %v11184_v8 = vor.u32 %v14706_v6, %v11183_v5  ;;  %v11695_v9 = vld [vmem:[#allocation2 + $0xf80] sm:$0xf]  ;;  %6588 = vmatpush.bf16.msra.mxu1 %v10672_v7 }
  0x21   : > { %v14834_v10 = vld [vmem:[#allocation2 + $0xfbc] sm:$0xf0] }
  0x22   : > { %v10095_v11 = vld [vmem:[#allocation2 + $0x300] sm:$0xf]  ;;  %v11696_v12 = vor.u32 %v14834_v10, %v11695_v9  ;;  %6601 = vmatpush.bf16.msra.mxu2 %v11184_v8 }
  0x23   : > { %v14434_v13 = vld [vmem:[#allocation2 + $0x33c] sm:$0xf0] }
  0x24   : > { %v10607_v14 = vld [vmem:[#allocation2 + $0x700] sm:$0xf]  ;;  %v10096_v16 = vor.u32 %v14434_v13, %v10095_v11  ;;  %6614 = vmatpush.bf16.msra.mxu3 %v11696_v12 }
  0x25   : > { %v14562_v15 = vld [vmem:[#allocation2 + $0x73c] sm:$0xf0] }
  0x26   : > { %v10608_v17 = vor.u32 %v14562_v15, %v10607_v14  ;;  %v11119_v18 = vld [vmem:[#allocation2 + $0xb00] sm:$0xf]  ;;  %6576 = vmatpush.bf16.msra.mxu0 %v10096_v16 }
  0x27   : > { %v14690_v19 = vld [vmem:[#allocation2 + $0xb3c] sm:$0xf0] }
  0x28   : > { %v11631_v20 = vld [vmem:[#allocation2 + $0xf00] sm:$0xf]  ;;  %v11120_v21 = vor.u32 %v14690_v19, %v11119_v18  ;;  %6589 = vmatpush.bf16.msra.mxu1 %v10608_v17 }
  0x29   : > { %v14818_v22 = vld [vmem:[#allocation2 + $0xf3c] sm:$0xf0] }
  0x2a   : > { %v10031_v23 = vld [vmem:[#allocation2 + $0x280] sm:$0xf]  ;;  %v11632_v25 = vor.u32 %v14818_v22, %v11631_v20  ;;  %6602 = vmatpush.bf16.msra.mxu2 %v11120_v21 }
  0x2b   : > { %v14418_v24 = vld [vmem:[#allocation2 + $0x2bc] sm:$0xf0] }
  0x2c   : > { %v10543_v26 = vld [vmem:[#allocation2 + $0x680] sm:$0xf]  ;;  %v10032_v29 = vor.u32 %v14418_v24, %v10031_v23  ;;  %6615 = vmatpush.bf16.msra.mxu3 %v11632_v25 }
  0x2d   : > { %v14546_v27 = vld [vmem:[#allocation2 + $0x6bc] sm:$0xf0] }
  0x2e   : > { %v11055_v28 = vld [vmem:[#allocation2 + $0xa80] sm:$0xf]  ;;  %v10544_v33 = vor.u32 %v14546_v27, %v10543_v26  ;;  %6577 = vmatpush.bf16.msra.mxu0 %v10032_v29 }
  0x2f   : > { %v14674_v30 = vld [vmem:[#allocation2 + $0xabc] sm:$0xf0] }
  0x30   : > { %v11567_v31 = vld [vmem:[#allocation2 + $0xe80] sm:$0xf]  ;;  %v11056_v34 = vor.u32 %v14674_v30, %v11055_v28  ;;  %6590 = vmatpush.bf16.msra.mxu1 %v10544_v33 }
  0x31   : > { %v14802_v32 = vld [vmem:[#allocation2 + $0xebc] sm:$0xf0] }
  0x32   : > { %v9967_v35 = vld [vmem:[#allocation2 + $0x200] sm:$0xf]  ;;  %v11568_v38 = vor.u32 %v14802_v32, %v11567_v31  ;;  %6603 = vmatpush.bf16.msra.mxu2 %v11056_v34 }
  0x33   : > { %v14402_v36 = vld [vmem:[#allocation2 + $0x23c] sm:$0xf0] }
  0x34   : > { %v10479_v37 = vld [vmem:[#allocation2 + $0x600] sm:$0xf]  ;;  %v9968_v44 = vor.u32 %v14402_v36, %v9967_v35  ;;  %6616 = vmatpush.bf16.msra.mxu3 %v11568_v38 }
  0x35   : > { %v14530_v39 = vld [vmem:[#allocation2 + $0x63c] sm:$0xf0] }
  0x36   : > { %v10991_v40 = vld [vmem:[#allocation2 + $0xa00] sm:$0xf]  ;;  %v10480_v45 = vor.u32 %v14530_v39, %v10479_v37  ;;  %6578 = vmatpush.bf16.msra.mxu0 %v9968_v44 }
  0x37   : > { %v14658_v41 = vld [vmem:[#allocation2 + $0xa3c] sm:$0xf0] }
  0x38   : > { %v11503_v42 = vld [vmem:[#allocation2 + $0xe00] sm:$0xf]  ;;  %v10992_v46 = vor.u32 %v14658_v41, %v10991_v40  ;;  %6591 = vmatpush.bf16.msra.mxu1 %v10480_v45 }
  0x39   : > { %v14786_v43 = vld [vmem:[#allocation2 + $0xe3c] sm:$0xf0] }
  0x3a   : > { %v9903_v47 = vld [vmem:[#allocation2 + $0x180] sm:$0xf]  ;;  %v11504_v50 = vor.u32 %v14786_v43, %v11503_v42  ;;  %6604 = vmatpush.bf16.msra.mxu2 %v10992_v46 }
  0x3b   : > { %v14386_v48 = vld [vmem:[#allocation2 + $0x1bc] sm:$0xf0] }
  0x3c   : > { %v10415_v49 = vld [vmem:[#allocation2 + $0x580] sm:$0xf]  ;;  %v9904_v56 = vor.u32 %v14386_v48, %v9903_v47  ;;  %6617 = vmatpush.bf16.msra.mxu3 %v11504_v50 }
  0x3d   : > { %v14514_v51 = vld [vmem:[#allocation2 + $0x5bc] sm:$0xf0] }
  0x3e   : > { %v10927_v52 = vld [vmem:[#allocation2 + $0x980] sm:$0xf]  ;;  %v10416_v57 = vor.u32 %v14514_v51, %v10415_v49  ;;  %6579 = vmatpush.bf16.msra.mxu0 %v9904_v56 }
  0x3f   : > { %v14642_v53 = vld [vmem:[#allocation2 + $0x9bc] sm:$0xf0] }
  0x40   : > { %v11439_v54 = vld [vmem:[#allocation2 + $0xd80] sm:$0xf]  ;;  %v10928_v58 = vor.u32 %v14642_v53, %v10927_v52  ;;  %6592 = vmatpush.bf16.msra.mxu1 %v10416_v57 }
  0x41   : > { %v14770_v55 = vld [vmem:[#allocation2 + $0xdbc] sm:$0xf0] }
  0x42   : > { %v9839_v59 = vld [vmem:[#allocation2 + $0x100] sm:$0xf]  ;;  %v11440_v62 = vor.u32 %v14770_v55, %v11439_v54  ;;  %6605 = vmatpush.bf16.msra.mxu2 %v10928_v58 }
  0x43   : > { %v14370_v60 = vld [vmem:[#allocation2 + $0x13c] sm:$0xf0] }
  0x44   : > { %v10351_v61 = vld [vmem:[#allocation2 + $0x500] sm:$0xf]  ;;  %v9840_v4 = vor.u32 %v14370_v60, %v9839_v59  ;;  %6618 = vmatpush.bf16.msra.mxu3 %v11440_v62 }
  0x45   : > { %v14498_v63 = vld [vmem:[#allocation2 + $0x53c] sm:$0xf0] }
  0x46   : > { %v10863_v0 = vld [vmem:[#allocation2 + $0x900] sm:$0xf]  ;;  %v10352_v5 = vor.u32 %v14498_v63, %v10351_v61  ;;  %6580 = vmatpush.bf16.msra.mxu0 %v9840_v4 }
  0x47   : > { %v14626_v1 = vld [vmem:[#allocation2 + $0x93c] sm:$0xf0] }
  0x48   : > { %v11375_v2 = vld [vmem:[#allocation2 + $0xd00] sm:$0xf]  ;;  %v10864_v6 = vor.u32 %v14626_v1, %v10863_v0  ;;  %6593 = vmatpush.bf16.msra.mxu1 %v10352_v5 }
  0x49   : > { %v14754_v3 = vld [vmem:[#allocation2 + $0xd3c] sm:$0xf0] }
  0x4a   : > { %v9775_v7 = vld [vmem:[#allocation2 + $0x80] sm:$0xf]  ;;  %v11376_v10 = vor.u32 %v14754_v3, %v11375_v2  ;;  %6606 = vmatpush.bf16.msra.mxu2 %v10864_v6  ;;  %v381_v3 = vld [vmem:[%s15813_s14 + $0x10] sm:$0xff] }
  0x4b   : > { %v14354_v8 = vld [vmem:[#allocation2 + $0xbc] sm:$0xf0] }
  0x4c   : > { %v10287_v9 = vld [vmem:[#allocation2 + $0x480] sm:$0xf]  ;;  %v9776_v16 = vor.u32 %v14354_v8, %v9775_v7  ;;  %6619 = vmatpush.bf16.msra.mxu3 %v11376_v10  ;;  %v15817_v8 = vpack.c.bf16 %v381_v3, %v381_v3  ;;  %v382_v10 = vld [vmem:[%s15813_s14 + $0x18] sm:$0xff] }
  0x4d   : > { %v14482_v11 = vld [vmem:[#allocation2 + $0x4bc] sm:$0xf0] }
  0x4e   : > { %v10799_v12 = vld [vmem:[#allocation2 + $0x880] sm:$0xf]  ;;  %v10288_v19 = vor.u32 %v14482_v11, %v10287_v9  ;;  %6581 = vmatpush.bf16.msra.mxu0 %v9776_v16 }
  0x4f   : > { %v14610_v13 = vld [vmem:[#allocation2 + $0x8bc] sm:$0xf0] }
  0x50   : > { %v11311_v14 = vld [vmem:[#allocation2 + $0xc80] sm:$0xf]  ;;  %v10800_v20 = vor.u32 %v14610_v13, %v10799_v12  ;;  %6594 = vmatpush.bf16.msra.mxu1 %v10288_v19  ;;  %v380_v19 = vld [vmem:[%s15813_s14 + $0x8] sm:$0xff] }
  0x51   : > { %v14738_v15 = vld [vmem:[#allocation2 + $0xcbc] sm:$0xf0] }
  0x52   : > { %v9711_v17 = vld [vmem:[#allocation2] sm:$0xf]  ;;  %v11312_v24 = vor.u32 %v14738_v15, %v11311_v14  ;;  %6607 = vmatpush.bf16.msra.mxu2 %v10800_v20  ;;  %v15822_v15 = vpack.c.bf16 %v382_v10, %v382_v10  ;;  %v10673_v10 = vld [vmem:[#allocation2 + $0x7c0] sm:$0xf0] }
  0x53   : > { %v14338_v18 = vld [vmem:[#allocation2 + $0x3c] sm:$0xf0] }
  0x54   : > { %v10223_v21 = vld [vmem:[#allocation2 + $0x400] sm:$0xf]  ;;  %v9712_v31 = vor.u32 %v14338_v18, %v9711_v17  ;;  %6620 = vmatpush.bf16.msra.mxu3 %v11312_v24 }
  0x55   : > { %v14466_v22 = vld [vmem:[#allocation2 + $0x43c] sm:$0xf0] }
  0x56   : > { %v10735_v23 = vld [vmem:[#allocation2 + $0x800] sm:$0xf]  ;;  %v10224_v35 = vor.u32 %v14466_v22, %v10223_v21  ;;  %6582 = vmatpush.bf16.msra.mxu0 %v9712_v31 }
  0x57   : > { %v14594_v25 = vld [vmem:[#allocation2 + $0x83c] sm:$0xf0] }
  0x58   : > { %v11247_v26 = vld [vmem:[#allocation2 + $0xc00] sm:$0xf]  ;;  %v10736_v36 = vor.u32 %v14594_v25, %v10735_v23  ;;  %6595 = vmatpush.bf16.msra.mxu1 %v10224_v35  ;;  %v15828_v25 = vpack.c.bf16 %v380_v19, %v380_v19 }
  0x59   : > { %v14722_v27 = vld [vmem:[#allocation2 + $0xc3c] sm:$0xf0] }
  0x5a   : > { %v12207_v28 = vld [vmem:[#allocation2 + $0x1380] sm:$0xf]  ;;  %v11248_v39 = vor.u32 %v14722_v27, %v11247_v26  ;;  %6608 = vmatpush.bf16.msra.mxu2 %v10736_v36 }
  0x5b   : > { %v14962_v29 = vld [vmem:[#allocation2 + $0x13bc] sm:$0xf0]  ;;  %6596 = vmatmul.bf16.vlgmr.msra.gmra.mxu1 %v15828_v25 }
  0x5c   : > { %v12719_v30 = vld [vmem:[#allocation2 + $0x1780] sm:$0xf]  ;;  %v12208_v40 = vor.u32 %v14962_v29, %v12207_v28  ;;  %6621 = vmatpush.bf16.msra.mxu3 %v11248_v39 }
  0x5d   : > { %v15090_v32 = vld [vmem:[#allocation2 + $0x17bc] sm:$0xf0]  ;;  %6609 = vmatmul.bf16.vlgmr.msra.gmra.mxu2 %v15817_v8 }
  0x5e   : > { %v13231_v33 = vld [vmem:[#allocation2 + $0x1b80] sm:$0xf]  ;;  %v12720_v41 = vor.u32 %v15090_v32, %v12719_v30  ;;  %6627 = vmatpush.bf16.msrb.mxu0 %v12208_v40 }
  0x5f   : > { %v15218_v34 = vld [vmem:[#allocation2 + $0x1bbc] sm:$0xf0]  ;;  %6622 = vmatmul.bf16.vlgmr.msra.gmra.mxu3 %v15822_v15 }
  0x60   : > { %v13743_v37 = vld [vmem:[#allocation2 + $0x1f80] sm:$0xf]  ;;  %v13232_v42 = vor.u32 %v15218_v34, %v13231_v33  ;;  %6640 = vmatpush.bf16.msrb.mxu1 %v12720_v41 }
  0x61   : > { %v15346_v38 = vld [vmem:[#allocation2 + $0x1fbc] sm:$0xf0] }
  0x62   : > { %v12143_v43 = vld [vmem:[#allocation2 + $0x1300] sm:$0xf]  ;;  %v13744_v46 = vor.u32 %v15346_v38, %v13743_v37  ;;  %6653 = vmatpush.bf16.msrb.mxu2 %v13232_v42 }
  0x63   : > { %v14946_v44 = vld [vmem:[#allocation2 + $0x133c] sm:$0xf0] }
  0x64   : > { %v12655_v45 = vld [vmem:[#allocation2 + $0x1700] sm:$0xf]  ;;  %v12144_v52 = vor.u32 %v14946_v44, %v12143_v43  ;;  %6666 = vmatpush.bf16.msrb.mxu3 %v13744_v46 }
  0x65   : > { %v15074_v47 = vld [vmem:[#allocation2 + $0x173c] sm:$0xf0] }
  0x66   : > { %v13167_v48 = vld [vmem:[#allocation2 + $0x1b00] sm:$0xf]  ;;  %v12656_v54 = vor.u32 %v15074_v47, %v12655_v45  ;;  %6628 = vmatpush.bf16.msrb.mxu0 %v12144_v52 }
  0x67   : > { %v15202_v49 = vld [vmem:[#allocation2 + $0x1b3c] sm:$0xf0] }
  0x68   : > { %v13679_v50 = vld [vmem:[#allocation2 + $0x1f00] sm:$0xf]  ;;  %v13168_v55 = vor.u32 %v15202_v49, %v13167_v48  ;;  %6641 = vmatpush.bf16.msrb.mxu1 %v12656_v54 }
  0x69   : > { %v15330_v51 = vld [vmem:[#allocation2 + $0x1f3c] sm:$0xf0] }
  0x6a   : > { %v12079_v53 = vld [vmem:[#allocation2 + $0x1280] sm:$0xf]  ;;  %v13680_v59 = vor.u32 %v15330_v51, %v13679_v50  ;;  %6654 = vmatpush.bf16.msrb.mxu2 %v13168_v55 }
  0x6b   : > { %v14930_v56 = vld [vmem:[#allocation2 + $0x12bc] sm:$0xf0] }
  0x6c   : > { %v12591_v57 = vld [vmem:[#allocation2 + $0x1680] sm:$0xf]  ;;  %v12080_v0 = vor.u32 %v14930_v56, %v12079_v53  ;;  %6667 = vmatpush.bf16.msrb.mxu3 %v13680_v59 }
  0x6d   : > { %v15058_v58 = vld [vmem:[#allocation2 + $0x16bc] sm:$0xf0] }
  0x6e   : > { %v13103_v60 = vld [vmem:[#allocation2 + $0x1a80] sm:$0xf]  ;;  %v12592_v1 = vor.u32 %v15058_v58, %v12591_v57  ;;  %6629 = vmatpush.bf16.msrb.mxu0 %v12080_v0 }
  0x6f   : > { %v15186_v61 = vld [vmem:[#allocation2 + $0x1abc] sm:$0xf0] }
  0x70   : > { %v13615_v62 = vld [vmem:[#allocation2 + $0x1e80] sm:$0xf]  ;;  %v13104_v5 = vor.u32 %v15186_v61, %v13103_v60  ;;  %6642 = vmatpush.bf16.msrb.mxu1 %v12592_v1 }
  0x71   : > { %v15314_v63 = vld [vmem:[#allocation2 + $0x1ebc] sm:$0xf0] }
  0x72   : > { %v12015_v2 = vld [vmem:[#allocation2 + $0x1200] sm:$0xf]  ;;  %v13616_v11 = vor.u32 %v15314_v63, %v13615_v62  ;;  %6655 = vmatpush.bf16.msrb.mxu2 %v13104_v5  ;;  %v10161_v5 = vld [vmem:[#allocation2 + $0x3c0] sm:$0xf0] }
  0x73   : > { %v379_v4 = vld [vmem:[%s15813_s14] sm:$0xff] }
  0x74   : > { %v14914_v6 = vld [vmem:[#allocation2 + $0x123c] sm:$0xf0]  ;;  %v15819_v9 = vpack.c.bf16 %v379_v4, %v379_v4  ;;  %6668 = vmatpush.bf16.msrb.mxu3 %v13616_v11  ;;  %v14442_v4 = vld [vmem:[#allocation2 + $0x384] sm:$0xf] }
  0x75   : > { %v12527_v7 = vld [vmem:[#allocation2 + $0x1600] sm:$0xf]  ;;  %v12016_v18 = vor.u32 %v14914_v6, %v12015_v2  ;;  %v14570_v6 = vld [vmem:[#allocation2 + $0x784] sm:$0xf] }
  0x76   : > { %v15042_v12 = vld [vmem:[#allocation2 + $0x163c] sm:$0xf0]  ;;  %6583 = vmatmul.bf16.vlgmr.msra.gmra.mxu0 %v15819_v9  ;;  %v14698_v11 = vld [vmem:[#allocation2 + $0xb84] sm:$0xf] }
  0x77   : > { %v13039_v13 = vld [vmem:[#allocation2 + $0x1a00] sm:$0xf]  ;;  %v12528_v20 = vor.u32 %v15042_v12, %v12527_v7  ;;  %6630 = vmatpush.bf16.msrb.mxu0 %v12016_v18  ;;  %v11185_v12 = vld [vmem:[#allocation2 + $0xbc0] sm:$0xf0]  ;;  %v385_v18 = vld [vmem:[%s15813_s14 + $0x30] sm:$0xff] }
  0x78   : > { %v15170_v14 = vld [vmem:[#allocation2 + $0x1a3c] sm:$0xf0] }
  0x79   : > { %v13551_v16 = vld [vmem:[#allocation2 + $0x1e00] sm:$0xf]  ;;  %v13040_v21 = vor.u32 %v15170_v14, %v13039_v13  ;;  %6643 = vmatpush.bf16.msrb.mxu1 %v12528_v20  ;;  %v10164_v20 = vor.u32 %v14442_v4, %v10161_v5  ;;  %v9905_v4 = vld [vmem:[#allocation2 + $0x1c0] sm:$0xf0] }
  0x7a   : > { %v15298_v17 = vld [vmem:[#allocation2 + $0x1e3c] sm:$0xf0]  ;;  %v14506_v5 = vld [vmem:[#allocation2 + $0x584] sm:$0xf] }
  0x7b   : > { %v11951_v22 = vld [vmem:[#allocation2 + $0x1180] sm:$0xf]  ;;  %v13552_v26 = vor.u32 %v15298_v17, %v13551_v16  ;;  %6656 = vmatpush.bf16.msrb.mxu2 %v13040_v21  ;;  %v14826_v16 = vld [vmem:[#allocation2 + $0xf84] sm:$0xf] }
  0x7c   : > { %v14898_v23 = vld [vmem:[#allocation2 + $0x11bc] sm:$0xf0]  ;;  %v11697_v17 = vld [vmem:[#allocation2 + $0xfc0] sm:$0xf0] }
  0x7d   : > { %v12463_v24 = vld [vmem:[#allocation2 + $0x1580] sm:$0xf]  ;;  %v11952_v32 = vor.u32 %v14898_v23, %v11951_v22  ;;  %6669 = vmatpush.bf16.msrb.mxu3 %v13552_v26  ;;  %v14426_v21 = vld [vmem:[#allocation2 + $0x304] sm:$0xf]  ;;  %v386_v23 = vld [vmem:[%s15813_s14 + $0x38] sm:$0xff]  ;;  %v11188_v26 = vor.u32 %v14698_v11, %v11185_v12 }
  0x7e   : > { %v15026_v27 = vld [vmem:[#allocation2 + $0x15bc] sm:$0xf0]  ;;  %v10929_v11 = vld [vmem:[#allocation2 + $0x9c0] sm:$0xf0] }
  0x7f   : > { %v12975_v28 = vld [vmem:[#allocation2 + $0x1980] sm:$0xf]  ;;  %v12464_v33 = vor.u32 %v15026_v27, %v12463_v24  ;;  %6631 = vmatpush.bf16.msrb.mxu0 %v11952_v32  ;;  %v10676_v24 = vor.u32 %v14570_v6, %v10673_v10  ;;  %v10097_v27 = vld [vmem:[#allocation2 + $0x340] sm:$0xf0] }
  0x80   : > { %v15154_v29 = vld [vmem:[#allocation2 + $0x19bc] sm:$0xf0]  ;;  %v14682_v32 = vld [vmem:[#allocation2 + $0xb04] sm:$0xf] }
  0x81   : > { %v13487_v30 = vld [vmem:[#allocation2 + $0x1d80] sm:$0xf]  ;;  %v12976_v34 = vor.u32 %v15154_v29, %v12975_v28  ;;  %6644 = vmatpush.bf16.msrb.mxu1 %v12464_v33  ;;  %v14554_v28 = vld [vmem:[#allocation2 + $0x704] sm:$0xf]  ;;  %v384_v29 = vld [vmem:[%s15813_s14 + $0x28] sm:$0xff] }
  0x82   : > { %v15282_v31 = vld [vmem:[#allocation2 + $0x1dbc] sm:$0xf0]  ;;  %v11121_v33 = vld [vmem:[#allocation2 + $0xb40] sm:$0xf0] }
  0x83   : > { %v11887_v35 = vld [vmem:[#allocation2 + $0x1100] sm:$0xf]  ;;  %v13488_v38 = vor.u32 %v15282_v31, %v13487_v30  ;;  %6657 = vmatpush.bf16.msrb.mxu2 %v12976_v34  ;;  %v11700_v30 = vor.u32 %v14826_v16, %v11697_v17  ;;  %v10609_v31 = vld [vmem:[#allocation2 + $0x740] sm:$0xf0]  ;;  %v15835_v34 = vpack.c.bf16 %v385_v18, %v385_v18 }
  0x84   : > { %v14882_v36 = vld [vmem:[#allocation2 + $0x113c] sm:$0xf0]  ;;  %v14634_v10 = vld [vmem:[#allocation2 + $0x984] sm:$0xf] }
  0x85   : > { %v12399_v37 = vld [vmem:[#allocation2 + $0x1500] sm:$0xf]  ;;  %v11888_v44 = vor.u32 %v14882_v36, %v11887_v35  ;;  %6670 = vmatpush.bf16.msrb.mxu3 %v13488_v38  ;;  %v14810_v35 = vld [vmem:[#allocation2 + $0xf04] sm:$0xf]  ;;  %v15839_v38 = vpack.c.bf16 %v386_v23, %v386_v23  ;;  %v10932_v17 = vor.u32 %v14634_v10, %v10929_v11 }
  0x86   : > { %v15010_v39 = vld [vmem:[#allocation2 + $0x153c] sm:$0xf0]  ;;  %v11633_v36 = vld [vmem:[#allocation2 + $0xf40] sm:$0xf0] }
  0x87   : > { %v12911_v40 = vld [vmem:[#allocation2 + $0x1900] sm:$0xf]  ;;  %v12400_v45 = vor.u32 %v15010_v39, %v12399_v37  ;;  %6632 = vmatpush.bf16.msrb.mxu0 %v11888_v44  ;;  %v10100_v39 = vor.u32 %v14426_v21, %v10097_v27  ;;  %v10033_v44 = vld [vmem:[#allocation2 + $0x2c0] sm:$0xf0] }
  0x88   : > { %v15138_v41 = vld [vmem:[#allocation2 + $0x193c] sm:$0xf0]  ;;  %v14762_v12 = vld [vmem:[#allocation2 + $0xd84] sm:$0xf] }
  0x89   : > { %v13423_v42 = vld [vmem:[#allocation2 + $0x1d00] sm:$0xf]  ;;  %v12912_v46 = vor.u32 %v15138_v41, %v12911_v40  ;;  %6645 = vmatpush.bf16.msrb.mxu1 %v12400_v45  ;;  %v15841_v40 = vpack.c.bf16 %v384_v29, %v384_v29  ;;  %v10612_v41 = vor.u32 %v14554_v28, %v10609_v31  ;;  %v14538_v45 = vld [vmem:[#allocation2 + $0x684] sm:$0xf] }
  0x8a   : > { %v15266_v43 = vld [vmem:[#allocation2 + $0x1d3c] sm:$0xf0]  ;;  %v14362_v18 = vld [vmem:[#allocation2 + $0x104] sm:$0xf] }
  0x8b   : > { %v11823_v47 = vld [vmem:[#allocation2 + $0x1080] sm:$0xf]  ;;  %v13424_v50 = vor.u32 %v15266_v43, %v13423_v42  ;;  %6658 = vmatpush.bf16.msrb.mxu2 %v12912_v46  ;;  %v11124_v42 = vor.u32 %v14682_v32, %v11121_v33  ;;  %v14410_v43 = vld [vmem:[#allocation2 + $0x284] sm:$0xf]  ;;  %v11636_v46 = vor.u32 %v14810_v35, %v11633_v36 }
  0x8c   : > { %v14866_v48 = vld [vmem:[#allocation2 + $0x10bc] sm:$0xf0]  ;;  %v14618_v23 = vld [vmem:[#allocation2 + $0x904] sm:$0xf] }
  0x8d   : > { %v12335_v49 = vld [vmem:[#allocation2 + $0x1480] sm:$0xf]  ;;  %v11824_v56 = vor.u32 %v14866_v48, %v11823_v47  ;;  %6671 = vmatpush.bf16.msrb.mxu3 %v13424_v50  ;;  %v10545_v47 = vld [vmem:[#allocation2 + $0x6c0] sm:$0xf0] }
  0x8e   : > { %v14994_v51 = vld [vmem:[#allocation2 + $0x14bc] sm:$0xf0]  ;;  %v14666_v48 = vld [vmem:[#allocation2 + $0xa84] sm:$0xf] }
  0x8f   : > { %v12847_v52 = vld [vmem:[#allocation2 + $0x1880] sm:$0xf]  ;;  %v12336_v59 = vor.u32 %v14994_v51, %v12335_v49  ;;  %6633 = vmatpush.bf16.msrb.mxu0 %v11824_v56  ;;  %v11057_v49 = vld [vmem:[#allocation2 + $0xac0] sm:$0xf0] }
  0x90   : > { %v15122_v53 = vld [vmem:[#allocation2 + $0x18bc] sm:$0xf0]  ;;  %v14794_v50 = vld [vmem:[#allocation2 + $0xe84] sm:$0xf] }
  0x91   : > { %v13359_v54 = vld [vmem:[#allocation2 + $0x1c80] sm:$0xf]  ;;  %v12848_v60 = vor.u32 %v15122_v53, %v12847_v52  ;;  %6646 = vmatpush.bf16.msrb.mxu1 %v12336_v59  ;;  %v11569_v51 = vld [vmem:[#allocation2 + $0xec0] sm:$0xf0]  ;;  %v10036_v52 = vor.u32 %v14410_v43, %v10033_v44  ;;  %v10548_v53 = vor.u32 %v14538_v45, %v10545_v47 }
  0x92   : > { %v15250_v55 = vld [vmem:[#allocation2 + $0x1cbc] sm:$0xf0]  ;;  %v9969_v56 = vld [vmem:[#allocation2 + $0x240] sm:$0xf0] }
  0x93   : > { %v11759_v57 = vld [vmem:[#allocation2 + $0x1000] sm:$0xf]  ;;  %v13360_v0 = vor.u32 %v15250_v55, %v13359_v54  ;;  %6659 = vmatpush.bf16.msrb.mxu2 %v12848_v60  ;;  %v11060_v54 = vor.u32 %v14666_v48, %v11057_v49  ;;  %v14394_v55 = vld [vmem:[#allocation2 + $0x204] sm:$0xf] }
  0x94   : > { %v14850_v58 = vld [vmem:[#allocation2 + $0x103c] sm:$0xf0]  ;;  %v10481_v59 = vld [vmem:[#allocation2 + $0x640] sm:$0xf0] }
  0x95   : > { %v12271_v61 = vld [vmem:[#allocation2 + $0x1400] sm:$0xf]  ;;  %v11760_v7 = vor.u32 %v14850_v58, %v11759_v57  ;;  %6672 = vmatpush.bf16.msrb.mxu3 %v13360_v0  ;;  %v14522_v57 = vld [vmem:[#allocation2 + $0x604] sm:$0xf]  ;;  %v11572_v58 = vor.u32 %v14794_v50, %v11569_v51  ;;  %v9972_v0 = vor.u32 %v14394_v55, %v9969_v56 }
  0x96   : > { %v14978_v62 = vld [vmem:[#allocation2 + $0x143c] sm:$0xf0]  ;;  %v14650_v60 = vld [vmem:[#allocation2 + $0xa04] sm:$0xf] }
  0x97   : > { %v12783_v63 = vld [vmem:[#allocation2 + $0x1800] sm:$0xf]  ;;  %v12272_v13 = vor.u32 %v14978_v62, %v12271_v61  ;;  %6634 = vmatpush.bf16.msrb.mxu0 %v11760_v7  ;;  %v10993_v61 = vld [vmem:[#allocation2 + $0xa40] sm:$0xf0] }
  0x98   : > { %v15106_v1 = vld [vmem:[#allocation2 + $0x183c] sm:$0xf0]  ;;  %v14778_v62 = vld [vmem:[#allocation2 + $0xe04] sm:$0xf] }
  0x99   : > { %v13295_v2 = vld [vmem:[#allocation2 + $0x1c00] sm:$0xf]  ;;  %v12784_v14 = vor.u32 %v15106_v1, %v12783_v63  ;;  %6647 = vmatpush.bf16.msrb.mxu1 %v12272_v13  ;;  %v11505_v63 = vld [vmem:[#allocation2 + $0xe40] sm:$0xf0]  ;;  %v10484_v1 = vor.u32 %v14522_v57, %v10481_v59 }
  0x9a   : > { %v15234_v3 = vld [vmem:[#allocation2 + $0x1c3c] sm:$0xf0]  ;;  %v11508_v6 = vor.u32 %v14778_v62, %v11505_v63  ;;  %v10417_v7 = vld [vmem:[#allocation2 + $0x5c0] sm:$0xf0] }
  0x9b   : > { %v13296_v19 = vor.u32 %v15234_v3, %v13295_v2  ;;  %v383_v22 = vld [vmem:[%s15813_s14 + $0x20] sm:$0xff]  ;;  %6660 = vmatpush.bf16.msrb.mxu2 %v12784_v14  ;;  %6679 = vmatpush.bf16.msra.mxu0 %v10164_v20  ;;  %v10996_v2 = vor.u32 %v14650_v60, %v10993_v61  ;;  %v10420_v16 = vor.u32 %v14506_v5, %v10417_v7  ;;  %s377_s14 = scalar_lea.vmem %s16617_s8, %s9708_s30 }
  0x9c   : > { %v15837_v37 = vpack.c.bf16 %v383_v22, %v383_v22  ;;  %6648 = vmatmul.bf16.vlgmr.msrb.gmra.mxu1 %v15841_v40  ;;  %v14378_v3 = vld [vmem:[#allocation2 + $0x184] sm:$0xf] }
  0x9d   : > { %6673 = vmatpush.bf16.msrb.mxu3 %v13296_v19  ;;  %6692 = vmatpush.bf16.msra.mxu1 %v10676_v24  ;;  %v11441_v13 = vld [vmem:[#allocation2 + $0xdc0] sm:$0xf0]  ;;  %v9908_v14 = vor.u32 %v14378_v3, %v9905_v4 }
  0x9e   : > { %6661 = vmatmul.bf16.vlgmr.msrb.gmra.mxu2 %v15835_v34  ;;  %6635 = vmatmul.bf16.vlgmr.msrb.gmra.mxu0 %v15837_v37  ;;  %v9841_v19 = vld [vmem:[#allocation2 + $0x140] sm:$0xf0]  ;;  %v11444_v21 = vor.u32 %v14762_v12, %v11441_v13 }
  0x9f   : > { %6705 = vmatpush.bf16.msra.mxu2 %v11188_v26  ;;  %6680 = vmatpush.bf16.msra.mxu0 %v10100_v39  ;;  %v14490_v20 = vld [vmem:[#allocation2 + $0x504] sm:$0xf]  ;;  %v9844_v28 = vor.u32 %v14362_v18, %v9841_v19 }
  0xa0   : > { %6674 = vmatmul.bf16.vlgmr.msrb.gmra.mxu3 %v15839_v38  ;;  %v10353_v22 = vld [vmem:[#allocation2 + $0x540] sm:$0xf0] }
  0xa1   : > { %6718 = vmatpush.bf16.msra.mxu3 %v11700_v30  ;;  %6693 = vmatpush.bf16.msra.mxu1 %v10612_v41  ;;  %v10865_v24 = vld [vmem:[#allocation2 + $0x940] sm:$0xf0]  ;;  %v10356_v29 = vor.u32 %v14490_v20, %v10353_v22 }
  0xa2   : > { %v14746_v26 = vld [vmem:[#allocation2 + $0xd04] sm:$0xf]  ;;  %v10868_v30 = vor.u32 %v14618_v23, %v10865_v24 }
  0xa3   : > { %6706 = vmatpush.bf16.msra.mxu2 %v11124_v42  ;;  %6681 = vmatpush.bf16.msra.mxu0 %v10036_v52  ;;  %v11377_v27 = vld [vmem:[#allocation2 + $0xd40] sm:$0xf0] }
  0xa4   : > { %v14346_v31 = vld [vmem:[#allocation2 + $0x84] sm:$0xf]  ;;  %v11380_v35 = vor.u32 %v14746_v26, %v11377_v27 }
  0xa5   : > { %6719 = vmatpush.bf16.msra.mxu3 %v11636_v46  ;;  %6694 = vmatpush.bf16.msra.mxu1 %v10548_v53  ;;  %v9777_v32 = vld [vmem:[#allocation2 + $0xc0] sm:$0xf0] }
  0xa6   : > { %v14474_v33 = vld [vmem:[#allocation2 + $0x484] sm:$0xf]  ;;  %v9780_v45 = vor.u32 %v14346_v31, %v9777_v32 }
  0xa7   : > { %6707 = vmatpush.bf16.msra.mxu2 %v11060_v54  ;;  %6682 = vmatpush.bf16.msra.mxu0 %v9972_v0  ;;  %v10289_v36 = vld [vmem:[#allocation2 + $0x4c0] sm:$0xf0] }
  0xa8   : > { %v14602_v39 = vld [vmem:[#allocation2 + $0x884] sm:$0xf]  ;;  %v10292_v48 = vor.u32 %v14474_v33, %v10289_v36 }
  0xa9   : > { %6720 = vmatpush.bf16.msra.mxu3 %v11572_v58  ;;  %6695 = vmatpush.bf16.msra.mxu1 %v10484_v1  ;;  %v10801_v41 = vld [vmem:[#allocation2 + $0x8c0] sm:$0xf0] }
  0xaa   : > { %v14730_v42 = vld [vmem:[#allocation2 + $0xc84] sm:$0xf]  ;;  %v10804_v49 = vor.u32 %v14602_v39, %v10801_v41 }
  0xab   : > { %6708 = vmatpush.bf16.msra.mxu2 %v10996_v2  ;;  %6683 = vmatpush.bf16.msra.mxu0 %v9908_v14  ;;  %v11313_v43 = vld [vmem:[#allocation2 + $0xcc0] sm:$0xf0] }
  0xac   : > { %v14330_v44 = vld [vmem:[#allocation2 + $0x4] sm:$0xf]  ;;  %v11316_v53 = vor.u32 %v14730_v42, %v11313_v43 }
  0xad   : > { %6721 = vmatpush.bf16.msra.mxu3 %v11508_v6  ;;  %6696 = vmatpush.bf16.msra.mxu1 %v10420_v16  ;;  %v9713_v46 = vld [vmem:[#allocation2 + $0x40] sm:$0xf0] }
  0xae   : > { %v14458_v47 = vld [vmem:[#allocation2 + $0x404] sm:$0xf]  ;;  %v9716_v59 = vor.u32 %v14330_v44, %v9713_v46 }
  0xaf   : > { %6709 = vmatpush.bf16.msra.mxu2 %v10932_v17  ;;  %6684 = vmatpush.bf16.msra.mxu0 %v9844_v28  ;;  %v10225_v50 = vld [vmem:[#allocation2 + $0x440] sm:$0xf0] }
  0xb0   : > { %v14586_v51 = vld [vmem:[#allocation2 + $0x804] sm:$0xf]  ;;  %v10228_v63 = vor.u32 %v14458_v47, %v10225_v50 }
  0xb1   : > { %6722 = vmatpush.bf16.msra.mxu3 %v11444_v21  ;;  %6697 = vmatpush.bf16.msra.mxu1 %v10356_v29  ;;  %v10737_v52 = vld [vmem:[#allocation2 + $0x840] sm:$0xf0] }
  0xb2   : > { %v14714_v54 = vld [vmem:[#allocation2 + $0xc04] sm:$0xf]  ;;  %v10740_v0 = vor.u32 %v14586_v51, %v10737_v52 }
  0xb3   : > { %6710 = vmatpush.bf16.msra.mxu2 %v10868_v30  ;;  %v11249_v55 = vld [vmem:[#allocation2 + $0xc40] sm:$0xf0]  ;;  %6685 = vmatpush.bf16.msra.mxu0 %v9780_v45 }
  0xb4   : > { %v14954_v56 = vld [vmem:[#allocation2 + $0x1384] sm:$0xf]  ;;  %v11252_v3 = vor.u32 %v14714_v54, %v11249_v55 }
  0xb5   : > { %6723 = vmatpush.bf16.msra.mxu3 %v11380_v35  ;;  %v12209_v57 = vld [vmem:[#allocation2 + $0x13c0] sm:$0xf0]  ;;  %6698 = vmatpush.bf16.msra.mxu1 %v10292_v48 }
  0xb6   : > { %v15082_v58 = vld [vmem:[#allocation2 + $0x1784] sm:$0xf]  ;;  %v12212_v4 = vor.u32 %v14954_v56, %v12209_v57 }
  0xb7   : > { %v12721_v60 = vld [vmem:[#allocation2 + $0x17c0] sm:$0xf0]  ;;  %6711 = vmatpush.bf16.msra.mxu2 %v10804_v49  ;;  %6686 = vmatpush.bf16.msra.mxu0 %v9716_v59 }
  0xb8   : > { %v15210_v61 = vld [vmem:[#allocation2 + $0x1b84] sm:$0xf]  ;;  %v12724_v5 = vor.u32 %v15082_v58, %v12721_v60 }
  0xb9   : > { %v13233_v62 = vld [vmem:[#allocation2 + $0x1bc0] sm:$0xf0]  ;;  %6724 = vmatpush.bf16.msra.mxu3 %v11316_v53  ;;  %6699 = vmatpush.bf16.msra.mxu1 %v10228_v63 }
  0xba   : > { %v15338_v1 = vld [vmem:[#allocation2 + $0x1f84] sm:$0xf]  ;;  %v13236_v6 = vor.u32 %v15210_v61, %v13233_v62  ;;  %6687 = vmatmul.bf16.vlgmr.msra.gmra.mxu0 %v15819_v9 }
  0xbb   : > { %v13745_v2 = vld [vmem:[#allocation2 + $0x1fc0] sm:$0xf0]  ;;  %6712 = vmatpush.bf16.msra.mxu2 %v10740_v0  ;;  %6731 = vmatpush.bf16.msrb.mxu0 %v12212_v4 }
  0xbc   : > { %v14938_v7 = vld [vmem:[#allocation2 + $0x1304] sm:$0xf]  ;;  %v13748_v12 = vor.u32 %v15338_v1, %v13745_v2  ;;  %6700 = vmatmul.bf16.vlgmr.msra.gmra.mxu1 %v15828_v25 }
  0xbd   : > { %v12145_v10 = vld [vmem:[#allocation2 + $0x1340] sm:$0xf0]  ;;  %6725 = vmatpush.bf16.msra.mxu3 %v11252_v3  ;;  %6744 = vmatpush.bf16.msrb.mxu1 %v12724_v5 }
  0xbe   : > { %v15066_v11 = vld [vmem:[#allocation2 + $0x1704] sm:$0xf]  ;;  %v12148_v19 = vor.u32 %v14938_v7, %v12145_v10  ;;  %6713 = vmatmul.bf16.vlgmr.msra.gmra.mxu2 %v15817_v8 }
  0xbf   : > { %v12657_v13 = vld [vmem:[#allocation2 + $0x1740] sm:$0xf0]  ;;  %6757 = vmatpush.bf16.msrb.mxu2 %v13236_v6 }
  0xc0   : > { %v15194_v14 = vld [vmem:[#allocation2 + $0x1b04] sm:$0xf]  ;;  %v12660_v20 = vor.u32 %v15066_v11, %v12657_v13  ;;  %6726 = vmatmul.bf16.vlgmr.msra.gmra.mxu3 %v15822_v15  ;;  %6732 = vmatpush.bf16.msrb.mxu0 %v12148_v19 }
  0xc1   : > { %v13169_v16 = vld [vmem:[#allocation2 + $0x1b40] sm:$0xf0]  ;;  %6770 = vmatpush.bf16.msrb.mxu3 %v13748_v12 }
  0xc2   : > { %v15322_v17 = vld [vmem:[#allocation2 + $0x1f04] sm:$0xf]  ;;  %v13172_v21 = vor.u32 %v15194_v14, %v13169_v16  ;;  %6745 = vmatpush.bf16.msrb.mxu1 %v12660_v20 }
  0xc3   : > { %v13681_v18 = vld [vmem:[#allocation2 + $0x1f40] sm:$0xf0] }
  0xc4   : > { %v14922_v22 = vld [vmem:[#allocation2 + $0x1284] sm:$0xf]  ;;  %v13684_v26 = vor.u32 %v15322_v17, %v13681_v18  ;;  %6758 = vmatpush.bf16.msrb.mxu2 %v13172_v21 }
  0xc5   : > { %v12081_v23 = vld [vmem:[#allocation2 + $0x12c0] sm:$0xf0] }
  0xc6   : > { %v15050_v24 = vld [vmem:[#allocation2 + $0x1684] sm:$0xf]  ;;  %v12084_v32 = vor.u32 %v14922_v22, %v12081_v23  ;;  %6771 = vmatpush.bf16.msrb.mxu3 %v13684_v26 }
  0xc7   : > { %v12593_v27 = vld [vmem:[#allocation2 + $0x16c0] sm:$0xf0] }
  0xc8   : > { %v15178_v28 = vld [vmem:[#allocation2 + $0x1a84] sm:$0xf]  ;;  %v12596_v33 = vor.u32 %v15050_v24, %v12593_v27  ;;  %6733 = vmatpush.bf16.msrb.mxu0 %v12084_v32 }
  0xc9   : > { %v13105_v29 = vld [vmem:[#allocation2 + $0x1ac0] sm:$0xf0] }
  0xca   : > { %v15306_v30 = vld [vmem:[#allocation2 + $0x1e84] sm:$0xf]  ;;  %v13108_v35 = vor.u32 %v15178_v28, %v13105_v29  ;;  %6746 = vmatpush.bf16.msrb.mxu1 %v12596_v33 }
  0xcb   : > { %v13617_v31 = vld [vmem:[#allocation2 + $0x1ec0] sm:$0xf0] }
  0xcc   : > { %v14906_v36 = vld [vmem:[#allocation2 + $0x1204] sm:$0xf]  ;;  %v13620_v42 = vor.u32 %v15306_v30, %v13617_v31  ;;  %6759 = vmatpush.bf16.msrb.mxu2 %v13108_v35 }
  0xcd   : > { %v12017_v39 = vld [vmem:[#allocation2 + $0x1240] sm:$0xf0] }
  0xce   : > { %v15034_v41 = vld [vmem:[#allocation2 + $0x1604] sm:$0xf]  ;;  %v12020_v48 = vor.u32 %v14906_v36, %v12017_v39  ;;  %6772 = vmatpush.bf16.msrb.mxu3 %v13620_v42  ;;  %v10167_v39 = vld [vmem:[#allocation2 + $0x388] sm:$0xf] }
  0xcf   : > { %v12529_v43 = vld [vmem:[#allocation2 + $0x1640] sm:$0xf0]  ;;  %v10679_v42 = vld [vmem:[#allocation2 + $0x788] sm:$0xf] }
  0xd0   : > { %v15162_v44 = vld [vmem:[#allocation2 + $0x1a04] sm:$0xf]  ;;  %v12532_v49 = vor.u32 %v15034_v41, %v12529_v43  ;;  %6734 = vmatpush.bf16.msrb.mxu0 %v12020_v48  ;;  %v14451_v41 = vld [vmem:[#allocation2 + $0x3c4] sm:$0xf0] }
  0xd1   : > { %v13041_v45 = vld [vmem:[#allocation2 + $0x1a40] sm:$0xf0] }
  0xd2   : > { %v15290_v46 = vld [vmem:[#allocation2 + $0x1e04] sm:$0xf]  ;;  %v13044_v50 = vor.u32 %v15162_v44, %v13041_v45  ;;  %6747 = vmatpush.bf16.msrb.mxu1 %v12532_v49  ;;  %v14579_v44 = vld [vmem:[#allocation2 + $0x7c4] sm:$0xf0] }
  0xd3   : > { %v13553_v47 = vld [vmem:[#allocation2 + $0x1e40] sm:$0xf0]  ;;  %v11191_v45 = vld [vmem:[#allocation2 + $0xb88] sm:$0xf] }
  0xd4   : > { %v14890_v51 = vld [vmem:[#allocation2 + $0x1184] sm:$0xf]  ;;  %v13556_v54 = vor.u32 %v15290_v46, %v13553_v47  ;;  %6760 = vmatpush.bf16.msrb.mxu2 %v13044_v50  ;;  %v14707_v46 = vld [vmem:[#allocation2 + $0xbc4] sm:$0xf0] }
  0xd5   : > { %v11953_v52 = vld [vmem:[#allocation2 + $0x11c0] sm:$0xf0]  ;;  %v11703_v49 = vld [vmem:[#allocation2 + $0xf88] sm:$0xf] }
  0xd6   : > { %v15018_v53 = vld [vmem:[#allocation2 + $0x1584] sm:$0xf]  ;;  %v11956_v60 = vor.u32 %v14890_v51, %v11953_v52  ;;  %6773 = vmatpush.bf16.msrb.mxu3 %v13556_v54  ;;  %v14835_v50 = vld [vmem:[#allocation2 + $0xfc4] sm:$0xf0]  ;;  %v10168_v52 = vor.u32 %v14451_v41, %v10167_v39  ;;  %v11192_v54 = vor.u32 %v14707_v46, %v11191_v45 }
  0xd7   : > { %v12465_v55 = vld [vmem:[#allocation2 + $0x15c0] sm:$0xf0]  ;;  %v10935_v39 = vld [vmem:[#allocation2 + $0x988] sm:$0xf] }
  0xd8   : > { %v15146_v56 = vld [vmem:[#allocation2 + $0x1984] sm:$0xf]  ;;  %v12468_v61 = vor.u32 %v15018_v53, %v12465_v55  ;;  %6735 = vmatpush.bf16.msrb.mxu0 %v11956_v60  ;;  %v10680_v53 = vor.u32 %v14579_v44, %v10679_v42  ;;  %v10103_v55 = vld [vmem:[#allocation2 + $0x308] sm:$0xf] }
  0xd9   : > { %v12977_v57 = vld [vmem:[#allocation2 + $0x19c0] sm:$0xf0]  ;;  %v11127_v60 = vld [vmem:[#allocation2 + $0xb08] sm:$0xf] }
  0xda   : > { %v15274_v58 = vld [vmem:[#allocation2 + $0x1d84] sm:$0xf]  ;;  %v12980_v62 = vor.u32 %v15146_v56, %v12977_v57  ;;  %6748 = vmatpush.bf16.msrb.mxu1 %v12468_v61  ;;  %v14435_v56 = vld [vmem:[#allocation2 + $0x344] sm:$0xf0] }
  0xdb   : > { %v13489_v59 = vld [vmem:[#allocation2 + $0x1dc0] sm:$0xf0]  ;;  %v10615_v57 = vld [vmem:[#allocation2 + $0x708] sm:$0xf] }
  0xdc   : > { %v14874_v63 = vld [vmem:[#allocation2 + $0x1104] sm:$0xf]  ;;  %v13492_v2 = vor.u32 %v15274_v58, %v13489_v59  ;;  %6761 = vmatpush.bf16.msrb.mxu2 %v12980_v62  ;;  %v11704_v58 = vor.u32 %v14835_v50, %v11703_v49  ;;  %v14563_v59 = vld [vmem:[#allocation2 + $0x744] sm:$0xf0] }
  0xdd   : > { %v11889_v0 = vld [vmem:[#allocation2 + $0x1140] sm:$0xf0]  ;;  %v14691_v61 = vld [vmem:[#allocation2 + $0xb44] sm:$0xf0] }
  0xde   : > { %v15002_v1 = vld [vmem:[#allocation2 + $0x1504] sm:$0xf]  ;;  %v11892_v10 = vor.u32 %v14874_v63, %v11889_v0  ;;  %6774 = vmatpush.bf16.msrb.mxu3 %v13492_v2  ;;  %v11639_v62 = vld [vmem:[#allocation2 + $0xf08] sm:$0xf]  ;;  %v10104_v0 = vor.u32 %v14435_v56, %v10103_v55  ;;  %v11128_v2 = vor.u32 %v14691_v61, %v11127_v60 }
  0xdf   : > { %v12401_v3 = vld [vmem:[#allocation2 + $0x1540] sm:$0xf0]  ;;  %v14819_v63 = vld [vmem:[#allocation2 + $0xf44] sm:$0xf0] }
  0xe0   : > { %v15130_v4 = vld [vmem:[#allocation2 + $0x1904] sm:$0xf]  ;;  %v12404_v11 = vor.u32 %v15002_v1, %v12401_v3  ;;  %6736 = vmatpush.bf16.msrb.mxu0 %v11892_v10  ;;  %v10616_v1 = vor.u32 %v14563_v59, %v10615_v57  ;;  %v10039_v3 = vld [vmem:[#allocation2 + $0x288] sm:$0xf] }
  0xe1   : > { %v12913_v5 = vld [vmem:[#allocation2 + $0x1940] sm:$0xf0]  ;;  %v11063_v10 = vld [vmem:[#allocation2 + $0xa88] sm:$0xf] }
  0xe2   : > { %v15258_v6 = vld [vmem:[#allocation2 + $0x1d04] sm:$0xf]  ;;  %v12916_v12 = vor.u32 %v15130_v4, %v12913_v5  ;;  %6749 = vmatpush.bf16.msrb.mxu1 %v12404_v11  ;;  %v14419_v4 = vld [vmem:[#allocation2 + $0x2c4] sm:$0xf0] }
  0xe3   : > { %v13425_v7 = vld [vmem:[#allocation2 + $0x1d40] sm:$0xf0]  ;;  %v10551_v5 = vld [vmem:[#allocation2 + $0x688] sm:$0xf] }
  0xe4   : > { %v14858_v13 = vld [vmem:[#allocation2 + $0x1084] sm:$0xf]  ;;  %v13428_v17 = vor.u32 %v15258_v6, %v13425_v7  ;;  %6762 = vmatpush.bf16.msrb.mxu2 %v12916_v12  ;;  %v11640_v6 = vor.u32 %v14819_v63, %v11639_v62  ;;  %v14547_v7 = vld [vmem:[#allocation2 + $0x6c4] sm:$0xf0] }
  0xe5   : > { %v11825_v14 = vld [vmem:[#allocation2 + $0x10c0] sm:$0xf0]  ;;  %v14675_v11 = vld [vmem:[#allocation2 + $0xac4] sm:$0xf0] }
  0xe6   : > { %v14986_v16 = vld [vmem:[#allocation2 + $0x1484] sm:$0xf]  ;;  %v11828_v23 = vor.u32 %v14858_v13, %v11825_v14  ;;  %6775 = vmatpush.bf16.msrb.mxu3 %v13428_v17  ;;  %v11575_v12 = vld [vmem:[#allocation2 + $0xe88] sm:$0xf]  ;;  %v10040_v14 = vor.u32 %v14419_v4, %v10039_v3  ;;  %v11064_v17 = vor.u32 %v14675_v11, %v11063_v10 }
  0xe7   : > { %v12337_v18 = vld [vmem:[#allocation2 + $0x14c0] sm:$0xf0]  ;;  %v14803_v13 = vld [vmem:[#allocation2 + $0xec4] sm:$0xf0] }
  0xe8   : > { %v15114_v19 = vld [vmem:[#allocation2 + $0x1884] sm:$0xf]  ;;  %v12340_v27 = vor.u32 %v14986_v16, %v12337_v18  ;;  %6737 = vmatpush.bf16.msrb.mxu0 %v11828_v23  ;;  %v10552_v16 = vor.u32 %v14547_v7, %v10551_v5  ;;  %v9975_v18 = vld [vmem:[#allocation2 + $0x208] sm:$0xf] }
  0xe9   : > { %v12849_v20 = vld [vmem:[#allocation2 + $0x18c0] sm:$0xf0]  ;;  %v10999_v23 = vld [vmem:[#allocation2 + $0xa08] sm:$0xf] }
  0xea   : > { %v15242_v21 = vld [vmem:[#allocation2 + $0x1c84] sm:$0xf]  ;;  %v12852_v28 = vor.u32 %v15114_v19, %v12849_v20  ;;  %6750 = vmatpush.bf16.msrb.mxu1 %v12340_v27  ;;  %v14403_v19 = vld [vmem:[#allocation2 + $0x244] sm:$0xf0] }
  0xeb   : > { %v13361_v22 = vld [vmem:[#allocation2 + $0x1cc0] sm:$0xf0]  ;;  %v10487_v20 = vld [vmem:[#allocation2 + $0x608] sm:$0xf] }
  0xec   : > { %v14842_v24 = vld [vmem:[#allocation2 + $0x1004] sm:$0xf]  ;;  %v13364_v32 = vor.u32 %v15242_v21, %v13361_v22  ;;  %6763 = vmatpush.bf16.msrb.mxu2 %v12852_v28  ;;  %v11576_v21 = vor.u32 %v14803_v13, %v11575_v12  ;;  %v14531_v22 = vld [vmem:[#allocation2 + $0x644] sm:$0xf0]  ;;  %v9976_v28 = vor.u32 %v14403_v19, %v9975_v18 }
  0xed   : > { %v11761_v26 = vld [vmem:[#allocation2 + $0x1040] sm:$0xf0]  ;;  %v14787_v27 = vld [vmem:[#allocation2 + $0xe44] sm:$0xf0] }
  0xee   : > { %v14970_v29 = vld [vmem:[#allocation2 + $0x1404] sm:$0xf]  ;;  %v11764_v43 = vor.u32 %v14842_v24, %v11761_v26  ;;  %6776 = vmatpush.bf16.msrb.mxu3 %v13364_v32  ;;  %v14659_v24 = vld [vmem:[#allocation2 + $0xa44] sm:$0xf0] }
  0xef   : > { %v12273_v30 = vld [vmem:[#allocation2 + $0x1440] sm:$0xf0]  ;;  %v11511_v26 = vld [vmem:[#allocation2 + $0xe08] sm:$0xf] }
  0xf0   : > { %v15098_v31 = vld [vmem:[#allocation2 + $0x1804] sm:$0xf]  ;;  %v12276_v47 = vor.u32 %v14970_v29, %v12273_v30  ;;  %6738 = vmatpush.bf16.msrb.mxu0 %v11764_v43  ;;  %v10488_v29 = vor.u32 %v14531_v22, %v10487_v20  ;;  %v11000_v30 = vor.u32 %v14659_v24, %v10999_v23  ;;  %v14387_v32 = vld [vmem:[#allocation2 + $0x1c4] sm:$0xf0] }
  0xf1   : > { %v12785_v33 = vld [vmem:[#allocation2 + $0x1840] sm:$0xf0]  ;;  %v14643_v41 = vld [vmem:[#allocation2 + $0x9c4] sm:$0xf0] }
  0xf2   : > { %v15226_v35 = vld [vmem:[#allocation2 + $0x1c04] sm:$0xf]  ;;  %v12788_v48 = vor.u32 %v15098_v31, %v12785_v33  ;;  %6751 = vmatpush.bf16.msrb.mxu1 %v12276_v47  ;;  %v9911_v31 = vld [vmem:[#allocation2 + $0x188] sm:$0xf]  ;;  %v10936_v46 = vor.u32 %v14643_v41, %v10935_v39 }
  0xf3   : > { %v13297_v36 = vld [vmem:[#allocation2 + $0x1c40] sm:$0xf0]  ;;  %6739 = vmatmul.bf16.vlgmr.msrb.gmra.mxu0 %v15837_v37  ;;  %v10423_v33 = vld [vmem:[#allocation2 + $0x588] sm:$0xf]  ;;  %v9912_v44 = vor.u32 %v14387_v32, %v9911_v31 }
  0xf4   : > { %v13300_v51 = vor.u32 %v15226_v35, %v13297_v36  ;;  %6764 = vmatpush.bf16.msrb.mxu2 %v12788_v48  ;;  %6783 = vmatpush.bf16.msra.mxu0 %v10168_v52  ;;  %v11512_v35 = vor.u32 %v14787_v27, %v11511_v26  ;;  %v14515_v36 = vld [vmem:[#allocation2 + $0x5c4] sm:$0xf0] }
  0xf5   : > { %6752 = vmatmul.bf16.vlgmr.msrb.gmra.mxu1 %v15841_v40  ;;  %v11447_v42 = vld [vmem:[#allocation2 + $0xd88] sm:$0xf]  ;;  %v10424_v45 = vor.u32 %v14515_v36, %v10423_v33 }
  0xf6   : > { %6777 = vmatpush.bf16.msrb.mxu3 %v13300_v51  ;;  %6796 = vmatpush.bf16.msra.mxu1 %v10680_v53  ;;  %v14771_v43 = vld [vmem:[#allocation2 + $0xdc4] sm:$0xf0] }
  0xf7   : > { %6765 = vmatmul.bf16.vlgmr.msrb.gmra.mxu2 %v15835_v34  ;;  %v9847_v47 = vld [vmem:[#allocation2 + $0x108] sm:$0xf]  ;;  %v11448_v50 = vor.u32 %v14771_v43, %v11447_v42 }
  0xf8   : > { %6809 = vmatpush.bf16.msra.mxu2 %v11192_v54  ;;  %6784 = vmatpush.bf16.msra.mxu0 %v10104_v0  ;;  %v14371_v48 = vld [vmem:[#allocation2 + $0x144] sm:$0xf0] }
  0xf9   : > { %6778 = vmatmul.bf16.vlgmr.msrb.gmra.mxu3 %v15839_v38  ;;  %v10359_v49 = vld [vmem:[#allocation2 + $0x508] sm:$0xf]  ;;  %v9848_v56 = vor.u32 %v14371_v48, %v9847_v47 }
  0xfa   : > { %6822 = vmatpush.bf16.msra.mxu3 %v11704_v58  ;;  %6797 = vmatpush.bf16.msra.mxu1 %v10616_v1  ;;  %v14499_v51 = vld [vmem:[#allocation2 + $0x544] sm:$0xf0] }
  0xfb   : > { %v10871_v52 = vld [vmem:[#allocation2 + $0x908] sm:$0xf]  ;;  %v10360_v57 = vor.u32 %v14499_v51, %v10359_v49 }
  0xfc   : > { %6810 = vmatpush.bf16.msra.mxu2 %v11128_v2  ;;  %6785 = vmatpush.bf16.msra.mxu0 %v10040_v14  ;;  %v14627_v53 = vld [vmem:[#allocation2 + $0x944] sm:$0xf0] }
  0xfd   : > { %v11383_v54 = vld [vmem:[#allocation2 + $0xd08] sm:$0xf]  ;;  %v10872_v58 = vor.u32 %v14627_v53, %v10871_v52 }
  0xfe   : > { %6823 = vmatpush.bf16.msra.mxu3 %v11640_v6  ;;  %6798 = vmatpush.bf16.msra.mxu1 %v10552_v16  ;;  %v14755_v55 = vld [vmem:[#allocation2 + $0xd44] sm:$0xf0] }
  0xff   : > { %v9783_v59 = vld [vmem:[#allocation2 + $0x88] sm:$0xf]  ;;  %v11384_v62 = vor.u32 %v14755_v55, %v11383_v54 }
 0x100   : > { %6811 = vmatpush.bf16.msra.mxu2 %v11064_v17  ;;  %6786 = vmatpush.bf16.msra.mxu0 %v9976_v28  ;;  %v14355_v60 = vld [vmem:[#allocation2 + $0xc4] sm:$0xf0] }
 0x101   : > { %v10295_v61 = vld [vmem:[#allocation2 + $0x488] sm:$0xf]  ;;  %v9784_v4 = vor.u32 %v14355_v60, %v9783_v59 }
 0x102   : > { %6824 = vmatpush.bf16.msra.mxu3 %v11576_v21  ;;  %6799 = vmatpush.bf16.msra.mxu1 %v10488_v29  ;;  %v14483_v63 = vld [vmem:[#allocation2 + $0x4c4] sm:$0xf0] }
 0x103   : > { %v10807_v0 = vld [vmem:[#allocation2 + $0x888] sm:$0xf]  ;;  %v10296_v7 = vor.u32 %v14483_v63, %v10295_v61 }
 0x104   : > { %6812 = vmatpush.bf16.msra.mxu2 %v11000_v30  ;;  %6787 = vmatpush.bf16.msra.mxu0 %v9912_v44  ;;  %v14611_v1 = vld [vmem:[#allocation2 + $0x8c4] sm:$0xf0] }
 0x105   : > { %v11319_v2 = vld [vmem:[#allocation2 + $0xc88] sm:$0xf]  ;;  %v10808_v10 = vor.u32 %v14611_v1, %v10807_v0 }
 0x106   : > { %6825 = vmatpush.bf16.msra.mxu3 %v11512_v35  ;;  %6800 = vmatpush.bf16.msra.mxu1 %v10424_v45  ;;  %v14739_v3 = vld [vmem:[#allocation2 + $0xcc4] sm:$0xf0] }
 0x107   : > { %v9719_v5 = vld [vmem:[#allocation2 + $0x8] sm:$0xf]  ;;  %v11320_v14 = vor.u32 %v14739_v3, %v11319_v2 }
 0x108   : > { %6813 = vmatpush.bf16.msra.mxu2 %v10936_v46  ;;  %6788 = vmatpush.bf16.msra.mxu0 %v9848_v56  ;;  %v14339_v6 = vld [vmem:[#allocation2 + $0x44] sm:$0xf0] }
 0x109   : > { %v10231_v11 = vld [vmem:[#allocation2 + $0x408] sm:$0xf]  ;;  %v9720_v22 = vor.u32 %v14339_v6, %v9719_v5 }
 0x10a   : > { %6826 = vmatpush.bf16.msra.mxu3 %v11448_v50  ;;  %6801 = vmatpush.bf16.msra.mxu1 %v10360_v57  ;;  %v14467_v12 = vld [vmem:[#allocation2 + $0x444] sm:$0xf0] }
 0x10b   : > { %v10743_v13 = vld [vmem:[#allocation2 + $0x808] sm:$0xf]  ;;  %v10232_v27 = vor.u32 %v14467_v12, %v10231_v11 }
 0x10c   : > { %6814 = vmatpush.bf16.msra.mxu2 %v10872_v58  ;;  %v14595_v16 = vld [vmem:[#allocation2 + $0x844] sm:$0xf0]  ;;  %6789 = vmatpush.bf16.msra.mxu0 %v9784_v4 }
 0x10d   : > { %v11255_v17 = vld [vmem:[#allocation2 + $0xc08] sm:$0xf]  ;;  %v10744_v28 = vor.u32 %v14595_v16, %v10743_v13 }
 0x10e   : > { %6827 = vmatpush.bf16.msra.mxu3 %v11384_v62  ;;  %v14723_v18 = vld [vmem:[#allocation2 + $0xc44] sm:$0xf0]  ;;  %6802 = vmatpush.bf16.msra.mxu1 %v10296_v7 }
 0x10f   : > { %v12215_v19 = vld [vmem:[#allocation2 + $0x1388] sm:$0xf]  ;;  %v11256_v31 = vor.u32 %v14723_v18, %v11255_v17 }
 0x110   : > { %v14963_v20 = vld [vmem:[#allocation2 + $0x13c4] sm:$0xf0]  ;;  %6815 = vmatpush.bf16.msra.mxu2 %v10808_v10  ;;  %6790 = vmatpush.bf16.msra.mxu0 %v9720_v22 }
 0x111   : > { %v12727_v21 = vld [vmem:[#allocation2 + $0x1788] sm:$0xf]  ;;  %v12216_v32 = vor.u32 %v14963_v20, %v12215_v19 }
 0x112   : > { %v15091_v23 = vld [vmem:[#allocation2 + $0x17c4] sm:$0xf0]  ;;  %6828 = vmatpush.bf16.msra.mxu3 %v11320_v14  ;;  %6803 = vmatpush.bf16.msra.mxu1 %v10232_v27 }
 0x113   : > { %v13239_v24 = vld [vmem:[#allocation2 + $0x1b88] sm:$0xf]  ;;  %v12728_v33 = vor.u32 %v15091_v23, %v12727_v21  ;;  %6791 = vmatmul.bf16.vlgmr.msra.gmra.mxu0 %v15819_v9 }
 0x114   : > { %v15219_v26 = vld [vmem:[#allocation2 + $0x1bc4] sm:$0xf0]  ;;  %6816 = vmatpush.bf16.msra.mxu2 %v10744_v28  ;;  %6835 = vmatpush.bf16.msrb.mxu0 %v12216_v32 }
 0x115   : > { %v13751_v29 = vld [vmem:[#allocation2 + $0x1f88] sm:$0xf]  ;;  %v13240_v35 = vor.u32 %v15219_v26, %v13239_v24  ;;  %6804 = vmatmul.bf16.vlgmr.msra.gmra.mxu1 %v15828_v25  ;;  %v6584_v24 = vpop.f32.mrf.mxu0 }
 0x116   : > { %v15347_v30 = vld [vmem:[#allocation2 + $0x1fc4] sm:$0xf0]  ;;  %6829 = vmatpush.bf16.msra.mxu3 %v11256_v31  ;;  %6848 = vmatpush.bf16.msrb.mxu1 %v12728_v33 }
 0x117   : > { %v12151_v36 = vld [vmem:[#allocation2 + $0x1308] sm:$0xf]  ;;  %v13752_v42 = vor.u32 %v15347_v30, %v13751_v29  ;;  %6817 = vmatmul.bf16.vlgmr.msra.gmra.mxu2 %v15817_v8 }
 0x118   : > { %v14947_v39 = vld [vmem:[#allocation2 + $0x1344] sm:$0xf0]  ;;  %6861 = vmatpush.bf16.msrb.mxu2 %v13240_v35 }
 0x119   : > { %v12663_v41 = vld [vmem:[#allocation2 + $0x1708] sm:$0xf]  ;;  %v12152_v48 = vor.u32 %v14947_v39, %v12151_v36  ;;  %6830 = vmatmul.bf16.vlgmr.msra.gmra.mxu3 %v15822_v15 }
 0x11a   : > { %v15075_v43 = vld [vmem:[#allocation2 + $0x1744] sm:$0xf0]  ;;  %6874 = vmatpush.bf16.msrb.mxu3 %v13752_v42  ;;  %v15859_v42 = vld [vmem:[#allocation4] sm:$0xff] }
 0x11b   : > { %v13175_v44 = vld [vmem:[#allocation2 + $0x1b08] sm:$0xf]  ;;  %v12664_v49 = vor.u32 %v15075_v43, %v12663_v41  ;;  %6836 = vmatpush.bf16.msrb.mxu0 %v12152_v48  ;;  %v6597_v43 = vpop.f32.mrf.mxu1 }
 0x11c   : > { %v15203_v45 = vld [vmem:[#allocation2 + $0x1b44] sm:$0xf0] }
 0x11d   : > { %v13687_v46 = vld [vmem:[#allocation2 + $0x1f08] sm:$0xf]  ;;  %v13176_v50 = vor.u32 %v15203_v45, %v13175_v44  ;;  %6849 = vmatpush.bf16.msrb.mxu1 %v12664_v49 }
 0x11e   : > { %v15331_v47 = vld [vmem:[#allocation2 + $0x1f44] sm:$0xf0] }
 0x11f   : > { %v12087_v51 = vld [vmem:[#allocation2 + $0x1288] sm:$0xf]  ;;  %v13688_v54 = vor.u32 %v15331_v47, %v13687_v46  ;;  %6862 = vmatpush.bf16.msrb.mxu2 %v13176_v50 }
 0x120   : > { %v14931_v52 = vld [vmem:[#allocation2 + $0x12c4] sm:$0xf0] }
 0x121   : > { %v12599_v53 = vld [vmem:[#allocation2 + $0x1688] sm:$0xf]  ;;  %v12088_v60 = vor.u32 %v14931_v52, %v12087_v51  ;;  %6875 = vmatpush.bf16.msrb.mxu3 %v13688_v54 }
 0x122   : > { %v15059_v55 = vld [vmem:[#allocation2 + $0x16c4] sm:$0xf0] }
 0x123   : > { %v13111_v56 = vld [vmem:[#allocation2 + $0x1a88] sm:$0xf]  ;;  %v12600_v61 = vor.u32 %v15059_v55, %v12599_v53  ;;  %6837 = vmatpush.bf16.msrb.mxu0 %v12088_v60  ;;  %v15861_v53 = vpop.f32.mrf.mxu2 }
 0x124   : > { %v15187_v57 = vld [vmem:[#allocation2 + $0x1ac4] sm:$0xf0] }
 0x125   : > { %v13623_v58 = vld [vmem:[#allocation2 + $0x1e88] sm:$0xf]  ;;  %v13112_v62 = vor.u32 %v15187_v57, %v13111_v56  ;;  %6850 = vmatpush.bf16.msrb.mxu1 %v12600_v61  ;;  %v1423_v56 = vperm.slane %v15859_v42, 0  ;;  %v15864_v57 = vpop.f32.mrf.mxu3  ;;  %v6586_v61 = vpop.f32.mrf.mxu0 }
 0x126   : > { %v15315_v59 = vld [vmem:[#allocation2 + $0x1ec4] sm:$0xf0] }
 0x127   : > { %v12023_v63 = vld [vmem:[#allocation2 + $0x1208] sm:$0xf]  ;;  %v13624_v2 = vor.u32 %v15315_v59, %v13623_v58  ;;  %6863 = vmatpush.bf16.msrb.mxu2 %v13112_v62 }
 0x128   : > { %v14915_v0 = vld [vmem:[#allocation2 + $0x1244] sm:$0xf0] }
 0x129   : > { %v12535_v1 = vld [vmem:[#allocation2 + $0x1608] sm:$0xf]  ;;  %v12024_v10 = vor.u32 %v14915_v0, %v12023_v63  ;;  %6876 = vmatpush.bf16.msrb.mxu3 %v13624_v2 }
 0x12a   : > { %v15043_v3 = vld [vmem:[#allocation2 + $0x1644] sm:$0xf0] }
 0x12b   : > { %v13047_v4 = vld [vmem:[#allocation2 + $0x1a08] sm:$0xf]  ;;  %v12536_v11 = vor.u32 %v15043_v3, %v12535_v1  ;;  %6838 = vmatpush.bf16.msrb.mxu0 %v12024_v10  ;;  %v10169_v10 = vld [vmem:[#allocation2 + $0x3c8] sm:$0xf0] }
 0x12c   : > { %v15171_v5 = vld [vmem:[#allocation2 + $0x1a44] sm:$0xf0] }
 0x12d   : > { %v13559_v6 = vld [vmem:[#allocation2 + $0x1e08] sm:$0xf]  ;;  %v13048_v12 = vor.u32 %v15171_v5, %v13047_v4  ;;  %6851 = vmatpush.bf16.msrb.mxu1 %v12536_v11  ;;  %v14571_v11 = vld [vmem:[#allocation2 + $0x78c] sm:$0xf] }
 0x12e   : > { %v15299_v7 = vld [vmem:[#allocation2 + $0x1e44] sm:$0xf0] }
 0x12f   : > { %v11959_v13 = vld [vmem:[#allocation2 + $0x1188] sm:$0xf]  ;;  %v13560_v17 = vor.u32 %v15299_v7, %v13559_v6  ;;  %6864 = vmatpush.bf16.msrb.mxu2 %v13048_v12  ;;  %v14443_v7 = vld [vmem:[#allocation2 + $0x38c] sm:$0xf]  ;;  %v6585_v12 = vadd.f32 %v6584_v24, %v1423_v56 }
 0x130   : > { %v14899_v14 = vld [vmem:[#allocation2 + $0x11c4] sm:$0xf0]  ;;  %v10105_v24 = vld [vmem:[#allocation2 + $0x348] sm:$0xf0] }
 0x131   : > { %v12471_v16 = vld [vmem:[#allocation2 + $0x1588] sm:$0xf]  ;;  %v11960_v23 = vor.u32 %v14899_v14, %v11959_v13  ;;  %6877 = vmatpush.bf16.msrb.mxu3 %v13560_v17  ;;  %v10681_v14 = vld [vmem:[#allocation2 + $0x7c8] sm:$0xf0] }
 0x132   : > { %v15027_v18 = vld [vmem:[#allocation2 + $0x15c4] sm:$0xf0]  ;;  %v11193_v17 = vld [vmem:[#allocation2 + $0xbc8] sm:$0xf0] }
 0x133   : > { %v12983_v19 = vld [vmem:[#allocation2 + $0x1988] sm:$0xf]  ;;  %v12472_v26 = vor.u32 %v15027_v18, %v12471_v16  ;;  %6839 = vmatpush.bf16.msrb.mxu0 %v11960_v23  ;;  %v14699_v16 = vld [vmem:[#allocation2 + $0xb8c] sm:$0xf]  ;;  %v6599_v18 = vpop.f32.mrf.mxu1 }
 0x134   : > { %v15155_v20 = vld [vmem:[#allocation2 + $0x19c4] sm:$0xf0]  ;;  %v11065_v56 = vld [vmem:[#allocation2 + $0xac8] sm:$0xf0] }
 0x135   : > { %v13495_v21 = vld [vmem:[#allocation2 + $0x1d88] sm:$0xf]  ;;  %v12984_v27 = vor.u32 %v15155_v20, %v12983_v19  ;;  %6852 = vmatpush.bf16.msrb.mxu1 %v12472_v26  ;;  %v10172_v26 = vor.u32 %v14443_v7, %v10169_v10  ;;  %v11513_v7 = vld [vmem:[#allocation2 + $0xe48] sm:$0xf0] }
 0x136   : > { %v15283_v22 = vld [vmem:[#allocation2 + $0x1dc4] sm:$0xf0] }
 0x137   : > { %v11895_v28 = vld [vmem:[#allocation2 + $0x1108] sm:$0xf]  ;;  %v13496_v31 = vor.u32 %v15283_v22, %v13495_v21  ;;  %6865 = vmatpush.bf16.msrb.mxu2 %v12984_v27  ;;  %v14827_v21 = vld [vmem:[#allocation2 + $0xf8c] sm:$0xf]  ;;  %v6612_v27 = vpop.f32.mrf.mxu2 }
 0x138   : > { %v14883_v29 = vld [vmem:[#allocation2 + $0x1144] sm:$0xf0]  ;;  %v11705_v22 = vld [vmem:[#allocation2 + $0xfc8] sm:$0xf0] }
 0x139   : > { %v12407_v30 = vld [vmem:[#allocation2 + $0x1508] sm:$0xf]  ;;  %v11896_v41 = vor.u32 %v14883_v29, %v11895_v28  ;;  %6878 = vmatpush.bf16.msrb.mxu3 %v13496_v31  ;;  %v10684_v28 = vor.u32 %v14571_v11, %v10681_v14  ;;  %v11196_v29 = vor.u32 %v14699_v16, %v11193_v17  ;;  %v14555_v31 = vld [vmem:[#allocation2 + $0x70c] sm:$0xf]  ;;  %v6636_v11 = vpop.f32.mrf.mxu0 }
 0x13a   : > { %v15011_v32 = vld [vmem:[#allocation2 + $0x1544] sm:$0xf0]  ;;  %v14379_v14 = vld [vmem:[#allocation2 + $0x18c] sm:$0xf] }
 0x13b   : > { %v12919_v33 = vld [vmem:[#allocation2 + $0x1908] sm:$0xf]  ;;  %v12408_v44 = vor.u32 %v15011_v32, %v12407_v30  ;;  %6840 = vmatpush.bf16.msrb.mxu0 %v11896_v41  ;;  %v14427_v30 = vld [vmem:[#allocation2 + $0x30c] sm:$0xf]  ;;  %v6598_v32 = vadd.f32 %v6597_v43, %v6585_v12  ;;  %v6649_v18 = vpop.f32.mrf.mxu1 }
 0x13c   : > { %v15139_v35 = vld [vmem:[#allocation2 + $0x1944] sm:$0xf0]  ;;  %v11129_v41 = vld [vmem:[#allocation2 + $0xb48] sm:$0xf0] }
 0x13d   : > { %v13431_v36 = vld [vmem:[#allocation2 + $0x1d08] sm:$0xf]  ;;  %v12920_v45 = vor.u32 %v15139_v35, %v12919_v33  ;;  %6853 = vmatpush.bf16.msrb.mxu1 %v12408_v44  ;;  %v6625_v33 = vpop.f32.mrf.mxu3  ;;  %v11708_v35 = vor.u32 %v14827_v21, %v11705_v22  ;;  %v14811_v44 = vld [vmem:[#allocation2 + $0xf0c] sm:$0xf] }
 0x13e   : > { %v15267_v39 = vld [vmem:[#allocation2 + $0x1d44] sm:$0xf0]  ;;  %v14411_v43 = vld [vmem:[#allocation2 + $0x28c] sm:$0xf] }
 0x13f   : > { %v11831_v46 = vld [vmem:[#allocation2 + $0x1088] sm:$0xf]  ;;  %v13432_v49 = vor.u32 %v15267_v39, %v13431_v36  ;;  %6866 = vmatpush.bf16.msrb.mxu2 %v12920_v45  ;;  %v10617_v36 = vld [vmem:[#allocation2 + $0x748] sm:$0xf0]  ;;  %v6662_v33 = vpop.f32.mrf.mxu2 }
 0x140   : > { %v14867_v47 = vld [vmem:[#allocation2 + $0x10c4] sm:$0xf0]  ;;  %v14683_v39 = vld [vmem:[#allocation2 + $0xb0c] sm:$0xf] }
 0x141   : > { %v12343_v48 = vld [vmem:[#allocation2 + $0x1488] sm:$0xf]  ;;  %v11832_v58 = vor.u32 %v14867_v47, %v11831_v46  ;;  %6879 = vmatpush.bf16.msrb.mxu3 %v13432_v49  ;;  %v11641_v45 = vld [vmem:[#allocation2 + $0xf48] sm:$0xf0]  ;;  %v10108_v46 = vor.u32 %v14427_v30, %v10105_v24  ;;  %v10620_v47 = vor.u32 %v14555_v31, %v10617_v36  ;;  %v6611_v49 = vadd.f32 %v15861_v53, %v6598_v32 }
 0x142   : > { %v14995_v50 = vld [vmem:[#allocation2 + $0x14c4] sm:$0xf0]  ;;  %v14507_v16 = vld [vmem:[#allocation2 + $0x58c] sm:$0xf] }
 0x143   : > { %v12855_v51 = vld [vmem:[#allocation2 + $0x1888] sm:$0xf]  ;;  %v12344_v62 = vor.u32 %v14995_v50, %v12343_v48  ;;  %6841 = vmatpush.bf16.msrb.mxu0 %v11832_v58  ;;  %v11132_v48 = vor.u32 %v14683_v39, %v11129_v41  ;;  %v10041_v50 = vld [vmem:[#allocation2 + $0x2c8] sm:$0xf0] }
 0x144   : > { %v15123_v52 = vld [vmem:[#allocation2 + $0x18c4] sm:$0xf0]  ;;  %v14795_v58 = vld [vmem:[#allocation2 + $0xe8c] sm:$0xf] }
 0x145   : > { %v13367_v54 = vld [vmem:[#allocation2 + $0x1c88] sm:$0xf]  ;;  %v12856_v63 = vor.u32 %v15123_v52, %v12855_v51  ;;  %6854 = vmatpush.bf16.msrb.mxu1 %v12344_v62  ;;  %v14539_v51 = vld [vmem:[#allocation2 + $0x68c] sm:$0xf]  ;;  %v11644_v52 = vor.u32 %v14811_v44, %v11641_v45  ;;  %v6624_v62 = vadd.f32 %v15864_v57, %v6611_v49  ;;  %v6675_v45 = vpop.f32.mrf.mxu3 }
 0x146   : > { %v15251_v55 = vld [vmem:[#allocation2 + $0x1cc4] sm:$0xf0]  ;;  %v9913_v57 = vld [vmem:[#allocation2 + $0x1c8] sm:$0xf0] }
 0x147   : > { %v11767_v59 = vld [vmem:[#allocation2 + $0x1008] sm:$0xf]  ;;  %v13368_v3 = vor.u32 %v15251_v55, %v13367_v54  ;;  %6867 = vmatpush.bf16.msrb.mxu2 %v12856_v63  ;;  %v10553_v54 = vld [vmem:[#allocation2 + $0x6c8] sm:$0xf0]  ;;  %v6637_v17 = vadd.f32 %v6636_v11, %v6624_v62 }
 0x148   : > { %v14851_v60 = vld [vmem:[#allocation2 + $0x1044] sm:$0xf0]  ;;  %v14667_v55 = vld [vmem:[#allocation2 + $0xa8c] sm:$0xf]  ;;  %v10556_v53 = vor.u32 %v14539_v51, %v10553_v54 }
 0x149   : > { %v12279_v0 = vld [vmem:[#allocation2 + $0x1408] sm:$0xf]  ;;  %v11768_v13 = vor.u32 %v14851_v60, %v11767_v59  ;;  %6880 = vmatpush.bf16.msrb.mxu3 %v13368_v3  ;;  %v11577_v59 = vld [vmem:[#allocation2 + $0xec8] sm:$0xf0]  ;;  %v10044_v60 = vor.u32 %v14411_v43, %v10041_v50  ;;  %v11068_v61 = vor.u32 %v14667_v55, %v11065_v56  ;;  %v6650_v27 = vadd.f32 %v6649_v18, %v6637_v17  ;;  %v6638_v50 = vpop.f32.mrf.mxu0 }
 0x14a   : > { %v14979_v1 = vld [vmem:[#allocation2 + $0x1444] sm:$0xf0]  ;;  %v14395_v63 = vld [vmem:[#allocation2 + $0x20c] sm:$0xf] }
 0x14b   : > { %v12791_v2 = vld [vmem:[#allocation2 + $0x1808] sm:$0xf]  ;;  %v12280_v19 = vor.u32 %v14979_v1, %v12279_v0  ;;  %6842 = vmatpush.bf16.msrb.mxu0 %v11768_v13  ;;  %v9977_v0 = vld [vmem:[#allocation2 + $0x248] sm:$0xf0]  ;;  %v6663_v44 = vadd.f32 %v6662_v33, %v6650_v27 }
 0x14c   : > { %v15107_v4 = vld [vmem:[#allocation2 + $0x1844] sm:$0xf0]  ;;  %v14523_v1 = vld [vmem:[#allocation2 + $0x60c] sm:$0xf]  ;;  %v9980_v10 = vor.u32 %v14395_v63, %v9977_v0 }
 0x14d   : > { %v13303_v5 = vld [vmem:[#allocation2 + $0x1c08] sm:$0xf]  ;;  %v12792_v20 = vor.u32 %v15107_v4, %v12791_v2  ;;  %6855 = vmatpush.bf16.msrb.mxu1 %v12280_v19  ;;  %v11580_v2 = vor.u32 %v14795_v58, %v11577_v59  ;;  %v10489_v3 = vld [vmem:[#allocation2 + $0x648] sm:$0xf0]  ;;  %v6676_v43 = vadd.f32 %v6675_v45, %v6663_v44  ;;  %v6651_v58 = vpop.f32.mrf.mxu1 }
 0x14e   : > { %v15235_v6 = vld [vmem:[#allocation2 + $0x1c44] sm:$0xf0]  ;;  %6843 = vmatmul.bf16.vlgmr.msrb.gmra.mxu0 %v15837_v37  ;;  %v14651_v4 = vld [vmem:[#allocation2 + $0xa0c] sm:$0xf]  ;;  %v10492_v12 = vor.u32 %v14523_v1, %v10489_v3 }
 0x14f   : > { %v13304_v23 = vor.u32 %v15235_v6, %v13303_v5  ;;  %6868 = vmatpush.bf16.msrb.mxu2 %v12792_v20  ;;  %6887 = vmatpush.bf16.msra.mxu0 %v10172_v26  ;;  %v11001_v5 = vld [vmem:[#allocation2 + $0xa48] sm:$0xf0] }
 0x150   : > { %6856 = vmatmul.bf16.vlgmr.msrb.gmra.mxu1 %v15841_v40  ;;  %v14779_v6 = vld [vmem:[#allocation2 + $0xe0c] sm:$0xf]  ;;  %v11004_v13 = vor.u32 %v14651_v4, %v11001_v5 }
 0x151   : > { %6881 = vmatpush.bf16.msrb.mxu3 %v13304_v23  ;;  %6900 = vmatpush.bf16.msra.mxu1 %v10684_v28  ;;  %v11516_v19 = vor.u32 %v14779_v6, %v11513_v7  ;;  %v10425_v20 = vld [vmem:[#allocation2 + $0x5c8] sm:$0xf0]  ;;  %v9916_v28 = vor.u32 %v14379_v14, %v9913_v57  ;;  %v6677_v57 = vpop.f32.mrf.mxu3 }
 0x152   : > { %6869 = vmatmul.bf16.vlgmr.msrb.gmra.mxu2 %v15835_v34  ;;  %v14635_v21 = vld [vmem:[#allocation2 + $0x98c] sm:$0xf] }
 0x153   : > { %6913 = vmatpush.bf16.msra.mxu2 %v11196_v29  ;;  %6888 = vmatpush.bf16.msra.mxu0 %v10108_v46  ;;  %v10937_v22 = vld [vmem:[#allocation2 + $0x9c8] sm:$0xf0]  ;;  %v10428_v29 = vor.u32 %v14507_v16, %v10425_v20 }
 0x154   : > { %6882 = vmatmul.bf16.vlgmr.msrb.gmra.mxu3 %v15839_v38  ;;  %v14763_v23 = vld [vmem:[#allocation2 + $0xd8c] sm:$0xf]  ;;  %v10940_v30 = vor.u32 %v14635_v21, %v10937_v22 }
 0x155   : > { %6926 = vmatpush.bf16.msra.mxu3 %v11708_v35  ;;  %6901 = vmatpush.bf16.msra.mxu1 %v10620_v47  ;;  %v11449_v26 = vld [vmem:[#allocation2 + $0xdc8] sm:$0xf0] }
 0x156   : > { %v14363_v24 = vld [vmem:[#allocation2 + $0x10c] sm:$0xf]  ;;  %v11452_v35 = vor.u32 %v14763_v23, %v11449_v26 }
 0x157   : > { %6914 = vmatpush.bf16.msra.mxu2 %v11132_v48  ;;  %6889 = vmatpush.bf16.msra.mxu0 %v10044_v60  ;;  %v9849_v31 = vld [vmem:[#allocation2 + $0x148] sm:$0xf0] }
 0x158   : > { %v14491_v32 = vld [vmem:[#allocation2 + $0x50c] sm:$0xf]  ;;  %v9852_v48 = vor.u32 %v14363_v24, %v9849_v31 }
 0x159   : > { %6927 = vmatpush.bf16.msra.mxu3 %v11644_v52  ;;  %6902 = vmatpush.bf16.msra.mxu1 %v10556_v53  ;;  %v10361_v36 = vld [vmem:[#allocation2 + $0x548] sm:$0xf0] }
 0x15a   : > { %v14619_v39 = vld [vmem:[#allocation2 + $0x90c] sm:$0xf]  ;;  %v10364_v51 = vor.u32 %v14491_v32, %v10361_v36 }
 0x15b   : > { %6915 = vmatpush.bf16.msra.mxu2 %v11068_v61  ;;  %6890 = vmatpush.bf16.msra.mxu0 %v9980_v10  ;;  %v10873_v41 = vld [vmem:[#allocation2 + $0x948] sm:$0xf0]  ;;  %v8239_v61 = vmax.f32 %v6676_v43, 0.0  ;;  %v6664_v10 = vpop.f32.mrf.mxu2 }
 0x15c   : > { %v14747_v46 = vld [vmem:[#allocation2 + $0xd0c] sm:$0xf]  ;;  %v10876_v52 = vor.u32 %v14619_v39, %v10873_v41  ;;  %v15885_v10 = vpop.f32.mrf.mxu0 }
 0x15d   : > { %6928 = vmatpush.bf16.msra.mxu3 %v11580_v2  ;;  %6903 = vmatpush.bf16.msra.mxu1 %v10492_v12  ;;  %v11385_v47 = vld [vmem:[#allocation2 + $0xd48] sm:$0xf0]  ;;  %8255 = vst [vmem:[%s15878_s18] sm:$0xff] %v8239_v61 }
 0x15e   : > { %v14347_v49 = vld [vmem:[#allocation2 + $0x8c] sm:$0xf]  ;;  %v11388_v59 = vor.u32 %v14747_v46, %v11385_v47 }
 0x15f   : > { %6916 = vmatpush.bf16.msra.mxu2 %v11004_v13  ;;  %6891 = vmatpush.bf16.msra.mxu0 %v9916_v28  ;;  %v9785_v54 = vld [vmem:[#allocation2 + $0xc8] sm:$0xf0] }
 0x160   : > { %v14475_v55 = vld [vmem:[#allocation2 + $0x48c] sm:$0xf]  ;;  %v9788_v0 = vor.u32 %v14347_v49, %v9785_v54 }
 0x161   : > { %6929 = vmatpush.bf16.msra.mxu3 %v11516_v19  ;;  %6904 = vmatpush.bf16.msra.mxu1 %v10428_v29  ;;  %v10297_v56 = vld [vmem:[#allocation2 + $0x4c8] sm:$0xf0] }
 0x162   : > { %v14603_v60 = vld [vmem:[#allocation2 + $0x88c] sm:$0xf]  ;;  %v10300_v3 = vor.u32 %v14475_v55, %v10297_v56 }
 0x163   : > { %6917 = vmatpush.bf16.msra.mxu2 %v10940_v30  ;;  %v10809_v53 = vld [vmem:[#allocation2 + $0x8c8] sm:$0xf0]  ;;  %6892 = vmatpush.bf16.msra.mxu0 %v9852_v48 }
 0x164   : > { %v14731_v62 = vld [vmem:[#allocation2 + $0xc8c] sm:$0xf]  ;;  %v10812_v4 = vor.u32 %v14603_v60, %v10809_v53 }
 0x165   : > { %6930 = vmatpush.bf16.msra.mxu3 %v11452_v35  ;;  %v11321_v63 = vld [vmem:[#allocation2 + $0xcc8] sm:$0xf0]  ;;  %6905 = vmatpush.bf16.msra.mxu1 %v10364_v51 }
 0x166   : > { %v14331_v1 = vld [vmem:[#allocation2 + $0xc] sm:$0xf]  ;;  %v11324_v11 = vor.u32 %v14731_v62, %v11321_v63 }
 0x167   : > { %v9721_v2 = vld [vmem:[#allocation2 + $0x48] sm:$0xf0]  ;;  %6918 = vmatpush.bf16.msra.mxu2 %v10876_v52  ;;  %6893 = vmatpush.bf16.msra.mxu0 %v9788_v0 }
 0x168   : > { %v14459_v5 = vld [vmem:[#allocation2 + $0x40c] sm:$0xf]  ;;  %v9724_v19 = vor.u32 %v14331_v1, %v9721_v2 }
 0x169   : > { %v10233_v6 = vld [vmem:[#allocation2 + $0x448] sm:$0xf0]  ;;  %6931 = vmatpush.bf16.msra.mxu3 %v11388_v59  ;;  %6906 = vmatpush.bf16.msra.mxu1 %v10300_v3 }
 0x16a   : > { %v14587_v7 = vld [vmem:[#allocation2 + $0x80c] sm:$0xf]  ;;  %v10236_v23 = vor.u32 %v14459_v5, %v10233_v6 }
 0x16b   : > { %v10745_v12 = vld [vmem:[#allocation2 + $0x848] sm:$0xf0]  ;;  %6919 = vmatpush.bf16.msra.mxu2 %v10812_v4  ;;  %6894 = vmatpush.bf16.msra.mxu0 %v9724_v19 }
 0x16c   : > { %v14715_v13 = vld [vmem:[#allocation2 + $0xc0c] sm:$0xf]  ;;  %v10748_v26 = vor.u32 %v14587_v7, %v10745_v12 }
 0x16d   : > { %v11257_v14 = vld [vmem:[#allocation2 + $0xc48] sm:$0xf0]  ;;  %6932 = vmatpush.bf16.msra.mxu3 %v11324_v11  ;;  %6907 = vmatpush.bf16.msra.mxu1 %v10236_v23 }
 0x16e   : > { %v14955_v16 = vld [vmem:[#allocation2 + $0x138c] sm:$0xf]  ;;  %v11260_v29 = vor.u32 %v14715_v13, %v11257_v14  ;;  %6895 = vmatmul.bf16.vlgmr.msra.gmra.mxu0 %v15819_v9 }
 0x16f   : > { %v12217_v17 = vld [vmem:[#allocation2 + $0x13c8] sm:$0xf0]  ;;  %6920 = vmatpush.bf16.msra.mxu2 %v10748_v26 }
 0x170   : > { %v15083_v18 = vld [vmem:[#allocation2 + $0x178c] sm:$0xf]  ;;  %v12220_v30 = vor.u32 %v14955_v16, %v12217_v17  ;;  %6908 = vmatmul.bf16.vlgmr.msra.gmra.mxu1 %v15828_v25  ;;  %v15887_v16 = vpop.f32.mrf.mxu1 }
 0x171   : > { %v12729_v20 = vld [vmem:[#allocation2 + $0x17c8] sm:$0xf0]  ;;  %6933 = vmatpush.bf16.msra.mxu3 %v11260_v29 }
 0x172   : > { %v15211_v21 = vld [vmem:[#allocation2 + $0x1b8c] sm:$0xf]  ;;  %v12732_v24 = vor.u32 %v15083_v18, %v12729_v20  ;;  %6939 = vmatpush.bf16.msrb.mxu0 %v12220_v30  ;;  %6921 = vmatmul.bf16.vlgmr.msra.gmra.mxu2 %v15817_v8 }
 0x173   : > { %v13241_v22 = vld [vmem:[#allocation2 + $0x1bc8] sm:$0xf0] }
 0x174   : > { %v15339_v27 = vld [vmem:[#allocation2 + $0x1f8c] sm:$0xf]  ;;  %v13244_v31 = vor.u32 %v15211_v21, %v13241_v22  ;;  %6952 = vmatpush.bf16.msrb.mxu1 %v12732_v24  ;;  %6934 = vmatmul.bf16.vlgmr.msra.gmra.mxu3 %v15822_v15  ;;  %v15889_v24 = vpop.f32.mrf.mxu2 }
 0x175   : > { %v13753_v28 = vld [vmem:[#allocation2 + $0x1fc8] sm:$0xf0] }
 0x176   : > { %v14939_v32 = vld [vmem:[#allocation2 + $0x130c] sm:$0xf]  ;;  %v13756_v36 = vor.u32 %v15339_v27, %v13753_v28  ;;  %6965 = vmatpush.bf16.msrb.mxu2 %v13244_v31 }
 0x177   : > { %v12153_v33 = vld [vmem:[#allocation2 + $0x1348] sm:$0xf0] }
 0x178   : > { %v15067_v35 = vld [vmem:[#allocation2 + $0x170c] sm:$0xf]  ;;  %v12156_v47 = vor.u32 %v14939_v32, %v12153_v33  ;;  %6978 = vmatpush.bf16.msrb.mxu3 %v13756_v36  ;;  %v15891_v36 = vpop.f32.mrf.mxu3 }
 0x179   : > { %v12665_v39 = vld [vmem:[#allocation2 + $0x1748] sm:$0xf0] }
 0x17a   : > { %v15195_v41 = vld [vmem:[#allocation2 + $0x1b0c] sm:$0xf]  ;;  %v12668_v48 = vor.u32 %v15067_v35, %v12665_v39  ;;  %6940 = vmatpush.bf16.msrb.mxu0 %v12156_v47 }
 0x17b   : > { %v13177_v44 = vld [vmem:[#allocation2 + $0x1b48] sm:$0xf0] }
 0x17c   : > { %v15323_v45 = vld [vmem:[#allocation2 + $0x1f0c] sm:$0xf]  ;;  %v13180_v49 = vor.u32 %v15195_v41, %v13177_v44  ;;  %6953 = vmatpush.bf16.msrb.mxu1 %v12668_v48 }
 0x17d   : > { %v13689_v46 = vld [vmem:[#allocation2 + $0x1f48] sm:$0xf0] }
 0x17e   : > { %v14923_v43 = vld [vmem:[#allocation2 + $0x128c] sm:$0xf]  ;;  %v13692_v52 = vor.u32 %v15323_v45, %v13689_v46  ;;  %6966 = vmatpush.bf16.msrb.mxu2 %v13180_v49  ;;  %v6690_v45 = vpop.f32.mrf.mxu0 }
 0x17f   : > { %v12089_v50 = vld [vmem:[#allocation2 + $0x12c8] sm:$0xf0]  ;;  %v14820_v45 = vld [vmem:[#allocation2 + $0xf4c] sm:$0xf0] }
 0x180   : > { %v15051_v51 = vld [vmem:[#allocation2 + $0x168c] sm:$0xf]  ;;  %v12092_v60 = vor.u32 %v14923_v43, %v12089_v50  ;;  %6979 = vmatpush.bf16.msrb.mxu3 %v13692_v52  ;;  %v6703_v50 = vpop.f32.mrf.mxu1 }
 0x181   : > { %v12601_v54 = vld [vmem:[#allocation2 + $0x16c8] sm:$0xf0]  ;;  %v10559_v50 = vld [vmem:[#allocation2 + $0x690] sm:$0xf] }
 0x182   : > { %v15179_v55 = vld [vmem:[#allocation2 + $0x1a8c] sm:$0xf]  ;;  %v12604_v53 = vor.u32 %v15051_v51, %v12601_v54  ;;  %6941 = vmatpush.bf16.msrb.mxu0 %v12092_v60 }
 0x183   : > { %v13113_v56 = vld [vmem:[#allocation2 + $0x1ac8] sm:$0xf0] }
 0x184   : > { %v15307_v58 = vld [vmem:[#allocation2 + $0x1e8c] sm:$0xf]  ;;  %v13116_v61 = vor.u32 %v15179_v55, %v13113_v56  ;;  %6954 = vmatpush.bf16.msrb.mxu1 %v12604_v53 }
 0x185   : > { %v13625_v59 = vld [vmem:[#allocation2 + $0x1ec8] sm:$0xf0] }
 0x186   : > { %v14907_v62 = vld [vmem:[#allocation2 + $0x120c] sm:$0xf]  ;;  %v13628_v1 = vor.u32 %v15307_v58, %v13625_v59  ;;  %6967 = vmatpush.bf16.msrb.mxu2 %v13116_v61  ;;  %v1424_v59 = vperm.slane %v15859_v42, 1  ;;  %v14452_v42 = vld [vmem:[#allocation2 + $0x3cc] sm:$0xf0] }
 0x187   : > { %v12025_v63 = vld [vmem:[#allocation2 + $0x1248] sm:$0xf0] }
 0x188   : > { %v15035_v0 = vld [vmem:[#allocation2 + $0x160c] sm:$0xf]  ;;  %v12028_v7 = vor.u32 %v14907_v62, %v12025_v63  ;;  %6980 = vmatpush.bf16.msrb.mxu3 %v13628_v1 }
 0x189   : > { %v12537_v2 = vld [vmem:[#allocation2 + $0x1648] sm:$0xf0] }
 0x18a   : > { %v15163_v3 = vld [vmem:[#allocation2 + $0x1a0c] sm:$0xf]  ;;  %v12540_v11 = vor.u32 %v15035_v0, %v12537_v2  ;;  %6942 = vmatpush.bf16.msrb.mxu0 %v12028_v7 }
 0x18b   : > { %v13049_v4 = vld [vmem:[#allocation2 + $0x1a48] sm:$0xf0] }
 0x18c   : > { %v15291_v5 = vld [vmem:[#allocation2 + $0x1e0c] sm:$0xf]  ;;  %v13052_v12 = vor.u32 %v15163_v3, %v13049_v4  ;;  %6955 = vmatpush.bf16.msrb.mxu1 %v12540_v11  ;;  %v6716_v3 = vpop.f32.mrf.mxu2  ;;  %v6729_v11 = vpop.f32.mrf.mxu3 }
 0x18d   : > { %v13561_v6 = vld [vmem:[#allocation2 + $0x1e48] sm:$0xf0]  ;;  %v14660_v3 = vld [vmem:[#allocation2 + $0xa4c] sm:$0xf0] }
 0x18e   : > { %v14891_v13 = vld [vmem:[#allocation2 + $0x118c] sm:$0xf]  ;;  %v13564_v17 = vor.u32 %v15291_v5, %v13561_v6  ;;  %6968 = vmatpush.bf16.msrb.mxu2 %v13052_v12  ;;  %v10175_v12 = vld [vmem:[#allocation2 + $0x390] sm:$0xf] }
 0x18f   : > { %v11961_v14 = vld [vmem:[#allocation2 + $0x11c8] sm:$0xf0] }
 0x190   : > { %v15019_v57 = vld [vmem:[#allocation2 + $0x158c] sm:$0xf]  ;;  %v11964_v23 = vor.u32 %v14891_v13, %v11961_v14  ;;  %6981 = vmatpush.bf16.msrb.mxu3 %v13564_v17  ;;  %v10687_v13 = vld [vmem:[#allocation2 + $0x790] sm:$0xf]  ;;  %v6689_v14 = vadd.f32 %v15885_v10, %v1424_v59 }
 0x191   : > { %v12473_v18 = vld [vmem:[#allocation2 + $0x15c8] sm:$0xf0]  ;;  %v14580_v17 = vld [vmem:[#allocation2 + $0x7cc] sm:$0xf0] }
 0x192   : > { %v15147_v19 = vld [vmem:[#allocation2 + $0x198c] sm:$0xf]  ;;  %v12476_v26 = vor.u32 %v15019_v57, %v12473_v18  ;;  %6943 = vmatpush.bf16.msrb.mxu0 %v11964_v23  ;;  %v11199_v18 = vld [vmem:[#allocation2 + $0xb90] sm:$0xf]  ;;  %v6702_v10 = vadd.f32 %v15887_v16, %v6689_v14 }
 0x193   : > { %v12985_v20 = vld [vmem:[#allocation2 + $0x19c8] sm:$0xf0]  ;;  %v14836_v23 = vld [vmem:[#allocation2 + $0xfcc] sm:$0xf0] }
 0x194   : > { %v15275_v21 = vld [vmem:[#allocation2 + $0x1d8c] sm:$0xf]  ;;  %v12988_v27 = vor.u32 %v15147_v19, %v12985_v20  ;;  %6956 = vmatpush.bf16.msrb.mxu1 %v12476_v26  ;;  %v14708_v19 = vld [vmem:[#allocation2 + $0xbcc] sm:$0xf0] }
 0x195   : > { %v13497_v22 = vld [vmem:[#allocation2 + $0x1dc8] sm:$0xf0]  ;;  %v14420_v16 = vld [vmem:[#allocation2 + $0x2cc] sm:$0xf0] }
 0x196   : > { %v14875_v28 = vld [vmem:[#allocation2 + $0x110c] sm:$0xf]  ;;  %v13500_v31 = vor.u32 %v15275_v21, %v13497_v22  ;;  %6969 = vmatpush.bf16.msrb.mxu2 %v12988_v27  ;;  %v11711_v22 = vld [vmem:[#allocation2 + $0xf90] sm:$0xf]  ;;  %v10176_v27 = vor.u32 %v14452_v42, %v10175_v12 }
 0x197   : > { %v11897_v29 = vld [vmem:[#allocation2 + $0x1148] sm:$0xf0]  ;;  %v9919_v42 = vld [vmem:[#allocation2 + $0x190] sm:$0xf] }
 0x198   : > { %v15003_v30 = vld [vmem:[#allocation2 + $0x150c] sm:$0xf]  ;;  %v11900_v44 = vor.u32 %v14875_v28, %v11897_v29  ;;  %6982 = vmatpush.bf16.msrb.mxu3 %v13500_v31  ;;  %v10688_v28 = vor.u32 %v14580_v17, %v10687_v13  ;;  %v11200_v29 = vor.u32 %v14708_v19, %v11199_v18  ;;  %v14436_v31 = vld [vmem:[#allocation2 + $0x34c] sm:$0xf0] }
 0x199   : > { %v12409_v32 = vld [vmem:[#allocation2 + $0x1548] sm:$0xf0]  ;;  %v14388_v13 = vld [vmem:[#allocation2 + $0x1cc] sm:$0xf0] }
 0x19a   : > { %v15131_v33 = vld [vmem:[#allocation2 + $0x190c] sm:$0xf]  ;;  %v12412_v46 = vor.u32 %v15003_v30, %v12409_v32  ;;  %6944 = vmatpush.bf16.msrb.mxu0 %v11900_v44  ;;  %v10111_v30 = vld [vmem:[#allocation2 + $0x310] sm:$0xf] }
 0x19b   : > { %v12921_v35 = vld [vmem:[#allocation2 + $0x1948] sm:$0xf0]  ;;  %v10623_v32 = vld [vmem:[#allocation2 + $0x710] sm:$0xf] }
 0x19c   : > { %v15259_v39 = vld [vmem:[#allocation2 + $0x1d0c] sm:$0xf]  ;;  %v12924_v47 = vor.u32 %v15131_v33, %v12921_v35  ;;  %6957 = vmatpush.bf16.msrb.mxu1 %v12412_v46  ;;  %v11712_v33 = vor.u32 %v14836_v23, %v11711_v22  ;;  %v14564_v35 = vld [vmem:[#allocation2 + $0x74c] sm:$0xf0]  ;;  %v10112_v46 = vor.u32 %v14436_v31, %v10111_v30 }
 0x19d   : > { %v13433_v41 = vld [vmem:[#allocation2 + $0x1d48] sm:$0xf0]  ;;  %v11647_v44 = vld [vmem:[#allocation2 + $0xf10] sm:$0xf] }
 0x19e   : > { %v14859_v48 = vld [vmem:[#allocation2 + $0x108c] sm:$0xf]  ;;  %v13436_v51 = vor.u32 %v15259_v39, %v13433_v41  ;;  %6970 = vmatpush.bf16.msrb.mxu2 %v12924_v47  ;;  %v11135_v39 = vld [vmem:[#allocation2 + $0xb10] sm:$0xf]  ;;  %v10624_v47 = vor.u32 %v14564_v35, %v10623_v32  ;;  %v6766_v32 = vpop.f32.mrf.mxu2 }
 0x19f   : > { %v11833_v49 = vld [vmem:[#allocation2 + $0x10c8] sm:$0xf0]  ;;  %v14692_v41 = vld [vmem:[#allocation2 + $0xb4c] sm:$0xf0] }
 0x1a0   : > { %v14987_v43 = vld [vmem:[#allocation2 + $0x148c] sm:$0xf]  ;;  %v11836_v60 = vor.u32 %v14859_v48, %v11833_v49  ;;  %6983 = vmatpush.bf16.msrb.mxu3 %v13436_v51  ;;  %v11136_v48 = vor.u32 %v14692_v41, %v11135_v39  ;;  %v6715_v49 = vadd.f32 %v15889_v24, %v6702_v10  ;;  %v11648_v51 = vor.u32 %v14820_v45, %v11647_v44  ;;  %v14516_v18 = vld [vmem:[#allocation2 + $0x5cc] sm:$0xf0]  ;;  %v6779_v44 = vpop.f32.mrf.mxu3 }
 0x1a1   : > { %v12345_v52 = vld [vmem:[#allocation2 + $0x14c8] sm:$0xf0]  ;;  %v10943_v19 = vld [vmem:[#allocation2 + $0x990] sm:$0xf] }
 0x1a2   : > { %v15115_v54 = vld [vmem:[#allocation2 + $0x188c] sm:$0xf]  ;;  %v12348_v62 = vor.u32 %v14987_v43, %v12345_v52  ;;  %6945 = vmatpush.bf16.msrb.mxu0 %v11836_v60  ;;  %v10047_v43 = vld [vmem:[#allocation2 + $0x290] sm:$0xf] }
 0x1a3   : > { %v12857_v55 = vld [vmem:[#allocation2 + $0x18c8] sm:$0xf0]  ;;  %v14548_v52 = vld [vmem:[#allocation2 + $0x6cc] sm:$0xf0]  ;;  %v10048_v59 = vor.u32 %v14420_v16, %v10047_v43 }
 0x1a4   : > { %v15243_v56 = vld [vmem:[#allocation2 + $0x1c8c] sm:$0xf]  ;;  %v12860_v63 = vor.u32 %v15115_v54, %v12857_v55  ;;  %6958 = vmatpush.bf16.msrb.mxu1 %v12348_v62  ;;  %v11071_v54 = vld [vmem:[#allocation2 + $0xa90] sm:$0xf]  ;;  %v10560_v24 = vor.u32 %v14548_v52, %v10559_v50 }
 0x1a5   : > { %v13369_v58 = vld [vmem:[#allocation2 + $0x1cc8] sm:$0xf0]  ;;  %v14676_v55 = vld [vmem:[#allocation2 + $0xacc] sm:$0xf0] }
 0x1a6   : > { %v14843_v53 = vld [vmem:[#allocation2 + $0x100c] sm:$0xf]  ;;  %v13372_v4 = vor.u32 %v15243_v56, %v13369_v58  ;;  %6971 = vmatpush.bf16.msrb.mxu2 %v12860_v63  ;;  %v11583_v56 = vld [vmem:[#allocation2 + $0xe90] sm:$0xf]  ;;  %v11072_v60 = vor.u32 %v14676_v55, %v11071_v54 }
 0x1a7   : > { %v11769_v61 = vld [vmem:[#allocation2 + $0x1048] sm:$0xf0]  ;;  %v14804_v58 = vld [vmem:[#allocation2 + $0xecc] sm:$0xf0] }
 0x1a8   : > { %v14971_v0 = vld [vmem:[#allocation2 + $0x140c] sm:$0xf]  ;;  %v11772_v57 = vor.u32 %v14843_v53, %v11769_v61  ;;  %6984 = vmatpush.bf16.msrb.mxu3 %v13372_v4  ;;  %v6728_v53 = vadd.f32 %v15891_v36, %v6715_v49  ;;  %v9983_v61 = vld [vmem:[#allocation2 + $0x210] sm:$0xf] }
 0x1a9   : > { %v12281_v1 = vld [vmem:[#allocation2 + $0x1448] sm:$0xf0]  ;;  %v14404_v62 = vld [vmem:[#allocation2 + $0x24c] sm:$0xf0] }
 0x1aa   : > { %v15099_v2 = vld [vmem:[#allocation2 + $0x180c] sm:$0xf]  ;;  %v12284_v20 = vor.u32 %v14971_v0, %v12281_v1  ;;  %6946 = vmatpush.bf16.msrb.mxu0 %v11772_v57  ;;  %v10495_v63 = vld [vmem:[#allocation2 + $0x610] sm:$0xf]  ;;  %v11584_v0 = vor.u32 %v14804_v58, %v11583_v56  ;;  %v6753_v57 = vpop.f32.mrf.mxu1 }
 0x1ab   : > { %v12793_v5 = vld [vmem:[#allocation2 + $0x1848] sm:$0xf0]  ;;  %v14532_v1 = vld [vmem:[#allocation2 + $0x64c] sm:$0xf0] }
 0x1ac   : > { %v15227_v6 = vld [vmem:[#allocation2 + $0x1c0c] sm:$0xf]  ;;  %v12796_v21 = vor.u32 %v15099_v2, %v12793_v5  ;;  %6959 = vmatpush.bf16.msrb.mxu1 %v12284_v20  ;;  %v11007_v2 = vld [vmem:[#allocation2 + $0xa10] sm:$0xf]  ;;  %v10496_v11 = vor.u32 %v14532_v1, %v10495_v63 }
 0x1ad   : > { %v13305_v7 = vld [vmem:[#allocation2 + $0x1c48] sm:$0xf0]  ;;  %6947 = vmatmul.bf16.vlgmr.msrb.gmra.mxu0 %v15837_v37  ;;  %v11519_v4 = vld [vmem:[#allocation2 + $0xe10] sm:$0xf]  ;;  %v11008_v12 = vor.u32 %v14660_v3, %v11007_v2 }
 0x1ae   : > { %v13308_v26 = vor.u32 %v15227_v6, %v13305_v7  ;;  %6972 = vmatpush.bf16.msrb.mxu2 %v12796_v21  ;;  %6991 = vmatpush.bf16.msra.mxu0 %v10176_v27  ;;  %v14788_v5 = vld [vmem:[#allocation2 + $0xe4c] sm:$0xf0]  ;;  %v9984_v6 = vor.u32 %v14404_v62, %v9983_v61  ;;  %v6740_v7 = vpop.f32.mrf.mxu0 }
 0x1af   : > { %6960 = vmatmul.bf16.vlgmr.msrb.gmra.mxu1 %v15841_v40  ;;  %v10431_v36 = vld [vmem:[#allocation2 + $0x590] sm:$0xf]  ;;  %v6741_v14 = vadd.f32 %v6740_v7, %v6728_v53  ;;  %v11520_v17 = vor.u32 %v14788_v5, %v11519_v4  ;;  %v6768_v5 = vpop.f32.mrf.mxu2 }
 0x1b0   : > { %6985 = vmatpush.bf16.msrb.mxu3 %v13308_v26  ;;  %7004 = vmatpush.bf16.msra.mxu1 %v10688_v28  ;;  %v14644_v20 = vld [vmem:[#allocation2 + $0x9cc] sm:$0xf0]  ;;  %v9920_v26 = vor.u32 %v14388_v13, %v9919_v42  ;;  %v10432_v27 = vor.u32 %v14516_v18, %v10431_v36  ;;  %v6781_v42 = vpop.f32.mrf.mxu3 }
 0x1b1   : > { %6973 = vmatmul.bf16.vlgmr.msrb.gmra.mxu2 %v15835_v34  ;;  %v11455_v21 = vld [vmem:[#allocation2 + $0xd90] sm:$0xf]  ;;  %v6754_v23 = vadd.f32 %v6753_v57, %v6741_v14  ;;  %v10944_v28 = vor.u32 %v14644_v20, %v10943_v19 }
 0x1b2   : > { %7017 = vmatpush.bf16.msra.mxu2 %v11200_v29  ;;  %6992 = vmatpush.bf16.msra.mxu0 %v10112_v46  ;;  %v14772_v22 = vld [vmem:[#allocation2 + $0xdcc] sm:$0xf0]  ;;  %v6755_v55 = vpop.f32.mrf.mxu1 }
 0x1b3   : > { %6986 = vmatmul.bf16.vlgmr.msrb.gmra.mxu3 %v15839_v38  ;;  %v9855_v29 = vld [vmem:[#allocation2 + $0x110] sm:$0xf]  ;;  %v11456_v10 = vor.u32 %v14772_v22, %v11455_v21  ;;  %v6767_v41 = vadd.f32 %v6766_v32, %v6754_v23 }
 0x1b4   : > { %7030 = vmatpush.bf16.msra.mxu3 %v11712_v33  ;;  %7005 = vmatpush.bf16.msra.mxu1 %v10624_v47  ;;  %v14372_v30 = vld [vmem:[#allocation2 + $0x14c] sm:$0xf0] }
 0x1b5   : > { %v10367_v31 = vld [vmem:[#allocation2 + $0x510] sm:$0xf]  ;;  %v9856_v47 = vor.u32 %v14372_v30, %v9855_v29  ;;  %v6780_v49 = vadd.f32 %v6779_v44, %v6767_v41 }
 0x1b6   : > { %7018 = vmatpush.bf16.msra.mxu2 %v11136_v48  ;;  %6993 = vmatpush.bf16.msra.mxu0 %v10048_v59  ;;  %v14500_v33 = vld [vmem:[#allocation2 + $0x54c] sm:$0xf0]  ;;  %v6742_v43 = vpop.f32.mrf.mxu0 }
 0x1b7   : > { %v10879_v35 = vld [vmem:[#allocation2 + $0x910] sm:$0xf]  ;;  %v10368_v16 = vor.u32 %v14500_v33, %v10367_v31 }
 0x1b8   : > { %7031 = vmatpush.bf16.msra.mxu3 %v11648_v51  ;;  %7006 = vmatpush.bf16.msra.mxu1 %v10560_v24  ;;  %v14628_v39 = vld [vmem:[#allocation2 + $0x94c] sm:$0xf0]  ;;  %v8240_v24 = vmax.f32 %v6780_v49, 0.0 }
 0x1b9   : > { %v11391_v45 = vld [vmem:[#allocation2 + $0xd10] sm:$0xf]  ;;  %v10880_v50 = vor.u32 %v14628_v39, %v10879_v35 }
 0x1ba   : > { %7019 = vmatpush.bf16.msra.mxu2 %v11072_v60  ;;  %6994 = vmatpush.bf16.msra.mxu0 %v9984_v6  ;;  %v14756_v46 = vld [vmem:[#allocation2 + $0xd4c] sm:$0xf0]  ;;  %8256 = vst [vmem:[%s15878_s18 + $0x8] sm:$0xff] %v8240_v24  ;;  %v15909_v42 = vpop.f32.mrf.mxu1 }
 0x1bb   : > { %v9791_v48 = vld [vmem:[#allocation2 + $0x90] sm:$0xf]  ;;  %v11392_v56 = vor.u32 %v14756_v46, %v11391_v45 }
 0x1bc   : > { %7032 = vmatpush.bf16.msra.mxu3 %v11584_v0  ;;  %7007 = vmatpush.bf16.msra.mxu1 %v10496_v11  ;;  %v14356_v51 = vld [vmem:[#allocation2 + $0xcc] sm:$0xf0] }
 0x1bd   : > { %v10303_v52 = vld [vmem:[#allocation2 + $0x490] sm:$0xf]  ;;  %v9792_v61 = vor.u32 %v14356_v51, %v9791_v48 }
 0x1be   : > { %7020 = vmatpush.bf16.msra.mxu2 %v11008_v12  ;;  %6995 = vmatpush.bf16.msra.mxu0 %v9920_v26  ;;  %v14484_v54 = vld [vmem:[#allocation2 + $0x4cc] sm:$0xf0] }
 0x1bf   : > { %v10815_v58 = vld [vmem:[#allocation2 + $0x890] sm:$0xf]  ;;  %v10304_v0 = vor.u32 %v14484_v54, %v10303_v52 }
 0x1c0   : > { %7033 = vmatpush.bf16.msra.mxu3 %v11520_v17  ;;  %7008 = vmatpush.bf16.msra.mxu1 %v10432_v27  ;;  %v14612_v59 = vld [vmem:[#allocation2 + $0x8cc] sm:$0xf0] }
 0x1c1   : > { %v11327_v60 = vld [vmem:[#allocation2 + $0xc90] sm:$0xf]  ;;  %v10816_v1 = vor.u32 %v14612_v59, %v10815_v58 }
 0x1c2   : > { %7021 = vmatpush.bf16.msra.mxu2 %v10944_v28  ;;  %v14740_v53 = vld [vmem:[#allocation2 + $0xccc] sm:$0xf0]  ;;  %6996 = vmatpush.bf16.msra.mxu0 %v9856_v47 }
 0x1c3   : > { %v9727_v62 = vld [vmem:[#allocation2 + $0x10] sm:$0xf]  ;;  %v11328_v6 = vor.u32 %v14740_v53, %v11327_v60 }
 0x1c4   : > { %7034 = vmatpush.bf16.msra.mxu3 %v11456_v10  ;;  %v14340_v63 = vld [vmem:[#allocation2 + $0x4c] sm:$0xf0]  ;;  %7009 = vmatpush.bf16.msra.mxu1 %v10368_v16 }
 0x1c5   : > { %v10239_v2 = vld [vmem:[#allocation2 + $0x410] sm:$0xf]  ;;  %v9728_v57 = vor.u32 %v14340_v63, %v9727_v62 }
 0x1c6   : > { %7022 = vmatpush.bf16.msra.mxu2 %v10880_v50  ;;  %v14468_v3 = vld [vmem:[#allocation2 + $0x44c] sm:$0xf0]  ;;  %6997 = vmatpush.bf16.msra.mxu0 %v9792_v61 }
 0x1c7   : > { %v10751_v4 = vld [vmem:[#allocation2 + $0x810] sm:$0xf]  ;;  %v10240_v20 = vor.u32 %v14468_v3, %v10239_v2 }
 0x1c8   : > { %7035 = vmatpush.bf16.msra.mxu3 %v11392_v56  ;;  %v14596_v7 = vld [vmem:[#allocation2 + $0x84c] sm:$0xf0]  ;;  %7010 = vmatpush.bf16.msra.mxu1 %v10304_v0 }
 0x1c9   : > { %v11263_v11 = vld [vmem:[#allocation2 + $0xc10] sm:$0xf]  ;;  %v10752_v21 = vor.u32 %v14596_v7, %v10751_v4  ;;  %v15907_v4 = vpop.f32.mrf.mxu0 }
 0x1ca   : > { %v14724_v12 = vld [vmem:[#allocation2 + $0xc4c] sm:$0xf0]  ;;  %7023 = vmatpush.bf16.msra.mxu2 %v10816_v1  ;;  %6998 = vmatpush.bf16.msra.mxu0 %v9728_v57 }
 0x1cb   : > { %v12223_v13 = vld [vmem:[#allocation2 + $0x1390] sm:$0xf]  ;;  %v11264_v26 = vor.u32 %v14724_v12, %v11263_v11 }
 0x1cc   : > { %v14964_v36 = vld [vmem:[#allocation2 + $0x13cc] sm:$0xf0]  ;;  %7036 = vmatpush.bf16.msra.mxu3 %v11328_v6  ;;  %7011 = vmatpush.bf16.msra.mxu1 %v10240_v20 }
 0x1cd   : > { %v12735_v14 = vld [vmem:[#allocation2 + $0x1790] sm:$0xf]  ;;  %v12224_v27 = vor.u32 %v14964_v36, %v12223_v13  ;;  %6999 = vmatmul.bf16.vlgmr.msra.gmra.mxu0 %v15819_v9 }
 0x1ce   : > { %v15092_v17 = vld [vmem:[#allocation2 + $0x17cc] sm:$0xf0]  ;;  %7024 = vmatpush.bf16.msra.mxu2 %v10752_v21 }
 0x1cf   : > { %v13247_v18 = vld [vmem:[#allocation2 + $0x1b90] sm:$0xf]  ;;  %v12736_v28 = vor.u32 %v15092_v17, %v12735_v14  ;;  %7043 = vmatpush.bf16.msrb.mxu0 %v12224_v27  ;;  %7012 = vmatmul.bf16.vlgmr.msra.gmra.mxu1 %v15828_v25  ;;  %v15911_v27 = vpop.f32.mrf.mxu2 }
 0x1d0   : > { %v15220_v19 = vld [vmem:[#allocation2 + $0x1bcc] sm:$0xf0]  ;;  %7037 = vmatpush.bf16.msra.mxu3 %v11264_v26 }
 0x1d1   : > { %v13759_v22 = vld [vmem:[#allocation2 + $0x1f90] sm:$0xf]  ;;  %v13248_v29 = vor.u32 %v15220_v19, %v13247_v18  ;;  %7056 = vmatpush.bf16.msrb.mxu1 %v12736_v28  ;;  %7025 = vmatmul.bf16.vlgmr.msra.gmra.mxu2 %v15817_v8 }
 0x1d2   : > { %v15348_v23 = vld [vmem:[#allocation2 + $0x1fcc] sm:$0xf0] }
 0x1d3   : > { %v12159_v30 = vld [vmem:[#allocation2 + $0x1310] sm:$0xf]  ;;  %v13760_v10 = vor.u32 %v15348_v23, %v13759_v22  ;;  %7069 = vmatpush.bf16.msrb.mxu2 %v13248_v29  ;;  %7038 = vmatmul.bf16.vlgmr.msra.gmra.mxu3 %v15822_v15 }
 0x1d4   : > { %v14948_v31 = vld [vmem:[#allocation2 + $0x134c] sm:$0xf0] }
 0x1d5   : > { %v12671_v32 = vld [vmem:[#allocation2 + $0x1710] sm:$0xf]  ;;  %v12160_v45 = vor.u32 %v14948_v31, %v12159_v30  ;;  %7082 = vmatpush.bf16.msrb.mxu3 %v13760_v10 }
 0x1d6   : > { %v15076_v33 = vld [vmem:[#allocation2 + $0x174c] sm:$0xf0] }
 0x1d7   : > { %v13183_v35 = vld [vmem:[#allocation2 + $0x1b10] sm:$0xf]  ;;  %v12672_v46 = vor.u32 %v15076_v33, %v12671_v32  ;;  %7044 = vmatpush.bf16.msrb.mxu0 %v12160_v45  ;;  %v15913_v32 = vpop.f32.mrf.mxu3 }
 0x1d8   : > { %v15204_v39 = vld [vmem:[#allocation2 + $0x1b4c] sm:$0xf0] }
 0x1d9   : > { %v13695_v41 = vld [vmem:[#allocation2 + $0x1f10] sm:$0xf]  ;;  %v13184_v47 = vor.u32 %v15204_v39, %v13183_v35  ;;  %7057 = vmatpush.bf16.msrb.mxu1 %v12672_v46  ;;  %v6794_v39 = vpop.f32.mrf.mxu0 }
 0x1da   : > { %v15332_v44 = vld [vmem:[#allocation2 + $0x1f4c] sm:$0xf0]  ;;  %v14812_v39 = vld [vmem:[#allocation2 + $0xf14] sm:$0xf] }
 0x1db   : > { %v12095_v48 = vld [vmem:[#allocation2 + $0x1290] sm:$0xf]  ;;  %v13696_v16 = vor.u32 %v15332_v44, %v13695_v41  ;;  %7070 = vmatpush.bf16.msrb.mxu2 %v13184_v47 }
 0x1dc   : > { %v14932_v49 = vld [vmem:[#allocation2 + $0x12cc] sm:$0xf0] }
 0x1dd   : > { %v12607_v43 = vld [vmem:[#allocation2 + $0x1690] sm:$0xf]  ;;  %v12096_v56 = vor.u32 %v14932_v49, %v12095_v48  ;;  %7083 = vmatpush.bf16.msrb.mxu3 %v13696_v16  ;;  %v6807_v48 = vpop.f32.mrf.mxu1 }
 0x1de   : > { %v15060_v50 = vld [vmem:[#allocation2 + $0x16cc] sm:$0xf0]  ;;  %v14412_v48 = vld [vmem:[#allocation2 + $0x294] sm:$0xf] }
 0x1df   : > { %v13119_v51 = vld [vmem:[#allocation2 + $0x1a90] sm:$0xf]  ;;  %v12608_v58 = vor.u32 %v15060_v50, %v12607_v43  ;;  %7045 = vmatpush.bf16.msrb.mxu0 %v12096_v56 }
 0x1e0   : > { %v15188_v52 = vld [vmem:[#allocation2 + $0x1acc] sm:$0xf0] }
 0x1e1   : > { %v13631_v54 = vld [vmem:[#allocation2 + $0x1e90] sm:$0xf]  ;;  %v13120_v59 = vor.u32 %v15188_v52, %v13119_v51  ;;  %7058 = vmatpush.bf16.msrb.mxu1 %v12608_v58 }
 0x1e2   : > { %v15316_v55 = vld [vmem:[#allocation2 + $0x1ecc] sm:$0xf0] }
 0x1e3   : > { %v12031_v24 = vld [vmem:[#allocation2 + $0x1210] sm:$0xf]  ;;  %v13632_v61 = vor.u32 %v15316_v55, %v13631_v54  ;;  %7071 = vmatpush.bf16.msrb.mxu2 %v13120_v59  ;;  %v15915_v54 = vld [vmem:[#allocation4] sm:$0xff] }
 0x1e4   : > { %v14916_v60 = vld [vmem:[#allocation2 + $0x124c] sm:$0xf0]  ;;  %v1425_v55 = vperm.slane %v15915_v54, 2 }
 0x1e5   : > { %v12543_v53 = vld [vmem:[#allocation2 + $0x1610] sm:$0xf]  ;;  %v12032_v3 = vor.u32 %v14916_v60, %v12031_v24  ;;  %7084 = vmatpush.bf16.msrb.mxu3 %v13632_v61 }
 0x1e6   : > { %v15044_v62 = vld [vmem:[#allocation2 + $0x164c] sm:$0xf0] }
 0x1e7   : > { %v13055_v63 = vld [vmem:[#allocation2 + $0x1a10] sm:$0xf]  ;;  %v12544_v5 = vor.u32 %v15044_v62, %v12543_v53  ;;  %7046 = vmatpush.bf16.msrb.mxu0 %v12032_v3 }
 0x1e8   : > { %v15172_v0 = vld [vmem:[#allocation2 + $0x1a4c] sm:$0xf0] }
 0x1e9   : > { %v13567_v1 = vld [vmem:[#allocation2 + $0x1e10] sm:$0xf]  ;;  %v13056_v6 = vor.u32 %v15172_v0, %v13055_v63  ;;  %7059 = vmatpush.bf16.msrb.mxu1 %v12544_v5  ;;  %v6820_v63 = vpop.f32.mrf.mxu2  ;;  %v6833_v5 = vpop.f32.mrf.mxu3 }
 0x1ea   : > { %v15300_v2 = vld [vmem:[#allocation2 + $0x1e4c] sm:$0xf0]  ;;  %v14652_v63 = vld [vmem:[#allocation2 + $0xa14] sm:$0xf]  ;;  %v6844_v5 = vpop.f32.mrf.mxu0 }
 0x1eb   : > { %v11967_v7 = vld [vmem:[#allocation2 + $0x1190] sm:$0xf]  ;;  %v13568_v13 = vor.u32 %v15300_v2, %v13567_v1  ;;  %7072 = vmatpush.bf16.msrb.mxu2 %v13056_v6  ;;  %v14444_v6 = vld [vmem:[#allocation2 + $0x394] sm:$0xf] }
 0x1ec   : > { %v14900_v11 = vld [vmem:[#allocation2 + $0x11cc] sm:$0xf0] }
 0x1ed   : > { %v12479_v12 = vld [vmem:[#allocation2 + $0x1590] sm:$0xf]  ;;  %v11968_v19 = vor.u32 %v14900_v11, %v11967_v7  ;;  %7085 = vmatpush.bf16.msrb.mxu3 %v13568_v13  ;;  %v10177_v7 = vld [vmem:[#allocation2 + $0x3d0] sm:$0xf0] }
 0x1ee   : > { %v15028_v36 = vld [vmem:[#allocation2 + $0x15cc] sm:$0xf0]  ;;  %v14572_v11 = vld [vmem:[#allocation2 + $0x794] sm:$0xf] }
 0x1ef   : > { %v12991_v14 = vld [vmem:[#allocation2 + $0x1990] sm:$0xf]  ;;  %v12480_v20 = vor.u32 %v15028_v36, %v12479_v12  ;;  %7047 = vmatpush.bf16.msrb.mxu0 %v11968_v19  ;;  %v6793_v12 = vadd.f32 %v15907_v4, %v1425_v55  ;;  %v10689_v36 = vld [vmem:[#allocation2 + $0x7d0] sm:$0xf0] }
 0x1f0   : > { %v15156_v57 = vld [vmem:[#allocation2 + $0x19cc] sm:$0xf0]  ;;  %v14828_v19 = vld [vmem:[#allocation2 + $0xf94] sm:$0xf] }
 0x1f1   : > { %v13503_v17 = vld [vmem:[#allocation2 + $0x1d90] sm:$0xf]  ;;  %v12992_v21 = vor.u32 %v15156_v57, %v12991_v14  ;;  %7060 = vmatpush.bf16.msrb.mxu1 %v12480_v20  ;;  %v14700_v14 = vld [vmem:[#allocation2 + $0xb94] sm:$0xf]  ;;  %v6806_v4 = vadd.f32 %v15909_v42, %v6793_v12 }
 0x1f2   : > { %v15284_v18 = vld [vmem:[#allocation2 + $0x1dcc] sm:$0xf0]  ;;  %v11201_v57 = vld [vmem:[#allocation2 + $0xbd0] sm:$0xf0] }
 0x1f3   : > { %v11903_v22 = vld [vmem:[#allocation2 + $0x1110] sm:$0xf]  ;;  %v13504_v28 = vor.u32 %v15284_v18, %v13503_v17  ;;  %7073 = vmatpush.bf16.msrb.mxu2 %v12992_v21  ;;  %v11713_v20 = vld [vmem:[#allocation2 + $0xfd0] sm:$0xf0] }
 0x1f4   : > { %v14884_v23 = vld [vmem:[#allocation2 + $0x114c] sm:$0xf0]  ;;  %v10049_v42 = vld [vmem:[#allocation2 + $0x2d0] sm:$0xf0] }
 0x1f5   : > { %v12415_v26 = vld [vmem:[#allocation2 + $0x1510] sm:$0xf]  ;;  %v11904_v35 = vor.u32 %v14884_v23, %v11903_v22  ;;  %7086 = vmatpush.bf16.msrb.mxu3 %v13504_v28  ;;  %v10180_v22 = vor.u32 %v14444_v6, %v10177_v7  ;;  %v10692_v23 = vor.u32 %v14572_v11, %v10689_v36  ;;  %v14428_v28 = vld [vmem:[#allocation2 + $0x314] sm:$0xf]  ;;  %v6857_v36 = vpop.f32.mrf.mxu1 }
 0x1f6   : > { %v15012_v29 = vld [vmem:[#allocation2 + $0x154c] sm:$0xf0]  ;;  %v11585_v55 = vld [vmem:[#allocation2 + $0xed0] sm:$0xf0] }
 0x1f7   : > { %v12927_v30 = vld [vmem:[#allocation2 + $0x1910] sm:$0xf]  ;;  %v12416_v41 = vor.u32 %v15012_v29, %v12415_v26  ;;  %7048 = vmatpush.bf16.msrb.mxu0 %v11904_v35  ;;  %v11204_v26 = vor.u32 %v14700_v14, %v11201_v57  ;;  %v10113_v29 = vld [vmem:[#allocation2 + $0x350] sm:$0xf0] }
 0x1f8   : > { %v15140_v31 = vld [vmem:[#allocation2 + $0x194c] sm:$0xf0]  ;;  %v11137_v35 = vld [vmem:[#allocation2 + $0xb50] sm:$0xf0] }
 0x1f9   : > { %v13439_v10 = vld [vmem:[#allocation2 + $0x1d10] sm:$0xf]  ;;  %v12928_v44 = vor.u32 %v15140_v31, %v12927_v30  ;;  %7061 = vmatpush.bf16.msrb.mxu1 %v12416_v41  ;;  %v14556_v30 = vld [vmem:[#allocation2 + $0x714] sm:$0xf]  ;;  %v11716_v31 = vor.u32 %v14828_v19, %v11713_v20 }
 0x1fa   : > { %v15268_v33 = vld [vmem:[#allocation2 + $0x1d4c] sm:$0xf0]  ;;  %v11649_v41 = vld [vmem:[#allocation2 + $0xf50] sm:$0xf0] }
 0x1fb   : > { %v11839_v45 = vld [vmem:[#allocation2 + $0x1090] sm:$0xf]  ;;  %v13440_v49 = vor.u32 %v15268_v33, %v13439_v10  ;;  %7074 = vmatpush.bf16.msrb.mxu2 %v12928_v44  ;;  %v10625_v10 = vld [vmem:[#allocation2 + $0x750] sm:$0xf0]  ;;  %v10116_v44 = vor.u32 %v14428_v28, %v10113_v29 }
 0x1fc   : > { %v14868_v46 = vld [vmem:[#allocation2 + $0x10cc] sm:$0xf0]  ;;  %v14684_v33 = vld [vmem:[#allocation2 + $0xb14] sm:$0xf] }
 0x1fd   : > { %v12351_v47 = vld [vmem:[#allocation2 + $0x1490] sm:$0xf]  ;;  %v11840_v56 = vor.u32 %v14868_v46, %v11839_v45  ;;  %7087 = vmatpush.bf16.msrb.mxu3 %v13440_v49  ;;  %v10628_v45 = vor.u32 %v14556_v30, %v10625_v10  ;;  %v11140_v46 = vor.u32 %v14684_v33, %v11137_v35  ;;  %v14540_v49 = vld [vmem:[#allocation2 + $0x694] sm:$0xf] }
 0x1fe   : > { %v14996_v43 = vld [vmem:[#allocation2 + $0x14cc] sm:$0xf0]  ;;  %v14380_v11 = vld [vmem:[#allocation2 + $0x194] sm:$0xf] }
 0x1ff   : > { %v12863_v16 = vld [vmem:[#allocation2 + $0x1890] sm:$0xf]  ;;  %v12352_v24 = vor.u32 %v14996_v43, %v12351_v47  ;;  %7049 = vmatpush.bf16.msrb.mxu0 %v11840_v56  ;;  %v6819_v47 = vadd.f32 %v15911_v27, %v6806_v4  ;;  %v11652_v43 = vor.u32 %v14812_v39, %v11649_v41  ;;  %v10052_v56 = vor.u32 %v14412_v48, %v10049_v42  ;;  %v9921_v12 = vld [vmem:[#allocation2 + $0x1d0] sm:$0xf0]  ;;  %v6870_v4 = vpop.f32.mrf.mxu2  ;;  %v6883_v41 = vpop.f32.mrf.mxu3 }
 0x200   : > { %v15124_v50 = vld [vmem:[#allocation2 + $0x18cc] sm:$0xf0]  ;;  %v10433_v57 = vld [vmem:[#allocation2 + $0x5d0] sm:$0xf0]  ;;  %v6846_v42 = vpop.f32.mrf.mxu0 }
 0x201   : > { %v13375_v51 = vld [vmem:[#allocation2 + $0x1c90] sm:$0xf]  ;;  %v12864_v60 = vor.u32 %v15124_v50, %v12863_v16  ;;  %7062 = vmatpush.bf16.msrb.mxu1 %v12352_v24  ;;  %v10561_v16 = vld [vmem:[#allocation2 + $0x6d0] sm:$0xf0] }
 0x202   : > { %v15252_v52 = vld [vmem:[#allocation2 + $0x1ccc] sm:$0xf0]  ;;  %v14668_v50 = vld [vmem:[#allocation2 + $0xa94] sm:$0xf]  ;;  %v10564_v27 = vor.u32 %v14540_v49, %v10561_v16 }
 0x203   : > { %v11775_v58 = vld [vmem:[#allocation2 + $0x1010] sm:$0xf]  ;;  %v13376_v0 = vor.u32 %v15252_v52, %v13375_v51  ;;  %7075 = vmatpush.bf16.msrb.mxu2 %v12864_v60  ;;  %v11073_v51 = vld [vmem:[#allocation2 + $0xad0] sm:$0xf0] }
 0x204   : > { %v14852_v59 = vld [vmem:[#allocation2 + $0x104c] sm:$0xf0]  ;;  %v14796_v52 = vld [vmem:[#allocation2 + $0xe94] sm:$0xf] }
 0x205   : > { %v12287_v53 = vld [vmem:[#allocation2 + $0x1410] sm:$0xf]  ;;  %v11776_v13 = vor.u32 %v14852_v59, %v11775_v58  ;;  %7088 = vmatpush.bf16.msrb.mxu3 %v13376_v0  ;;  %v11076_v58 = vor.u32 %v14668_v50, %v11073_v51  ;;  %v6832_v59 = vadd.f32 %v15913_v32, %v6819_v47  ;;  %v14396_v24 = vld [vmem:[#allocation2 + $0x214] sm:$0xf] }
 0x206   : > { %v14980_v61 = vld [vmem:[#allocation2 + $0x144c] sm:$0xf0]  ;;  %v9985_v60 = vld [vmem:[#allocation2 + $0x250] sm:$0xf0] }
 0x207   : > { %v12799_v62 = vld [vmem:[#allocation2 + $0x1810] sm:$0xf]  ;;  %v12288_v17 = vor.u32 %v14980_v61, %v12287_v53  ;;  %7050 = vmatpush.bf16.msrb.mxu0 %v11776_v13  ;;  %v14524_v53 = vld [vmem:[#allocation2 + $0x614] sm:$0xf]  ;;  %v11588_v61 = vor.u32 %v14796_v52, %v11585_v55  ;;  %v6845_v13 = vadd.f32 %v6844_v5, %v6832_v59  ;;  %v6859_v52 = vpop.f32.mrf.mxu1 }
 0x208   : > { %v15108_v1 = vld [vmem:[#allocation2 + $0x184c] sm:$0xf0]  ;;  %v11009_v0 = vld [vmem:[#allocation2 + $0xa50] sm:$0xf0] }
 0x209   : > { %v13311_v2 = vld [vmem:[#allocation2 + $0x1c10] sm:$0xf]  ;;  %v12800_v18 = vor.u32 %v15108_v1, %v12799_v62  ;;  %7063 = vmatpush.bf16.msrb.mxu1 %v12288_v17  ;;  %v10497_v62 = vld [vmem:[#allocation2 + $0x650] sm:$0xf0]  ;;  %v11012_v7 = vor.u32 %v14652_v63, %v11009_v0 }
 0x20a   : > { %v15236_v3 = vld [vmem:[#allocation2 + $0x1c4c] sm:$0xf0]  ;;  %7051 = vmatmul.bf16.vlgmr.msrb.gmra.mxu0 %v15837_v37  ;;  %v14780_v1 = vld [vmem:[#allocation2 + $0xe14] sm:$0xf]  ;;  %v10500_v6 = vor.u32 %v14524_v53, %v10497_v62 }
 0x20b   : > { %v13312_v21 = vor.u32 %v15236_v3, %v13311_v2  ;;  %7076 = vmatpush.bf16.msrb.mxu2 %v12800_v18  ;;  %7095 = vmatpush.bf16.msra.mxu0 %v10180_v22  ;;  %v11521_v2 = vld [vmem:[#allocation2 + $0xe50] sm:$0xf0]  ;;  %v9988_v3 = vor.u32 %v14396_v24, %v9985_v60  ;;  %v9924_v22 = vor.u32 %v14380_v11, %v9921_v12  ;;  %v6885_v12 = vpop.f32.mrf.mxu3 }
 0x20c   : > { %7064 = vmatmul.bf16.vlgmr.msrb.gmra.mxu1 %v15841_v40  ;;  %v14508_v32 = vld [vmem:[#allocation2 + $0x594] sm:$0xf]  ;;  %v11524_v14 = vor.u32 %v14780_v1, %v11521_v2 }
 0x20d   : > { %7089 = vmatpush.bf16.msrb.mxu3 %v13312_v21  ;;  %7108 = vmatpush.bf16.msra.mxu1 %v10692_v23  ;;  %v14636_v17 = vld [vmem:[#allocation2 + $0x994] sm:$0xf]  ;;  %v6858_v21 = vadd.f32 %v6857_v36, %v6845_v13  ;;  %v10436_v23 = vor.u32 %v14508_v32, %v10433_v57 }
 0x20e   : > { %7077 = vmatmul.bf16.vlgmr.msrb.gmra.mxu2 %v15835_v34  ;;  %v10945_v18 = vld [vmem:[#allocation2 + $0x9d0] sm:$0xf0] }
 0x20f   : > { %7121 = vmatpush.bf16.msra.mxu2 %v11204_v26  ;;  %7096 = vmatpush.bf16.msra.mxu0 %v10116_v44  ;;  %v14764_v19 = vld [vmem:[#allocation2 + $0xd94] sm:$0xf]  ;;  %v10948_v26 = vor.u32 %v14636_v17, %v10945_v18  ;;  %v6871_v39 = vadd.f32 %v6870_v4, %v6858_v21 }
 0x210   : > { %7090 = vmatmul.bf16.vlgmr.msrb.gmra.mxu3 %v15839_v38  ;;  %v11457_v20 = vld [vmem:[#allocation2 + $0xdd0] sm:$0xf0] }
 0x211   : > { %7134 = vmatpush.bf16.msra.mxu3 %v11716_v31  ;;  %7109 = vmatpush.bf16.msra.mxu1 %v10628_v45  ;;  %v14364_v28 = vld [vmem:[#allocation2 + $0x114] sm:$0xf]  ;;  %v11460_v31 = vor.u32 %v14764_v19, %v11457_v20  ;;  %v6884_v48 = vadd.f32 %v6883_v41, %v6871_v39 }
 0x212   : > { %v9857_v29 = vld [vmem:[#allocation2 + $0x150] sm:$0xf0] }
 0x213   : > { %7122 = vmatpush.bf16.msra.mxu2 %v11140_v46  ;;  %7097 = vmatpush.bf16.msra.mxu0 %v10052_v56  ;;  %v14492_v30 = vld [vmem:[#allocation2 + $0x514] sm:$0xf]  ;;  %v9860_v46 = vor.u32 %v14364_v28, %v9857_v29 }
 0x214   : > { %v10369_v10 = vld [vmem:[#allocation2 + $0x550] sm:$0xf0] }
 0x215   : > { %7135 = vmatpush.bf16.msra.mxu3 %v11652_v43  ;;  %7110 = vmatpush.bf16.msra.mxu1 %v10564_v27  ;;  %v14620_v33 = vld [vmem:[#allocation2 + $0x914] sm:$0xf]  ;;  %v10372_v49 = vor.u32 %v14492_v30, %v10369_v10 }
 0x216   : > { %v10881_v35 = vld [vmem:[#allocation2 + $0x950] sm:$0xf0] }
 0x217   : > { %7123 = vmatpush.bf16.msra.mxu2 %v11076_v58  ;;  %7098 = vmatpush.bf16.msra.mxu0 %v9988_v3  ;;  %v14748_v44 = vld [vmem:[#allocation2 + $0xd14] sm:$0xf]  ;;  %v10884_v43 = vor.u32 %v14620_v33, %v10881_v35  ;;  %v8241_v58 = vmax.f32 %v6884_v48, 0.0  ;;  %v6872_v3 = vpop.f32.mrf.mxu2 }
 0x218   : > { %v11393_v45 = vld [vmem:[#allocation2 + $0xd50] sm:$0xf0]  ;;  %v15931_v3 = vpop.f32.mrf.mxu0 }
 0x219   : > { %7136 = vmatpush.bf16.msra.mxu3 %v11588_v61  ;;  %7111 = vmatpush.bf16.msra.mxu1 %v10500_v6  ;;  %v14348_v47 = vld [vmem:[#allocation2 + $0x94] sm:$0xf]  ;;  %v11396_v55 = vor.u32 %v14748_v44, %v11393_v45  ;;  %8257 = vst [vmem:[%s15878_s18 + $0x10] sm:$0xff] %v8241_v58 }
 0x21a   : > { %v9793_v16 = vld [vmem:[#allocation2 + $0xd0] sm:$0xf0] }
 0x21b   : > { %7124 = vmatpush.bf16.msra.mxu2 %v11012_v7  ;;  %7099 = vmatpush.bf16.msra.mxu0 %v9924_v22  ;;  %v14476_v50 = vld [vmem:[#allocation2 + $0x494] sm:$0xf]  ;;  %v9796_v60 = vor.u32 %v14348_v47, %v9793_v16 }
 0x21c   : > { %v10305_v51 = vld [vmem:[#allocation2 + $0x4d0] sm:$0xf0] }
 0x21d   : > { %7137 = vmatpush.bf16.msra.mxu3 %v11524_v14  ;;  %7112 = vmatpush.bf16.msra.mxu1 %v10436_v23  ;;  %v14604_v56 = vld [vmem:[#allocation2 + $0x894] sm:$0xf]  ;;  %v10308_v62 = vor.u32 %v14476_v50, %v10305_v51 }
 0x21e   : > { %v10817_v27 = vld [vmem:[#allocation2 + $0x8d0] sm:$0xf0] }
 0x21f   : > { %7125 = vmatpush.bf16.msra.mxu2 %v10948_v26  ;;  %v14732_v59 = vld [vmem:[#allocation2 + $0xc94] sm:$0xf]  ;;  %7100 = vmatpush.bf16.msra.mxu0 %v9860_v46  ;;  %v10820_v63 = vor.u32 %v14604_v56, %v10817_v27 }
 0x220   : > { %v11329_v24 = vld [vmem:[#allocation2 + $0xcd0] sm:$0xf0] }
 0x221   : > { %7138 = vmatpush.bf16.msra.mxu3 %v11460_v31  ;;  %v14332_v53 = vld [vmem:[#allocation2 + $0x14] sm:$0xf]  ;;  %7113 = vmatpush.bf16.msra.mxu1 %v10372_v49  ;;  %v11332_v5 = vor.u32 %v14732_v59, %v11329_v24 }
 0x222   : > { %v9729_v61 = vld [vmem:[#allocation2 + $0x50] sm:$0xf0] }
 0x223   : > { %7126 = vmatpush.bf16.msra.mxu2 %v10884_v43  ;;  %v14460_v0 = vld [vmem:[#allocation2 + $0x414] sm:$0xf]  ;;  %7101 = vmatpush.bf16.msra.mxu0 %v9796_v60  ;;  %v9732_v14 = vor.u32 %v14332_v53, %v9729_v61 }
 0x224   : > { %v10241_v1 = vld [vmem:[#allocation2 + $0x450] sm:$0xf0] }
 0x225   : > { %v14588_v2 = vld [vmem:[#allocation2 + $0x814] sm:$0xf]  ;;  %7139 = vmatpush.bf16.msra.mxu3 %v11396_v55  ;;  %7114 = vmatpush.bf16.msra.mxu1 %v10308_v62  ;;  %v10244_v19 = vor.u32 %v14460_v0, %v10241_v1 }
 0x226   : > { %v10753_v6 = vld [vmem:[#allocation2 + $0x850] sm:$0xf0] }
 0x227   : > { %v14716_v7 = vld [vmem:[#allocation2 + $0xc14] sm:$0xf]  ;;  %7127 = vmatpush.bf16.msra.mxu2 %v10820_v63  ;;  %v10756_v20 = vor.u32 %v14588_v2, %v10753_v6  ;;  %7102 = vmatpush.bf16.msra.mxu0 %v9732_v14 }
 0x228   : > { %v11265_v11 = vld [vmem:[#allocation2 + $0xc50] sm:$0xf0] }
 0x229   : > { %v14956_v32 = vld [vmem:[#allocation2 + $0x1394] sm:$0xf]  ;;  %7140 = vmatpush.bf16.msra.mxu3 %v11332_v5  ;;  %v11268_v23 = vor.u32 %v14716_v7, %v11265_v11  ;;  %7115 = vmatpush.bf16.msra.mxu1 %v10244_v19 }
 0x22a   : > { %v12225_v13 = vld [vmem:[#allocation2 + $0x13d0] sm:$0xf0]  ;;  %7103 = vmatmul.bf16.vlgmr.msra.gmra.mxu0 %v15819_v9 }
 0x22b   : > { %v15084_v36 = vld [vmem:[#allocation2 + $0x1794] sm:$0xf]  ;;  %v12228_v26 = vor.u32 %v14956_v32, %v12225_v13  ;;  %7128 = vmatpush.bf16.msra.mxu2 %v10756_v20  ;;  %v15933_v32 = vpop.f32.mrf.mxu1 }
 0x22c   : > { %v12737_v57 = vld [vmem:[#allocation2 + $0x17d0] sm:$0xf0]  ;;  %7116 = vmatmul.bf16.vlgmr.msra.gmra.mxu1 %v15828_v25 }
 0x22d   : > { %v15212_v17 = vld [vmem:[#allocation2 + $0x1b94] sm:$0xf]  ;;  %v12740_v28 = vor.u32 %v15084_v36, %v12737_v57  ;;  %7141 = vmatpush.bf16.msra.mxu3 %v11268_v23  ;;  %7147 = vmatpush.bf16.msrb.mxu0 %v12228_v26 }
 0x22e   : > { %v13249_v18 = vld [vmem:[#allocation2 + $0x1bd0] sm:$0xf0]  ;;  %7129 = vmatmul.bf16.vlgmr.msra.gmra.mxu2 %v15817_v8 }
 0x22f   : > { %v15340_v21 = vld [vmem:[#allocation2 + $0x1f94] sm:$0xf]  ;;  %v13252_v29 = vor.u32 %v15212_v17, %v13249_v18  ;;  %7160 = vmatpush.bf16.msrb.mxu1 %v12740_v28  ;;  %v15935_v28 = vpop.f32.mrf.mxu2 }
 0x230   : > { %v13761_v22 = vld [vmem:[#allocation2 + $0x1fd0] sm:$0xf0]  ;;  %7142 = vmatmul.bf16.vlgmr.msra.gmra.mxu3 %v15822_v15 }
 0x231   : > { %v14940_v30 = vld [vmem:[#allocation2 + $0x1314] sm:$0xf]  ;;  %v13764_v10 = vor.u32 %v15340_v21, %v13761_v22  ;;  %7173 = vmatpush.bf16.msrb.mxu2 %v13252_v29 }
 0x232   : > { %v12161_v4 = vld [vmem:[#allocation2 + $0x1350] sm:$0xf0] }
 0x233   : > { %v15068_v31 = vld [vmem:[#allocation2 + $0x1714] sm:$0xf]  ;;  %v12164_v45 = vor.u32 %v14940_v30, %v12161_v4  ;;  %7186 = vmatpush.bf16.msrb.mxu3 %v13764_v10  ;;  %v15937_v10 = vpop.f32.mrf.mxu3 }
 0x234   : > { %v12673_v33 = vld [vmem:[#allocation2 + $0x1750] sm:$0xf0] }
 0x235   : > { %v15196_v35 = vld [vmem:[#allocation2 + $0x1b14] sm:$0xf]  ;;  %v12676_v46 = vor.u32 %v15068_v31, %v12673_v33  ;;  %7148 = vmatpush.bf16.msrb.mxu0 %v12164_v45 }
 0x236   : > { %v13185_v39 = vld [vmem:[#allocation2 + $0x1b50] sm:$0xf0] }
 0x237   : > { %v15324_v41 = vld [vmem:[#allocation2 + $0x1f14] sm:$0xf]  ;;  %v13188_v47 = vor.u32 %v15196_v35, %v13185_v39  ;;  %7161 = vmatpush.bf16.msrb.mxu1 %v12676_v46 }
 0x238   : > { %v13697_v44 = vld [vmem:[#allocation2 + $0x1f50] sm:$0xf0] }
 0x239   : > { %v14924_v48 = vld [vmem:[#allocation2 + $0x1294] sm:$0xf]  ;;  %v13700_v43 = vor.u32 %v15324_v41, %v13697_v44  ;;  %7174 = vmatpush.bf16.msrb.mxu2 %v13188_v47  ;;  %v6898_v41 = vpop.f32.mrf.mxu0 }
 0x23a   : > { %v12097_v42 = vld [vmem:[#allocation2 + $0x12d0] sm:$0xf0]  ;;  %v14821_v41 = vld [vmem:[#allocation2 + $0xf54] sm:$0xf0] }
 0x23b   : > { %v15052_v49 = vld [vmem:[#allocation2 + $0x1694] sm:$0xf]  ;;  %v12100_v56 = vor.u32 %v14924_v48, %v12097_v42  ;;  %7187 = vmatpush.bf16.msrb.mxu3 %v13700_v43  ;;  %v6911_v42 = vpop.f32.mrf.mxu1 }
 0x23c   : > { %v12609_v16 = vld [vmem:[#allocation2 + $0x16d0] sm:$0xf0]  ;;  %v10567_v42 = vld [vmem:[#allocation2 + $0x698] sm:$0xf] }
 0x23d   : > { %v15180_v50 = vld [vmem:[#allocation2 + $0x1a94] sm:$0xf]  ;;  %v12612_v27 = vor.u32 %v15052_v49, %v12609_v16  ;;  %7149 = vmatpush.bf16.msrb.mxu0 %v12100_v56 }
 0x23e   : > { %v13121_v51 = vld [vmem:[#allocation2 + $0x1ad0] sm:$0xf0] }
 0x23f   : > { %v15308_v52 = vld [vmem:[#allocation2 + $0x1e94] sm:$0xf]  ;;  %v13124_v58 = vor.u32 %v15180_v50, %v13121_v51  ;;  %7162 = vmatpush.bf16.msrb.mxu1 %v12612_v27 }
 0x240   : > { %v13633_v55 = vld [vmem:[#allocation2 + $0x1ed0] sm:$0xf0] }
 0x241   : > { %v14908_v59 = vld [vmem:[#allocation2 + $0x1214] sm:$0xf]  ;;  %v13636_v53 = vor.u32 %v15308_v52, %v13633_v55  ;;  %7175 = vmatpush.bf16.msrb.mxu2 %v13124_v58  ;;  %v1426_v55 = vperm.slane %v15915_v54, 3  ;;  %v14453_v54 = vld [vmem:[#allocation2 + $0x3d4] sm:$0xf0] }
 0x242   : > { %v12033_v24 = vld [vmem:[#allocation2 + $0x1250] sm:$0xf0] }
 0x243   : > { %v15036_v60 = vld [vmem:[#allocation2 + $0x1614] sm:$0xf]  ;;  %v12036_v2 = vor.u32 %v14908_v59, %v12033_v24  ;;  %7188 = vmatpush.bf16.msrb.mxu3 %v13636_v53 }
 0x244   : > { %v12545_v61 = vld [vmem:[#allocation2 + $0x1650] sm:$0xf0] }
 0x245   : > { %v15164_v62 = vld [vmem:[#allocation2 + $0x1a14] sm:$0xf]  ;;  %v12548_v5 = vor.u32 %v15036_v60, %v12545_v61  ;;  %7150 = vmatpush.bf16.msrb.mxu0 %v12036_v2 }
 0x246   : > { %v13057_v63 = vld [vmem:[#allocation2 + $0x1a50] sm:$0xf0] }
 0x247   : > { %v15292_v0 = vld [vmem:[#allocation2 + $0x1e14] sm:$0xf]  ;;  %v13060_v6 = vor.u32 %v15164_v62, %v13057_v63  ;;  %7163 = vmatpush.bf16.msrb.mxu1 %v12548_v5  ;;  %v6924_v62 = vpop.f32.mrf.mxu2  ;;  %v6937_v5 = vpop.f32.mrf.mxu3 }
 0x248   : > { %v13569_v1 = vld [vmem:[#allocation2 + $0x1e50] sm:$0xf0]  ;;  %v14661_v62 = vld [vmem:[#allocation2 + $0xa54] sm:$0xf0] }
 0x249   : > { %v14892_v7 = vld [vmem:[#allocation2 + $0x1194] sm:$0xf]  ;;  %v13572_v13 = vor.u32 %v15292_v0, %v13569_v1  ;;  %7176 = vmatpush.bf16.msrb.mxu2 %v13060_v6  ;;  %v10183_v6 = vld [vmem:[#allocation2 + $0x398] sm:$0xf] }
 0x24a   : > { %v11969_v11 = vld [vmem:[#allocation2 + $0x11d0] sm:$0xf0] }
 0x24b   : > { %v15020_v12 = vld [vmem:[#allocation2 + $0x1594] sm:$0xf]  ;;  %v11972_v19 = vor.u32 %v14892_v7, %v11969_v11  ;;  %7189 = vmatpush.bf16.msrb.mxu3 %v13572_v13  ;;  %v10695_v7 = vld [vmem:[#allocation2 + $0x798] sm:$0xf]  ;;  %v6897_v11 = vadd.f32 %v15931_v3, %v1426_v55 }
 0x24c   : > { %v12481_v36 = vld [vmem:[#allocation2 + $0x15d0] sm:$0xf0]  ;;  %v14581_v13 = vld [vmem:[#allocation2 + $0x7d4] sm:$0xf0] }
 0x24d   : > { %v15148_v14 = vld [vmem:[#allocation2 + $0x1994] sm:$0xf]  ;;  %v12484_v20 = vor.u32 %v15020_v12, %v12481_v36  ;;  %7151 = vmatpush.bf16.msrb.mxu0 %v11972_v19  ;;  %v11207_v36 = vld [vmem:[#allocation2 + $0xb98] sm:$0xf]  ;;  %v6910_v3 = vadd.f32 %v15933_v32, %v6897_v11 }
 0x24e   : > { %v12993_v57 = vld [vmem:[#allocation2 + $0x19d0] sm:$0xf0]  ;;  %v14837_v19 = vld [vmem:[#allocation2 + $0xfd4] sm:$0xf0] }
 0x24f   : > { %v15276_v17 = vld [vmem:[#allocation2 + $0x1d94] sm:$0xf]  ;;  %v12996_v21 = vor.u32 %v15148_v14, %v12993_v57  ;;  %7164 = vmatpush.bf16.msrb.mxu1 %v12484_v20  ;;  %v14709_v14 = vld [vmem:[#allocation2 + $0xbd4] sm:$0xf0] }
 0x250   : > { %v13505_v18 = vld [vmem:[#allocation2 + $0x1dd0] sm:$0xf0]  ;;  %v14421_v32 = vld [vmem:[#allocation2 + $0x2d4] sm:$0xf0] }
 0x251   : > { %v14876_v22 = vld [vmem:[#allocation2 + $0x1114] sm:$0xf]  ;;  %v13508_v29 = vor.u32 %v15276_v17, %v13505_v18  ;;  %7177 = vmatpush.bf16.msrb.mxu2 %v12996_v21  ;;  %v11719_v18 = vld [vmem:[#allocation2 + $0xf98] sm:$0xf]  ;;  %v10184_v21 = vor.u32 %v14453_v54, %v10183_v6 }
 0x252   : > { %v11905_v23 = vld [vmem:[#allocation2 + $0x1150] sm:$0xf0]  ;;  %v9927_v54 = vld [vmem:[#allocation2 + $0x198] sm:$0xf] }
 0x253   : > { %v15004_v26 = vld [vmem:[#allocation2 + $0x1514] sm:$0xf]  ;;  %v11908_v39 = vor.u32 %v14876_v22, %v11905_v23  ;;  %7190 = vmatpush.bf16.msrb.mxu3 %v13508_v29  ;;  %v10696_v22 = vor.u32 %v14581_v13, %v10695_v7  ;;  %v11208_v23 = vor.u32 %v14709_v14, %v11207_v36  ;;  %v14437_v29 = vld [vmem:[#allocation2 + $0x354] sm:$0xf0] }
 0x254   : > { %v12417_v30 = vld [vmem:[#allocation2 + $0x1550] sm:$0xf0]  ;;  %v14389_v7 = vld [vmem:[#allocation2 + $0x1d4] sm:$0xf0] }
 0x255   : > { %v15132_v4 = vld [vmem:[#allocation2 + $0x1914] sm:$0xf]  ;;  %v12420_v44 = vor.u32 %v15004_v26, %v12417_v30  ;;  %7152 = vmatpush.bf16.msrb.mxu0 %v11908_v39  ;;  %v10119_v26 = vld [vmem:[#allocation2 + $0x318] sm:$0xf] }
 0x256   : > { %v12929_v31 = vld [vmem:[#allocation2 + $0x1950] sm:$0xf0]  ;;  %v10631_v30 = vld [vmem:[#allocation2 + $0x718] sm:$0xf] }
 0x257   : > { %v15260_v33 = vld [vmem:[#allocation2 + $0x1d14] sm:$0xf]  ;;  %v12932_v45 = vor.u32 %v15132_v4, %v12929_v31  ;;  %7165 = vmatpush.bf16.msrb.mxu1 %v12420_v44  ;;  %v11720_v4 = vor.u32 %v14837_v19, %v11719_v18  ;;  %v14565_v31 = vld [vmem:[#allocation2 + $0x754] sm:$0xf0]  ;;  %v10120_v44 = vor.u32 %v14437_v29, %v10119_v26 }
 0x258   : > { %v13441_v35 = vld [vmem:[#allocation2 + $0x1d50] sm:$0xf0]  ;;  %v11655_v39 = vld [vmem:[#allocation2 + $0xf18] sm:$0xf] }
 0x259   : > { %v14860_v46 = vld [vmem:[#allocation2 + $0x1094] sm:$0xf]  ;;  %v13444_v49 = vor.u32 %v15260_v33, %v13441_v35  ;;  %7178 = vmatpush.bf16.msrb.mxu2 %v12932_v45  ;;  %v11143_v33 = vld [vmem:[#allocation2 + $0xb18] sm:$0xf]  ;;  %v10632_v45 = vor.u32 %v14565_v31, %v10631_v30  ;;  %v6974_v30 = vpop.f32.mrf.mxu2 }
 0x25a   : > { %v11841_v47 = vld [vmem:[#allocation2 + $0x10d0] sm:$0xf0]  ;;  %v14693_v35 = vld [vmem:[#allocation2 + $0xb54] sm:$0xf0] }
 0x25b   : > { %v14988_v48 = vld [vmem:[#allocation2 + $0x1494] sm:$0xf]  ;;  %v11844_v56 = vor.u32 %v14860_v46, %v11841_v47  ;;  %7191 = vmatpush.bf16.msrb.mxu3 %v13444_v49  ;;  %v11144_v46 = vor.u32 %v14693_v35, %v11143_v33  ;;  %v6923_v47 = vadd.f32 %v15935_v28, %v6910_v3  ;;  %v11656_v49 = vor.u32 %v14821_v41, %v11655_v39  ;;  %v14517_v36 = vld [vmem:[#allocation2 + $0x5d4] sm:$0xf0]  ;;  %v6987_v39 = vpop.f32.mrf.mxu3 }
 0x25c   : > { %v12353_v43 = vld [vmem:[#allocation2 + $0x14d0] sm:$0xf0]  ;;  %v10951_v14 = vld [vmem:[#allocation2 + $0x998] sm:$0xf] }
 0x25d   : > { %v15116_v16 = vld [vmem:[#allocation2 + $0x1894] sm:$0xf]  ;;  %v12356_v59 = vor.u32 %v14988_v48, %v12353_v43  ;;  %7153 = vmatpush.bf16.msrb.mxu0 %v11844_v56  ;;  %v10055_v48 = vld [vmem:[#allocation2 + $0x298] sm:$0xf] }
 0x25e   : > { %v12865_v50 = vld [vmem:[#allocation2 + $0x18d0] sm:$0xf0]  ;;  %v14549_v43 = vld [vmem:[#allocation2 + $0x6d4] sm:$0xf0]  ;;  %v10056_v55 = vor.u32 %v14421_v32, %v10055_v48 }
 0x25f   : > { %v15244_v51 = vld [vmem:[#allocation2 + $0x1c94] sm:$0xf]  ;;  %v12868_v24 = vor.u32 %v15116_v16, %v12865_v50  ;;  %7166 = vmatpush.bf16.msrb.mxu1 %v12356_v59  ;;  %v11079_v16 = vld [vmem:[#allocation2 + $0xa98] sm:$0xf]  ;;  %v10568_v28 = vor.u32 %v14549_v43, %v10567_v42 }
 0x260   : > { %v13377_v52 = vld [vmem:[#allocation2 + $0x1cd0] sm:$0xf0]  ;;  %v14677_v50 = vld [vmem:[#allocation2 + $0xad4] sm:$0xf0] }
 0x261   : > { %v14844_v27 = vld [vmem:[#allocation2 + $0x1014] sm:$0xf]  ;;  %v13380_v63 = vor.u32 %v15244_v51, %v13377_v52  ;;  %7179 = vmatpush.bf16.msrb.mxu2 %v12868_v24  ;;  %v11591_v51 = vld [vmem:[#allocation2 + $0xe98] sm:$0xf]  ;;  %v11080_v56 = vor.u32 %v14677_v50, %v11079_v16 }
 0x262   : > { %v11777_v58 = vld [vmem:[#allocation2 + $0x1050] sm:$0xf0]  ;;  %v14805_v52 = vld [vmem:[#allocation2 + $0xed4] sm:$0xf0] }
 0x263   : > { %v14972_v60 = vld [vmem:[#allocation2 + $0x1414] sm:$0xf]  ;;  %v11780_v12 = vor.u32 %v14844_v27, %v11777_v58  ;;  %7192 = vmatpush.bf16.msrb.mxu3 %v13380_v63  ;;  %v6936_v27 = vadd.f32 %v15937_v10, %v6923_v47  ;;  %v9991_v58 = vld [vmem:[#allocation2 + $0x218] sm:$0xf] }
 0x264   : > { %v12289_v53 = vld [vmem:[#allocation2 + $0x1450] sm:$0xf0]  ;;  %v14405_v59 = vld [vmem:[#allocation2 + $0x254] sm:$0xf0] }
 0x265   : > { %v15100_v61 = vld [vmem:[#allocation2 + $0x1814] sm:$0xf]  ;;  %v12292_v57 = vor.u32 %v14972_v60, %v12289_v53  ;;  %7154 = vmatpush.bf16.msrb.mxu0 %v11780_v12  ;;  %v10503_v24 = vld [vmem:[#allocation2 + $0x618] sm:$0xf]  ;;  %v11592_v60 = vor.u32 %v14805_v52, %v11591_v51  ;;  %v6961_v12 = vpop.f32.mrf.mxu1 }
 0x266   : > { %v12801_v0 = vld [vmem:[#allocation2 + $0x1850] sm:$0xf0]  ;;  %v14533_v53 = vld [vmem:[#allocation2 + $0x654] sm:$0xf0] }
 0x267   : > { %v15228_v1 = vld [vmem:[#allocation2 + $0x1c14] sm:$0xf]  ;;  %v12804_v17 = vor.u32 %v15100_v61, %v12801_v0  ;;  %7167 = vmatpush.bf16.msrb.mxu1 %v12292_v57  ;;  %v11015_v61 = vld [vmem:[#allocation2 + $0xa18] sm:$0xf]  ;;  %v10504_v5 = vor.u32 %v14533_v53, %v10503_v24 }
 0x268   : > { %v13313_v2 = vld [vmem:[#allocation2 + $0x1c50] sm:$0xf0]  ;;  %7155 = vmatmul.bf16.vlgmr.msrb.gmra.mxu0 %v15837_v37  ;;  %v11527_v63 = vld [vmem:[#allocation2 + $0xe18] sm:$0xf]  ;;  %v11016_v6 = vor.u32 %v14661_v62, %v11015_v61 }
 0x269   : > { %v13316_v20 = vor.u32 %v15228_v1, %v13313_v2  ;;  %7180 = vmatpush.bf16.msrb.mxu2 %v12804_v17  ;;  %7199 = vmatpush.bf16.msra.mxu0 %v10184_v21  ;;  %v14789_v0 = vld [vmem:[#allocation2 + $0xe54] sm:$0xf0]  ;;  %v9992_v1 = vor.u32 %v14405_v59, %v9991_v58  ;;  %v6948_v2 = vpop.f32.mrf.mxu0 }
 0x26a   : > { %7168 = vmatmul.bf16.vlgmr.msrb.gmra.mxu1 %v15841_v40  ;;  %v10439_v10 = vld [vmem:[#allocation2 + $0x598] sm:$0xf]  ;;  %v6949_v11 = vadd.f32 %v6948_v2, %v6936_v27  ;;  %v11528_v13 = vor.u32 %v14789_v0, %v11527_v63  ;;  %v6976_v0 = vpop.f32.mrf.mxu2 }
 0x26b   : > { %7193 = vmatpush.bf16.msrb.mxu3 %v13316_v20  ;;  %7212 = vmatpush.bf16.msra.mxu1 %v10696_v22  ;;  %v14645_v57 = vld [vmem:[#allocation2 + $0x9d4] sm:$0xf0]  ;;  %v9928_v20 = vor.u32 %v14389_v7, %v9927_v54  ;;  %v10440_v21 = vor.u32 %v14517_v36, %v10439_v10  ;;  %v6989_v54 = vpop.f32.mrf.mxu3 }
 0x26c   : > { %7181 = vmatmul.bf16.vlgmr.msrb.gmra.mxu2 %v15835_v34  ;;  %v11463_v17 = vld [vmem:[#allocation2 + $0xd98] sm:$0xf]  ;;  %v6962_v19 = vadd.f32 %v6961_v12, %v6949_v11  ;;  %v10952_v22 = vor.u32 %v14645_v57, %v10951_v14 }
 0x26d   : > { %7225 = vmatpush.bf16.msra.mxu2 %v11208_v23  ;;  %7200 = vmatpush.bf16.msra.mxu0 %v10120_v44  ;;  %v14773_v18 = vld [vmem:[#allocation2 + $0xdd4] sm:$0xf0]  ;;  %v6963_v50 = vpop.f32.mrf.mxu1 }
 0x26e   : > { %7194 = vmatmul.bf16.vlgmr.msrb.gmra.mxu3 %v15839_v38  ;;  %v9863_v23 = vld [vmem:[#allocation2 + $0x118] sm:$0xf]  ;;  %v11464_v3 = vor.u32 %v14773_v18, %v11463_v17  ;;  %v6975_v35 = vadd.f32 %v6974_v30, %v6962_v19 }
 0x26f   : > { %7238 = vmatpush.bf16.msra.mxu3 %v11720_v4  ;;  %7213 = vmatpush.bf16.msra.mxu1 %v10632_v45  ;;  %v14373_v26 = vld [vmem:[#allocation2 + $0x154] sm:$0xf0] }
 0x270   : > { %v10375_v29 = vld [vmem:[#allocation2 + $0x518] sm:$0xf]  ;;  %v9864_v45 = vor.u32 %v14373_v26, %v9863_v23  ;;  %v6988_v47 = vadd.f32 %v6987_v39, %v6975_v35 }
 0x271   : > { %7226 = vmatpush.bf16.msra.mxu2 %v11144_v46  ;;  %7201 = vmatpush.bf16.msra.mxu0 %v10056_v55  ;;  %v14501_v4 = vld [vmem:[#allocation2 + $0x554] sm:$0xf0]  ;;  %v6950_v48 = vpop.f32.mrf.mxu0 }
 0x272   : > { %v10887_v31 = vld [vmem:[#allocation2 + $0x918] sm:$0xf]  ;;  %v10376_v32 = vor.u32 %v14501_v4, %v10375_v29 }
 0x273   : > { %7239 = vmatpush.bf16.msra.mxu3 %v11656_v49  ;;  %7214 = vmatpush.bf16.msra.mxu1 %v10568_v28  ;;  %v14629_v33 = vld [vmem:[#allocation2 + $0x954] sm:$0xf0]  ;;  %v8242_v28 = vmax.f32 %v6988_v47, 0.0 }
 0x274   : > { %v11399_v41 = vld [vmem:[#allocation2 + $0xd18] sm:$0xf]  ;;  %v10888_v42 = vor.u32 %v14629_v33, %v10887_v31 }
 0x275   : > { %7227 = vmatpush.bf16.msra.mxu2 %v11080_v56  ;;  %7202 = vmatpush.bf16.msra.mxu0 %v9992_v1  ;;  %v14757_v44 = vld [vmem:[#allocation2 + $0xd54] sm:$0xf0]  ;;  %8258 = vst [vmem:[%s15878_s18 + $0x18] sm:$0xff] %v8242_v28  ;;  %v15955_v54 = vpop.f32.mrf.mxu1 }
 0x276   : > { %v9799_v46 = vld [vmem:[#allocation2 + $0x98] sm:$0xf]  ;;  %v11400_v51 = vor.u32 %v14757_v44, %v11399_v41 }
 0x277   : > { %7240 = vmatpush.bf16.msra.mxu3 %v11592_v60  ;;  %7215 = vmatpush.bf16.msra.mxu1 %v10504_v5  ;;  %v14357_v49 = vld [vmem:[#allocation2 + $0xd4] sm:$0xf0] }
 0x278   : > { %v10311_v43 = vld [vmem:[#allocation2 + $0x498] sm:$0xf]  ;;  %v9800_v58 = vor.u32 %v14357_v49, %v9799_v46 }
 0x279   : > { %7228 = vmatpush.bf16.msra.mxu2 %v11016_v6  ;;  %7203 = vmatpush.bf16.msra.mxu0 %v9928_v20  ;;  %v14485_v16 = vld [vmem:[#allocation2 + $0x4d4] sm:$0xf0] }
 0x27a   : > { %v10823_v52 = vld [vmem:[#allocation2 + $0x898] sm:$0xf]  ;;  %v10312_v60 = vor.u32 %v14485_v16, %v10311_v43 }
 0x27b   : > { %7241 = vmatpush.bf16.msra.mxu3 %v11528_v13  ;;  %7216 = vmatpush.bf16.msra.mxu1 %v10440_v21  ;;  %v14613_v55 = vld [vmem:[#allocation2 + $0x8d4] sm:$0xf0] }
 0x27c   : > { %v11335_v56 = vld [vmem:[#allocation2 + $0xc98] sm:$0xf]  ;;  %v10824_v53 = vor.u32 %v14613_v55, %v10823_v52 }
 0x27d   : > { %7229 = vmatpush.bf16.msra.mxu2 %v10952_v22  ;;  %v14741_v27 = vld [vmem:[#allocation2 + $0xcd4] sm:$0xf0]  ;;  %7204 = vmatpush.bf16.msra.mxu0 %v9864_v45 }
 0x27e   : > { %v9735_v59 = vld [vmem:[#allocation2 + $0x18] sm:$0xf]  ;;  %v11336_v1 = vor.u32 %v14741_v27, %v11335_v56 }
 0x27f   : > { %7242 = vmatpush.bf16.msra.mxu3 %v11464_v3  ;;  %v14341_v24 = vld [vmem:[#allocation2 + $0x54] sm:$0xf0]  ;;  %7217 = vmatpush.bf16.msra.mxu1 %v10376_v32 }
 0x280   : > { %v10247_v61 = vld [vmem:[#allocation2 + $0x418] sm:$0xf]  ;;  %v9736_v12 = vor.u32 %v14341_v24, %v9735_v59 }
 0x281   : > { %7230 = vmatpush.bf16.msra.mxu2 %v10888_v42  ;;  %v14469_v62 = vld [vmem:[#allocation2 + $0x454] sm:$0xf0]  ;;  %7205 = vmatpush.bf16.msra.mxu0 %v9800_v58 }
 0x282   : > { %v10759_v63 = vld [vmem:[#allocation2 + $0x818] sm:$0xf]  ;;  %v10248_v57 = vor.u32 %v14469_v62, %v10247_v61 }
 0x283   : > { %7243 = vmatpush.bf16.msra.mxu3 %v11400_v51  ;;  %v14597_v2 = vld [vmem:[#allocation2 + $0x854] sm:$0xf0]  ;;  %7218 = vmatpush.bf16.msra.mxu1 %v10312_v60 }
 0x284   : > { %v11271_v5 = vld [vmem:[#allocation2 + $0xc18] sm:$0xf]  ;;  %v10760_v17 = vor.u32 %v14597_v2, %v10759_v63  ;;  %v15953_v63 = vpop.f32.mrf.mxu0 }
 0x285   : > { %v14725_v6 = vld [vmem:[#allocation2 + $0xc54] sm:$0xf0]  ;;  %7231 = vmatpush.bf16.msra.mxu2 %v10824_v53  ;;  %7206 = vmatpush.bf16.msra.mxu0 %v9736_v12 }
 0x286   : > { %v12231_v7 = vld [vmem:[#allocation2 + $0x1398] sm:$0xf]  ;;  %v11272_v20 = vor.u32 %v14725_v6, %v11271_v5 }
 0x287   : > { %v14965_v10 = vld [vmem:[#allocation2 + $0x13d4] sm:$0xf0]  ;;  %7244 = vmatpush.bf16.msra.mxu3 %v11336_v1  ;;  %7219 = vmatpush.bf16.msra.mxu1 %v10248_v57 }
 0x288   : > { %v12743_v11 = vld [vmem:[#allocation2 + $0x1798] sm:$0xf]  ;;  %v12232_v21 = vor.u32 %v14965_v10, %v12231_v7  ;;  %7207 = vmatmul.bf16.vlgmr.msra.gmra.mxu0 %v15819_v9 }
 0x289   : > { %v15093_v13 = vld [vmem:[#allocation2 + $0x17d4] sm:$0xf0]  ;;  %7232 = vmatpush.bf16.msra.mxu2 %v10760_v17 }
 0x28a   : > { %v13255_v36 = vld [vmem:[#allocation2 + $0x1b98] sm:$0xf]  ;;  %v12744_v22 = vor.u32 %v15093_v13, %v12743_v11  ;;  %7251 = vmatpush.bf16.msrb.mxu0 %v12232_v21  ;;  %7220 = vmatmul.bf16.vlgmr.msra.gmra.mxu1 %v15828_v25  ;;  %v15957_v21 = vpop.f32.mrf.mxu2 }
 0x28b   : > { %v15221_v14 = vld [vmem:[#allocation2 + $0x1bd4] sm:$0xf0]  ;;  %7245 = vmatpush.bf16.msra.mxu3 %v11272_v20 }
 0x28c   : > { %v13767_v18 = vld [vmem:[#allocation2 + $0x1f98] sm:$0xf]  ;;  %v13256_v23 = vor.u32 %v15221_v14, %v13255_v36  ;;  %7264 = vmatpush.bf16.msrb.mxu1 %v12744_v22  ;;  %7233 = vmatmul.bf16.vlgmr.msra.gmra.mxu2 %v15817_v8 }
 0x28d   : > { %v15349_v19 = vld [vmem:[#allocation2 + $0x1fd4] sm:$0xf0] }
 0x28e   : > { %v12167_v26 = vld [vmem:[#allocation2 + $0x1318] sm:$0xf]  ;;  %v13768_v3 = vor.u32 %v15349_v19, %v13767_v18  ;;  %7277 = vmatpush.bf16.msrb.mxu2 %v13256_v23  ;;  %7246 = vmatmul.bf16.vlgmr.msra.gmra.mxu3 %v15822_v15 }
 0x28f   : > { %v14949_v29 = vld [vmem:[#allocation2 + $0x1354] sm:$0xf0] }
 0x290   : > { %v12679_v30 = vld [vmem:[#allocation2 + $0x1718] sm:$0xf]  ;;  %v12168_v41 = vor.u32 %v14949_v29, %v12167_v26  ;;  %7290 = vmatpush.bf16.msrb.mxu3 %v13768_v3 }
 0x291   : > { %v15077_v4 = vld [vmem:[#allocation2 + $0x1754] sm:$0xf0] }
 0x292   : > { %v13191_v31 = vld [vmem:[#allocation2 + $0x1b18] sm:$0xf]  ;;  %v12680_v44 = vor.u32 %v15077_v4, %v12679_v30  ;;  %7252 = vmatpush.bf16.msrb.mxu0 %v12168_v41  ;;  %v15959_v30 = vpop.f32.mrf.mxu3 }
 0x293   : > { %v15205_v33 = vld [vmem:[#allocation2 + $0x1b54] sm:$0xf0] }
 0x294   : > { %v13703_v35 = vld [vmem:[#allocation2 + $0x1f18] sm:$0xf]  ;;  %v13192_v45 = vor.u32 %v15205_v33, %v13191_v31  ;;  %7265 = vmatpush.bf16.msrb.mxu1 %v12680_v44  ;;  %v7002_v33 = vpop.f32.mrf.mxu0 }
 0x295   : > { %v15333_v39 = vld [vmem:[#allocation2 + $0x1f54] sm:$0xf0]  ;;  %v14813_v33 = vld [vmem:[#allocation2 + $0xf1c] sm:$0xf] }
 0x296   : > { %v12103_v46 = vld [vmem:[#allocation2 + $0x1298] sm:$0xf]  ;;  %v13704_v32 = vor.u32 %v15333_v39, %v13703_v35  ;;  %7278 = vmatpush.bf16.msrb.mxu2 %v13192_v45 }
 0x297   : > { %v14933_v47 = vld [vmem:[#allocation2 + $0x12d4] sm:$0xf0] }
 0x298   : > { %v12615_v48 = vld [vmem:[#allocation2 + $0x1698] sm:$0xf]  ;;  %v12104_v51 = vor.u32 %v14933_v47, %v12103_v46  ;;  %7291 = vmatpush.bf16.msrb.mxu3 %v13704_v32  ;;  %v7015_v46 = vpop.f32.mrf.mxu1 }
 0x299   : > { %v15061_v42 = vld [vmem:[#allocation2 + $0x16d4] sm:$0xf0]  ;;  %v14413_v46 = vld [vmem:[#allocation2 + $0x29c] sm:$0xf] }
 0x29a   : > { %v13127_v49 = vld [vmem:[#allocation2 + $0x1a98] sm:$0xf]  ;;  %v12616_v52 = vor.u32 %v15061_v42, %v12615_v48  ;;  %7253 = vmatpush.bf16.msrb.mxu0 %v12104_v51 }
 0x29b   : > { %v15189_v43 = vld [vmem:[#allocation2 + $0x1ad4] sm:$0xf0] }
 0x29c   : > { %v13639_v16 = vld [vmem:[#allocation2 + $0x1e98] sm:$0xf]  ;;  %v13128_v55 = vor.u32 %v15189_v43, %v13127_v49  ;;  %7266 = vmatpush.bf16.msrb.mxu1 %v12616_v52 }
 0x29d   : > { %v15317_v50 = vld [vmem:[#allocation2 + $0x1ed4] sm:$0xf0] }
 0x29e   : > { %v12039_v28 = vld [vmem:[#allocation2 + $0x1218] sm:$0xf]  ;;  %v13640_v58 = vor.u32 %v15317_v50, %v13639_v16  ;;  %7279 = vmatpush.bf16.msrb.mxu2 %v13128_v55  ;;  %v15961_v16 = vld [vmem:[#allocation4] sm:$0xff] }
 0x29f   : > { %v14917_v56 = vld [vmem:[#allocation2 + $0x1254] sm:$0xf0]  ;;  %v1427_v50 = vperm.slane %v15961_v16, 4 }
 0x2a0   : > { %v12551_v27 = vld [vmem:[#allocation2 + $0x1618] sm:$0xf]  ;;  %v12040_v62 = vor.u32 %v14917_v56, %v12039_v28  ;;  %7292 = vmatpush.bf16.msrb.mxu3 %v13640_v58 }
 0x2a1   : > { %v15045_v59 = vld [vmem:[#allocation2 + $0x1654] sm:$0xf0] }
 0x2a2   : > { %v13063_v24 = vld [vmem:[#allocation2 + $0x1a18] sm:$0xf]  ;;  %v12552_v0 = vor.u32 %v15045_v59, %v12551_v27  ;;  %7254 = vmatpush.bf16.msrb.mxu0 %v12040_v62 }
 0x2a3   : > { %v15173_v60 = vld [vmem:[#allocation2 + $0x1a54] sm:$0xf0] }
 0x2a4   : > { %v13575_v53 = vld [vmem:[#allocation2 + $0x1e18] sm:$0xf]  ;;  %v13064_v1 = vor.u32 %v15173_v60, %v13063_v24  ;;  %7267 = vmatpush.bf16.msrb.mxu1 %v12552_v0  ;;  %v7028_v24 = vpop.f32.mrf.mxu2  ;;  %v7041_v0 = vpop.f32.mrf.mxu3 }
 0x2a5   : > { %v15301_v61 = vld [vmem:[#allocation2 + $0x1e54] sm:$0xf0]  ;;  %v14653_v24 = vld [vmem:[#allocation2 + $0xa1c] sm:$0xf]  ;;  %v7052_v0 = vpop.f32.mrf.mxu0 }
 0x2a6   : > { %v11975_v2 = vld [vmem:[#allocation2 + $0x1198] sm:$0xf]  ;;  %v13576_v7 = vor.u32 %v15301_v61, %v13575_v53  ;;  %7280 = vmatpush.bf16.msrb.mxu2 %v13064_v1  ;;  %v14445_v1 = vld [vmem:[#allocation2 + $0x39c] sm:$0xf] }
 0x2a7   : > { %v14901_v5 = vld [vmem:[#allocation2 + $0x11d4] sm:$0xf0] }
 0x2a8   : > { %v12487_v6 = vld [vmem:[#allocation2 + $0x1598] sm:$0xf]  ;;  %v11976_v14 = vor.u32 %v14901_v5, %v11975_v2  ;;  %7293 = vmatpush.bf16.msrb.mxu3 %v13576_v7  ;;  %v10185_v2 = vld [vmem:[#allocation2 + $0x3d8] sm:$0xf0] }
 0x2a9   : > { %v15029_v10 = vld [vmem:[#allocation2 + $0x15d4] sm:$0xf0]  ;;  %v14573_v5 = vld [vmem:[#allocation2 + $0x79c] sm:$0xf] }
 0x2aa   : > { %v12999_v11 = vld [vmem:[#allocation2 + $0x1998] sm:$0xf]  ;;  %v12488_v57 = vor.u32 %v15029_v10, %v12487_v6  ;;  %7255 = vmatpush.bf16.msrb.mxu0 %v11976_v14  ;;  %v7001_v6 = vadd.f32 %v15953_v63, %v1427_v50  ;;  %v10697_v10 = vld [vmem:[#allocation2 + $0x7d8] sm:$0xf0] }
 0x2ab   : > { %v15157_v12 = vld [vmem:[#allocation2 + $0x19d4] sm:$0xf0]  ;;  %v14829_v14 = vld [vmem:[#allocation2 + $0xf9c] sm:$0xf] }
 0x2ac   : > { %v13511_v13 = vld [vmem:[#allocation2 + $0x1d98] sm:$0xf]  ;;  %v13000_v17 = vor.u32 %v15157_v12, %v12999_v11  ;;  %7268 = vmatpush.bf16.msrb.mxu1 %v12488_v57  ;;  %v14701_v11 = vld [vmem:[#allocation2 + $0xb9c] sm:$0xf]  ;;  %v7014_v63 = vadd.f32 %v15955_v54, %v7001_v6 }
 0x2ad   : > { %v15285_v36 = vld [vmem:[#allocation2 + $0x1dd4] sm:$0xf0]  ;;  %v11209_v12 = vld [vmem:[#allocation2 + $0xbd8] sm:$0xf0] }
 0x2ae   : > { %v11911_v18 = vld [vmem:[#allocation2 + $0x1118] sm:$0xf]  ;;  %v13512_v22 = vor.u32 %v15285_v36, %v13511_v13  ;;  %7281 = vmatpush.bf16.msrb.mxu2 %v13000_v17  ;;  %v11721_v57 = vld [vmem:[#allocation2 + $0xfd8] sm:$0xf0] }
 0x2af   : > { %v14885_v19 = vld [vmem:[#allocation2 + $0x1154] sm:$0xf0]  ;;  %v10057_v54 = vld [vmem:[#allocation2 + $0x2d8] sm:$0xf0] }
 0x2b0   : > { %v12423_v20 = vld [vmem:[#allocation2 + $0x1518] sm:$0xf]  ;;  %v11912_v31 = vor.u32 %v14885_v19, %v11911_v18  ;;  %7294 = vmatpush.bf16.msrb.mxu3 %v13512_v22  ;;  %v10188_v18 = vor.u32 %v14445_v1, %v10185_v2  ;;  %v10700_v19 = vor.u32 %v14573_v5, %v10697_v10  ;;  %v14429_v22 = vld [vmem:[#allocation2 + $0x31c] sm:$0xf]  ;;  %v7065_v10 = vpop.f32.mrf.mxu1 }
 0x2b1   : > { %v15013_v23 = vld [vmem:[#allocation2 + $0x1554] sm:$0xf0]  ;;  %v11593_v50 = vld [vmem:[#allocation2 + $0xed8] sm:$0xf0] }
 0x2b2   : > { %v12935_v26 = vld [vmem:[#allocation2 + $0x1918] sm:$0xf]  ;;  %v12424_v35 = vor.u32 %v15013_v23, %v12423_v20  ;;  %7256 = vmatpush.bf16.msrb.mxu0 %v11912_v31  ;;  %v11212_v20 = vor.u32 %v14701_v11, %v11209_v12  ;;  %v10121_v23 = vld [vmem:[#allocation2 + $0x358] sm:$0xf0] }
 0x2b3   : > { %v15141_v29 = vld [vmem:[#allocation2 + $0x1954] sm:$0xf0]  ;;  %v11145_v31 = vld [vmem:[#allocation2 + $0xb58] sm:$0xf0] }
 0x2b4   : > { %v13447_v3 = vld [vmem:[#allocation2 + $0x1d18] sm:$0xf]  ;;  %v12936_v39 = vor.u32 %v15141_v29, %v12935_v26  ;;  %7269 = vmatpush.bf16.msrb.mxu1 %v12424_v35  ;;  %v14557_v26 = vld [vmem:[#allocation2 + $0x71c] sm:$0xf]  ;;  %v11724_v29 = vor.u32 %v14829_v14, %v11721_v57 }
 0x2b5   : > { %v15269_v4 = vld [vmem:[#allocation2 + $0x1d54] sm:$0xf0]  ;;  %v11657_v35 = vld [vmem:[#allocation2 + $0xf58] sm:$0xf0] }
 0x2b6   : > { %v11847_v41 = vld [vmem:[#allocation2 + $0x1098] sm:$0xf]  ;;  %v13448_v47 = vor.u32 %v15269_v4, %v13447_v3  ;;  %7282 = vmatpush.bf16.msrb.mxu2 %v12936_v39  ;;  %v10633_v3 = vld [vmem:[#allocation2 + $0x758] sm:$0xf0]  ;;  %v10124_v39 = vor.u32 %v14429_v22, %v10121_v23 }
 0x2b7   : > { %v14869_v44 = vld [vmem:[#allocation2 + $0x10d4] sm:$0xf0]  ;;  %v14685_v4 = vld [vmem:[#allocation2 + $0xb1c] sm:$0xf] }
 0x2b8   : > { %v12359_v45 = vld [vmem:[#allocation2 + $0x1498] sm:$0xf]  ;;  %v11848_v51 = vor.u32 %v14869_v44, %v11847_v41  ;;  %7295 = vmatpush.bf16.msrb.mxu3 %v13448_v47  ;;  %v10636_v41 = vor.u32 %v14557_v26, %v10633_v3  ;;  %v11148_v44 = vor.u32 %v14685_v4, %v11145_v31  ;;  %v14541_v47 = vld [vmem:[#allocation2 + $0x69c] sm:$0xf] }
 0x2b9   : > { %v14997_v48 = vld [vmem:[#allocation2 + $0x14d4] sm:$0xf0]  ;;  %v14381_v5 = vld [vmem:[#allocation2 + $0x19c] sm:$0xf] }
 0x2ba   : > { %v12871_v32 = vld [vmem:[#allocation2 + $0x1898] sm:$0xf]  ;;  %v12360_v28 = vor.u32 %v14997_v48, %v12359_v45  ;;  %7257 = vmatpush.bf16.msrb.mxu0 %v11848_v51  ;;  %v7027_v45 = vadd.f32 %v15957_v21, %v7014_v63  ;;  %v11660_v48 = vor.u32 %v14813_v33, %v11657_v35  ;;  %v10060_v51 = vor.u32 %v14413_v46, %v10057_v54  ;;  %v9929_v6 = vld [vmem:[#allocation2 + $0x1d8] sm:$0xf0]  ;;  %v7078_v63 = vpop.f32.mrf.mxu2  ;;  %v7091_v35 = vpop.f32.mrf.mxu3 }
 0x2bb   : > { %v15125_v42 = vld [vmem:[#allocation2 + $0x18d4] sm:$0xf0]  ;;  %v10441_v12 = vld [vmem:[#allocation2 + $0x5d8] sm:$0xf0]  ;;  %v7054_v54 = vpop.f32.mrf.mxu0 }
 0x2bc   : > { %v13383_v49 = vld [vmem:[#allocation2 + $0x1c98] sm:$0xf]  ;;  %v12872_v56 = vor.u32 %v15125_v42, %v12871_v32  ;;  %7270 = vmatpush.bf16.msrb.mxu1 %v12360_v28  ;;  %v10569_v32 = vld [vmem:[#allocation2 + $0x6d8] sm:$0xf0] }
 0x2bd   : > { %v15253_v43 = vld [vmem:[#allocation2 + $0x1cd4] sm:$0xf0]  ;;  %v14669_v42 = vld [vmem:[#allocation2 + $0xa9c] sm:$0xf]  ;;  %v10572_v21 = vor.u32 %v14541_v47, %v10569_v32 }
 0x2be   : > { %v11783_v52 = vld [vmem:[#allocation2 + $0x1018] sm:$0xf]  ;;  %v13384_v60 = vor.u32 %v15253_v43, %v13383_v49  ;;  %7283 = vmatpush.bf16.msrb.mxu2 %v12872_v56  ;;  %v11081_v49 = vld [vmem:[#allocation2 + $0xad8] sm:$0xf0] }
 0x2bf   : > { %v14853_v55 = vld [vmem:[#allocation2 + $0x1054] sm:$0xf0]  ;;  %v14797_v43 = vld [vmem:[#allocation2 + $0xe9c] sm:$0xf] }
 0x2c0   : > { %v12295_v27 = vld [vmem:[#allocation2 + $0x1418] sm:$0xf]  ;;  %v11784_v7 = vor.u32 %v14853_v55, %v11783_v52  ;;  %7296 = vmatpush.bf16.msrb.mxu3 %v13384_v60  ;;  %v11084_v52 = vor.u32 %v14669_v42, %v11081_v49  ;;  %v7040_v55 = vadd.f32 %v15959_v30, %v7027_v45  ;;  %v14397_v28 = vld [vmem:[#allocation2 + $0x21c] sm:$0xf] }
 0x2c1   : > { %v14981_v58 = vld [vmem:[#allocation2 + $0x1454] sm:$0xf0]  ;;  %v9993_v56 = vld [vmem:[#allocation2 + $0x258] sm:$0xf0] }
 0x2c2   : > { %v12807_v59 = vld [vmem:[#allocation2 + $0x1818] sm:$0xf]  ;;  %v12296_v13 = vor.u32 %v14981_v58, %v12295_v27  ;;  %7258 = vmatpush.bf16.msrb.mxu0 %v11784_v7  ;;  %v14525_v27 = vld [vmem:[#allocation2 + $0x61c] sm:$0xf]  ;;  %v11596_v58 = vor.u32 %v14797_v43, %v11593_v50  ;;  %v7053_v7 = vadd.f32 %v7052_v0, %v7040_v55  ;;  %v7067_v43 = vpop.f32.mrf.mxu1 }
 0x2c3   : > { %v15109_v53 = vld [vmem:[#allocation2 + $0x1854] sm:$0xf0]  ;;  %v11017_v60 = vld [vmem:[#allocation2 + $0xa58] sm:$0xf0] }
 0x2c4   : > { %v13319_v61 = vld [vmem:[#allocation2 + $0x1c18] sm:$0xf]  ;;  %v12808_v36 = vor.u32 %v15109_v53, %v12807_v59  ;;  %7271 = vmatpush.bf16.msrb.mxu1 %v12296_v13  ;;  %v10505_v59 = vld [vmem:[#allocation2 + $0x658] sm:$0xf0]  ;;  %v11020_v2 = vor.u32 %v14653_v24, %v11017_v60 }
 0x2c5   : > { %v15237_v62 = vld [vmem:[#allocation2 + $0x1c54] sm:$0xf0]  ;;  %7259 = vmatmul.bf16.vlgmr.msrb.gmra.mxu0 %v15837_v37  ;;  %v14781_v53 = vld [vmem:[#allocation2 + $0xe1c] sm:$0xf]  ;;  %v10508_v1 = vor.u32 %v14525_v27, %v10505_v59 }
 0x2c6   : > { %v13320_v17 = vor.u32 %v15237_v62, %v13319_v61  ;;  %7284 = vmatpush.bf16.msrb.mxu2 %v12808_v36  ;;  %7303 = vmatpush.bf16.msra.mxu0 %v10188_v18  ;;  %v11529_v61 = vld [vmem:[#allocation2 + $0xe58] sm:$0xf0]  ;;  %v9996_v62 = vor.u32 %v14397_v28, %v9993_v56  ;;  %v9932_v18 = vor.u32 %v14381_v5, %v9929_v6  ;;  %v7093_v6 = vpop.f32.mrf.mxu3 }
 0x2c7   : > { %7272 = vmatmul.bf16.vlgmr.msrb.gmra.mxu1 %v15841_v40  ;;  %v14509_v30 = vld [vmem:[#allocation2 + $0x59c] sm:$0xf]  ;;  %v11532_v11 = vor.u32 %v14781_v53, %v11529_v61 }
 0x2c8   : > { %7297 = vmatpush.bf16.msrb.mxu3 %v13320_v17  ;;  %7316 = vmatpush.bf16.msra.mxu1 %v10700_v19  ;;  %v14637_v13 = vld [vmem:[#allocation2 + $0x99c] sm:$0xf]  ;;  %v7066_v17 = vadd.f32 %v7065_v10, %v7053_v7  ;;  %v10444_v19 = vor.u32 %v14509_v30, %v10441_v12 }
 0x2c9   : > { %7285 = vmatmul.bf16.vlgmr.msrb.gmra.mxu2 %v15835_v34  ;;  %v10953_v36 = vld [vmem:[#allocation2 + $0x9d8] sm:$0xf0] }
 0x2ca   : > { %7329 = vmatpush.bf16.msra.mxu2 %v11212_v20  ;;  %7304 = vmatpush.bf16.msra.mxu0 %v10124_v39  ;;  %v14765_v14 = vld [vmem:[#allocation2 + $0xd9c] sm:$0xf]  ;;  %v10956_v20 = vor.u32 %v14637_v13, %v10953_v36  ;;  %v7079_v33 = vadd.f32 %v7078_v63, %v7066_v17 }
 0x2cb   : > { %7298 = vmatmul.bf16.vlgmr.msrb.gmra.mxu3 %v15839_v38  ;;  %v11465_v57 = vld [vmem:[#allocation2 + $0xdd8] sm:$0xf0] }
 0x2cc   : > { %7342 = vmatpush.bf16.msra.mxu3 %v11724_v29  ;;  %7317 = vmatpush.bf16.msra.mxu1 %v10636_v41  ;;  %v14365_v22 = vld [vmem:[#allocation2 + $0x11c] sm:$0xf]  ;;  %v11468_v29 = vor.u32 %v14765_v14, %v11465_v57  ;;  %v7092_v46 = vadd.f32 %v7091_v35, %v7079_v33 }
 0x2cd   : > { %v9865_v23 = vld [vmem:[#allocation2 + $0x158] sm:$0xf0] }
 0x2ce   : > { %7330 = vmatpush.bf16.msra.mxu2 %v11148_v44  ;;  %7305 = vmatpush.bf16.msra.mxu0 %v10060_v51  ;;  %v14493_v26 = vld [vmem:[#allocation2 + $0x51c] sm:$0xf]  ;;  %v9868_v44 = vor.u32 %v14365_v22, %v9865_v23 }
 0x2cf   : > { %v10377_v3 = vld [vmem:[#allocation2 + $0x558] sm:$0xf0] }
 0x2d0   : > { %7343 = vmatpush.bf16.msra.mxu3 %v11660_v48  ;;  %7318 = vmatpush.bf16.msra.mxu1 %v10572_v21  ;;  %v14621_v4 = vld [vmem:[#allocation2 + $0x91c] sm:$0xf]  ;;  %v10380_v47 = vor.u32 %v14493_v26, %v10377_v3 }
 0x2d1   : > { %v10889_v31 = vld [vmem:[#allocation2 + $0x958] sm:$0xf0] }
 0x2d2   : > { %7331 = vmatpush.bf16.msra.mxu2 %v11084_v52  ;;  %7306 = vmatpush.bf16.msra.mxu0 %v9996_v62  ;;  %v14749_v39 = vld [vmem:[#allocation2 + $0xd1c] sm:$0xf]  ;;  %v10892_v48 = vor.u32 %v14621_v4, %v10889_v31  ;;  %v8243_v52 = vmax.f32 %v7092_v46, 0.0  ;;  %v7080_v62 = vpop.f32.mrf.mxu2 }
 0x2d3   : > { %v11401_v41 = vld [vmem:[#allocation2 + $0xd58] sm:$0xf0]  ;;  %v15977_v62 = vpop.f32.mrf.mxu0 }
 0x2d4   : > { %7344 = vmatpush.bf16.msra.mxu3 %v11596_v58  ;;  %7319 = vmatpush.bf16.msra.mxu1 %v10508_v1  ;;  %v14349_v45 = vld [vmem:[#allocation2 + $0x9c] sm:$0xf]  ;;  %v11404_v50 = vor.u32 %v14749_v39, %v11401_v41  ;;  %8259 = vst [vmem:[%s15878_s18 + $0x20] sm:$0xff] %v8243_v52 }
 0x2d5   : > { %v9801_v32 = vld [vmem:[#allocation2 + $0xd8] sm:$0xf0] }
 0x2d6   : > { %7332 = vmatpush.bf16.msra.mxu2 %v11020_v2  ;;  %7307 = vmatpush.bf16.msra.mxu0 %v9932_v18  ;;  %v14477_v42 = vld [vmem:[#allocation2 + $0x49c] sm:$0xf]  ;;  %v9804_v56 = vor.u32 %v14349_v45, %v9801_v32 }
 0x2d7   : > { %v10313_v49 = vld [vmem:[#allocation2 + $0x4d8] sm:$0xf0] }
 0x2d8   : > { %7345 = vmatpush.bf16.msra.mxu3 %v11532_v11  ;;  %7320 = vmatpush.bf16.msra.mxu1 %v10444_v19  ;;  %v14605_v51 = vld [vmem:[#allocation2 + $0x89c] sm:$0xf]  ;;  %v10316_v59 = vor.u32 %v14477_v42, %v10313_v49 }
 0x2d9   : > { %v10825_v21 = vld [vmem:[#allocation2 + $0x8d8] sm:$0xf0] }
 0x2da   : > { %7333 = vmatpush.bf16.msra.mxu2 %v10956_v20  ;;  %v14733_v55 = vld [vmem:[#allocation2 + $0xc9c] sm:$0xf]  ;;  %7308 = vmatpush.bf16.msra.mxu0 %v9868_v44  ;;  %v10828_v24 = vor.u32 %v14605_v51, %v10825_v21 }
 0x2db   : > { %v11337_v28 = vld [vmem:[#allocation2 + $0xcd8] sm:$0xf0] }
 0x2dc   : > { %7346 = vmatpush.bf16.msra.mxu3 %v11468_v29  ;;  %v14333_v27 = vld [vmem:[#allocation2 + $0x1c] sm:$0xf]  ;;  %7321 = vmatpush.bf16.msra.mxu1 %v10380_v47  ;;  %v11340_v0 = vor.u32 %v14733_v55, %v11337_v28 }
 0x2dd   : > { %v9737_v58 = vld [vmem:[#allocation2 + $0x58] sm:$0xf0] }
 0x2de   : > { %7334 = vmatpush.bf16.msra.mxu2 %v10892_v48  ;;  %v14461_v60 = vld [vmem:[#allocation2 + $0x41c] sm:$0xf]  ;;  %7309 = vmatpush.bf16.msra.mxu0 %v9804_v56  ;;  %v9740_v11 = vor.u32 %v14333_v27, %v9737_v58 }
 0x2df   : > { %v10249_v53 = vld [vmem:[#allocation2 + $0x458] sm:$0xf0] }
 0x2e0   : > { %v14589_v61 = vld [vmem:[#allocation2 + $0x81c] sm:$0xf]  ;;  %7347 = vmatpush.bf16.msra.mxu3 %v11404_v50  ;;  %7322 = vmatpush.bf16.msra.mxu1 %v10316_v59  ;;  %v10252_v14 = vor.u32 %v14461_v60, %v10249_v53 }
 0x2e1   : > { %v10761_v1 = vld [vmem:[#allocation2 + $0x858] sm:$0xf0] }
 0x2e2   : > { %v14717_v2 = vld [vmem:[#allocation2 + $0xc1c] sm:$0xf]  ;;  %7335 = vmatpush.bf16.msra.mxu2 %v10828_v24  ;;  %v10764_v57 = vor.u32 %v14589_v61, %v10761_v1  ;;  %7310 = vmatpush.bf16.msra.mxu0 %v9740_v11 }
 0x2e3   : > { %v11273_v5 = vld [vmem:[#allocation2 + $0xc58] sm:$0xf0] }
 0x2e4   : > { %v14957_v30 = vld [vmem:[#allocation2 + $0x139c] sm:$0xf]  ;;  %7348 = vmatpush.bf16.msra.mxu3 %v11340_v0  ;;  %v11276_v19 = vor.u32 %v14717_v2, %v11273_v5  ;;  %7323 = vmatpush.bf16.msra.mxu1 %v10252_v14 }
 0x2e5   : > { %v12233_v7 = vld [vmem:[#allocation2 + $0x13d8] sm:$0xf0]  ;;  %7311 = vmatmul.bf16.vlgmr.msra.gmra.mxu0 %v15819_v9 }
 0x2e6   : > { %v15085_v10 = vld [vmem:[#allocation2 + $0x179c] sm:$0xf]  ;;  %v12236_v20 = vor.u32 %v14957_v30, %v12233_v7  ;;  %7336 = vmatpush.bf16.msra.mxu2 %v10764_v57  ;;  %v15979_v30 = vpop.f32.mrf.mxu1 }
 0x2e7   : > { %v12745_v12 = vld [vmem:[#allocation2 + $0x17d8] sm:$0xf0]  ;;  %7324 = vmatmul.bf16.vlgmr.msra.gmra.mxu1 %v15828_v25 }
 0x2e8   : > { %v15213_v13 = vld [vmem:[#allocation2 + $0x1b9c] sm:$0xf]  ;;  %v12748_v22 = vor.u32 %v15085_v10, %v12745_v12  ;;  %7349 = vmatpush.bf16.msra.mxu3 %v11276_v19  ;;  %7355 = vmatpush.bf16.msrb.mxu0 %v12236_v20 }
 0x2e9   : > { %v13257_v36 = vld [vmem:[#allocation2 + $0x1bd8] sm:$0xf0]  ;;  %7337 = vmatmul.bf16.vlgmr.msra.gmra.mxu2 %v15817_v8 }
 0x2ea   : > { %v15341_v17 = vld [vmem:[#allocation2 + $0x1f9c] sm:$0xf]  ;;  %v13260_v23 = vor.u32 %v15213_v13, %v13257_v36  ;;  %7368 = vmatpush.bf16.msrb.mxu1 %v12748_v22  ;;  %v15981_v22 = vpop.f32.mrf.mxu2 }
 0x2eb   : > { %v13769_v18 = vld [vmem:[#allocation2 + $0x1fd8] sm:$0xf0]  ;;  %7350 = vmatmul.bf16.vlgmr.msra.gmra.mxu3 %v15822_v15 }
 0x2ec   : > { %v14941_v26 = vld [vmem:[#allocation2 + $0x131c] sm:$0xf]  ;;  %v13772_v3 = vor.u32 %v15341_v17, %v13769_v18  ;;  %7381 = vmatpush.bf16.msrb.mxu2 %v13260_v23 }
 0x2ed   : > { %v12169_v63 = vld [vmem:[#allocation2 + $0x1358] sm:$0xf0] }
 0x2ee   : > { %v15069_v29 = vld [vmem:[#allocation2 + $0x171c] sm:$0xf]  ;;  %v12172_v41 = vor.u32 %v14941_v26, %v12169_v63  ;;  %7394 = vmatpush.bf16.msrb.mxu3 %v13772_v3  ;;  %v15983_v3 = vpop.f32.mrf.mxu3 }
 0x2ef   : > { %v12681_v4 = vld [vmem:[#allocation2 + $0x1758] sm:$0xf0] }
 0x2f0   : > { %v15197_v31 = vld [vmem:[#allocation2 + $0x1b1c] sm:$0xf]  ;;  %v12684_v44 = vor.u32 %v15069_v29, %v12681_v4  ;;  %7356 = vmatpush.bf16.msrb.mxu0 %v12172_v41 }
 0x2f1   : > { %v13193_v33 = vld [vmem:[#allocation2 + $0x1b58] sm:$0xf0] }
 0x2f2   : > { %v15325_v35 = vld [vmem:[#allocation2 + $0x1f1c] sm:$0xf]  ;;  %v13196_v45 = vor.u32 %v15197_v31, %v13193_v33  ;;  %7369 = vmatpush.bf16.msrb.mxu1 %v12684_v44 }
 0x2f3   : > { %v13705_v39 = vld [vmem:[#allocation2 + $0x1f58] sm:$0xf0] }
 0x2f4   : > { %v14925_v46 = vld [vmem:[#allocation2 + $0x129c] sm:$0xf]  ;;  %v13708_v48 = vor.u32 %v15325_v35, %v13705_v39  ;;  %7382 = vmatpush.bf16.msrb.mxu2 %v13196_v45  ;;  %v7106_v35 = vpop.f32.mrf.mxu0 }
 0x2f5   : > { %v12105_v54 = vld [vmem:[#allocation2 + $0x12d8] sm:$0xf0]  ;;  %v14822_v35 = vld [vmem:[#allocation2 + $0xf5c] sm:$0xf0] }
 0x2f6   : > { %v15053_v47 = vld [vmem:[#allocation2 + $0x169c] sm:$0xf]  ;;  %v12108_v51 = vor.u32 %v14925_v46, %v12105_v54  ;;  %7395 = vmatpush.bf16.msrb.mxu3 %v13708_v48  ;;  %v7119_v54 = vpop.f32.mrf.mxu1 }
 0x2f7   : > { %v12617_v32 = vld [vmem:[#allocation2 + $0x16d8] sm:$0xf0]  ;;  %v10575_v54 = vld [vmem:[#allocation2 + $0x6a0] sm:$0xf] }
 0x2f8   : > { %v15181_v42 = vld [vmem:[#allocation2 + $0x1a9c] sm:$0xf]  ;;  %v12620_v21 = vor.u32 %v15053_v47, %v12617_v32  ;;  %7357 = vmatpush.bf16.msrb.mxu0 %v12108_v51 }
 0x2f9   : > { %v13129_v49 = vld [vmem:[#allocation2 + $0x1ad8] sm:$0xf0] }
 0x2fa   : > { %v15309_v43 = vld [vmem:[#allocation2 + $0x1e9c] sm:$0xf]  ;;  %v13132_v52 = vor.u32 %v15181_v42, %v13129_v49  ;;  %7370 = vmatpush.bf16.msrb.mxu1 %v12620_v21 }
 0x2fb   : > { %v13641_v50 = vld [vmem:[#allocation2 + $0x1ed8] sm:$0xf0] }
 0x2fc   : > { %v14909_v55 = vld [vmem:[#allocation2 + $0x121c] sm:$0xf]  ;;  %v13644_v27 = vor.u32 %v15309_v43, %v13641_v50  ;;  %7383 = vmatpush.bf16.msrb.mxu2 %v13132_v52  ;;  %v1428_v50 = vperm.slane %v15961_v16, 5  ;;  %v14454_v16 = vld [vmem:[#allocation2 + $0x3dc] sm:$0xf0] }
 0x2fd   : > { %v12041_v28 = vld [vmem:[#allocation2 + $0x1258] sm:$0xf0] }
 0x2fe   : > { %v15037_v56 = vld [vmem:[#allocation2 + $0x161c] sm:$0xf]  ;;  %v12044_v61 = vor.u32 %v14909_v55, %v12041_v28  ;;  %7396 = vmatpush.bf16.msrb.mxu3 %v13644_v27 }
 0x2ff   : > { %v12553_v58 = vld [vmem:[#allocation2 + $0x1658] sm:$0xf0] }
 0x300   : > { %v15165_v59 = vld [vmem:[#allocation2 + $0x1a1c] sm:$0xf]  ;;  %v12556_v0 = vor.u32 %v15037_v56, %v12553_v58  ;;  %7358 = vmatpush.bf16.msrb.mxu0 %v12044_v61 }
 0x301   : > { %v13065_v24 = vld [vmem:[#allocation2 + $0x1a58] sm:$0xf0] }
 0x302   : > { %v15293_v60 = vld [vmem:[#allocation2 + $0x1e1c] sm:$0xf]  ;;  %v13068_v1 = vor.u32 %v15165_v59, %v13065_v24  ;;  %7371 = vmatpush.bf16.msrb.mxu1 %v12556_v0  ;;  %v7132_v59 = vpop.f32.mrf.mxu2  ;;  %v7145_v0 = vpop.f32.mrf.mxu3 }
 0x303   : > { %v13577_v53 = vld [vmem:[#allocation2 + $0x1e58] sm:$0xf0]  ;;  %v14662_v59 = vld [vmem:[#allocation2 + $0xa5c] sm:$0xf0] }
 0x304   : > { %v14893_v2 = vld [vmem:[#allocation2 + $0x119c] sm:$0xf]  ;;  %v13580_v7 = vor.u32 %v15293_v60, %v13577_v53  ;;  %7384 = vmatpush.bf16.msrb.mxu2 %v13068_v1  ;;  %v10191_v1 = vld [vmem:[#allocation2 + $0x3a0] sm:$0xf] }
 0x305   : > { %v11977_v5 = vld [vmem:[#allocation2 + $0x11d8] sm:$0xf0] }
 0x306   : > { %v15021_v6 = vld [vmem:[#allocation2 + $0x159c] sm:$0xf]  ;;  %v11980_v14 = vor.u32 %v14893_v2, %v11977_v5  ;;  %7397 = vmatpush.bf16.msrb.mxu3 %v13580_v7  ;;  %v10703_v2 = vld [vmem:[#allocation2 + $0x7a0] sm:$0xf]  ;;  %v7105_v5 = vadd.f32 %v15977_v62, %v1428_v50 }
 0x307   : > { %v12489_v10 = vld [vmem:[#allocation2 + $0x15d8] sm:$0xf0]  ;;  %v14582_v7 = vld [vmem:[#allocation2 + $0x7dc] sm:$0xf0] }
 0x308   : > { %v15149_v11 = vld [vmem:[#allocation2 + $0x199c] sm:$0xf]  ;;  %v12492_v57 = vor.u32 %v15021_v6, %v12489_v10  ;;  %7359 = vmatpush.bf16.msrb.mxu0 %v11980_v14  ;;  %v11215_v10 = vld [vmem:[#allocation2 + $0xba0] sm:$0xf]  ;;  %v7118_v62 = vadd.f32 %v15979_v30, %v7105_v5 }
 0x309   : > { %v13001_v12 = vld [vmem:[#allocation2 + $0x19d8] sm:$0xf0]  ;;  %v14838_v14 = vld [vmem:[#allocation2 + $0xfdc] sm:$0xf0] }
 0x30a   : > { %v15277_v13 = vld [vmem:[#allocation2 + $0x1d9c] sm:$0xf]  ;;  %v13004_v17 = vor.u32 %v15149_v11, %v13001_v12  ;;  %7372 = vmatpush.bf16.msrb.mxu1 %v12492_v57  ;;  %v14710_v11 = vld [vmem:[#allocation2 + $0xbdc] sm:$0xf0] }
 0x30b   : > { %v13513_v36 = vld [vmem:[#allocation2 + $0x1dd8] sm:$0xf0]  ;;  %v14422_v30 = vld [vmem:[#allocation2 + $0x2dc] sm:$0xf0] }
 0x30c   : > { %v14877_v18 = vld [vmem:[#allocation2 + $0x111c] sm:$0xf]  ;;  %v13516_v23 = vor.u32 %v15277_v13, %v13513_v36  ;;  %7385 = vmatpush.bf16.msrb.mxu2 %v13004_v17  ;;  %v11727_v36 = vld [vmem:[#allocation2 + $0xfa0] sm:$0xf]  ;;  %v10192_v17 = vor.u32 %v14454_v16, %v10191_v1 }
 0x30d   : > { %v11913_v19 = vld [vmem:[#allocation2 + $0x1158] sm:$0xf0]  ;;  %v9935_v16 = vld [vmem:[#allocation2 + $0x1a0] sm:$0xf] }
 0x30e   : > { %v15005_v20 = vld [vmem:[#allocation2 + $0x151c] sm:$0xf]  ;;  %v11916_v33 = vor.u32 %v14877_v18, %v11913_v19  ;;  %7398 = vmatpush.bf16.msrb.mxu3 %v13516_v23  ;;  %v10704_v18 = vor.u32 %v14582_v7, %v10703_v2  ;;  %v11216_v19 = vor.u32 %v14710_v11, %v11215_v10  ;;  %v14438_v23 = vld [vmem:[#allocation2 + $0x35c] sm:$0xf0] }
 0x30f   : > { %v12425_v26 = vld [vmem:[#allocation2 + $0x1558] sm:$0xf0]  ;;  %v14390_v2 = vld [vmem:[#allocation2 + $0x1dc] sm:$0xf0] }
 0x310   : > { %v15133_v63 = vld [vmem:[#allocation2 + $0x191c] sm:$0xf]  ;;  %v12428_v39 = vor.u32 %v15005_v20, %v12425_v26  ;;  %7360 = vmatpush.bf16.msrb.mxu0 %v11916_v33  ;;  %v10127_v20 = vld [vmem:[#allocation2 + $0x320] sm:$0xf] }
 0x311   : > { %v12937_v29 = vld [vmem:[#allocation2 + $0x1958] sm:$0xf0]  ;;  %v10639_v26 = vld [vmem:[#allocation2 + $0x720] sm:$0xf] }
 0x312   : > { %v15261_v4 = vld [vmem:[#allocation2 + $0x1d1c] sm:$0xf]  ;;  %v12940_v41 = vor.u32 %v15133_v63, %v12937_v29  ;;  %7373 = vmatpush.bf16.msrb.mxu1 %v12428_v39  ;;  %v11728_v63 = vor.u32 %v14838_v14, %v11727_v36  ;;  %v14566_v29 = vld [vmem:[#allocation2 + $0x75c] sm:$0xf0]  ;;  %v10128_v39 = vor.u32 %v14438_v23, %v10127_v20 }
 0x313   : > { %v13449_v31 = vld [vmem:[#allocation2 + $0x1d58] sm:$0xf0]  ;;  %v11663_v33 = vld [vmem:[#allocation2 + $0xf20] sm:$0xf] }
 0x314   : > { %v14861_v44 = vld [vmem:[#allocation2 + $0x109c] sm:$0xf]  ;;  %v13452_v47 = vor.u32 %v15261_v4, %v13449_v31  ;;  %7386 = vmatpush.bf16.msrb.mxu2 %v12940_v41  ;;  %v11151_v4 = vld [vmem:[#allocation2 + $0xb20] sm:$0xf]  ;;  %v10640_v41 = vor.u32 %v14566_v29, %v10639_v26  ;;  %v7182_v26 = vpop.f32.mrf.mxu2 }
 0x315   : > { %v11849_v45 = vld [vmem:[#allocation2 + $0x10d8] sm:$0xf0]  ;;  %v14694_v31 = vld [vmem:[#allocation2 + $0xb5c] sm:$0xf0] }
 0x316   : > { %v14989_v46 = vld [vmem:[#allocation2 + $0x149c] sm:$0xf]  ;;  %v11852_v51 = vor.u32 %v14861_v44, %v11849_v45  ;;  %7399 = vmatpush.bf16.msrb.mxu3 %v13452_v47  ;;  %v11152_v44 = vor.u32 %v14694_v31, %v11151_v4  ;;  %v7131_v45 = vadd.f32 %v15981_v22, %v7118_v62  ;;  %v11664_v47 = vor.u32 %v14822_v35, %v11663_v33  ;;  %v14518_v10 = vld [vmem:[#allocation2 + $0x5dc] sm:$0xf0]  ;;  %v7195_v33 = vpop.f32.mrf.mxu3 }
 0x317   : > { %v12361_v48 = vld [vmem:[#allocation2 + $0x14d8] sm:$0xf0]  ;;  %v10959_v11 = vld [vmem:[#allocation2 + $0x9a0] sm:$0xf] }
 0x318   : > { %v15117_v32 = vld [vmem:[#allocation2 + $0x189c] sm:$0xf]  ;;  %v12364_v55 = vor.u32 %v14989_v46, %v12361_v48  ;;  %7361 = vmatpush.bf16.msrb.mxu0 %v11852_v51  ;;  %v10063_v46 = vld [vmem:[#allocation2 + $0x2a0] sm:$0xf] }
 0x319   : > { %v12873_v42 = vld [vmem:[#allocation2 + $0x18d8] sm:$0xf0]  ;;  %v14550_v48 = vld [vmem:[#allocation2 + $0x6dc] sm:$0xf0]  ;;  %v10064_v50 = vor.u32 %v14422_v30, %v10063_v46 }
 0x31a   : > { %v15245_v49 = vld [vmem:[#allocation2 + $0x1c9c] sm:$0xf]  ;;  %v12876_v28 = vor.u32 %v15117_v32, %v12873_v42  ;;  %7374 = vmatpush.bf16.msrb.mxu1 %v12364_v55  ;;  %v11087_v32 = vld [vmem:[#allocation2 + $0xaa0] sm:$0xf]  ;;  %v10576_v22 = vor.u32 %v14550_v48, %v10575_v54 }
 0x31b   : > { %v13385_v43 = vld [vmem:[#allocation2 + $0x1cd8] sm:$0xf0]  ;;  %v14678_v42 = vld [vmem:[#allocation2 + $0xadc] sm:$0xf0] }
 0x31c   : > { %v14845_v21 = vld [vmem:[#allocation2 + $0x101c] sm:$0xf]  ;;  %v13388_v24 = vor.u32 %v15245_v49, %v13385_v43  ;;  %7387 = vmatpush.bf16.msrb.mxu2 %v12876_v28  ;;  %v11599_v49 = vld [vmem:[#allocation2 + $0xea0] sm:$0xf]  ;;  %v11088_v51 = vor.u32 %v14678_v42, %v11087_v32 }
 0x31d   : > { %v11785_v52 = vld [vmem:[#allocation2 + $0x1058] sm:$0xf0]  ;;  %v14806_v43 = vld [vmem:[#allocation2 + $0xedc] sm:$0xf0] }
 0x31e   : > { %v14973_v56 = vld [vmem:[#allocation2 + $0x141c] sm:$0xf]  ;;  %v11788_v6 = vor.u32 %v14845_v21, %v11785_v52  ;;  %7400 = vmatpush.bf16.msrb.mxu3 %v13388_v24  ;;  %v7144_v21 = vadd.f32 %v15983_v3, %v7131_v45  ;;  %v9999_v52 = vld [vmem:[#allocation2 + $0x220] sm:$0xf] }
 0x31f   : > { %v12297_v27 = vld [vmem:[#allocation2 + $0x1458] sm:$0xf0]  ;;  %v14406_v55 = vld [vmem:[#allocation2 + $0x25c] sm:$0xf0] }
 0x320   : > { %v15101_v58 = vld [vmem:[#allocation2 + $0x181c] sm:$0xf]  ;;  %v12300_v12 = vor.u32 %v14973_v56, %v12297_v27  ;;  %7362 = vmatpush.bf16.msrb.mxu0 %v11788_v6  ;;  %v10511_v28 = vld [vmem:[#allocation2 + $0x620] sm:$0xf]  ;;  %v11600_v56 = vor.u32 %v14806_v43, %v11599_v49  ;;  %v7169_v6 = vpop.f32.mrf.mxu1 }
 0x321   : > { %v12809_v60 = vld [vmem:[#allocation2 + $0x1858] sm:$0xf0]  ;;  %v14534_v27 = vld [vmem:[#allocation2 + $0x65c] sm:$0xf0] }
 0x322   : > { %v15229_v53 = vld [vmem:[#allocation2 + $0x1c1c] sm:$0xf]  ;;  %v12812_v13 = vor.u32 %v15101_v58, %v12809_v60  ;;  %7375 = vmatpush.bf16.msrb.mxu1 %v12300_v12  ;;  %v11023_v58 = vld [vmem:[#allocation2 + $0xa20] sm:$0xf]  ;;  %v10512_v0 = vor.u32 %v14534_v27, %v10511_v28 }
 0x323   : > { %v13321_v61 = vld [vmem:[#allocation2 + $0x1c58] sm:$0xf0]  ;;  %7363 = vmatmul.bf16.vlgmr.msrb.gmra.mxu0 %v15837_v37  ;;  %v11535_v24 = vld [vmem:[#allocation2 + $0xe20] sm:$0xf]  ;;  %v11024_v1 = vor.u32 %v14662_v59, %v11023_v58 }
 0x324   : > { %v13324_v57 = vor.u32 %v15229_v53, %v13321_v61  ;;  %7388 = vmatpush.bf16.msrb.mxu2 %v12812_v13  ;;  %7407 = vmatpush.bf16.msra.mxu0 %v10192_v17  ;;  %v14790_v60 = vld [vmem:[#allocation2 + $0xe5c] sm:$0xf0]  ;;  %v10000_v53 = vor.u32 %v14406_v55, %v9999_v52  ;;  %v7156_v61 = vpop.f32.mrf.mxu0 }
 0x325   : > { %7376 = vmatmul.bf16.vlgmr.msrb.gmra.mxu1 %v15841_v40  ;;  %v10447_v3 = vld [vmem:[#allocation2 + $0x5a0] sm:$0xf]  ;;  %v7157_v5 = vadd.f32 %v7156_v61, %v7144_v21  ;;  %v11536_v7 = vor.u32 %v14790_v60, %v11535_v24  ;;  %v7184_v60 = vpop.f32.mrf.mxu2 }
 0x326   : > { %7401 = vmatpush.bf16.msrb.mxu3 %v13324_v57  ;;  %7420 = vmatpush.bf16.msra.mxu1 %v10704_v18  ;;  %v14646_v12 = vld [vmem:[#allocation2 + $0x9dc] sm:$0xf0]  ;;  %v9936_v57 = vor.u32 %v14390_v2, %v9935_v16  ;;  %v10448_v17 = vor.u32 %v14518_v10, %v10447_v3  ;;  %v7197_v16 = vpop.f32.mrf.mxu3 }
 0x327   : > { %7389 = vmatmul.bf16.vlgmr.msrb.gmra.mxu2 %v15835_v34  ;;  %v11471_v13 = vld [vmem:[#allocation2 + $0xda0] sm:$0xf]  ;;  %v7170_v14 = vadd.f32 %v7169_v6, %v7157_v5  ;;  %v10960_v18 = vor.u32 %v14646_v12, %v10959_v11 }
 0x328   : > { %7433 = vmatpush.bf16.msra.mxu2 %v11216_v19  ;;  %7408 = vmatpush.bf16.msra.mxu0 %v10128_v39  ;;  %v14774_v36 = vld [vmem:[#allocation2 + $0xddc] sm:$0xf0]  ;;  %v7171_v42 = vpop.f32.mrf.mxu1 }
 0x329   : > { %7402 = vmatmul.bf16.vlgmr.msrb.gmra.mxu3 %v15839_v38  ;;  %v9871_v19 = vld [vmem:[#allocation2 + $0x120] sm:$0xf]  ;;  %v11472_v62 = vor.u32 %v14774_v36, %v11471_v13  ;;  %v7183_v31 = vadd.f32 %v7182_v26, %v7170_v14 }
 0x32a   : > { %7446 = vmatpush.bf16.msra.mxu3 %v11728_v63  ;;  %7421 = vmatpush.bf16.msra.mxu1 %v10640_v41  ;;  %v14374_v20 = vld [vmem:[#allocation2 + $0x15c] sm:$0xf0] }
 0x32b   : > { %v10383_v23 = vld [vmem:[#allocation2 + $0x520] sm:$0xf]  ;;  %v9872_v41 = vor.u32 %v14374_v20, %v9871_v19  ;;  %v7196_v45 = vadd.f32 %v7195_v33, %v7183_v31 }
 0x32c   : > { %7434 = vmatpush.bf16.msra.mxu2 %v11152_v44  ;;  %7409 = vmatpush.bf16.msra.mxu0 %v10064_v50  ;;  %v14502_v63 = vld [vmem:[#allocation2 + $0x55c] sm:$0xf0]  ;;  %v7158_v46 = vpop.f32.mrf.mxu0 }
 0x32d   : > { %v10895_v29 = vld [vmem:[#allocation2 + $0x920] sm:$0xf]  ;;  %v10384_v30 = vor.u32 %v14502_v63, %v10383_v23 }
 0x32e   : > { %7447 = vmatpush.bf16.msra.mxu3 %v11664_v47  ;;  %7422 = vmatpush.bf16.msra.mxu1 %v10576_v22  ;;  %v14630_v4 = vld [vmem:[#allocation2 + $0x95c] sm:$0xf0]  ;;  %v8244_v22 = vmax.f32 %v7196_v45, 0.0 }
 0x32f   : > { %v11407_v35 = vld [vmem:[#allocation2 + $0xd20] sm:$0xf]  ;;  %v10896_v54 = vor.u32 %v14630_v4, %v10895_v29 }
 0x330   : > { %7435 = vmatpush.bf16.msra.mxu2 %v11088_v51  ;;  %7410 = vmatpush.bf16.msra.mxu0 %v10000_v53  ;;  %v14758_v39 = vld [vmem:[#allocation2 + $0xd5c] sm:$0xf0]  ;;  %8260 = vst [vmem:[%s15878_s18 + $0x28] sm:$0xff] %v8244_v22  ;;  %v16001_v16 = vpop.f32.mrf.mxu1 }
 0x331   : > { %v9807_v44 = vld [vmem:[#allocation2 + $0xa0] sm:$0xf]  ;;  %v11408_v49 = vor.u32 %v14758_v39, %v11407_v35 }
 0x332   : > { %7448 = vmatpush.bf16.msra.mxu3 %v11600_v56  ;;  %7423 = vmatpush.bf16.msra.mxu1 %v10512_v0  ;;  %v14358_v47 = vld [vmem:[#allocation2 + $0xdc] sm:$0xf0] }
 0x333   : > { %v10319_v48 = vld [vmem:[#allocation2 + $0x4a0] sm:$0xf]  ;;  %v9808_v52 = vor.u32 %v14358_v47, %v9807_v44 }
 0x334   : > { %7436 = vmatpush.bf16.msra.mxu2 %v11024_v1  ;;  %7411 = vmatpush.bf16.msra.mxu0 %v9936_v57  ;;  %v14486_v32 = vld [vmem:[#allocation2 + $0x4dc] sm:$0xf0] }
 0x335   : > { %v10831_v43 = vld [vmem:[#allocation2 + $0x8a0] sm:$0xf]  ;;  %v10320_v56 = vor.u32 %v14486_v32, %v10319_v48 }
 0x336   : > { %7449 = vmatpush.bf16.msra.mxu3 %v11536_v7  ;;  %7424 = vmatpush.bf16.msra.mxu1 %v10448_v17  ;;  %v14614_v50 = vld [vmem:[#allocation2 + $0x8dc] sm:$0xf0] }
 0x337   : > { %v11343_v51 = vld [vmem:[#allocation2 + $0xca0] sm:$0xf]  ;;  %v10832_v27 = vor.u32 %v14614_v50, %v10831_v43 }
 0x338   : > { %7437 = vmatpush.bf16.msra.mxu2 %v10960_v18  ;;  %v14742_v21 = vld [vmem:[#allocation2 + $0xcdc] sm:$0xf0]  ;;  %7412 = vmatpush.bf16.msra.mxu0 %v9872_v41 }
 0x339   : > { %v9743_v55 = vld [vmem:[#allocation2 + $0x20] sm:$0xf]  ;;  %v11344_v53 = vor.u32 %v14742_v21, %v11343_v51 }
 0x33a   : > { %7450 = vmatpush.bf16.msra.mxu3 %v11472_v62  ;;  %v14342_v28 = vld [vmem:[#allocation2 + $0x5c] sm:$0xf0]  ;;  %7425 = vmatpush.bf16.msra.mxu1 %v10384_v30 }
 0x33b   : > { %v10255_v58 = vld [vmem:[#allocation2 + $0x420] sm:$0xf]  ;;  %v9744_v6 = vor.u32 %v14342_v28, %v9743_v55 }
 0x33c   : > { %7438 = vmatpush.bf16.msra.mxu2 %v10896_v54  ;;  %v14470_v59 = vld [vmem:[#allocation2 + $0x45c] sm:$0xf0]  ;;  %7413 = vmatpush.bf16.msra.mxu0 %v9808_v52 }
 0x33d   : > { %v10767_v24 = vld [vmem:[#allocation2 + $0x820] sm:$0xf]  ;;  %v10256_v12 = vor.u32 %v14470_v59, %v10255_v58 }
 0x33e   : > { %7451 = vmatpush.bf16.msra.mxu3 %v11408_v49  ;;  %v14598_v61 = vld [vmem:[#allocation2 + $0x85c] sm:$0xf0]  ;;  %7426 = vmatpush.bf16.msra.mxu1 %v10320_v56 }
 0x33f   : > { %v11279_v0 = vld [vmem:[#allocation2 + $0xc20] sm:$0xf]  ;;  %v10768_v13 = vor.u32 %v14598_v61, %v10767_v24  ;;  %v15999_v24 = vpop.f32.mrf.mxu0 }
 0x340   : > { %v14726_v1 = vld [vmem:[#allocation2 + $0xc5c] sm:$0xf0]  ;;  %7439 = vmatpush.bf16.msra.mxu2 %v10832_v27  ;;  %7414 = vmatpush.bf16.msra.mxu0 %v9744_v6 }
 0x341   : > { %v12239_v2 = vld [vmem:[#allocation2 + $0x13a0] sm:$0xf]  ;;  %v11280_v57 = vor.u32 %v14726_v1, %v11279_v0 }
 0x342   : > { %v14966_v3 = vld [vmem:[#allocation2 + $0x13dc] sm:$0xf0]  ;;  %7452 = vmatpush.bf16.msra.mxu3 %v11344_v53  ;;  %7427 = vmatpush.bf16.msra.mxu1 %v10256_v12 }
 0x343   : > { %v12751_v5 = vld [vmem:[#allocation2 + $0x17a0] sm:$0xf]  ;;  %v12240_v17 = vor.u32 %v14966_v3, %v12239_v2  ;;  %7415 = vmatmul.bf16.vlgmr.msra.gmra.mxu0 %v15819_v9 }
 0x344   : > { %v15094_v7 = vld [vmem:[#allocation2 + $0x17dc] sm:$0xf0]  ;;  %7440 = vmatpush.bf16.msra.mxu2 %v10768_v13 }
 0x345   : > { %v13263_v10 = vld [vmem:[#allocation2 + $0x1ba0] sm:$0xf]  ;;  %v12752_v18 = vor.u32 %v15094_v7, %v12751_v5  ;;  %7459 = vmatpush.bf16.msrb.mxu0 %v12240_v17  ;;  %7428 = vmatmul.bf16.vlgmr.msra.gmra.mxu1 %v15828_v25  ;;  %v16003_v17 = vpop.f32.mrf.mxu2 }
 0x346   : > { %v15222_v11 = vld [vmem:[#allocation2 + $0x1bdc] sm:$0xf0]  ;;  %7453 = vmatpush.bf16.msra.mxu3 %v11280_v57 }
 0x347   : > { %v13775_v36 = vld [vmem:[#allocation2 + $0x1fa0] sm:$0xf]  ;;  %v13264_v19 = vor.u32 %v15222_v11, %v13263_v10  ;;  %7472 = vmatpush.bf16.msrb.mxu1 %v12752_v18  ;;  %7441 = vmatmul.bf16.vlgmr.msra.gmra.mxu2 %v15817_v8 }
 0x348   : > { %v15350_v14 = vld [vmem:[#allocation2 + $0x1fdc] sm:$0xf0] }
 0x349   : > { %v12175_v20 = vld [vmem:[#allocation2 + $0x1320] sm:$0xf]  ;;  %v13776_v62 = vor.u32 %v15350_v14, %v13775_v36  ;;  %7485 = vmatpush.bf16.msrb.mxu2 %v13264_v19  ;;  %7454 = vmatmul.bf16.vlgmr.msra.gmra.mxu3 %v15822_v15 }
 0x34a   : > { %v14950_v23 = vld [vmem:[#allocation2 + $0x135c] sm:$0xf0] }
 0x34b   : > { %v12687_v26 = vld [vmem:[#allocation2 + $0x1720] sm:$0xf]  ;;  %v12176_v35 = vor.u32 %v14950_v23, %v12175_v20  ;;  %7498 = vmatpush.bf16.msrb.mxu3 %v13776_v62 }
 0x34c   : > { %v15078_v63 = vld [vmem:[#allocation2 + $0x175c] sm:$0xf0] }
 0x34d   : > { %v13199_v29 = vld [vmem:[#allocation2 + $0x1b20] sm:$0xf]  ;;  %v12688_v39 = vor.u32 %v15078_v63, %v12687_v26  ;;  %7460 = vmatpush.bf16.msrb.mxu0 %v12176_v35  ;;  %v16005_v26 = vpop.f32.mrf.mxu3 }
 0x34e   : > { %v15206_v4 = vld [vmem:[#allocation2 + $0x1b5c] sm:$0xf0] }
 0x34f   : > { %v13711_v31 = vld [vmem:[#allocation2 + $0x1f20] sm:$0xf]  ;;  %v13200_v41 = vor.u32 %v15206_v4, %v13199_v29  ;;  %7473 = vmatpush.bf16.msrb.mxu1 %v12688_v39  ;;  %v7210_v4 = vpop.f32.mrf.mxu0 }
 0x350   : > { %v15334_v33 = vld [vmem:[#allocation2 + $0x1f5c] sm:$0xf0]  ;;  %v14814_v4 = vld [vmem:[#allocation2 + $0xf24] sm:$0xf] }
 0x351   : > { %v12111_v44 = vld [vmem:[#allocation2 + $0x12a0] sm:$0xf]  ;;  %v13712_v30 = vor.u32 %v15334_v33, %v13711_v31  ;;  %7486 = vmatpush.bf16.msrb.mxu2 %v13200_v41 }
 0x352   : > { %v14934_v45 = vld [vmem:[#allocation2 + $0x12dc] sm:$0xf0] }
 0x353   : > { %v12623_v46 = vld [vmem:[#allocation2 + $0x16a0] sm:$0xf]  ;;  %v12112_v49 = vor.u32 %v14934_v45, %v12111_v44  ;;  %7499 = vmatpush.bf16.msrb.mxu3 %v13712_v30  ;;  %v7223_v44 = vpop.f32.mrf.mxu1 }
 0x354   : > { %v15062_v54 = vld [vmem:[#allocation2 + $0x16dc] sm:$0xf0]  ;;  %v14414_v44 = vld [vmem:[#allocation2 + $0x2a4] sm:$0xf] }
 0x355   : > { %v13135_v47 = vld [vmem:[#allocation2 + $0x1aa0] sm:$0xf]  ;;  %v12624_v43 = vor.u32 %v15062_v54, %v12623_v46  ;;  %7461 = vmatpush.bf16.msrb.mxu0 %v12112_v49 }
 0x356   : > { %v15190_v48 = vld [vmem:[#allocation2 + $0x1adc] sm:$0xf0] }
 0x357   : > { %v13647_v32 = vld [vmem:[#allocation2 + $0x1ea0] sm:$0xf]  ;;  %v13136_v50 = vor.u32 %v15190_v48, %v13135_v47  ;;  %7474 = vmatpush.bf16.msrb.mxu1 %v12624_v43 }
 0x358   : > { %v15318_v42 = vld [vmem:[#allocation2 + $0x1edc] sm:$0xf0] }
 0x359   : > { %v12047_v22 = vld [vmem:[#allocation2 + $0x1220] sm:$0xf]  ;;  %v13648_v52 = vor.u32 %v15318_v42, %v13647_v32  ;;  %7487 = vmatpush.bf16.msrb.mxu2 %v13136_v50 }
 0x35a   : > { %v14918_v51 = vld [vmem:[#allocation2 + $0x125c] sm:$0xf0] }
 0x35b   : > { %v12559_v21 = vld [vmem:[#allocation2 + $0x1620] sm:$0xf]  ;;  %v12048_v59 = vor.u32 %v14918_v51, %v12047_v22  ;;  %7500 = vmatpush.bf16.msrb.mxu3 %v13648_v52 }
 0x35c   : > { %v15046_v55 = vld [vmem:[#allocation2 + $0x165c] sm:$0xf0] }
 0x35d   : > { %v13071_v28 = vld [vmem:[#allocation2 + $0x1a20] sm:$0xf]  ;;  %v12560_v60 = vor.u32 %v15046_v55, %v12559_v21  ;;  %7462 = vmatpush.bf16.msrb.mxu0 %v12048_v59 }
 0x35e   : > { %v15174_v56 = vld [vmem:[#allocation2 + $0x1a5c] sm:$0xf0] }
 0x35f   : > { %v13583_v27 = vld [vmem:[#allocation2 + $0x1e20] sm:$0xf]  ;;  %v13072_v53 = vor.u32 %v15174_v56, %v13071_v28  ;;  %7475 = vmatpush.bf16.msrb.mxu1 %v12560_v60  ;;  %v7236_v28 = vpop.f32.mrf.mxu2  ;;  %v7249_v60 = vpop.f32.mrf.mxu3 }
 0x360   : > { %v15302_v58 = vld [vmem:[#allocation2 + $0x1e5c] sm:$0xf0]  ;;  %v14654_v28 = vld [vmem:[#allocation2 + $0xa24] sm:$0xf]  ;;  %v7260_v60 = vpop.f32.mrf.mxu0 }
 0x361   : > { %v11983_v61 = vld [vmem:[#allocation2 + $0x11a0] sm:$0xf]  ;;  %v13584_v2 = vor.u32 %v15302_v58, %v13583_v27  ;;  %7488 = vmatpush.bf16.msrb.mxu2 %v13072_v53  ;;  %v14446_v53 = vld [vmem:[#allocation2 + $0x3a4] sm:$0xf] }
 0x362   : > { %v14902_v0 = vld [vmem:[#allocation2 + $0x11dc] sm:$0xf0] }
 0x363   : > { %v12495_v1 = vld [vmem:[#allocation2 + $0x15a0] sm:$0xf]  ;;  %v11984_v11 = vor.u32 %v14902_v0, %v11983_v61  ;;  %7501 = vmatpush.bf16.msrb.mxu3 %v13584_v2  ;;  %v10193_v61 = vld [vmem:[#allocation2 + $0x3e0] sm:$0xf0] }
 0x364   : > { %v15030_v3 = vld [vmem:[#allocation2 + $0x15dc] sm:$0xf0]  ;;  %v14574_v0 = vld [vmem:[#allocation2 + $0x7a4] sm:$0xf] }
 0x365   : > { %v13007_v5 = vld [vmem:[#allocation2 + $0x19a0] sm:$0xf]  ;;  %v12496_v12 = vor.u32 %v15030_v3, %v12495_v1  ;;  %7463 = vmatpush.bf16.msrb.mxu0 %v11984_v11  ;;  %v10705_v3 = vld [vmem:[#allocation2 + $0x7e0] sm:$0xf0] }
 0x366   : > { %v15158_v6 = vld [vmem:[#allocation2 + $0x19dc] sm:$0xf0]  ;;  %v14830_v11 = vld [vmem:[#allocation2 + $0xfa4] sm:$0xf] }
 0x367   : > { %v13519_v7 = vld [vmem:[#allocation2 + $0x1da0] sm:$0xf]  ;;  %v13008_v13 = vor.u32 %v15158_v6, %v13007_v5  ;;  %7476 = vmatpush.bf16.msrb.mxu1 %v12496_v12  ;;  %v14702_v5 = vld [vmem:[#allocation2 + $0xba4] sm:$0xf] }
 0x368   : > { %v15286_v10 = vld [vmem:[#allocation2 + $0x1ddc] sm:$0xf0]  ;;  %v11217_v6 = vld [vmem:[#allocation2 + $0xbe0] sm:$0xf0] }
 0x369   : > { %v11919_v36 = vld [vmem:[#allocation2 + $0x1120] sm:$0xf]  ;;  %v13520_v18 = vor.u32 %v15286_v10, %v13519_v7  ;;  %7489 = vmatpush.bf16.msrb.mxu2 %v13008_v13  ;;  %v11729_v12 = vld [vmem:[#allocation2 + $0xfe0] sm:$0xf0] }
 0x36a   : > { %v14886_v14 = vld [vmem:[#allocation2 + $0x115c] sm:$0xf0] }
 0x36b   : > { %v12431_v57 = vld [vmem:[#allocation2 + $0x1520] sm:$0xf]  ;;  %v11920_v29 = vor.u32 %v14886_v14, %v11919_v36  ;;  %7502 = vmatpush.bf16.msrb.mxu3 %v13520_v18  ;;  %v10196_v36 = vor.u32 %v14446_v53, %v10193_v61  ;;  %v10708_v14 = vor.u32 %v14574_v0, %v10705_v3  ;;  %v14430_v18 = vld [vmem:[#allocation2 + $0x324] sm:$0xf]  ;;  %v7273_v3 = vpop.f32.mrf.mxu1 }
 0x36c   : > { %v15014_v19 = vld [vmem:[#allocation2 + $0x155c] sm:$0xf0]  ;;  %v14382_v0 = vld [vmem:[#allocation2 + $0x1a4] sm:$0xf] }
 0x36d   : > { %v12943_v20 = vld [vmem:[#allocation2 + $0x1920] sm:$0xf]  ;;  %v12432_v31 = vor.u32 %v15014_v19, %v12431_v57  ;;  %7464 = vmatpush.bf16.msrb.mxu0 %v11920_v29  ;;  %v11220_v57 = vor.u32 %v14702_v5, %v11217_v6  ;;  %v10129_v19 = vld [vmem:[#allocation2 + $0x360] sm:$0xf0] }
 0x36e   : > { %v15142_v23 = vld [vmem:[#allocation2 + $0x195c] sm:$0xf0]  ;;  %v11153_v29 = vld [vmem:[#allocation2 + $0xb60] sm:$0xf0] }
 0x36f   : > { %v13455_v62 = vld [vmem:[#allocation2 + $0x1d20] sm:$0xf]  ;;  %v12944_v33 = vor.u32 %v15142_v23, %v12943_v20  ;;  %7477 = vmatpush.bf16.msrb.mxu1 %v12432_v31  ;;  %v14558_v20 = vld [vmem:[#allocation2 + $0x724] sm:$0xf]  ;;  %v11732_v23 = vor.u32 %v14830_v11, %v11729_v12 }
 0x370   : > { %v15270_v63 = vld [vmem:[#allocation2 + $0x1d5c] sm:$0xf0]  ;;  %v11665_v31 = vld [vmem:[#allocation2 + $0xf60] sm:$0xf0] }
 0x371   : > { %v11855_v35 = vld [vmem:[#allocation2 + $0x10a0] sm:$0xf]  ;;  %v13456_v45 = vor.u32 %v15270_v63, %v13455_v62  ;;  %7490 = vmatpush.bf16.msrb.mxu2 %v12944_v33  ;;  %v10641_v62 = vld [vmem:[#allocation2 + $0x760] sm:$0xf0]  ;;  %v10132_v33 = vor.u32 %v14430_v18, %v10129_v19 }
 0x372   : > { %v14870_v39 = vld [vmem:[#allocation2 + $0x10dc] sm:$0xf0]  ;;  %v14686_v63 = vld [vmem:[#allocation2 + $0xb24] sm:$0xf] }
 0x373   : > { %v12367_v41 = vld [vmem:[#allocation2 + $0x14a0] sm:$0xf]  ;;  %v11856_v49 = vor.u32 %v14870_v39, %v11855_v35  ;;  %7503 = vmatpush.bf16.msrb.mxu3 %v13456_v45  ;;  %v10644_v35 = vor.u32 %v14558_v20, %v10641_v62  ;;  %v11156_v39 = vor.u32 %v14686_v63, %v11153_v29  ;;  %v14542_v45 = vld [vmem:[#allocation2 + $0x6a4] sm:$0xf] }
 0x374   : > { %v14998_v46 = vld [vmem:[#allocation2 + $0x14dc] sm:$0xf0]  ;;  %v10449_v6 = vld [vmem:[#allocation2 + $0x5e0] sm:$0xf0] }
 0x375   : > { %v12879_v30 = vld [vmem:[#allocation2 + $0x18a0] sm:$0xf]  ;;  %v12368_v22 = vor.u32 %v14998_v46, %v12367_v41  ;;  %7465 = vmatpush.bf16.msrb.mxu0 %v11856_v49  ;;  %v11668_v46 = vor.u32 %v14814_v4, %v11665_v31  ;;  %v14766_v11 = vld [vmem:[#allocation2 + $0xda4] sm:$0xf]  ;;  %v7299_v31 = vpop.f32.mrf.mxu3 }
 0x376   : > { %v15126_v54 = vld [vmem:[#allocation2 + $0x18dc] sm:$0xf0]  ;;  %v11473_v12 = vld [vmem:[#allocation2 + $0xde0] sm:$0xf0] }
 0x377   : > { %v13391_v47 = vld [vmem:[#allocation2 + $0x1ca0] sm:$0xf]  ;;  %v12880_v51 = vor.u32 %v15126_v54, %v12879_v30  ;;  %7478 = vmatpush.bf16.msrb.mxu1 %v12368_v22  ;;  %v10577_v30 = vld [vmem:[#allocation2 + $0x6e0] sm:$0xf0] }
 0x378   : > { %v15254_v48 = vld [vmem:[#allocation2 + $0x1cdc] sm:$0xf0]  ;;  %v14670_v54 = vld [vmem:[#allocation2 + $0xaa4] sm:$0xf] }
 0x379   : > { %v16007_v32 = vld [vmem:[#allocation4] sm:$0xff]  ;;  %v13392_v56 = vor.u32 %v15254_v48, %v13391_v47  ;;  %7491 = vmatpush.bf16.msrb.mxu2 %v12880_v51 }
 0x37a   : > { %v1429_v42 = vperm.slane %v16007_v32, 6  ;;  %v11791_v43 = vld [vmem:[#allocation2 + $0x1020] sm:$0xf]  ;;  %v11089_v47 = vld [vmem:[#allocation2 + $0xae0] sm:$0xf0] }
 0x37b   : > { %v14854_v50 = vld [vmem:[#allocation2 + $0x105c] sm:$0xf0]  ;;  %7504 = vmatpush.bf16.msrb.mxu3 %v13392_v56  ;;  %v14798_v48 = vld [vmem:[#allocation2 + $0xea4] sm:$0xf] }
 0x37c   : > { %v12303_v21 = vld [vmem:[#allocation2 + $0x1420] sm:$0xf]  ;;  %v7209_v1 = vadd.f32 %v15999_v24, %v1429_v42  ;;  %v11792_v2 = vor.u32 %v14854_v50, %v11791_v43  ;;  %v11601_v42 = vld [vmem:[#allocation2 + $0xee0] sm:$0xf0]  ;;  %v11092_v43 = vor.u32 %v14670_v54, %v11089_v47 }
 0x37d   : > { %v14982_v52 = vld [vmem:[#allocation2 + $0x145c] sm:$0xf0]  ;;  %v14398_v22 = vld [vmem:[#allocation2 + $0x224] sm:$0xf] }
 0x37e   : > { %v12815_v55 = vld [vmem:[#allocation2 + $0x1820] sm:$0xf]  ;;  %v12304_v7 = vor.u32 %v14982_v52, %v12303_v21  ;;  %v7222_v24 = vadd.f32 %v16001_v16, %v7209_v1  ;;  %7466 = vmatpush.bf16.msrb.mxu0 %v11792_v2  ;;  %v10065_v16 = vld [vmem:[#allocation2 + $0x2e0] sm:$0xf0]  ;;  %v11604_v52 = vor.u32 %v14798_v48, %v11601_v42  ;;  %v7275_v48 = vpop.f32.mrf.mxu1 }
 0x37f   : > { %v15110_v27 = vld [vmem:[#allocation2 + $0x185c] sm:$0xf0]  ;;  %v10068_v49 = vor.u32 %v14414_v44, %v10065_v16  ;;  %v10001_v51 = vld [vmem:[#allocation2 + $0x260] sm:$0xf0]  ;;  %v7262_v16 = vpop.f32.mrf.mxu0 }
 0x380   : > { %v13327_v58 = vld [vmem:[#allocation2 + $0x1c20] sm:$0xf]  ;;  %v12816_v10 = vor.u32 %v15110_v27, %v12815_v55  ;;  %7479 = vmatpush.bf16.msrb.mxu1 %v12304_v7  ;;  %v7235_v41 = vadd.f32 %v16003_v17, %v7222_v24  ;;  %v10580_v17 = vor.u32 %v14542_v45, %v10577_v30  ;;  %v14526_v21 = vld [vmem:[#allocation2 + $0x624] sm:$0xf]  ;;  %v7286_v24 = vpop.f32.mrf.mxu2 }
 0x381   : > { %v15238_v59 = vld [vmem:[#allocation2 + $0x1c5c] sm:$0xf0]  ;;  %7467 = vmatmul.bf16.vlgmr.msrb.gmra.mxu0 %v15837_v37  ;;  %v10513_v55 = vld [vmem:[#allocation2 + $0x660] sm:$0xf0] }
 0x382   : > { %v13328_v13 = vor.u32 %v15238_v59, %v13327_v58  ;;  %7492 = vmatpush.bf16.msrb.mxu2 %v12816_v10  ;;  %7511 = vmatpush.bf16.msra.mxu0 %v10196_v36  ;;  %v7248_v50 = vadd.f32 %v16005_v26, %v7235_v41  ;;  %v11025_v56 = vld [vmem:[#allocation2 + $0xa60] sm:$0xf0]  ;;  %v10004_v59 = vor.u32 %v14398_v22, %v10001_v51 }
 0x383   : > { %7480 = vmatmul.bf16.vlgmr.msrb.gmra.mxu1 %v15841_v40  ;;  %v14782_v27 = vld [vmem:[#allocation2 + $0xe24] sm:$0xf]  ;;  %v10516_v53 = vor.u32 %v14526_v21, %v10513_v55  ;;  %v11028_v61 = vor.u32 %v14654_v28, %v11025_v56 }
 0x384   : > { %7505 = vmatpush.bf16.msrb.mxu3 %v13328_v13  ;;  %7524 = vmatpush.bf16.msra.mxu1 %v10708_v14  ;;  %v11537_v58 = vld [vmem:[#allocation2 + $0xe60] sm:$0xf0]  ;;  %v7261_v2 = vadd.f32 %v7260_v60, %v7248_v50 }
 0x385   : > { %7493 = vmatmul.bf16.vlgmr.msrb.gmra.mxu2 %v15835_v34  ;;  %v9937_v1 = vld [vmem:[#allocation2 + $0x1e0] sm:$0xf0]  ;;  %v11540_v5 = vor.u32 %v14782_v27, %v11537_v58 }
 0x386   : > { %7537 = vmatpush.bf16.msra.mxu2 %v11220_v57  ;;  %7512 = vmatpush.bf16.msra.mxu0 %v10132_v33  ;;  %v14510_v26 = vld [vmem:[#allocation2 + $0x5a4] sm:$0xf]  ;;  %v7274_v13 = vadd.f32 %v7273_v3, %v7261_v2  ;;  %v9940_v36 = vor.u32 %v14382_v0, %v9937_v1  ;;  %v7301_v1 = vpop.f32.mrf.mxu3 }
 0x387   : > { %7506 = vmatmul.bf16.vlgmr.msrb.gmra.mxu3 %v15839_v38  ;;  %v14638_v7 = vld [vmem:[#allocation2 + $0x9a4] sm:$0xf]  ;;  %v10452_v14 = vor.u32 %v14510_v26, %v10449_v6 }
 0x388   : > { %7550 = vmatpush.bf16.msra.mxu3 %v11732_v23  ;;  %7525 = vmatpush.bf16.msra.mxu1 %v10644_v35  ;;  %v10961_v10 = vld [vmem:[#allocation2 + $0x9e0] sm:$0xf0]  ;;  %v11476_v23 = vor.u32 %v14766_v11, %v11473_v12  ;;  %v7287_v4 = vadd.f32 %v7286_v24, %v7274_v13 }
 0x389   : > { %v10964_v57 = vor.u32 %v14638_v7, %v10961_v10  ;;  %v14366_v18 = vld [vmem:[#allocation2 + $0x124] sm:$0xf] }
 0x38a   : > { %7538 = vmatpush.bf16.msra.mxu2 %v11156_v39  ;;  %7513 = vmatpush.bf16.msra.mxu0 %v10068_v49  ;;  %v9873_v19 = vld [vmem:[#allocation2 + $0x160] sm:$0xf0]  ;;  %v7300_v44 = vadd.f32 %v7299_v31, %v7287_v4 }
 0x38b   : > { %v14494_v20 = vld [vmem:[#allocation2 + $0x524] sm:$0xf]  ;;  %v9876_v39 = vor.u32 %v14366_v18, %v9873_v19 }
 0x38c   : > { %7551 = vmatpush.bf16.msra.mxu3 %v11668_v46  ;;  %7526 = vmatpush.bf16.msra.mxu1 %v10580_v17  ;;  %v10385_v62 = vld [vmem:[#allocation2 + $0x560] sm:$0xf0] }
 0x38d   : > { %v14622_v63 = vld [vmem:[#allocation2 + $0x924] sm:$0xf]  ;;  %v10388_v45 = vor.u32 %v14494_v20, %v10385_v62 }
 0x38e   : > { %7539 = vmatpush.bf16.msra.mxu2 %v11092_v43  ;;  %7514 = vmatpush.bf16.msra.mxu0 %v10004_v59  ;;  %v10897_v29 = vld [vmem:[#allocation2 + $0x960] sm:$0xf0]  ;;  %v8245_v43 = vmax.f32 %v7300_v44, 0.0  ;;  %v7288_v59 = vpop.f32.mrf.mxu2 }
 0x38f   : > { %v14750_v33 = vld [vmem:[#allocation2 + $0xd24] sm:$0xf]  ;;  %v10900_v46 = vor.u32 %v14622_v63, %v10897_v29  ;;  %v16023_v59 = vpop.f32.mrf.mxu0 }
 0x390   : > { %7552 = vmatpush.bf16.msra.mxu3 %v11604_v52  ;;  %7527 = vmatpush.bf16.msra.mxu1 %v10516_v53  ;;  %v11409_v35 = vld [vmem:[#allocation2 + $0xd60] sm:$0xf0]  ;;  %8261 = vst [vmem:[%s15878_s18 + $0x30] sm:$0xff] %v8245_v43 }
 0x391   : > { %v14350_v41 = vld [vmem:[#allocation2 + $0xa4] sm:$0xf]  ;;  %v11412_v42 = vor.u32 %v14750_v33, %v11409_v35 }
 0x392   : > { %7540 = vmatpush.bf16.msra.mxu2 %v11028_v61  ;;  %7515 = vmatpush.bf16.msra.mxu0 %v9940_v36  ;;  %v9809_v30 = vld [vmem:[#allocation2 + $0xe0] sm:$0xf0] }
 0x393   : > { %v14478_v54 = vld [vmem:[#allocation2 + $0x4a4] sm:$0xf]  ;;  %v9812_v51 = vor.u32 %v14350_v41, %v9809_v30 }
 0x394   : > { %7553 = vmatpush.bf16.msra.mxu3 %v11540_v5  ;;  %7528 = vmatpush.bf16.msra.mxu1 %v10452_v14  ;;  %v10321_v47 = vld [vmem:[#allocation2 + $0x4e0] sm:$0xf0] }
 0x395   : > { %v14606_v49 = vld [vmem:[#allocation2 + $0x8a4] sm:$0xf]  ;;  %v10324_v55 = vor.u32 %v14478_v54, %v10321_v47 }
 0x396   : > { %7541 = vmatpush.bf16.msra.mxu2 %v10964_v57  ;;  %v10833_v17 = vld [vmem:[#allocation2 + $0x8e0] sm:$0xf0]  ;;  %7516 = vmatpush.bf16.msra.mxu0 %v9876_v39 }
 0x397   : > { %v14734_v50 = vld [vmem:[#allocation2 + $0xca4] sm:$0xf]  ;;  %v10836_v28 = vor.u32 %v14606_v49, %v10833_v17 }
 0x398   : > { %7554 = vmatpush.bf16.msra.mxu3 %v11476_v23  ;;  %v11345_v22 = vld [vmem:[#allocation2 + $0xce0] sm:$0xf0]  ;;  %7529 = vmatpush.bf16.msra.mxu1 %v10388_v45 }
 0x399   : > { %v14334_v21 = vld [vmem:[#allocation2 + $0x24] sm:$0xf]  ;;  %v11348_v60 = vor.u32 %v14734_v50, %v11345_v22 }
 0x39a   : > { %v9745_v52 = vld [vmem:[#allocation2 + $0x60] sm:$0xf0]  ;;  %7542 = vmatpush.bf16.msra.mxu2 %v10900_v46  ;;  %7517 = vmatpush.bf16.msra.mxu0 %v9812_v51 }
 0x39b   : > { %v14462_v56 = vld [vmem:[#allocation2 + $0x424] sm:$0xf]  ;;  %v9748_v5 = vor.u32 %v14334_v21, %v9745_v52 }
 0x39c   : > { %v10257_v27 = vld [vmem:[#allocation2 + $0x460] sm:$0xf0]  ;;  %7555 = vmatpush.bf16.msra.mxu3 %v11412_v42  ;;  %7530 = vmatpush.bf16.msra.mxu1 %v10324_v55 }
 0x39d   : > { %v14590_v58 = vld [vmem:[#allocation2 + $0x824] sm:$0xf]  ;;  %v10260_v11 = vor.u32 %v14462_v56, %v10257_v27 }
 0x39e   : > { %v10769_v53 = vld [vmem:[#allocation2 + $0x860] sm:$0xf0]  ;;  %7543 = vmatpush.bf16.msra.mxu2 %v10836_v28  ;;  %7518 = vmatpush.bf16.msra.mxu0 %v9748_v5 }
 0x39f   : > { %v14718_v61 = vld [vmem:[#allocation2 + $0xc24] sm:$0xf]  ;;  %v10772_v12 = vor.u32 %v14590_v58, %v10769_v53 }
 0x3a0   : > { %v11281_v0 = vld [vmem:[#allocation2 + $0xc60] sm:$0xf0]  ;;  %7556 = vmatpush.bf16.msra.mxu3 %v11348_v60  ;;  %7531 = vmatpush.bf16.msra.mxu1 %v10260_v11 }
 0x3a1   : > { %v14958_v26 = vld [vmem:[#allocation2 + $0x13a4] sm:$0xf]  ;;  %v11284_v14 = vor.u32 %v14718_v61, %v11281_v0  ;;  %7519 = vmatmul.bf16.vlgmr.msra.gmra.mxu0 %v15819_v9 }
 0x3a2   : > { %v12241_v2 = vld [vmem:[#allocation2 + $0x13e0] sm:$0xf0]  ;;  %7544 = vmatpush.bf16.msra.mxu2 %v10772_v12 }
 0x3a3   : > { %v15086_v3 = vld [vmem:[#allocation2 + $0x17a4] sm:$0xf]  ;;  %v12244_v57 = vor.u32 %v14958_v26, %v12241_v2  ;;  %7532 = vmatmul.bf16.vlgmr.msra.gmra.mxu1 %v15828_v25  ;;  %v16025_v26 = vpop.f32.mrf.mxu1 }
 0x3a4   : > { %v12753_v6 = vld [vmem:[#allocation2 + $0x17e0] sm:$0xf0]  ;;  %7557 = vmatpush.bf16.msra.mxu3 %v11284_v14 }
 0x3a5   : > { %v15214_v7 = vld [vmem:[#allocation2 + $0x1ba4] sm:$0xf]  ;;  %v12756_v18 = vor.u32 %v15086_v3, %v12753_v6  ;;  %7563 = vmatpush.bf16.msrb.mxu0 %v12244_v57  ;;  %7545 = vmatmul.bf16.vlgmr.msra.gmra.mxu2 %v15817_v8 }
 0x3a6   : > { %v13265_v10 = vld [vmem:[#allocation2 + $0x1be0] sm:$0xf0] }
 0x3a7   : > { %v15342_v13 = vld [vmem:[#allocation2 + $0x1fa4] sm:$0xf]  ;;  %v13268_v19 = vor.u32 %v15214_v7, %v13265_v10  ;;  %7576 = vmatpush.bf16.msrb.mxu1 %v12756_v18  ;;  %7558 = vmatmul.bf16.vlgmr.msra.gmra.mxu3 %v15822_v15  ;;  %v16027_v18 = vpop.f32.mrf.mxu2 }
 0x3a8   : > { %v13777_v36 = vld [vmem:[#allocation2 + $0x1fe0] sm:$0xf0] }
 0x3a9   : > { %v14942_v20 = vld [vmem:[#allocation2 + $0x1324] sm:$0xf]  ;;  %v13780_v62 = vor.u32 %v15342_v13, %v13777_v36  ;;  %7589 = vmatpush.bf16.msrb.mxu2 %v13268_v19 }
 0x3aa   : > { %v12177_v24 = vld [vmem:[#allocation2 + $0x1360] sm:$0xf0] }
 0x3ab   : > { %v15070_v23 = vld [vmem:[#allocation2 + $0x1724] sm:$0xf]  ;;  %v12180_v35 = vor.u32 %v14942_v20, %v12177_v24  ;;  %7602 = vmatpush.bf16.msrb.mxu3 %v13780_v62  ;;  %v16029_v62 = vpop.f32.mrf.mxu3 }
 0x3ac   : > { %v12689_v63 = vld [vmem:[#allocation2 + $0x1760] sm:$0xf0] }
 0x3ad   : > { %v15198_v29 = vld [vmem:[#allocation2 + $0x1b24] sm:$0xf]  ;;  %v12692_v39 = vor.u32 %v15070_v23, %v12689_v63  ;;  %7564 = vmatpush.bf16.msrb.mxu0 %v12180_v35 }
 0x3ae   : > { %v13201_v4 = vld [vmem:[#allocation2 + $0x1b60] sm:$0xf0] }
 0x3af   : > { %v15326_v31 = vld [vmem:[#allocation2 + $0x1f24] sm:$0xf]  ;;  %v13204_v41 = vor.u32 %v15198_v29, %v13201_v4  ;;  %7577 = vmatpush.bf16.msrb.mxu1 %v12692_v39 }
 0x3b0   : > { %v13713_v33 = vld [vmem:[#allocation2 + $0x1f60] sm:$0xf0] }
 0x3b1   : > { %v14926_v44 = vld [vmem:[#allocation2 + $0x12a4] sm:$0xf]  ;;  %v13716_v46 = vor.u32 %v15326_v31, %v13713_v33  ;;  %7590 = vmatpush.bf16.msrb.mxu2 %v13204_v41  ;;  %v7314_v31 = vpop.f32.mrf.mxu0 }
 0x3b2   : > { %v12113_v16 = vld [vmem:[#allocation2 + $0x12e0] sm:$0xf0]  ;;  %v14823_v31 = vld [vmem:[#allocation2 + $0xf64] sm:$0xf0] }
 0x3b3   : > { %v15054_v45 = vld [vmem:[#allocation2 + $0x16a4] sm:$0xf]  ;;  %v12116_v49 = vor.u32 %v14926_v44, %v12113_v16  ;;  %7603 = vmatpush.bf16.msrb.mxu3 %v13716_v46  ;;  %v7327_v16 = vpop.f32.mrf.mxu1 }
 0x3b4   : > { %v12625_v30 = vld [vmem:[#allocation2 + $0x16e0] sm:$0xf0]  ;;  %v10583_v16 = vld [vmem:[#allocation2 + $0x6a8] sm:$0xf] }
 0x3b5   : > { %v15182_v54 = vld [vmem:[#allocation2 + $0x1aa4] sm:$0xf]  ;;  %v12628_v17 = vor.u32 %v15054_v45, %v12625_v30  ;;  %7565 = vmatpush.bf16.msrb.mxu0 %v12116_v49 }
 0x3b6   : > { %v13137_v47 = vld [vmem:[#allocation2 + $0x1ae0] sm:$0xf0] }
 0x3b7   : > { %v15310_v48 = vld [vmem:[#allocation2 + $0x1ea4] sm:$0xf]  ;;  %v13140_v43 = vor.u32 %v15182_v54, %v13137_v47  ;;  %7578 = vmatpush.bf16.msrb.mxu1 %v12628_v17 }
 0x3b8   : > { %v13649_v42 = vld [vmem:[#allocation2 + $0x1ee0] sm:$0xf0] }
 0x3b9   : > { %v14910_v50 = vld [vmem:[#allocation2 + $0x1224] sm:$0xf]  ;;  %v13652_v21 = vor.u32 %v15310_v48, %v13649_v42  ;;  %7591 = vmatpush.bf16.msrb.mxu2 %v13140_v43  ;;  %v1430_v42 = vperm.slane %v16007_v32, 7  ;;  %v14455_v32 = vld [vmem:[#allocation2 + $0x3e4] sm:$0xf0] }
 0x3ba   : > { %v12049_v22 = vld [vmem:[#allocation2 + $0x1260] sm:$0xf0] }
 0x3bb   : > { %v15038_v51 = vld [vmem:[#allocation2 + $0x1624] sm:$0xf]  ;;  %v12052_v58 = vor.u32 %v14910_v50, %v12049_v22  ;;  %7604 = vmatpush.bf16.msrb.mxu3 %v13652_v21 }
 0x3bc   : > { %v12561_v52 = vld [vmem:[#allocation2 + $0x1660] sm:$0xf0] }
 0x3bd   : > { %v15166_v55 = vld [vmem:[#allocation2 + $0x1a24] sm:$0xf]  ;;  %v12564_v60 = vor.u32 %v15038_v51, %v12561_v52  ;;  %7566 = vmatpush.bf16.msrb.mxu0 %v12052_v58 }
 0x3be   : > { %v13073_v28 = vld [vmem:[#allocation2 + $0x1a60] sm:$0xf0] }
 0x3bf   : > { %v15294_v56 = vld [vmem:[#allocation2 + $0x1e24] sm:$0xf]  ;;  %v13076_v53 = vor.u32 %v15166_v55, %v13073_v28  ;;  %7579 = vmatpush.bf16.msrb.mxu1 %v12564_v60  ;;  %v7340_v55 = vpop.f32.mrf.mxu2  ;;  %v7353_v60 = vpop.f32.mrf.mxu3 }
 0x3c0   : > { %v13585_v27 = vld [vmem:[#allocation2 + $0x1e60] sm:$0xf0]  ;;  %v14663_v55 = vld [vmem:[#allocation2 + $0xa64] sm:$0xf0] }
 0x3c1   : > { %v14894_v61 = vld [vmem:[#allocation2 + $0x11a4] sm:$0xf]  ;;  %v13588_v2 = vor.u32 %v15294_v56, %v13585_v27  ;;  %7592 = vmatpush.bf16.msrb.mxu2 %v13076_v53  ;;  %v10199_v53 = vld [vmem:[#allocation2 + $0x3a8] sm:$0xf] }
 0x3c2   : > { %v11985_v0 = vld [vmem:[#allocation2 + $0x11e0] sm:$0xf0] }
 0x3c3   : > { %v15022_v1 = vld [vmem:[#allocation2 + $0x15a4] sm:$0xf]  ;;  %v11988_v11 = vor.u32 %v14894_v61, %v11985_v0  ;;  %7605 = vmatpush.bf16.msrb.mxu3 %v13588_v2  ;;  %v10711_v61 = vld [vmem:[#allocation2 + $0x7a8] sm:$0xf]  ;;  %v7313_v0 = vadd.f32 %v16023_v59, %v1430_v42 }
 0x3c4   : > { %v12497_v3 = vld [vmem:[#allocation2 + $0x15e0] sm:$0xf0]  ;;  %v14583_v2 = vld [vmem:[#allocation2 + $0x7e4] sm:$0xf0] }
 0x3c5   : > { %v15150_v5 = vld [vmem:[#allocation2 + $0x19a4] sm:$0xf]  ;;  %v12500_v12 = vor.u32 %v15022_v1, %v12497_v3  ;;  %7567 = vmatpush.bf16.msrb.mxu0 %v11988_v11  ;;  %v11223_v3 = vld [vmem:[#allocation2 + $0xba8] sm:$0xf]  ;;  %v7326_v59 = vadd.f32 %v16025_v26, %v7313_v0 }
 0x3c6   : > { %v13009_v6 = vld [vmem:[#allocation2 + $0x19e0] sm:$0xf0]  ;;  %v14839_v11 = vld [vmem:[#allocation2 + $0xfe4] sm:$0xf0] }
 0x3c7   : > { %v15278_v7 = vld [vmem:[#allocation2 + $0x1da4] sm:$0xf]  ;;  %v13012_v13 = vor.u32 %v15150_v5, %v13009_v6  ;;  %7580 = vmatpush.bf16.msrb.mxu1 %v12500_v12  ;;  %v14711_v5 = vld [vmem:[#allocation2 + $0xbe4] sm:$0xf0] }
 0x3c8   : > { %v13521_v10 = vld [vmem:[#allocation2 + $0x1de0] sm:$0xf0]  ;;  %v14423_v26 = vld [vmem:[#allocation2 + $0x2e4] sm:$0xf0] }
 0x3c9   : > { %v14878_v36 = vld [vmem:[#allocation2 + $0x1124] sm:$0xf]  ;;  %v13524_v19 = vor.u32 %v15278_v7, %v13521_v10  ;;  %7593 = vmatpush.bf16.msrb.mxu2 %v13012_v13  ;;  %v11735_v10 = vld [vmem:[#allocation2 + $0xfa8] sm:$0xf]  ;;  %v10200_v13 = vor.u32 %v14455_v32, %v10199_v53 }
 0x3ca   : > { %v11921_v14 = vld [vmem:[#allocation2 + $0x1160] sm:$0xf0]  ;;  %v9943_v32 = vld [vmem:[#allocation2 + $0x1a8] sm:$0xf] }
 0x3cb   : > { %v15006_v57 = vld [vmem:[#allocation2 + $0x1524] sm:$0xf]  ;;  %v11924_v4 = vor.u32 %v14878_v36, %v11921_v14  ;;  %7606 = vmatpush.bf16.msrb.mxu3 %v13524_v19  ;;  %v10712_v36 = vor.u32 %v14583_v2, %v10711_v61  ;;  %v11224_v14 = vor.u32 %v14711_v5, %v11223_v3  ;;  %v14439_v19 = vld [vmem:[#allocation2 + $0x364] sm:$0xf0] }
 0x3cc   : > { %v12433_v20 = vld [vmem:[#allocation2 + $0x1560] sm:$0xf0]  ;;  %v14391_v61 = vld [vmem:[#allocation2 + $0x1e4] sm:$0xf0] }
 0x3cd   : > { %v15134_v24 = vld [vmem:[#allocation2 + $0x1924] sm:$0xf]  ;;  %v12436_v33 = vor.u32 %v15006_v57, %v12433_v20  ;;  %7568 = vmatpush.bf16.msrb.mxu0 %v11924_v4  ;;  %v10135_v57 = vld [vmem:[#allocation2 + $0x328] sm:$0xf] }
 0x3ce   : > { %v12945_v23 = vld [vmem:[#allocation2 + $0x1960] sm:$0xf0]  ;;  %v10647_v20 = vld [vmem:[#allocation2 + $0x728] sm:$0xf] }
 0x3cf   : > { %v15262_v63 = vld [vmem:[#allocation2 + $0x1d24] sm:$0xf]  ;;  %v12948_v35 = vor.u32 %v15134_v24, %v12945_v23  ;;  %7581 = vmatpush.bf16.msrb.mxu1 %v12436_v33  ;;  %v11736_v24 = vor.u32 %v14839_v11, %v11735_v10  ;;  %v14567_v23 = vld [vmem:[#allocation2 + $0x764] sm:$0xf0]  ;;  %v10136_v33 = vor.u32 %v14439_v19, %v10135_v57 }
 0x3d0   : > { %v13457_v29 = vld [vmem:[#allocation2 + $0x1d60] sm:$0xf0]  ;;  %v11671_v4 = vld [vmem:[#allocation2 + $0xf28] sm:$0xf] }
 0x3d1   : > { %v14862_v39 = vld [vmem:[#allocation2 + $0x10a4] sm:$0xf]  ;;  %v13460_v45 = vor.u32 %v15262_v63, %v13457_v29  ;;  %7594 = vmatpush.bf16.msrb.mxu2 %v12948_v35  ;;  %v11159_v63 = vld [vmem:[#allocation2 + $0xb28] sm:$0xf]  ;;  %v10648_v35 = vor.u32 %v14567_v23, %v10647_v20  ;;  %v7390_v20 = vpop.f32.mrf.mxu2 }
 0x3d2   : > { %v11857_v41 = vld [vmem:[#allocation2 + $0x10e0] sm:$0xf0]  ;;  %v14695_v29 = vld [vmem:[#allocation2 + $0xb64] sm:$0xf0] }
 0x3d3   : > { %v14990_v44 = vld [vmem:[#allocation2 + $0x14a4] sm:$0xf]  ;;  %v11860_v49 = vor.u32 %v14862_v39, %v11857_v41  ;;  %7607 = vmatpush.bf16.msrb.mxu3 %v13460_v45  ;;  %v11160_v39 = vor.u32 %v14695_v29, %v11159_v63  ;;  %v7339_v41 = vadd.f32 %v16027_v18, %v7326_v59  ;;  %v11672_v45 = vor.u32 %v14823_v31, %v11671_v4  ;;  %v14519_v3 = vld [vmem:[#allocation2 + $0x5e4] sm:$0xf0]  ;;  %v7403_v4 = vpop.f32.mrf.mxu3 }
 0x3d4   : > { %v12369_v46 = vld [vmem:[#allocation2 + $0x14e0] sm:$0xf0]  ;;  %v10967_v5 = vld [vmem:[#allocation2 + $0x9a8] sm:$0xf] }
 0x3d5   : > { %v15118_v30 = vld [vmem:[#allocation2 + $0x18a4] sm:$0xf]  ;;  %v12372_v50 = vor.u32 %v14990_v44, %v12369_v46  ;;  %7569 = vmatpush.bf16.msrb.mxu0 %v11860_v49  ;;  %v10071_v44 = vld [vmem:[#allocation2 + $0x2a8] sm:$0xf] }
 0x3d6   : > { %v12881_v54 = vld [vmem:[#allocation2 + $0x18e0] sm:$0xf0]  ;;  %v14551_v46 = vld [vmem:[#allocation2 + $0x6e4] sm:$0xf0]  ;;  %v10072_v42 = vor.u32 %v14423_v26, %v10071_v44 }
 0x3d7   : > { %v15246_v47 = vld [vmem:[#allocation2 + $0x1ca4] sm:$0xf]  ;;  %v12884_v22 = vor.u32 %v15118_v30, %v12881_v54  ;;  %7582 = vmatpush.bf16.msrb.mxu1 %v12372_v50  ;;  %v11095_v30 = vld [vmem:[#allocation2 + $0xaa8] sm:$0xf]  ;;  %v10584_v18 = vor.u32 %v14551_v46, %v10583_v16 }
 0x3d8   : > { %v13393_v48 = vld [vmem:[#allocation2 + $0x1ce0] sm:$0xf0]  ;;  %v14679_v54 = vld [vmem:[#allocation2 + $0xae4] sm:$0xf0] }
 0x3d9   : > { %v14846_v17 = vld [vmem:[#allocation2 + $0x1024] sm:$0xf]  ;;  %v13396_v28 = vor.u32 %v15246_v47, %v13393_v48  ;;  %7595 = vmatpush.bf16.msrb.mxu2 %v12884_v22  ;;  %v11607_v47 = vld [vmem:[#allocation2 + $0xea8] sm:$0xf]  ;;  %v11096_v49 = vor.u32 %v14679_v54, %v11095_v30 }
 0x3da   : > { %v11793_v43 = vld [vmem:[#allocation2 + $0x1060] sm:$0xf0]  ;;  %v14807_v48 = vld [vmem:[#allocation2 + $0xee4] sm:$0xf0] }
 0x3db   : > { %v14974_v51 = vld [vmem:[#allocation2 + $0x1424] sm:$0xf]  ;;  %v11796_v1 = vor.u32 %v14846_v17, %v11793_v43  ;;  %7608 = vmatpush.bf16.msrb.mxu3 %v13396_v28  ;;  %v7352_v17 = vadd.f32 %v16029_v62, %v7339_v41  ;;  %v10007_v43 = vld [vmem:[#allocation2 + $0x228] sm:$0xf] }
 0x3dc   : > { %v12305_v21 = vld [vmem:[#allocation2 + $0x1460] sm:$0xf0]  ;;  %v14407_v50 = vld [vmem:[#allocation2 + $0x264] sm:$0xf0] }
 0x3dd   : > { %v15102_v52 = vld [vmem:[#allocation2 + $0x1824] sm:$0xf]  ;;  %v12308_v6 = vor.u32 %v14974_v51, %v12305_v21  ;;  %7570 = vmatpush.bf16.msrb.mxu0 %v11796_v1  ;;  %v10519_v22 = vld [vmem:[#allocation2 + $0x628] sm:$0xf]  ;;  %v11608_v51 = vor.u32 %v14807_v48, %v11607_v47  ;;  %v7377_v1 = vpop.f32.mrf.mxu1 }
 0x3de   : > { %v12817_v56 = vld [vmem:[#allocation2 + $0x1860] sm:$0xf0]  ;;  %v14535_v21 = vld [vmem:[#allocation2 + $0x664] sm:$0xf0] }
 0x3df   : > { %v15230_v27 = vld [vmem:[#allocation2 + $0x1c24] sm:$0xf]  ;;  %v12820_v7 = vor.u32 %v15102_v52, %v12817_v56  ;;  %7583 = vmatpush.bf16.msrb.mxu1 %v12308_v6  ;;  %v11031_v52 = vld [vmem:[#allocation2 + $0xa28] sm:$0xf]  ;;  %v10520_v60 = vor.u32 %v14535_v21, %v10519_v22 }
 0x3e0   : > { %v13329_v58 = vld [vmem:[#allocation2 + $0x1c60] sm:$0xf0]  ;;  %7571 = vmatmul.bf16.vlgmr.msrb.gmra.mxu0 %v15837_v37  ;;  %v11543_v28 = vld [vmem:[#allocation2 + $0xe28] sm:$0xf]  ;;  %v11032_v53 = vor.u32 %v14663_v55, %v11031_v52 }
 0x3e1   : > { %v13332_v12 = vor.u32 %v15230_v27, %v13329_v58  ;;  %7596 = vmatpush.bf16.msrb.mxu2 %v12820_v7  ;;  %7615 = vmatpush.bf16.msra.mxu0 %v10200_v13  ;;  %v14791_v56 = vld [vmem:[#allocation2 + $0xe64] sm:$0xf0]  ;;  %v10008_v27 = vor.u32 %v14407_v50, %v10007_v43  ;;  %v7364_v58 = vpop.f32.mrf.mxu0 }
 0x3e2   : > { %7584 = vmatmul.bf16.vlgmr.msrb.gmra.mxu1 %v15841_v40  ;;  %v10455_v62 = vld [vmem:[#allocation2 + $0x5a8] sm:$0xf]  ;;  %v7365_v0 = vadd.f32 %v7364_v58, %v7352_v17  ;;  %v11544_v2 = vor.u32 %v14791_v56, %v11543_v28  ;;  %v7392_v56 = vpop.f32.mrf.mxu2 }
 0x3e3   : > { %7609 = vmatpush.bf16.msrb.mxu3 %v13332_v12  ;;  %7628 = vmatpush.bf16.msra.mxu1 %v10712_v36  ;;  %v14647_v6 = vld [vmem:[#allocation2 + $0x9e4] sm:$0xf0]  ;;  %v9944_v12 = vor.u32 %v14391_v61, %v9943_v32  ;;  %v10456_v13 = vor.u32 %v14519_v3, %v10455_v62  ;;  %v7405_v32 = vpop.f32.mrf.mxu3 }
 0x3e4   : > { %7597 = vmatmul.bf16.vlgmr.msrb.gmra.mxu2 %v15835_v34  ;;  %v11479_v7 = vld [vmem:[#allocation2 + $0xda8] sm:$0xf]  ;;  %v7378_v11 = vadd.f32 %v7377_v1, %v7365_v0  ;;  %v10968_v36 = vor.u32 %v14647_v6, %v10967_v5 }
 0x3e5   : > { %7641 = vmatpush.bf16.msra.mxu2 %v11224_v14  ;;  %7616 = vmatpush.bf16.msra.mxu0 %v10136_v33  ;;  %v14775_v10 = vld [vmem:[#allocation2 + $0xde4] sm:$0xf0]  ;;  %v7379_v54 = vpop.f32.mrf.mxu1 }
 0x3e6   : > { %7610 = vmatmul.bf16.vlgmr.msrb.gmra.mxu3 %v15839_v38  ;;  %v9879_v14 = vld [vmem:[#allocation2 + $0x128] sm:$0xf]  ;;  %v11480_v59 = vor.u32 %v14775_v10, %v11479_v7  ;;  %v7391_v29 = vadd.f32 %v7390_v20, %v7378_v11 }
 0x3e7   : > { %7654 = vmatpush.bf16.msra.mxu3 %v11736_v24  ;;  %7629 = vmatpush.bf16.msra.mxu1 %v10648_v35  ;;  %v14375_v57 = vld [vmem:[#allocation2 + $0x164] sm:$0xf0] }
 0x3e8   : > { %v10391_v19 = vld [vmem:[#allocation2 + $0x528] sm:$0xf]  ;;  %v9880_v35 = vor.u32 %v14375_v57, %v9879_v14  ;;  %v7404_v41 = vadd.f32 %v7403_v4, %v7391_v29 }
 0x3e9   : > { %7642 = vmatpush.bf16.msra.mxu2 %v11160_v39  ;;  %7617 = vmatpush.bf16.msra.mxu0 %v10072_v42  ;;  %v14503_v24 = vld [vmem:[#allocation2 + $0x564] sm:$0xf0]  ;;  %v7366_v44 = vpop.f32.mrf.mxu0 }
 0x3ea   : > { %v10903_v23 = vld [vmem:[#allocation2 + $0x928] sm:$0xf]  ;;  %v10392_v26 = vor.u32 %v14503_v24, %v10391_v19 }
 0x3eb   : > { %7655 = vmatpush.bf16.msra.mxu3 %v11672_v45  ;;  %7630 = vmatpush.bf16.msra.mxu1 %v10584_v18  ;;  %v14631_v63 = vld [vmem:[#allocation2 + $0x964] sm:$0xf0]  ;;  %v8246_v18 = vmax.f32 %v7404_v41, 0.0 }
 0x3ec   : > { %v11415_v31 = vld [vmem:[#allocation2 + $0xd28] sm:$0xf]  ;;  %v10904_v16 = vor.u32 %v14631_v63, %v10903_v23 }
 0x3ed   : > { %7643 = vmatpush.bf16.msra.mxu2 %v11096_v49  ;;  %7618 = vmatpush.bf16.msra.mxu0 %v10008_v27  ;;  %v14759_v33 = vld [vmem:[#allocation2 + $0xd64] sm:$0xf0]  ;;  %8262 = vst [vmem:[%s15878_s18 + $0x38] sm:$0xff] %v8246_v18  ;;  %v16047_v32 = vpop.f32.mrf.mxu1 }
 0x3ee   : > { %v9815_v39 = vld [vmem:[#allocation2 + $0xa8] sm:$0xf]  ;;  %v11416_v47 = vor.u32 %v14759_v33, %v11415_v31 }
 0x3ef   : > { %7656 = vmatpush.bf16.msra.mxu3 %v11608_v51  ;;  %7631 = vmatpush.bf16.msra.mxu1 %v10520_v60  ;;  %v14359_v45 = vld [vmem:[#allocation2 + $0xe4] sm:$0xf0] }
 0x3f0   : > { %v10327_v46 = vld [vmem:[#allocation2 + $0x4a8] sm:$0xf]  ;;  %v9816_v43 = vor.u32 %v14359_v45, %v9815_v39 }
 0x3f1   : > { %7644 = vmatpush.bf16.msra.mxu2 %v11032_v53  ;;  %7619 = vmatpush.bf16.msra.mxu0 %v9944_v12  ;;  %v14487_v30 = vld [vmem:[#allocation2 + $0x4e4] sm:$0xf0] }
 0x3f2   : > { %v10839_v48 = vld [vmem:[#allocation2 + $0x8a8] sm:$0xf]  ;;  %v10328_v51 = vor.u32 %v14487_v30, %v10327_v46 }
 0x3f3   : > { %7657 = vmatpush.bf16.msra.mxu3 %v11544_v2  ;;  %7632 = vmatpush.bf16.msra.mxu1 %v10456_v13  ;;  %v14615_v42 = vld [vmem:[#allocation2 + $0x8e4] sm:$0xf0] }
 0x3f4   : > { %v11351_v49 = vld [vmem:[#allocation2 + $0xca8] sm:$0xf]  ;;  %v10840_v21 = vor.u32 %v14615_v42, %v10839_v48 }
 0x3f5   : > { %7645 = vmatpush.bf16.msra.mxu2 %v10968_v36  ;;  %v14743_v17 = vld [vmem:[#allocation2 + $0xce4] sm:$0xf0]  ;;  %7620 = vmatpush.bf16.msra.mxu0 %v9880_v35 }
 0x3f6   : > { %v9751_v50 = vld [vmem:[#allocation2 + $0x28] sm:$0xf]  ;;  %v11352_v27 = vor.u32 %v14743_v17, %v11351_v49 }
 0x3f7   : > { %7658 = vmatpush.bf16.msra.mxu3 %v11480_v59  ;;  %v14343_v22 = vld [vmem:[#allocation2 + $0x64] sm:$0xf0]  ;;  %7633 = vmatpush.bf16.msra.mxu1 %v10392_v26 }
 0x3f8   : > { %v10263_v52 = vld [vmem:[#allocation2 + $0x428] sm:$0xf]  ;;  %v9752_v1 = vor.u32 %v14343_v22, %v9751_v50 }
 0x3f9   : > { %7646 = vmatpush.bf16.msra.mxu2 %v10904_v16  ;;  %v14471_v55 = vld [vmem:[#allocation2 + $0x464] sm:$0xf0]  ;;  %7621 = vmatpush.bf16.msra.mxu0 %v9816_v43 }
 0x3fa   : > { %v10775_v28 = vld [vmem:[#allocation2 + $0x828] sm:$0xf]  ;;  %v10264_v6 = vor.u32 %v14471_v55, %v10263_v52 }
 0x3fb   : > { %7659 = vmatpush.bf16.msra.mxu3 %v11416_v47  ;;  %v14599_v58 = vld [vmem:[#allocation2 + $0x864] sm:$0xf0]  ;;  %7634 = vmatpush.bf16.msra.mxu1 %v10328_v51 }
 0x3fc   : > { %v11287_v60 = vld [vmem:[#allocation2 + $0xc28] sm:$0xf]  ;;  %v10776_v7 = vor.u32 %v14599_v58, %v10775_v28  ;;  %v16045_v28 = vpop.f32.mrf.mxu0 }
 0x3fd   : > { %v14727_v53 = vld [vmem:[#allocation2 + $0xc64] sm:$0xf0]  ;;  %7647 = vmatpush.bf16.msra.mxu2 %v10840_v21  ;;  %7622 = vmatpush.bf16.msra.mxu0 %v9752_v1 }
 0x3fe   : > { %v12247_v61 = vld [vmem:[#allocation2 + $0x13a8] sm:$0xf]  ;;  %v11288_v12 = vor.u32 %v14727_v53, %v11287_v60 }
 0x3ff   : > { %v14967_v62 = vld [vmem:[#allocation2 + $0x13e4] sm:$0xf0]  ;;  %7660 = vmatpush.bf16.msra.mxu3 %v11352_v27  ;;  %7635 = vmatpush.bf16.msra.mxu1 %v10264_v6 }
 0x400   : > { %v12759_v0 = vld [vmem:[#allocation2 + $0x17a8] sm:$0xf]  ;;  %v12248_v13 = vor.u32 %v14967_v62, %v12247_v61  ;;  %7623 = vmatmul.bf16.vlgmr.msra.gmra.mxu0 %v15819_v9 }
 0x401   : > { %v15095_v2 = vld [vmem:[#allocation2 + $0x17e4] sm:$0xf0]  ;;  %7648 = vmatpush.bf16.msra.mxu2 %v10776_v7 }
 0x402   : > { %v13271_v3 = vld [vmem:[#allocation2 + $0x1ba8] sm:$0xf]  ;;  %v12760_v36 = vor.u32 %v15095_v2, %v12759_v0  ;;  %7667 = vmatpush.bf16.msrb.mxu0 %v12248_v13  ;;  %7636 = vmatmul.bf16.vlgmr.msra.gmra.mxu1 %v15828_v25  ;;  %v16049_v13 = vpop.f32.mrf.mxu2 }
 0x403   : > { %v15223_v5 = vld [vmem:[#allocation2 + $0x1be4] sm:$0xf0]  ;;  %7661 = vmatpush.bf16.msra.mxu3 %v11288_v12 }
 0x404   : > { %v13783_v10 = vld [vmem:[#allocation2 + $0x1fa8] sm:$0xf]  ;;  %v13272_v14 = vor.u32 %v15223_v5, %v13271_v3  ;;  %7680 = vmatpush.bf16.msrb.mxu1 %v12760_v36  ;;  %7649 = vmatmul.bf16.vlgmr.msra.gmra.mxu2 %v15817_v8 }
 0x405   : > { %v15351_v11 = vld [vmem:[#allocation2 + $0x1fe4] sm:$0xf0] }
 0x406   : > { %v12183_v57 = vld [vmem:[#allocation2 + $0x1328] sm:$0xf]  ;;  %v13784_v59 = vor.u32 %v15351_v11, %v13783_v10  ;;  %7693 = vmatpush.bf16.msrb.mxu2 %v13272_v14  ;;  %7662 = vmatmul.bf16.vlgmr.msra.gmra.mxu3 %v15822_v15 }
 0x407   : > { %v14951_v19 = vld [vmem:[#allocation2 + $0x1364] sm:$0xf0] }
 0x408   : > { %v12695_v20 = vld [vmem:[#allocation2 + $0x1728] sm:$0xf]  ;;  %v12184_v31 = vor.u32 %v14951_v19, %v12183_v57  ;;  %7706 = vmatpush.bf16.msrb.mxu3 %v13784_v59 }
 0x409   : > { %v15079_v24 = vld [vmem:[#allocation2 + $0x1764] sm:$0xf0] }
 0x40a   : > { %v13207_v23 = vld [vmem:[#allocation2 + $0x1b28] sm:$0xf]  ;;  %v12696_v33 = vor.u32 %v15079_v24, %v12695_v20  ;;  %7668 = vmatpush.bf16.msrb.mxu0 %v12184_v31  ;;  %v16051_v20 = vpop.f32.mrf.mxu3 }
 0x40b   : > { %v15207_v63 = vld [vmem:[#allocation2 + $0x1b64] sm:$0xf0] }
 0x40c   : > { %v13719_v29 = vld [vmem:[#allocation2 + $0x1f28] sm:$0xf]  ;;  %v13208_v35 = vor.u32 %v15207_v63, %v13207_v23  ;;  %7681 = vmatpush.bf16.msrb.mxu1 %v12696_v33 }
 0x40d   : > { %v15335_v4 = vld [vmem:[#allocation2 + $0x1f64] sm:$0xf0] }
 0x40e   : > { %v12119_v39 = vld [vmem:[#allocation2 + $0x12a8] sm:$0xf]  ;;  %v13720_v26 = vor.u32 %v15335_v4, %v13719_v29  ;;  %7694 = vmatpush.bf16.msrb.mxu2 %v13208_v35  ;;  %v7418_v29 = vpop.f32.mrf.mxu0 }
 0x40f   : > { %v14935_v41 = vld [vmem:[#allocation2 + $0x12e4] sm:$0xf0]  ;;  %v14815_v29 = vld [vmem:[#allocation2 + $0xf2c] sm:$0xf] }
 0x410   : > { %v12631_v44 = vld [vmem:[#allocation2 + $0x16a8] sm:$0xf]  ;;  %v12120_v47 = vor.u32 %v14935_v41, %v12119_v39  ;;  %7707 = vmatpush.bf16.msrb.mxu3 %v13720_v26  ;;  %v7431_v41 = vpop.f32.mrf.mxu1 }
 0x411   : > { %v15063_v16 = vld [vmem:[#allocation2 + $0x16e4] sm:$0xf0]  ;;  %v14415_v41 = vld [vmem:[#allocation2 + $0x2ac] sm:$0xf] }
 0x412   : > { %v13143_v45 = vld [vmem:[#allocation2 + $0x1aa8] sm:$0xf]  ;;  %v12632_v48 = vor.u32 %v15063_v16, %v12631_v44  ;;  %7669 = vmatpush.bf16.msrb.mxu0 %v12120_v47 }
 0x413   : > { %v15191_v46 = vld [vmem:[#allocation2 + $0x1ae4] sm:$0xf0] }
 0x414   : > { %v13655_v30 = vld [vmem:[#allocation2 + $0x1ea8] sm:$0xf]  ;;  %v13144_v42 = vor.u32 %v15191_v46, %v13143_v45  ;;  %7682 = vmatpush.bf16.msrb.mxu1 %v12632_v48 }
 0x415   : > { %v15319_v54 = vld [vmem:[#allocation2 + $0x1ee4] sm:$0xf0] }
 0x416   : > { %v12055_v18 = vld [vmem:[#allocation2 + $0x1228] sm:$0xf]  ;;  %v13656_v43 = vor.u32 %v15319_v54, %v13655_v30  ;;  %7695 = vmatpush.bf16.msrb.mxu2 %v13144_v42 }
 0x417   : > { %v14919_v49 = vld [vmem:[#allocation2 + $0x1264] sm:$0xf0] }
 0x418   : > { %v12567_v17 = vld [vmem:[#allocation2 + $0x1628] sm:$0xf]  ;;  %v12056_v55 = vor.u32 %v14919_v49, %v12055_v18  ;;  %7708 = vmatpush.bf16.msrb.mxu3 %v13656_v43 }
 0x419   : > { %v15047_v50 = vld [vmem:[#allocation2 + $0x1664] sm:$0xf0] }
 0x41a   : > { %v13079_v22 = vld [vmem:[#allocation2 + $0x1a28] sm:$0xf]  ;;  %v12568_v56 = vor.u32 %v15047_v50, %v12567_v17  ;;  %7670 = vmatpush.bf16.msrb.mxu0 %v12056_v55 }
 0x41b   : > { %v15175_v51 = vld [vmem:[#allocation2 + $0x1a64] sm:$0xf0] }
 0x41c   : > { %v13591_v21 = vld [vmem:[#allocation2 + $0x1e28] sm:$0xf]  ;;  %v13080_v27 = vor.u32 %v15175_v51, %v13079_v22  ;;  %7683 = vmatpush.bf16.msrb.mxu1 %v12568_v56  ;;  %v7444_v22 = vpop.f32.mrf.mxu2  ;;  %v7457_v56 = vpop.f32.mrf.mxu3 }
 0x41d   : > { %v15303_v52 = vld [vmem:[#allocation2 + $0x1e64] sm:$0xf0]  ;;  %v14655_v22 = vld [vmem:[#allocation2 + $0xa2c] sm:$0xf]  ;;  %v7468_v56 = vpop.f32.mrf.mxu0 }
 0x41e   : > { %v11991_v58 = vld [vmem:[#allocation2 + $0x11a8] sm:$0xf]  ;;  %v13592_v61 = vor.u32 %v15303_v52, %v13591_v21  ;;  %7696 = vmatpush.bf16.msrb.mxu2 %v13080_v27  ;;  %v14447_v27 = vld [vmem:[#allocation2 + $0x3ac] sm:$0xf] }
 0x41f   : > { %v14903_v60 = vld [vmem:[#allocation2 + $0x11e4] sm:$0xf0] }
 0x420   : > { %v12503_v53 = vld [vmem:[#allocation2 + $0x15a8] sm:$0xf]  ;;  %v11992_v5 = vor.u32 %v14903_v60, %v11991_v58  ;;  %7709 = vmatpush.bf16.msrb.mxu3 %v13592_v61  ;;  %v10201_v58 = vld [vmem:[#allocation2 + $0x3e8] sm:$0xf0] }
 0x421   : > { %v15031_v62 = vld [vmem:[#allocation2 + $0x15e4] sm:$0xf0]  ;;  %v14575_v60 = vld [vmem:[#allocation2 + $0x7ac] sm:$0xf] }
 0x422   : > { %v13015_v0 = vld [vmem:[#allocation2 + $0x19a8] sm:$0xf]  ;;  %v12504_v6 = vor.u32 %v15031_v62, %v12503_v53  ;;  %7671 = vmatpush.bf16.msrb.mxu0 %v11992_v5  ;;  %v10713_v62 = vld [vmem:[#allocation2 + $0x7e8] sm:$0xf0] }
 0x423   : > { %v15159_v1 = vld [vmem:[#allocation2 + $0x19e4] sm:$0xf0]  ;;  %v14831_v5 = vld [vmem:[#allocation2 + $0xfac] sm:$0xf] }
 0x424   : > { %v13527_v2 = vld [vmem:[#allocation2 + $0x1da8] sm:$0xf]  ;;  %v13016_v7 = vor.u32 %v15159_v1, %v13015_v0  ;;  %7684 = vmatpush.bf16.msrb.mxu1 %v12504_v6  ;;  %v14703_v0 = vld [vmem:[#allocation2 + $0xbac] sm:$0xf] }
 0x425   : > { %v15287_v3 = vld [vmem:[#allocation2 + $0x1de4] sm:$0xf0]  ;;  %v11225_v1 = vld [vmem:[#allocation2 + $0xbe8] sm:$0xf0] }
 0x426   : > { %v11927_v10 = vld [vmem:[#allocation2 + $0x1128] sm:$0xf]  ;;  %v13528_v36 = vor.u32 %v15287_v3, %v13527_v2  ;;  %7697 = vmatpush.bf16.msrb.mxu2 %v13016_v7  ;;  %v11737_v6 = vld [vmem:[#allocation2 + $0xfe8] sm:$0xf0] }
 0x427   : > { %v14887_v11 = vld [vmem:[#allocation2 + $0x1164] sm:$0xf0] }
 0x428   : > { %v12439_v12 = vld [vmem:[#allocation2 + $0x1528] sm:$0xf]  ;;  %v11928_v23 = vor.u32 %v14887_v11, %v11927_v10  ;;  %7710 = vmatpush.bf16.msrb.mxu3 %v13528_v36  ;;  %v10204_v10 = vor.u32 %v14447_v27, %v10201_v58  ;;  %v10716_v11 = vor.u32 %v14575_v60, %v10713_v62  ;;  %v14431_v36 = vld [vmem:[#allocation2 + $0x32c] sm:$0xf]  ;;  %v7481_v62 = vpop.f32.mrf.mxu1 }
 0x429   : > { %v15015_v14 = vld [vmem:[#allocation2 + $0x1564] sm:$0xf0]  ;;  %v14383_v60 = vld [vmem:[#allocation2 + $0x1ac] sm:$0xf] }
 0x42a   : > { %v12951_v57 = vld [vmem:[#allocation2 + $0x1928] sm:$0xf]  ;;  %v12440_v4 = vor.u32 %v15015_v14, %v12439_v12  ;;  %7672 = vmatpush.bf16.msrb.mxu0 %v11928_v23  ;;  %v11228_v12 = vor.u32 %v14703_v0, %v11225_v1  ;;  %v10137_v14 = vld [vmem:[#allocation2 + $0x368] sm:$0xf0] }
 0x42b   : > { %v15143_v19 = vld [vmem:[#allocation2 + $0x1964] sm:$0xf0]  ;;  %v11161_v23 = vld [vmem:[#allocation2 + $0xb68] sm:$0xf0] }
 0x42c   : > { %v13463_v59 = vld [vmem:[#allocation2 + $0x1d28] sm:$0xf]  ;;  %v12952_v31 = vor.u32 %v15143_v19, %v12951_v57  ;;  %7685 = vmatpush.bf16.msrb.mxu1 %v12440_v4  ;;  %v14559_v57 = vld [vmem:[#allocation2 + $0x72c] sm:$0xf]  ;;  %v11740_v19 = vor.u32 %v14831_v5, %v11737_v6 }
 0x42d   : > { %v15271_v24 = vld [vmem:[#allocation2 + $0x1d64] sm:$0xf0]  ;;  %v11673_v4 = vld [vmem:[#allocation2 + $0xf68] sm:$0xf0] }
 0x42e   : > { %v16053_v63 = vld [vmem:[#allocation4 + $0x8] sm:$0xff]  ;;  %v13464_v44 = vor.u32 %v15271_v24, %v13463_v59  ;;  %7698 = vmatpush.bf16.msrb.mxu2 %v12952_v31  ;;  %v10140_v31 = vor.u32 %v14431_v36, %v10137_v14 }
 0x42f   : > { %v11863_v33 = vld [vmem:[#allocation2 + $0x10a8] sm:$0xf]  ;;  %v1431_v54 = vperm.slane %v16053_v63, 0  ;;  %v10649_v59 = vld [vmem:[#allocation2 + $0x768] sm:$0xf0] }
 0x430   : > { %v14871_v35 = vld [vmem:[#allocation2 + $0x10e4] sm:$0xf0]  ;;  %7711 = vmatpush.bf16.msrb.mxu3 %v13464_v44  ;;  %v14687_v24 = vld [vmem:[#allocation2 + $0xb2c] sm:$0xf] }
 0x431   : > { %v12375_v39 = vld [vmem:[#allocation2 + $0x14a8] sm:$0xf]  ;;  %v11864_v47 = vor.u32 %v14871_v35, %v11863_v33  ;;  %v7417_v53 = vadd.f32 %v16045_v28, %v1431_v54  ;;  %v10652_v33 = vor.u32 %v14559_v57, %v10649_v59  ;;  %v11164_v35 = vor.u32 %v14687_v24, %v11161_v23  ;;  %v14543_v44 = vld [vmem:[#allocation2 + $0x6ac] sm:$0xf] }
 0x432   : > { %v14999_v26 = vld [vmem:[#allocation2 + $0x14e4] sm:$0xf0]  ;;  %v11609_v54 = vld [vmem:[#allocation2 + $0xee8] sm:$0xf0] }
 0x433   : > { %v12887_v16 = vld [vmem:[#allocation2 + $0x18a8] sm:$0xf]  ;;  %v12376_v18 = vor.u32 %v14999_v26, %v12375_v39  ;;  %7673 = vmatpush.bf16.msrb.mxu0 %v11864_v47  ;;  %v7430_v28 = vadd.f32 %v16047_v32, %v7417_v53  ;;  %v10073_v32 = vld [vmem:[#allocation2 + $0x2e8] sm:$0xf0]  ;;  %v11676_v26 = vor.u32 %v14815_v29, %v11673_v4  ;;  %v7507_v4 = vpop.f32.mrf.mxu3 }
 0x434   : > { %v15127_v45 = vld [vmem:[#allocation2 + $0x18e4] sm:$0xf0]  ;;  %v10076_v47 = vor.u32 %v14415_v41, %v10073_v32  ;;  %v9945_v53 = vld [vmem:[#allocation2 + $0x1e8] sm:$0xf0]  ;;  %v7470_v32 = vpop.f32.mrf.mxu0 }
 0x435   : > { %v13399_v46 = vld [vmem:[#allocation2 + $0x1ca8] sm:$0xf]  ;;  %v12888_v49 = vor.u32 %v15127_v45, %v12887_v16  ;;  %7686 = vmatpush.bf16.msrb.mxu1 %v12376_v18  ;;  %v7443_v39 = vadd.f32 %v16049_v13, %v7430_v28  ;;  %v10585_v16 = vld [vmem:[#allocation2 + $0x6e8] sm:$0xf0]  ;;  %v7494_v28 = vpop.f32.mrf.mxu2 }
 0x436   : > { %v15255_v30 = vld [vmem:[#allocation2 + $0x1ce4] sm:$0xf0]  ;;  %v14671_v45 = vld [vmem:[#allocation2 + $0xaac] sm:$0xf]  ;;  %v10588_v13 = vor.u32 %v14543_v44, %v10585_v16 }
 0x437   : > { %v11799_v48 = vld [vmem:[#allocation2 + $0x1028] sm:$0xf]  ;;  %v13400_v51 = vor.u32 %v15255_v30, %v13399_v46  ;;  %7699 = vmatpush.bf16.msrb.mxu2 %v12888_v49  ;;  %v11097_v46 = vld [vmem:[#allocation2 + $0xae8] sm:$0xf0] }
 0x438   : > { %v14855_v42 = vld [vmem:[#allocation2 + $0x1064] sm:$0xf0]  ;;  %v14799_v30 = vld [vmem:[#allocation2 + $0xeac] sm:$0xf] }
 0x439   : > { %v12311_v17 = vld [vmem:[#allocation2 + $0x1428] sm:$0xf]  ;;  %v11800_v61 = vor.u32 %v14855_v42, %v11799_v48  ;;  %7712 = vmatpush.bf16.msrb.mxu3 %v13400_v51  ;;  %v11100_v48 = vor.u32 %v14671_v45, %v11097_v46  ;;  %v7456_v42 = vadd.f32 %v16051_v20, %v7443_v39  ;;  %v14399_v18 = vld [vmem:[#allocation2 + $0x22c] sm:$0xf] }
 0x43a   : > { %v14983_v43 = vld [vmem:[#allocation2 + $0x1464] sm:$0xf0]  ;;  %v10009_v49 = vld [vmem:[#allocation2 + $0x268] sm:$0xf0] }
 0x43b   : > { %v12823_v50 = vld [vmem:[#allocation2 + $0x1828] sm:$0xf]  ;;  %v12312_v2 = vor.u32 %v14983_v43, %v12311_v17  ;;  %7674 = vmatpush.bf16.msrb.mxu0 %v11800_v61  ;;  %v14527_v17 = vld [vmem:[#allocation2 + $0x62c] sm:$0xf]  ;;  %v11612_v43 = vor.u32 %v14799_v30, %v11609_v54  ;;  %v7469_v61 = vadd.f32 %v7468_v56, %v7456_v42  ;;  %v7483_v30 = vpop.f32.mrf.mxu1 }
 0x43c   : > { %v15111_v21 = vld [vmem:[#allocation2 + $0x1864] sm:$0xf0]  ;;  %v11033_v51 = vld [vmem:[#allocation2 + $0xa68] sm:$0xf0] }
 0x43d   : > { %v13335_v52 = vld [vmem:[#allocation2 + $0x1c28] sm:$0xf]  ;;  %v12824_v3 = vor.u32 %v15111_v21, %v12823_v50  ;;  %7687 = vmatpush.bf16.msrb.mxu1 %v12312_v2  ;;  %v10521_v50 = vld [vmem:[#allocation2 + $0x668] sm:$0xf0]  ;;  %v11036_v58 = vor.u32 %v14655_v22, %v11033_v51 }
 0x43e   : > { %v15239_v55 = vld [vmem:[#allocation2 + $0x1c64] sm:$0xf0]  ;;  %7675 = vmatmul.bf16.vlgmr.msrb.gmra.mxu0 %v15837_v37  ;;  %v14783_v21 = vld [vmem:[#allocation2 + $0xe2c] sm:$0xf]  ;;  %v10524_v27 = vor.u32 %v14527_v17, %v10521_v50 }
 0x43f   : > { %v13336_v7 = vor.u32 %v15239_v55, %v13335_v52  ;;  %7700 = vmatpush.bf16.msrb.mxu2 %v12824_v3  ;;  %7719 = vmatpush.bf16.msra.mxu0 %v10204_v10  ;;  %v11545_v52 = vld [vmem:[#allocation2 + $0xe68] sm:$0xf0]  ;;  %v10012_v55 = vor.u32 %v14399_v18, %v10009_v49  ;;  %v9948_v10 = vor.u32 %v14383_v60, %v9945_v53  ;;  %v7509_v53 = vpop.f32.mrf.mxu3 }
 0x440   : > { %7688 = vmatmul.bf16.vlgmr.msrb.gmra.mxu1 %v15841_v40  ;;  %v14511_v20 = vld [vmem:[#allocation2 + $0x5ac] sm:$0xf]  ;;  %v11548_v0 = vor.u32 %v14783_v21, %v11545_v52 }
 0x441   : > { %7713 = vmatpush.bf16.msrb.mxu3 %v13336_v7  ;;  %7732 = vmatpush.bf16.msra.mxu1 %v10716_v11  ;;  %v10457_v1 = vld [vmem:[#allocation2 + $0x5e8] sm:$0xf0]  ;;  %v7482_v7 = vadd.f32 %v7481_v62, %v7469_v61 }
 0x442   : > { %7701 = vmatmul.bf16.vlgmr.msrb.gmra.mxu2 %v15835_v34  ;;  %v14639_v2 = vld [vmem:[#allocation2 + $0x9ac] sm:$0xf]  ;;  %v10460_v11 = vor.u32 %v14511_v20, %v10457_v1 }
 0x443   : > { %7745 = vmatpush.bf16.msra.mxu2 %v11228_v12  ;;  %7720 = vmatpush.bf16.msra.mxu0 %v10140_v31  ;;  %v10969_v3 = vld [vmem:[#allocation2 + $0x9e8] sm:$0xf0]  ;;  %v7495_v29 = vadd.f32 %v7494_v28, %v7482_v7 }
 0x444   : > { %7714 = vmatmul.bf16.vlgmr.msrb.gmra.mxu3 %v15839_v38  ;;  %v14767_v5 = vld [vmem:[#allocation2 + $0xdac] sm:$0xf]  ;;  %v10972_v12 = vor.u32 %v14639_v2, %v10969_v3 }
 0x445   : > { %7758 = vmatpush.bf16.msra.mxu3 %v11740_v19  ;;  %7733 = vmatpush.bf16.msra.mxu1 %v10652_v33  ;;  %v11481_v6 = vld [vmem:[#allocation2 + $0xde8] sm:$0xf0]  ;;  %v7508_v41 = vadd.f32 %v7507_v4, %v7495_v29 }
 0x446   : > { %v14367_v36 = vld [vmem:[#allocation2 + $0x12c] sm:$0xf]  ;;  %v11484_v19 = vor.u32 %v14767_v5, %v11481_v6 }
 0x447   : > { %7746 = vmatpush.bf16.msra.mxu2 %v11164_v35  ;;  %7721 = vmatpush.bf16.msra.mxu0 %v10076_v47  ;;  %v9881_v14 = vld [vmem:[#allocation2 + $0x168] sm:$0xf0] }
 0x448   : > { %v14495_v57 = vld [vmem:[#allocation2 + $0x52c] sm:$0xf]  ;;  %v9884_v35 = vor.u32 %v14367_v36, %v9881_v14 }
 0x449   : > { %7759 = vmatpush.bf16.msra.mxu3 %v11676_v26  ;;  %7734 = vmatpush.bf16.msra.mxu1 %v10588_v13  ;;  %v10393_v59 = vld [vmem:[#allocation2 + $0x568] sm:$0xf0] }
 0x44a   : > { %v14623_v24 = vld [vmem:[#allocation2 + $0x92c] sm:$0xf]  ;;  %v10396_v44 = vor.u32 %v14495_v57, %v10393_v59 }
 0x44b   : > { %7747 = vmatpush.bf16.msra.mxu2 %v11100_v48  ;;  %7722 = vmatpush.bf16.msra.mxu0 %v10012_v55  ;;  %v10905_v23 = vld [vmem:[#allocation2 + $0x968] sm:$0xf0]  ;;  %v8247_v48 = vmax.f32 %v7508_v41, 0.0  ;;  %v7496_v55 = vpop.f32.mrf.mxu2 }
 0x44c   : > { %v14751_v31 = vld [vmem:[#allocation2 + $0xd2c] sm:$0xf]  ;;  %v10908_v26 = vor.u32 %v14623_v24, %v10905_v23  ;;  %v16069_v55 = vpop.f32.mrf.mxu0 }
 0x44d   : > { %7760 = vmatpush.bf16.msra.mxu3 %v11612_v43  ;;  %7735 = vmatpush.bf16.msra.mxu1 %v10524_v27  ;;  %v11417_v33 = vld [vmem:[#allocation2 + $0xd68] sm:$0xf0]  ;;  %8263 = vst [vmem:[%s15878_s18 + $0x40] sm:$0xff] %v8247_v48 }
 0x44e   : > { %v14351_v39 = vld [vmem:[#allocation2 + $0xac] sm:$0xf]  ;;  %v11420_v54 = vor.u32 %v14751_v31, %v11417_v33 }
 0x44f   : > { %7748 = vmatpush.bf16.msra.mxu2 %v11036_v58  ;;  %7723 = vmatpush.bf16.msra.mxu0 %v9948_v10  ;;  %v9817_v16 = vld [vmem:[#allocation2 + $0xe8] sm:$0xf0] }
 0x450   : > { %v14479_v45 = vld [vmem:[#allocation2 + $0x4ac] sm:$0xf]  ;;  %v9820_v49 = vor.u32 %v14351_v39, %v9817_v16 }
 0x451   : > { %7761 = vmatpush.bf16.msra.mxu3 %v11548_v0  ;;  %7736 = vmatpush.bf16.msra.mxu1 %v10460_v11  ;;  %v10329_v46 = vld [vmem:[#allocation2 + $0x4e8] sm:$0xf0] }
 0x452   : > { %v14607_v47 = vld [vmem:[#allocation2 + $0x8ac] sm:$0xf]  ;;  %v10332_v50 = vor.u32 %v14479_v45, %v10329_v46 }
 0x453   : > { %7749 = vmatpush.bf16.msra.mxu2 %v10972_v12  ;;  %v10841_v13 = vld [vmem:[#allocation2 + $0x8e8] sm:$0xf0]  ;;  %7724 = vmatpush.bf16.msra.mxu0 %v9884_v35 }
 0x454   : > { %v14735_v42 = vld [vmem:[#allocation2 + $0xcac] sm:$0xf]  ;;  %v10844_v22 = vor.u32 %v14607_v47, %v10841_v13 }
 0x455   : > { %7762 = vmatpush.bf16.msra.mxu3 %v11484_v19  ;;  %v11353_v18 = vld [vmem:[#allocation2 + $0xce8] sm:$0xf0]  ;;  %7737 = vmatpush.bf16.msra.mxu1 %v10396_v44 }
 0x456   : > { %v14335_v17 = vld [vmem:[#allocation2 + $0x2c] sm:$0xf]  ;;  %v11356_v56 = vor.u32 %v14735_v42, %v11353_v18 }
 0x457   : > { %v9753_v43 = vld [vmem:[#allocation2 + $0x68] sm:$0xf0]  ;;  %7750 = vmatpush.bf16.msra.mxu2 %v10908_v26  ;;  %7725 = vmatpush.bf16.msra.mxu0 %v9820_v49 }
 0x458   : > { %v14463_v51 = vld [vmem:[#allocation2 + $0x42c] sm:$0xf]  ;;  %v9756_v0 = vor.u32 %v14335_v17, %v9753_v43 }
 0x459   : > { %v10265_v21 = vld [vmem:[#allocation2 + $0x468] sm:$0xf0]  ;;  %7763 = vmatpush.bf16.msra.mxu3 %v11420_v54  ;;  %7738 = vmatpush.bf16.msra.mxu1 %v10332_v50 }
 0x45a   : > { %v14591_v52 = vld [vmem:[#allocation2 + $0x82c] sm:$0xf]  ;;  %v10268_v5 = vor.u32 %v14463_v51, %v10265_v21 }
 0x45b   : > { %v10777_v27 = vld [vmem:[#allocation2 + $0x868] sm:$0xf0]  ;;  %7751 = vmatpush.bf16.msra.mxu2 %v10844_v22  ;;  %7726 = vmatpush.bf16.msra.mxu0 %v9756_v0 }
 0x45c   : > { %v14719_v58 = vld [vmem:[#allocation2 + $0xc2c] sm:$0xf]  ;;  %v10780_v6 = vor.u32 %v14591_v52, %v10777_v27 }
 0x45d   : > { %v11289_v60 = vld [vmem:[#allocation2 + $0xc68] sm:$0xf0]  ;;  %7764 = vmatpush.bf16.msra.mxu3 %v11356_v56  ;;  %7739 = vmatpush.bf16.msra.mxu1 %v10268_v5 }
 0x45e   : > { %v14959_v20 = vld [vmem:[#allocation2 + $0x13ac] sm:$0xf]  ;;  %v11292_v11 = vor.u32 %v14719_v58, %v11289_v60  ;;  %7727 = vmatmul.bf16.vlgmr.msra.gmra.mxu0 %v15819_v9 }
 0x45f   : > { %v12249_v61 = vld [vmem:[#allocation2 + $0x13e8] sm:$0xf0]  ;;  %7752 = vmatpush.bf16.msra.mxu2 %v10780_v6 }
 0x460   : > { %v15087_v62 = vld [vmem:[#allocation2 + $0x17ac] sm:$0xf]  ;;  %v12252_v12 = vor.u32 %v14959_v20, %v12249_v61  ;;  %7740 = vmatmul.bf16.vlgmr.msra.gmra.mxu1 %v15828_v25  ;;  %v16071_v20 = vpop.f32.mrf.mxu1 }
 0x461   : > { %v12761_v1 = vld [vmem:[#allocation2 + $0x17e8] sm:$0xf0]  ;;  %7765 = vmatpush.bf16.msra.mxu3 %v11292_v11 }
 0x462   : > { %v15215_v2 = vld [vmem:[#allocation2 + $0x1bac] sm:$0xf]  ;;  %v12764_v36 = vor.u32 %v15087_v62, %v12761_v1  ;;  %7771 = vmatpush.bf16.msrb.mxu0 %v12252_v12  ;;  %7753 = vmatmul.bf16.vlgmr.msra.gmra.mxu2 %v15817_v8 }
 0x463   : > { %v13273_v3 = vld [vmem:[#allocation2 + $0x1be8] sm:$0xf0] }
 0x464   : > { %v15343_v7 = vld [vmem:[#allocation2 + $0x1fac] sm:$0xf]  ;;  %v13276_v14 = vor.u32 %v15215_v2, %v13273_v3  ;;  %7784 = vmatpush.bf16.msrb.mxu1 %v12764_v36  ;;  %7766 = vmatmul.bf16.vlgmr.msra.gmra.mxu3 %v15822_v15  ;;  %v16073_v36 = vpop.f32.mrf.mxu2 }
 0x465   : > { %v13785_v10 = vld [vmem:[#allocation2 + $0x1fe8] sm:$0xf0] }
 0x466   : > { %v14943_v57 = vld [vmem:[#allocation2 + $0x132c] sm:$0xf]  ;;  %v13788_v59 = vor.u32 %v15343_v7, %v13785_v10  ;;  %7797 = vmatpush.bf16.msrb.mxu2 %v13276_v14 }
 0x467   : > { %v12185_v28 = vld [vmem:[#allocation2 + $0x1368] sm:$0xf0] }
 0x468   : > { %v15071_v19 = vld [vmem:[#allocation2 + $0x172c] sm:$0xf]  ;;  %v12188_v33 = vor.u32 %v14943_v57, %v12185_v28  ;;  %7810 = vmatpush.bf16.msrb.mxu3 %v13788_v59  ;;  %v16075_v59 = vpop.f32.mrf.mxu3 }
 0x469   : > { %v12697_v24 = vld [vmem:[#allocation2 + $0x1768] sm:$0xf0] }
 0x46a   : > { %v15199_v23 = vld [vmem:[#allocation2 + $0x1b2c] sm:$0xf]  ;;  %v12700_v35 = vor.u32 %v15071_v19, %v12697_v24  ;;  %7772 = vmatpush.bf16.msrb.mxu0 %v12188_v33 }
 0x46b   : > { %v13209_v29 = vld [vmem:[#allocation2 + $0x1b68] sm:$0xf0] }
 0x46c   : > { %v15327_v4 = vld [vmem:[#allocation2 + $0x1f2c] sm:$0xf]  ;;  %v13212_v39 = vor.u32 %v15199_v23, %v13209_v29  ;;  %7785 = vmatpush.bf16.msrb.mxu1 %v12700_v35 }
 0x46d   : > { %v13721_v31 = vld [vmem:[#allocation2 + $0x1f68] sm:$0xf0] }
 0x46e   : > { %v14927_v41 = vld [vmem:[#allocation2 + $0x12ac] sm:$0xf]  ;;  %v13724_v26 = vor.u32 %v15327_v4, %v13721_v31  ;;  %7798 = vmatpush.bf16.msrb.mxu2 %v13212_v39  ;;  %v7522_v4 = vpop.f32.mrf.mxu0 }
 0x46f   : > { %v12121_v32 = vld [vmem:[#allocation2 + $0x12e8] sm:$0xf0]  ;;  %v14824_v4 = vld [vmem:[#allocation2 + $0xf6c] sm:$0xf0] }
 0x470   : > { %v15055_v44 = vld [vmem:[#allocation2 + $0x16ac] sm:$0xf]  ;;  %v12124_v47 = vor.u32 %v14927_v41, %v12121_v32  ;;  %7811 = vmatpush.bf16.msrb.mxu3 %v13724_v26  ;;  %v7535_v32 = vpop.f32.mrf.mxu1 }
 0x471   : > { %v12633_v16 = vld [vmem:[#allocation2 + $0x16e8] sm:$0xf0]  ;;  %v10591_v32 = vld [vmem:[#allocation2 + $0x6b0] sm:$0xf] }
 0x472   : > { %v15183_v45 = vld [vmem:[#allocation2 + $0x1aac] sm:$0xf]  ;;  %v12636_v13 = vor.u32 %v15055_v44, %v12633_v16  ;;  %7773 = vmatpush.bf16.msrb.mxu0 %v12124_v47 }
 0x473   : > { %v13145_v46 = vld [vmem:[#allocation2 + $0x1ae8] sm:$0xf0] }
 0x474   : > { %v15311_v30 = vld [vmem:[#allocation2 + $0x1eac] sm:$0xf]  ;;  %v13148_v48 = vor.u32 %v15183_v45, %v13145_v46  ;;  %7786 = vmatpush.bf16.msrb.mxu1 %v12636_v13 }
 0x475   : > { %v13657_v54 = vld [vmem:[#allocation2 + $0x1ee8] sm:$0xf0] }
 0x476   : > { %v14911_v42 = vld [vmem:[#allocation2 + $0x122c] sm:$0xf]  ;;  %v13660_v17 = vor.u32 %v15311_v30, %v13657_v54  ;;  %7799 = vmatpush.bf16.msrb.mxu2 %v13148_v48  ;;  %v1432_v54 = vperm.slane %v16053_v63, 1  ;;  %v14456_v63 = vld [vmem:[#allocation2 + $0x3ec] sm:$0xf0] }
 0x477   : > { %v12057_v18 = vld [vmem:[#allocation2 + $0x1268] sm:$0xf0] }
 0x478   : > { %v15039_v49 = vld [vmem:[#allocation2 + $0x162c] sm:$0xf]  ;;  %v12060_v52 = vor.u32 %v14911_v42, %v12057_v18  ;;  %7812 = vmatpush.bf16.msrb.mxu3 %v13660_v17 }
 0x479   : > { %v12569_v43 = vld [vmem:[#allocation2 + $0x1668] sm:$0xf0] }
 0x47a   : > { %v15167_v50 = vld [vmem:[#allocation2 + $0x1a2c] sm:$0xf]  ;;  %v12572_v56 = vor.u32 %v15039_v49, %v12569_v43  ;;  %7774 = vmatpush.bf16.msrb.mxu0 %v12060_v52 }
 0x47b   : > { %v13081_v22 = vld [vmem:[#allocation2 + $0x1a68] sm:$0xf0] }
 0x47c   : > { %v15295_v51 = vld [vmem:[#allocation2 + $0x1e2c] sm:$0xf]  ;;  %v13084_v27 = vor.u32 %v15167_v50, %v13081_v22  ;;  %7787 = vmatpush.bf16.msrb.mxu1 %v12572_v56  ;;  %v7548_v50 = vpop.f32.mrf.mxu2  ;;  %v7561_v56 = vpop.f32.mrf.mxu3 }
 0x47d   : > { %v13593_v21 = vld [vmem:[#allocation2 + $0x1e68] sm:$0xf0]  ;;  %v14664_v50 = vld [vmem:[#allocation2 + $0xa6c] sm:$0xf0] }
 0x47e   : > { %v14895_v58 = vld [vmem:[#allocation2 + $0x11ac] sm:$0xf]  ;;  %v13596_v61 = vor.u32 %v15295_v51, %v13593_v21  ;;  %7800 = vmatpush.bf16.msrb.mxu2 %v13084_v27  ;;  %v10207_v27 = vld [vmem:[#allocation2 + $0x3b0] sm:$0xf] }
 0x47f   : > { %v11993_v60 = vld [vmem:[#allocation2 + $0x11e8] sm:$0xf0] }
 0x480   : > { %v15023_v53 = vld [vmem:[#allocation2 + $0x15ac] sm:$0xf]  ;;  %v11996_v5 = vor.u32 %v14895_v58, %v11993_v60  ;;  %7813 = vmatpush.bf16.msrb.mxu3 %v13596_v61  ;;  %v10719_v58 = vld [vmem:[#allocation2 + $0x7b0] sm:$0xf]  ;;  %v7521_v60 = vadd.f32 %v16069_v55, %v1432_v54 }
 0x481   : > { %v12505_v62 = vld [vmem:[#allocation2 + $0x15e8] sm:$0xf0]  ;;  %v14584_v61 = vld [vmem:[#allocation2 + $0x7ec] sm:$0xf0] }
 0x482   : > { %v15151_v0 = vld [vmem:[#allocation2 + $0x19ac] sm:$0xf]  ;;  %v12508_v6 = vor.u32 %v15023_v53, %v12505_v62  ;;  %7775 = vmatpush.bf16.msrb.mxu0 %v11996_v5  ;;  %v11231_v62 = vld [vmem:[#allocation2 + $0xbb0] sm:$0xf]  ;;  %v7534_v55 = vadd.f32 %v16071_v20, %v7521_v60 }
 0x483   : > { %v13017_v1 = vld [vmem:[#allocation2 + $0x19e8] sm:$0xf0]  ;;  %v14840_v5 = vld [vmem:[#allocation2 + $0xfec] sm:$0xf0] }
 0x484   : > { %v15279_v2 = vld [vmem:[#allocation2 + $0x1dac] sm:$0xf]  ;;  %v13020_v7 = vor.u32 %v15151_v0, %v13017_v1  ;;  %7788 = vmatpush.bf16.msrb.mxu1 %v12508_v6  ;;  %v14712_v0 = vld [vmem:[#allocation2 + $0xbec] sm:$0xf0] }
 0x485   : > { %v13529_v3 = vld [vmem:[#allocation2 + $0x1de8] sm:$0xf0]  ;;  %v14424_v20 = vld [vmem:[#allocation2 + $0x2ec] sm:$0xf0] }
 0x486   : > { %v14879_v10 = vld [vmem:[#allocation2 + $0x112c] sm:$0xf]  ;;  %v13532_v14 = vor.u32 %v15279_v2, %v13529_v3  ;;  %7801 = vmatpush.bf16.msrb.mxu2 %v13020_v7  ;;  %v11743_v3 = vld [vmem:[#allocation2 + $0xfb0] sm:$0xf]  ;;  %v10208_v7 = vor.u32 %v14456_v63, %v10207_v27 }
 0x487   : > { %v11929_v11 = vld [vmem:[#allocation2 + $0x1168] sm:$0xf0]  ;;  %v9951_v63 = vld [vmem:[#allocation2 + $0x1b0] sm:$0xf] }
 0x488   : > { %v15007_v12 = vld [vmem:[#allocation2 + $0x152c] sm:$0xf]  ;;  %v11932_v29 = vor.u32 %v14879_v10, %v11929_v11  ;;  %7814 = vmatpush.bf16.msrb.mxu3 %v13532_v14  ;;  %v10720_v10 = vor.u32 %v14584_v61, %v10719_v58  ;;  %v11232_v11 = vor.u32 %v14712_v0, %v11231_v62  ;;  %v14440_v14 = vld [vmem:[#allocation2 + $0x36c] sm:$0xf0] }
 0x489   : > { %v12441_v57 = vld [vmem:[#allocation2 + $0x1568] sm:$0xf0]  ;;  %v14392_v58 = vld [vmem:[#allocation2 + $0x1ec] sm:$0xf0] }
 0x48a   : > { %v15135_v28 = vld [vmem:[#allocation2 + $0x192c] sm:$0xf]  ;;  %v12444_v31 = vor.u32 %v15007_v12, %v12441_v57  ;;  %7776 = vmatpush.bf16.msrb.mxu0 %v11932_v29  ;;  %v10143_v12 = vld [vmem:[#allocation2 + $0x330] sm:$0xf] }
 0x48b   : > { %v12953_v19 = vld [vmem:[#allocation2 + $0x1968] sm:$0xf0]  ;;  %v10655_v57 = vld [vmem:[#allocation2 + $0x730] sm:$0xf] }
 0x48c   : > { %v15263_v24 = vld [vmem:[#allocation2 + $0x1d2c] sm:$0xf]  ;;  %v12956_v33 = vor.u32 %v15135_v28, %v12953_v19  ;;  %7789 = vmatpush.bf16.msrb.mxu1 %v12444_v31  ;;  %v11744_v28 = vor.u32 %v14840_v5, %v11743_v3  ;;  %v14568_v19 = vld [vmem:[#allocation2 + $0x76c] sm:$0xf0]  ;;  %v10144_v31 = vor.u32 %v14440_v14, %v10143_v12 }
 0x48d   : > { %v13465_v23 = vld [vmem:[#allocation2 + $0x1d68] sm:$0xf0]  ;;  %v11679_v29 = vld [vmem:[#allocation2 + $0xf30] sm:$0xf] }
 0x48e   : > { %v14863_v35 = vld [vmem:[#allocation2 + $0x10ac] sm:$0xf]  ;;  %v13468_v44 = vor.u32 %v15263_v24, %v13465_v23  ;;  %7802 = vmatpush.bf16.msrb.mxu2 %v12956_v33  ;;  %v11167_v24 = vld [vmem:[#allocation2 + $0xb30] sm:$0xf]  ;;  %v10656_v33 = vor.u32 %v14568_v19, %v10655_v57  ;;  %v7598_v57 = vpop.f32.mrf.mxu2 }
 0x48f   : > { %v11865_v39 = vld [vmem:[#allocation2 + $0x10e8] sm:$0xf0]  ;;  %v14696_v23 = vld [vmem:[#allocation2 + $0xb6c] sm:$0xf0] }
 0x490   : > { %v14991_v41 = vld [vmem:[#allocation2 + $0x14ac] sm:$0xf]  ;;  %v11868_v47 = vor.u32 %v14863_v35, %v11865_v39  ;;  %7815 = vmatpush.bf16.msrb.mxu3 %v13468_v44  ;;  %v11168_v35 = vor.u32 %v14696_v23, %v11167_v24  ;;  %v7547_v39 = vadd.f32 %v16073_v36, %v7534_v55  ;;  %v11680_v44 = vor.u32 %v14824_v4, %v11679_v29  ;;  %v14520_v62 = vld [vmem:[#allocation2 + $0x5ec] sm:$0xf0]  ;;  %v7611_v29 = vpop.f32.mrf.mxu3 }
 0x491   : > { %v12377_v26 = vld [vmem:[#allocation2 + $0x14e8] sm:$0xf0]  ;;  %v10975_v0 = vld [vmem:[#allocation2 + $0x9b0] sm:$0xf] }
 0x492   : > { %v15119_v16 = vld [vmem:[#allocation2 + $0x18ac] sm:$0xf]  ;;  %v12380_v42 = vor.u32 %v14991_v41, %v12377_v26  ;;  %7777 = vmatpush.bf16.msrb.mxu0 %v11868_v47  ;;  %v10079_v41 = vld [vmem:[#allocation2 + $0x2b0] sm:$0xf] }
 0x493   : > { %v12889_v45 = vld [vmem:[#allocation2 + $0x18e8] sm:$0xf0]  ;;  %v14552_v26 = vld [vmem:[#allocation2 + $0x6ec] sm:$0xf0]  ;;  %v10080_v54 = vor.u32 %v14424_v20, %v10079_v41 }
 0x494   : > { %v15247_v46 = vld [vmem:[#allocation2 + $0x1cac] sm:$0xf]  ;;  %v12892_v18 = vor.u32 %v15119_v16, %v12889_v45  ;;  %7790 = vmatpush.bf16.msrb.mxu1 %v12380_v42  ;;  %v11103_v16 = vld [vmem:[#allocation2 + $0xab0] sm:$0xf]  ;;  %v10592_v36 = vor.u32 %v14552_v26, %v10591_v32 }
 0x495   : > { %v13401_v30 = vld [vmem:[#allocation2 + $0x1ce8] sm:$0xf0]  ;;  %v14680_v45 = vld [vmem:[#allocation2 + $0xaec] sm:$0xf0] }
 0x496   : > { %v14847_v13 = vld [vmem:[#allocation2 + $0x102c] sm:$0xf]  ;;  %v13404_v22 = vor.u32 %v15247_v46, %v13401_v30  ;;  %7803 = vmatpush.bf16.msrb.mxu2 %v12892_v18  ;;  %v11615_v46 = vld [vmem:[#allocation2 + $0xeb0] sm:$0xf]  ;;  %v11104_v47 = vor.u32 %v14680_v45, %v11103_v16 }
 0x497   : > { %v11801_v48 = vld [vmem:[#allocation2 + $0x1068] sm:$0xf0]  ;;  %v14808_v30 = vld [vmem:[#allocation2 + $0xeec] sm:$0xf0] }
 0x498   : > { %v14975_v49 = vld [vmem:[#allocation2 + $0x142c] sm:$0xf]  ;;  %v11804_v53 = vor.u32 %v14847_v13, %v11801_v48  ;;  %7816 = vmatpush.bf16.msrb.mxu3 %v13404_v22  ;;  %v7560_v13 = vadd.f32 %v16075_v59, %v7547_v39  ;;  %v10015_v48 = vld [vmem:[#allocation2 + $0x230] sm:$0xf] }
 0x499   : > { %v12313_v17 = vld [vmem:[#allocation2 + $0x1468] sm:$0xf0]  ;;  %v14408_v42 = vld [vmem:[#allocation2 + $0x26c] sm:$0xf0] }
 0x49a   : > { %v15103_v43 = vld [vmem:[#allocation2 + $0x182c] sm:$0xf]  ;;  %v12316_v1 = vor.u32 %v14975_v49, %v12313_v17  ;;  %7778 = vmatpush.bf16.msrb.mxu0 %v11804_v53  ;;  %v10527_v18 = vld [vmem:[#allocation2 + $0x630] sm:$0xf]  ;;  %v11616_v49 = vor.u32 %v14808_v30, %v11615_v46  ;;  %v7585_v53 = vpop.f32.mrf.mxu1 }
 0x49b   : > { %v12825_v51 = vld [vmem:[#allocation2 + $0x1868] sm:$0xf0]  ;;  %v14536_v17 = vld [vmem:[#allocation2 + $0x66c] sm:$0xf0] }
 0x49c   : > { %v15231_v21 = vld [vmem:[#allocation2 + $0x1c2c] sm:$0xf]  ;;  %v12828_v2 = vor.u32 %v15103_v43, %v12825_v51  ;;  %7791 = vmatpush.bf16.msrb.mxu1 %v12316_v1  ;;  %v11039_v43 = vld [vmem:[#allocation2 + $0xa30] sm:$0xf]  ;;  %v10528_v56 = vor.u32 %v14536_v17, %v10527_v18 }
 0x49d   : > { %v13337_v52 = vld [vmem:[#allocation2 + $0x1c68] sm:$0xf0]  ;;  %7779 = vmatmul.bf16.vlgmr.msrb.gmra.mxu0 %v15837_v37  ;;  %v11551_v22 = vld [vmem:[#allocation2 + $0xe30] sm:$0xf]  ;;  %v11040_v27 = vor.u32 %v14664_v50, %v11039_v43 }
 0x49e   : > { %v13340_v6 = vor.u32 %v15231_v21, %v13337_v52  ;;  %7804 = vmatpush.bf16.msrb.mxu2 %v12828_v2  ;;  %7823 = vmatpush.bf16.msra.mxu0 %v10208_v7  ;;  %v14792_v51 = vld [vmem:[#allocation2 + $0xe6c] sm:$0xf0]  ;;  %v10016_v21 = vor.u32 %v14408_v42, %v10015_v48  ;;  %v7572_v52 = vpop.f32.mrf.mxu0 }
 0x49f   : > { %7792 = vmatmul.bf16.vlgmr.msrb.gmra.mxu1 %v15841_v40  ;;  %v10463_v59 = vld [vmem:[#allocation2 + $0x5b0] sm:$0xf]  ;;  %v7573_v60 = vadd.f32 %v7572_v52, %v7560_v13  ;;  %v11552_v61 = vor.u32 %v14792_v51, %v11551_v22  ;;  %v7600_v51 = vpop.f32.mrf.mxu2 }
 0x4a0   : > { %7817 = vmatpush.bf16.msrb.mxu3 %v13340_v6  ;;  %7836 = vmatpush.bf16.msra.mxu1 %v10720_v10  ;;  %v14648_v1 = vld [vmem:[#allocation2 + $0x9ec] sm:$0xf0]  ;;  %v9952_v6 = vor.u32 %v14392_v58, %v9951_v63  ;;  %v10464_v7 = vor.u32 %v14520_v62, %v10463_v59  ;;  %v7613_v63 = vpop.f32.mrf.mxu3 }
 0x4a1   : > { %7805 = vmatmul.bf16.vlgmr.msrb.gmra.mxu2 %v15835_v34  ;;  %v11487_v2 = vld [vmem:[#allocation2 + $0xdb0] sm:$0xf]  ;;  %v7586_v5 = vadd.f32 %v7585_v53, %v7573_v60  ;;  %v10976_v10 = vor.u32 %v14648_v1, %v10975_v0 }
 0x4a2   : > { %7849 = vmatpush.bf16.msra.mxu2 %v11232_v11  ;;  %7824 = vmatpush.bf16.msra.mxu0 %v10144_v31  ;;  %v14776_v3 = vld [vmem:[#allocation2 + $0xdec] sm:$0xf0]  ;;  %v7587_v45 = vpop.f32.mrf.mxu1 }
 0x4a3   : > { %7818 = vmatmul.bf16.vlgmr.msrb.gmra.mxu3 %v15839_v38  ;;  %v9887_v11 = vld [vmem:[#allocation2 + $0x130] sm:$0xf]  ;;  %v11488_v55 = vor.u32 %v14776_v3, %v11487_v2  ;;  %v7599_v23 = vadd.f32 %v7598_v57, %v7586_v5 }
 0x4a4   : > { %7862 = vmatpush.bf16.msra.mxu3 %v11744_v28  ;;  %7837 = vmatpush.bf16.msra.mxu1 %v10656_v33  ;;  %v14376_v12 = vld [vmem:[#allocation2 + $0x16c] sm:$0xf0] }
 0x4a5   : > { %v10399_v14 = vld [vmem:[#allocation2 + $0x530] sm:$0xf]  ;;  %v9888_v33 = vor.u32 %v14376_v12, %v9887_v11  ;;  %v7612_v39 = vadd.f32 %v7611_v29, %v7599_v23 }
 0x4a6   : > { %7850 = vmatpush.bf16.msra.mxu2 %v11168_v35  ;;  %7825 = vmatpush.bf16.msra.mxu0 %v10080_v54  ;;  %v14504_v28 = vld [vmem:[#allocation2 + $0x56c] sm:$0xf0]  ;;  %v7574_v41 = vpop.f32.mrf.mxu0 }
 0x4a7   : > { %v10911_v19 = vld [vmem:[#allocation2 + $0x930] sm:$0xf]  ;;  %v10400_v20 = vor.u32 %v14504_v28, %v10399_v14 }
 0x4a8   : > { %7863 = vmatpush.bf16.msra.mxu3 %v11680_v44  ;;  %7838 = vmatpush.bf16.msra.mxu1 %v10592_v36  ;;  %v14632_v24 = vld [vmem:[#allocation2 + $0x96c] sm:$0xf0]  ;;  %v8248_v36 = vmax.f32 %v7612_v39, 0.0 }
 0x4a9   : > { %v11423_v4 = vld [vmem:[#allocation2 + $0xd30] sm:$0xf]  ;;  %v10912_v32 = vor.u32 %v14632_v24, %v10911_v19 }
 0x4aa   : > { %7851 = vmatpush.bf16.msra.mxu2 %v11104_v47  ;;  %7826 = vmatpush.bf16.msra.mxu0 %v10016_v21  ;;  %v14760_v31 = vld [vmem:[#allocation2 + $0xd6c] sm:$0xf0]  ;;  %8264 = vst [vmem:[%s15878_s18 + $0x48] sm:$0xff] %v8248_v36  ;;  %v16093_v63 = vpop.f32.mrf.mxu1 }
 0x4ab   : > { %v9823_v35 = vld [vmem:[#allocation2 + $0xb0] sm:$0xf]  ;;  %v11424_v46 = vor.u32 %v14760_v31, %v11423_v4 }
 0x4ac   : > { %7864 = vmatpush.bf16.msra.mxu3 %v11616_v49  ;;  %7839 = vmatpush.bf16.msra.mxu1 %v10528_v56  ;;  %v14360_v44 = vld [vmem:[#allocation2 + $0xec] sm:$0xf0] }
 0x4ad   : > { %v10335_v26 = vld [vmem:[#allocation2 + $0x4b0] sm:$0xf]  ;;  %v9824_v48 = vor.u32 %v14360_v44, %v9823_v35 }
 0x4ae   : > { %7852 = vmatpush.bf16.msra.mxu2 %v11040_v27  ;;  %7827 = vmatpush.bf16.msra.mxu0 %v9952_v6  ;;  %v14488_v16 = vld [vmem:[#allocation2 + $0x4ec] sm:$0xf0] }
 0x4af   : > { %v10847_v30 = vld [vmem:[#allocation2 + $0x8b0] sm:$0xf]  ;;  %v10336_v49 = vor.u32 %v14488_v16, %v10335_v26 }
 0x4b0   : > { %7865 = vmatpush.bf16.msra.mxu3 %v11552_v61  ;;  %7840 = vmatpush.bf16.msra.mxu1 %v10464_v7  ;;  %v14616_v54 = vld [vmem:[#allocation2 + $0x8ec] sm:$0xf0] }
 0x4b1   : > { %v11359_v47 = vld [vmem:[#allocation2 + $0xcb0] sm:$0xf]  ;;  %v10848_v17 = vor.u32 %v14616_v54, %v10847_v30 }
 0x4b2   : > { %7853 = vmatpush.bf16.msra.mxu2 %v10976_v10  ;;  %v14744_v13 = vld [vmem:[#allocation2 + $0xcec] sm:$0xf0]  ;;  %7828 = vmatpush.bf16.msra.mxu0 %v9888_v33 }
 0x4b3   : > { %v9759_v42 = vld [vmem:[#allocation2 + $0x30] sm:$0xf]  ;;  %v11360_v21 = vor.u32 %v14744_v13, %v11359_v47 }
 0x4b4   : > { %7866 = vmatpush.bf16.msra.mxu3 %v11488_v55  ;;  %v14344_v18 = vld [vmem:[#allocation2 + $0x6c] sm:$0xf0]  ;;  %7841 = vmatpush.bf16.msra.mxu1 %v10400_v20 }
 0x4b5   : > { %v10271_v43 = vld [vmem:[#allocation2 + $0x430] sm:$0xf]  ;;  %v9760_v53 = vor.u32 %v14344_v18, %v9759_v42 }
 0x4b6   : > { %7854 = vmatpush.bf16.msra.mxu2 %v10912_v32  ;;  %v14472_v50 = vld [vmem:[#allocation2 + $0x46c] sm:$0xf0]  ;;  %7829 = vmatpush.bf16.msra.mxu0 %v9824_v48 }
 0x4b7   : > { %v10783_v22 = vld [vmem:[#allocation2 + $0x830] sm:$0xf]  ;;  %v10272_v1 = vor.u32 %v14472_v50, %v10271_v43 }
 0x4b8   : > { %7867 = vmatpush.bf16.msra.mxu3 %v11424_v46  ;;  %v14600_v52 = vld [vmem:[#allocation2 + $0x86c] sm:$0xf0]  ;;  %7842 = vmatpush.bf16.msra.mxu1 %v10336_v49 }
 0x4b9   : > { %v11295_v56 = vld [vmem:[#allocation2 + $0xc30] sm:$0xf]  ;;  %v10784_v2 = vor.u32 %v14600_v52, %v10783_v22  ;;  %v16091_v22 = vpop.f32.mrf.mxu0 }
 0x4ba   : > { %v14728_v27 = vld [vmem:[#allocation2 + $0xc6c] sm:$0xf0]  ;;  %7855 = vmatpush.bf16.msra.mxu2 %v10848_v17  ;;  %7830 = vmatpush.bf16.msra.mxu0 %v9760_v53 }
 0x4bb   : > { %v12255_v58 = vld [vmem:[#allocation2 + $0x13b0] sm:$0xf]  ;;  %v11296_v6 = vor.u32 %v14728_v27, %v11295_v56 }
 0x4bc   : > { %v14968_v59 = vld [vmem:[#allocation2 + $0x13ec] sm:$0xf0]  ;;  %7868 = vmatpush.bf16.msra.mxu3 %v11360_v21  ;;  %7843 = vmatpush.bf16.msra.mxu1 %v10272_v1 }
 0x4bd   : > { %v12767_v60 = vld [vmem:[#allocation2 + $0x17b0] sm:$0xf]  ;;  %v12256_v7 = vor.u32 %v14968_v59, %v12255_v58  ;;  %7831 = vmatmul.bf16.vlgmr.msra.gmra.mxu0 %v15819_v9 }
 0x4be   : > { %v15096_v61 = vld [vmem:[#allocation2 + $0x17ec] sm:$0xf0]  ;;  %7856 = vmatpush.bf16.msra.mxu2 %v10784_v2 }
 0x4bf   : > { %v13279_v62 = vld [vmem:[#allocation2 + $0x1bb0] sm:$0xf]  ;;  %v12768_v10 = vor.u32 %v15096_v61, %v12767_v60  ;;  %7875 = vmatpush.bf16.msrb.mxu0 %v12256_v7  ;;  %7844 = vmatmul.bf16.vlgmr.msra.gmra.mxu1 %v15828_v25  ;;  %v16095_v7 = vpop.f32.mrf.mxu2 }
 0x4c0   : > { %v15224_v0 = vld [vmem:[#allocation2 + $0x1bec] sm:$0xf0]  ;;  %7869 = vmatpush.bf16.msra.mxu3 %v11296_v6 }
 0x4c1   : > { %v13791_v3 = vld [vmem:[#allocation2 + $0x1fb0] sm:$0xf]  ;;  %v13280_v11 = vor.u32 %v15224_v0, %v13279_v62  ;;  %7888 = vmatpush.bf16.msrb.mxu1 %v12768_v10  ;;  %7857 = vmatmul.bf16.vlgmr.msra.gmra.mxu2 %v15817_v8 }
 0x4c2   : > { %v15352_v5 = vld [vmem:[#allocation2 + $0x1fec] sm:$0xf0] }
 0x4c3   : > { %v12191_v12 = vld [vmem:[#allocation2 + $0x1330] sm:$0xf]  ;;  %v13792_v55 = vor.u32 %v15352_v5, %v13791_v3  ;;  %7901 = vmatpush.bf16.msrb.mxu2 %v13280_v11  ;;  %7870 = vmatmul.bf16.vlgmr.msra.gmra.mxu3 %v15822_v15 }
 0x4c4   : > { %v14952_v14 = vld [vmem:[#allocation2 + $0x136c] sm:$0xf0] }
 0x4c5   : > { %v12703_v57 = vld [vmem:[#allocation2 + $0x1730] sm:$0xf]  ;;  %v12192_v4 = vor.u32 %v14952_v14, %v12191_v12  ;;  %7914 = vmatpush.bf16.msrb.mxu3 %v13792_v55 }
 0x4c6   : > { %v15080_v28 = vld [vmem:[#allocation2 + $0x176c] sm:$0xf0] }
 0x4c7   : > { %v13215_v19 = vld [vmem:[#allocation2 + $0x1b30] sm:$0xf]  ;;  %v12704_v31 = vor.u32 %v15080_v28, %v12703_v57  ;;  %7876 = vmatpush.bf16.msrb.mxu0 %v12192_v4  ;;  %v16097_v57 = vpop.f32.mrf.mxu3 }
 0x4c8   : > { %v15208_v24 = vld [vmem:[#allocation2 + $0x1b6c] sm:$0xf0] }
 0x4c9   : > { %v13727_v23 = vld [vmem:[#allocation2 + $0x1f30] sm:$0xf]  ;;  %v13216_v33 = vor.u32 %v15208_v24, %v13215_v19  ;;  %7889 = vmatpush.bf16.msrb.mxu1 %v12704_v31  ;;  %v7626_v24 = vpop.f32.mrf.mxu0 }
 0x4ca   : > { %v15336_v29 = vld [vmem:[#allocation2 + $0x1f6c] sm:$0xf0]  ;;  %v14816_v24 = vld [vmem:[#allocation2 + $0xf34] sm:$0xf] }
 0x4cb   : > { %v12127_v35 = vld [vmem:[#allocation2 + $0x12b0] sm:$0xf]  ;;  %v13728_v20 = vor.u32 %v15336_v29, %v13727_v23  ;;  %7902 = vmatpush.bf16.msrb.mxu2 %v13216_v33 }
 0x4cc   : > { %v14936_v39 = vld [vmem:[#allocation2 + $0x12ec] sm:$0xf0] }
 0x4cd   : > { %v12639_v41 = vld [vmem:[#allocation2 + $0x16b0] sm:$0xf]  ;;  %v12128_v46 = vor.u32 %v14936_v39, %v12127_v35  ;;  %7915 = vmatpush.bf16.msrb.mxu3 %v13728_v20  ;;  %v7639_v35 = vpop.f32.mrf.mxu1 }
 0x4ce   : > { %v15064_v32 = vld [vmem:[#allocation2 + $0x16ec] sm:$0xf0]  ;;  %v14416_v35 = vld [vmem:[#allocation2 + $0x2b4] sm:$0xf] }
 0x4cf   : > { %v13151_v44 = vld [vmem:[#allocation2 + $0x1ab0] sm:$0xf]  ;;  %v12640_v30 = vor.u32 %v15064_v32, %v12639_v41  ;;  %7877 = vmatpush.bf16.msrb.mxu0 %v12128_v46 }
 0x4d0   : > { %v15192_v26 = vld [vmem:[#allocation2 + $0x1aec] sm:$0xf0] }
 0x4d1   : > { %v13663_v16 = vld [vmem:[#allocation2 + $0x1eb0] sm:$0xf]  ;;  %v13152_v54 = vor.u32 %v15192_v26, %v13151_v44  ;;  %7890 = vmatpush.bf16.msrb.mxu1 %v12640_v30 }
 0x4d2   : > { %v15320_v45 = vld [vmem:[#allocation2 + $0x1eec] sm:$0xf0] }
 0x4d3   : > { %v12063_v36 = vld [vmem:[#allocation2 + $0x1230] sm:$0xf]  ;;  %v13664_v48 = vor.u32 %v15320_v45, %v13663_v16  ;;  %7903 = vmatpush.bf16.msrb.mxu2 %v13152_v54  ;;  %v16099_v16 = vld [vmem:[#allocation4 + $0x8] sm:$0xff] }
 0x4d4   : > { %v14920_v47 = vld [vmem:[#allocation2 + $0x126c] sm:$0xf0]  ;;  %v1433_v45 = vperm.slane %v16099_v16, 2 }
 0x4d5   : > { %v12575_v13 = vld [vmem:[#allocation2 + $0x1630] sm:$0xf]  ;;  %v12064_v50 = vor.u32 %v14920_v47, %v12063_v36  ;;  %7916 = vmatpush.bf16.msrb.mxu3 %v13664_v48 }
 0x4d6   : > { %v15048_v42 = vld [vmem:[#allocation2 + $0x166c] sm:$0xf0] }
 0x4d7   : > { %v13087_v18 = vld [vmem:[#allocation2 + $0x1a30] sm:$0xf]  ;;  %v12576_v51 = vor.u32 %v15048_v42, %v12575_v13  ;;  %7878 = vmatpush.bf16.msrb.mxu0 %v12064_v50 }
 0x4d8   : > { %v15176_v49 = vld [vmem:[#allocation2 + $0x1a6c] sm:$0xf0] }
 0x4d9   : > { %v13599_v17 = vld [vmem:[#allocation2 + $0x1e30] sm:$0xf]  ;;  %v13088_v21 = vor.u32 %v15176_v49, %v13087_v18  ;;  %7891 = vmatpush.bf16.msrb.mxu1 %v12576_v51  ;;  %v7652_v18 = vpop.f32.mrf.mxu2  ;;  %v7665_v51 = vpop.f32.mrf.mxu3 }
 0x4da   : > { %v15304_v43 = vld [vmem:[#allocation2 + $0x1e6c] sm:$0xf0]  ;;  %v14656_v18 = vld [vmem:[#allocation2 + $0xa34] sm:$0xf]  ;;  %v7676_v51 = vpop.f32.mrf.mxu0 }
 0x4db   : > { %v11999_v52 = vld [vmem:[#allocation2 + $0x11b0] sm:$0xf]  ;;  %v13600_v58 = vor.u32 %v15304_v43, %v13599_v17  ;;  %7904 = vmatpush.bf16.msrb.mxu2 %v13088_v21  ;;  %v14448_v21 = vld [vmem:[#allocation2 + $0x3b4] sm:$0xf] }
 0x4dc   : > { %v14904_v56 = vld [vmem:[#allocation2 + $0x11ec] sm:$0xf0] }
 0x4dd   : > { %v12511_v27 = vld [vmem:[#allocation2 + $0x15b0] sm:$0xf]  ;;  %v12000_v0 = vor.u32 %v14904_v56, %v11999_v52  ;;  %7917 = vmatpush.bf16.msrb.mxu3 %v13600_v58  ;;  %v10209_v52 = vld [vmem:[#allocation2 + $0x3f0] sm:$0xf0] }
 0x4de   : > { %v15032_v59 = vld [vmem:[#allocation2 + $0x15ec] sm:$0xf0]  ;;  %v14576_v56 = vld [vmem:[#allocation2 + $0x7b4] sm:$0xf] }
 0x4df   : > { %v13023_v60 = vld [vmem:[#allocation2 + $0x19b0] sm:$0xf]  ;;  %v12512_v1 = vor.u32 %v15032_v59, %v12511_v27  ;;  %7879 = vmatpush.bf16.msrb.mxu0 %v12000_v0  ;;  %v7625_v27 = vadd.f32 %v16091_v22, %v1433_v45  ;;  %v10721_v59 = vld [vmem:[#allocation2 + $0x7f0] sm:$0xf0] }
 0x4e0   : > { %v15160_v53 = vld [vmem:[#allocation2 + $0x19ec] sm:$0xf0]  ;;  %v14832_v0 = vld [vmem:[#allocation2 + $0xfb4] sm:$0xf] }
 0x4e1   : > { %v13535_v61 = vld [vmem:[#allocation2 + $0x1db0] sm:$0xf]  ;;  %v13024_v2 = vor.u32 %v15160_v53, %v13023_v60  ;;  %7892 = vmatpush.bf16.msrb.mxu1 %v12512_v1  ;;  %v14704_v60 = vld [vmem:[#allocation2 + $0xbb4] sm:$0xf]  ;;  %v7638_v22 = vadd.f32 %v16093_v63, %v7625_v27 }
 0x4e2   : > { %v15288_v62 = vld [vmem:[#allocation2 + $0x1dec] sm:$0xf0]  ;;  %v11233_v53 = vld [vmem:[#allocation2 + $0xbf0] sm:$0xf0] }
 0x4e3   : > { %v11935_v3 = vld [vmem:[#allocation2 + $0x1130] sm:$0xf]  ;;  %v13536_v10 = vor.u32 %v15288_v62, %v13535_v61  ;;  %7905 = vmatpush.bf16.msrb.mxu2 %v13024_v2  ;;  %v11745_v1 = vld [vmem:[#allocation2 + $0xff0] sm:$0xf0] }
 0x4e4   : > { %v14888_v5 = vld [vmem:[#allocation2 + $0x116c] sm:$0xf0]  ;;  %v10081_v63 = vld [vmem:[#allocation2 + $0x2f0] sm:$0xf0] }
 0x4e5   : > { %v12447_v6 = vld [vmem:[#allocation2 + $0x1530] sm:$0xf]  ;;  %v11936_v19 = vor.u32 %v14888_v5, %v11935_v3  ;;  %7918 = vmatpush.bf16.msrb.mxu3 %v13536_v10  ;;  %v10212_v3 = vor.u32 %v14448_v21, %v10209_v52  ;;  %v10724_v5 = vor.u32 %v14576_v56, %v10721_v59  ;;  %v14432_v10 = vld [vmem:[#allocation2 + $0x334] sm:$0xf]  ;;  %v7689_v59 = vpop.f32.mrf.mxu1 }
 0x4e6   : > { %v15016_v11 = vld [vmem:[#allocation2 + $0x156c] sm:$0xf0]  ;;  %v11617_v45 = vld [vmem:[#allocation2 + $0xef0] sm:$0xf0] }
 0x4e7   : > { %v12959_v12 = vld [vmem:[#allocation2 + $0x1930] sm:$0xf]  ;;  %v12448_v23 = vor.u32 %v15016_v11, %v12447_v6  ;;  %7880 = vmatpush.bf16.msrb.mxu0 %v11936_v19  ;;  %v11236_v6 = vor.u32 %v14704_v60, %v11233_v53  ;;  %v10145_v11 = vld [vmem:[#allocation2 + $0x370] sm:$0xf0] }
 0x4e8   : > { %v15144_v14 = vld [vmem:[#allocation2 + $0x196c] sm:$0xf0]  ;;  %v11169_v19 = vld [vmem:[#allocation2 + $0xb70] sm:$0xf0] }
 0x4e9   : > { %v13471_v55 = vld [vmem:[#allocation2 + $0x1d30] sm:$0xf]  ;;  %v12960_v29 = vor.u32 %v15144_v14, %v12959_v12  ;;  %7893 = vmatpush.bf16.msrb.mxu1 %v12448_v23  ;;  %v14560_v12 = vld [vmem:[#allocation2 + $0x734] sm:$0xf]  ;;  %v11748_v14 = vor.u32 %v14832_v0, %v11745_v1 }
 0x4ea   : > { %v15272_v28 = vld [vmem:[#allocation2 + $0x1d6c] sm:$0xf0]  ;;  %v11681_v23 = vld [vmem:[#allocation2 + $0xf70] sm:$0xf0] }
 0x4eb   : > { %v11871_v4 = vld [vmem:[#allocation2 + $0x10b0] sm:$0xf]  ;;  %v13472_v39 = vor.u32 %v15272_v28, %v13471_v55  ;;  %7906 = vmatpush.bf16.msrb.mxu2 %v12960_v29  ;;  %v10657_v55 = vld [vmem:[#allocation2 + $0x770] sm:$0xf0]  ;;  %v10148_v29 = vor.u32 %v14432_v10, %v10145_v11 }
 0x4ec   : > { %v14872_v31 = vld [vmem:[#allocation2 + $0x10ec] sm:$0xf0]  ;;  %v14688_v28 = vld [vmem:[#allocation2 + $0xb34] sm:$0xf] }
 0x4ed   : > { %v12383_v33 = vld [vmem:[#allocation2 + $0x14b0] sm:$0xf]  ;;  %v11872_v46 = vor.u32 %v14872_v31, %v11871_v4  ;;  %7919 = vmatpush.bf16.msrb.mxu3 %v13472_v39  ;;  %v10660_v4 = vor.u32 %v14560_v12, %v10657_v55  ;;  %v11172_v31 = vor.u32 %v14688_v28, %v11169_v19  ;;  %v14544_v39 = vld [vmem:[#allocation2 + $0x6b4] sm:$0xf] }
 0x4ee   : > { %v15000_v41 = vld [vmem:[#allocation2 + $0x14ec] sm:$0xf0]  ;;  %v14384_v56 = vld [vmem:[#allocation2 + $0x1b4] sm:$0xf] }
 0x4ef   : > { %v12895_v20 = vld [vmem:[#allocation2 + $0x18b0] sm:$0xf]  ;;  %v12384_v36 = vor.u32 %v15000_v41, %v12383_v33  ;;  %7881 = vmatpush.bf16.msrb.mxu0 %v11872_v46  ;;  %v7651_v33 = vadd.f32 %v16095_v7, %v7638_v22  ;;  %v11684_v41 = vor.u32 %v14816_v24, %v11681_v23  ;;  %v10084_v46 = vor.u32 %v14416_v35, %v10081_v63  ;;  %v9953_v27 = vld [vmem:[#allocation2 + $0x1f0] sm:$0xf0]  ;;  %v7702_v22 = vpop.f32.mrf.mxu2  ;;  %v7715_v23 = vpop.f32.mrf.mxu3 }
 0x4f0   : > { %v15128_v32 = vld [vmem:[#allocation2 + $0x18ec] sm:$0xf0]  ;;  %v10465_v53 = vld [vmem:[#allocation2 + $0x5f0] sm:$0xf0]  ;;  %v7678_v63 = vpop.f32.mrf.mxu0 }
 0x4f1   : > { %v13407_v44 = vld [vmem:[#allocation2 + $0x1cb0] sm:$0xf]  ;;  %v12896_v47 = vor.u32 %v15128_v32, %v12895_v20  ;;  %7894 = vmatpush.bf16.msrb.mxu1 %v12384_v36  ;;  %v10593_v20 = vld [vmem:[#allocation2 + $0x6f0] sm:$0xf0] }
 0x4f2   : > { %v15256_v26 = vld [vmem:[#allocation2 + $0x1cec] sm:$0xf0]  ;;  %v14672_v32 = vld [vmem:[#allocation2 + $0xab4] sm:$0xf]  ;;  %v10596_v7 = vor.u32 %v14544_v39, %v10593_v20 }
 0x4f3   : > { %v11807_v30 = vld [vmem:[#allocation2 + $0x1030] sm:$0xf]  ;;  %v13408_v49 = vor.u32 %v15256_v26, %v13407_v44  ;;  %7907 = vmatpush.bf16.msrb.mxu2 %v12896_v47  ;;  %v11105_v44 = vld [vmem:[#allocation2 + $0xaf0] sm:$0xf0] }
 0x4f4   : > { %v14856_v54 = vld [vmem:[#allocation2 + $0x106c] sm:$0xf0]  ;;  %v14800_v26 = vld [vmem:[#allocation2 + $0xeb4] sm:$0xf] }
 0x4f5   : > { %v12319_v13 = vld [vmem:[#allocation2 + $0x1430] sm:$0xf]  ;;  %v11808_v58 = vor.u32 %v14856_v54, %v11807_v30  ;;  %7920 = vmatpush.bf16.msrb.mxu3 %v13408_v49  ;;  %v11108_v30 = vor.u32 %v14672_v32, %v11105_v44  ;;  %v7664_v54 = vadd.f32 %v16097_v57, %v7651_v33  ;;  %v14400_v36 = vld [vmem:[#allocation2 + $0x234] sm:$0xf] }
 0x4f6   : > { %v14984_v48 = vld [vmem:[#allocation2 + $0x146c] sm:$0xf0]  ;;  %v10017_v47 = vld [vmem:[#allocation2 + $0x270] sm:$0xf0] }
 0x4f7   : > { %v12831_v42 = vld [vmem:[#allocation2 + $0x1830] sm:$0xf]  ;;  %v12320_v61 = vor.u32 %v14984_v48, %v12319_v13  ;;  %7882 = vmatpush.bf16.msrb.mxu0 %v11808_v58  ;;  %v14528_v13 = vld [vmem:[#allocation2 + $0x634] sm:$0xf]  ;;  %v11620_v48 = vor.u32 %v14800_v26, %v11617_v45  ;;  %v7677_v58 = vadd.f32 %v7676_v51, %v7664_v54  ;;  %v7691_v26 = vpop.f32.mrf.mxu1 }
 0x4f8   : > { %v15112_v17 = vld [vmem:[#allocation2 + $0x186c] sm:$0xf0]  ;;  %v11041_v49 = vld [vmem:[#allocation2 + $0xa70] sm:$0xf0] }
 0x4f9   : > { %v13343_v43 = vld [vmem:[#allocation2 + $0x1c30] sm:$0xf]  ;;  %v12832_v62 = vor.u32 %v15112_v17, %v12831_v42  ;;  %7895 = vmatpush.bf16.msrb.mxu1 %v12320_v61  ;;  %v10529_v42 = vld [vmem:[#allocation2 + $0x670] sm:$0xf0]  ;;  %v11044_v52 = vor.u32 %v14656_v18, %v11041_v49 }
 0x4fa   : > { %v15240_v50 = vld [vmem:[#allocation2 + $0x1c6c] sm:$0xf0]  ;;  %7883 = vmatmul.bf16.vlgmr.msrb.gmra.mxu0 %v15837_v37  ;;  %v14784_v17 = vld [vmem:[#allocation2 + $0xe34] sm:$0xf]  ;;  %v10532_v21 = vor.u32 %v14528_v13, %v10529_v42 }
 0x4fb   : > { %v13344_v2 = vor.u32 %v15240_v50, %v13343_v43  ;;  %7908 = vmatpush.bf16.msrb.mxu2 %v12832_v62  ;;  %7927 = vmatpush.bf16.msra.mxu0 %v10212_v3  ;;  %v11553_v43 = vld [vmem:[#allocation2 + $0xe70] sm:$0xf0]  ;;  %v10020_v50 = vor.u32 %v14400_v36, %v10017_v47  ;;  %v9956_v3 = vor.u32 %v14384_v56, %v9953_v27  ;;  %v7717_v27 = vpop.f32.mrf.mxu3 }
 0x4fc   : > { %7896 = vmatmul.bf16.vlgmr.msrb.gmra.mxu1 %v15841_v40  ;;  %v14512_v57 = vld [vmem:[#allocation2 + $0x5b4] sm:$0xf]  ;;  %v11556_v60 = vor.u32 %v14784_v17, %v11553_v43 }
 0x4fd   : > { %7921 = vmatpush.bf16.msrb.mxu3 %v13344_v2  ;;  %7940 = vmatpush.bf16.msra.mxu1 %v10724_v5  ;;  %v14640_v61 = vld [vmem:[#allocation2 + $0x9b4] sm:$0xf]  ;;  %v7690_v2 = vadd.f32 %v7689_v59, %v7677_v58  ;;  %v10468_v5 = vor.u32 %v14512_v57, %v10465_v53 }
 0x4fe   : > { %7909 = vmatmul.bf16.vlgmr.msrb.gmra.mxu2 %v15835_v34  ;;  %v10977_v62 = vld [vmem:[#allocation2 + $0x9f0] sm:$0xf0] }
 0x4ff   : > { %7953 = vmatpush.bf16.msra.mxu2 %v11236_v6  ;;  %7928 = vmatpush.bf16.msra.mxu0 %v10148_v29  ;;  %v14768_v0 = vld [vmem:[#allocation2 + $0xdb4] sm:$0xf]  ;;  %v10980_v6 = vor.u32 %v14640_v61, %v10977_v62  ;;  %v7703_v24 = vadd.f32 %v7702_v22, %v7690_v2 }
 0x500   : > { %7922 = vmatmul.bf16.vlgmr.msrb.gmra.mxu3 %v15839_v38  ;;  %v11489_v1 = vld [vmem:[#allocation2 + $0xdf0] sm:$0xf0] }
 0x501   : > { %7966 = vmatpush.bf16.msra.mxu3 %v11748_v14  ;;  %7941 = vmatpush.bf16.msra.mxu1 %v10660_v4  ;;  %v14368_v10 = vld [vmem:[#allocation2 + $0x134] sm:$0xf]  ;;  %v11492_v14 = vor.u32 %v14768_v0, %v11489_v1  ;;  %v7716_v35 = vadd.f32 %v7715_v23, %v7703_v24 }
 0x502   : > { %v9889_v11 = vld [vmem:[#allocation2 + $0x170] sm:$0xf0] }
 0x503   : > { %7954 = vmatpush.bf16.msra.mxu2 %v11172_v31  ;;  %7929 = vmatpush.bf16.msra.mxu0 %v10084_v46  ;;  %v14496_v12 = vld [vmem:[#allocation2 + $0x534] sm:$0xf]  ;;  %v9892_v31 = vor.u32 %v14368_v10, %v9889_v11 }
 0x504   : > { %v10401_v55 = vld [vmem:[#allocation2 + $0x570] sm:$0xf0] }
 0x505   : > { %7967 = vmatpush.bf16.msra.mxu3 %v11684_v41  ;;  %7942 = vmatpush.bf16.msra.mxu1 %v10596_v7  ;;  %v14624_v28 = vld [vmem:[#allocation2 + $0x934] sm:$0xf]  ;;  %v10404_v39 = vor.u32 %v14496_v12, %v10401_v55 }
 0x506   : > { %v10913_v19 = vld [vmem:[#allocation2 + $0x970] sm:$0xf0] }
 0x507   : > { %7955 = vmatpush.bf16.msra.mxu2 %v11108_v30  ;;  %7930 = vmatpush.bf16.msra.mxu0 %v10020_v50  ;;  %v14752_v29 = vld [vmem:[#allocation2 + $0xd34] sm:$0xf]  ;;  %v10916_v41 = vor.u32 %v14624_v28, %v10913_v19  ;;  %v8249_v30 = vmax.f32 %v7716_v35, 0.0  ;;  %v7704_v50 = vpop.f32.mrf.mxu2 }
 0x508   : > { %v11425_v4 = vld [vmem:[#allocation2 + $0xd70] sm:$0xf0]  ;;  %v16115_v50 = vpop.f32.mrf.mxu0 }
 0x509   : > { %7968 = vmatpush.bf16.msra.mxu3 %v11620_v48  ;;  %7943 = vmatpush.bf16.msra.mxu1 %v10532_v21  ;;  %v14352_v33 = vld [vmem:[#allocation2 + $0xb4] sm:$0xf]  ;;  %v11428_v45 = vor.u32 %v14752_v29, %v11425_v4  ;;  %8265 = vst [vmem:[%s15878_s18 + $0x50] sm:$0xff] %v8249_v30 }
 0x50a   : > { %v9825_v20 = vld [vmem:[#allocation2 + $0xf0] sm:$0xf0] }
 0x50b   : > { %7956 = vmatpush.bf16.msra.mxu2 %v11044_v52  ;;  %7931 = vmatpush.bf16.msra.mxu0 %v9956_v3  ;;  %v14480_v32 = vld [vmem:[#allocation2 + $0x4b4] sm:$0xf]  ;;  %v9828_v47 = vor.u32 %v14352_v33, %v9825_v20 }
 0x50c   : > { %v10337_v44 = vld [vmem:[#allocation2 + $0x4f0] sm:$0xf0] }
 0x50d   : > { %7969 = vmatpush.bf16.msra.mxu3 %v11556_v60  ;;  %7944 = vmatpush.bf16.msra.mxu1 %v10468_v5  ;;  %v14608_v46 = vld [vmem:[#allocation2 + $0x8b4] sm:$0xf]  ;;  %v10340_v42 = vor.u32 %v14480_v32, %v10337_v44 }
 0x50e   : > { %v10849_v7 = vld [vmem:[#allocation2 + $0x8f0] sm:$0xf0] }
 0x50f   : > { %7957 = vmatpush.bf16.msra.mxu2 %v10980_v6  ;;  %v14736_v54 = vld [vmem:[#allocation2 + $0xcb4] sm:$0xf]  ;;  %7932 = vmatpush.bf16.msra.mxu0 %v9892_v31  ;;  %v10852_v18 = vor.u32 %v14608_v46, %v10849_v7 }
 0x510   : > { %v11361_v36 = vld [vmem:[#allocation2 + $0xcf0] sm:$0xf0] }
 0x511   : > { %7970 = vmatpush.bf16.msra.mxu3 %v11492_v14  ;;  %v14336_v13 = vld [vmem:[#allocation2 + $0x34] sm:$0xf]  ;;  %7945 = vmatpush.bf16.msra.mxu1 %v10404_v39  ;;  %v11364_v51 = vor.u32 %v14736_v54, %v11361_v36 }
 0x512   : > { %v9761_v48 = vld [vmem:[#allocation2 + $0x70] sm:$0xf0] }
 0x513   : > { %7958 = vmatpush.bf16.msra.mxu2 %v10916_v41  ;;  %v14464_v49 = vld [vmem:[#allocation2 + $0x434] sm:$0xf]  ;;  %7933 = vmatpush.bf16.msra.mxu0 %v9828_v47  ;;  %v9764_v60 = vor.u32 %v14336_v13, %v9761_v48 }
 0x514   : > { %v10273_v17 = vld [vmem:[#allocation2 + $0x470] sm:$0xf0] }
 0x515   : > { %v14592_v43 = vld [vmem:[#allocation2 + $0x834] sm:$0xf]  ;;  %7971 = vmatpush.bf16.msra.mxu3 %v11428_v45  ;;  %7946 = vmatpush.bf16.msra.mxu1 %v10340_v42  ;;  %v10276_v0 = vor.u32 %v14464_v49, %v10273_v17 }
 0x516   : > { %v10785_v21 = vld [vmem:[#allocation2 + $0x870] sm:$0xf0] }
 0x517   : > { %v14720_v52 = vld [vmem:[#allocation2 + $0xc34] sm:$0xf]  ;;  %7959 = vmatpush.bf16.msra.mxu2 %v10852_v18  ;;  %v10788_v1 = vor.u32 %v14592_v43, %v10785_v21  ;;  %7934 = vmatpush.bf16.msra.mxu0 %v9764_v60 }
 0x518   : > { %v11297_v56 = vld [vmem:[#allocation2 + $0xc70] sm:$0xf0] }
 0x519   : > { %v14960_v57 = vld [vmem:[#allocation2 + $0x13b4] sm:$0xf]  ;;  %7972 = vmatpush.bf16.msra.mxu3 %v11364_v51  ;;  %v11300_v5 = vor.u32 %v14720_v52, %v11297_v56  ;;  %7947 = vmatpush.bf16.msra.mxu1 %v10276_v0 }
 0x51a   : > { %v12257_v58 = vld [vmem:[#allocation2 + $0x13f0] sm:$0xf0]  ;;  %7935 = vmatmul.bf16.vlgmr.msra.gmra.mxu0 %v15819_v9 }
 0x51b   : > { %v15088_v59 = vld [vmem:[#allocation2 + $0x17b4] sm:$0xf]  ;;  %v12260_v6 = vor.u32 %v14960_v57, %v12257_v58  ;;  %7960 = vmatpush.bf16.msra.mxu2 %v10788_v1  ;;  %v16117_v57 = vpop.f32.mrf.mxu1 }
 0x51c   : > { %v12769_v53 = vld [vmem:[#allocation2 + $0x17f0] sm:$0xf0]  ;;  %7948 = vmatmul.bf16.vlgmr.msra.gmra.mxu1 %v15828_v25 }
 0x51d   : > { %v15216_v61 = vld [vmem:[#allocation2 + $0x1bb4] sm:$0xf]  ;;  %v12772_v10 = vor.u32 %v15088_v59, %v12769_v53  ;;  %7973 = vmatpush.bf16.msra.mxu3 %v11300_v5  ;;  %7979 = vmatpush.bf16.msrb.mxu0 %v12260_v6 }
 0x51e   : > { %v13281_v62 = vld [vmem:[#allocation2 + $0x1bf0] sm:$0xf0]  ;;  %7961 = vmatmul.bf16.vlgmr.msra.gmra.mxu2 %v15817_v8 }
 0x51f   : > { %v15344_v2 = vld [vmem:[#allocation2 + $0x1fb4] sm:$0xf]  ;;  %v13284_v11 = vor.u32 %v15216_v61, %v13281_v62  ;;  %7992 = vmatpush.bf16.msrb.mxu1 %v12772_v10  ;;  %v16119_v10 = vpop.f32.mrf.mxu2 }
 0x520   : > { %v13793_v3 = vld [vmem:[#allocation2 + $0x1ff0] sm:$0xf0]  ;;  %7974 = vmatmul.bf16.vlgmr.msra.gmra.mxu3 %v15822_v15 }
 0x521   : > { %v14944_v12 = vld [vmem:[#allocation2 + $0x1334] sm:$0xf]  ;;  %v13796_v55 = vor.u32 %v15344_v2, %v13793_v3  ;;  %8005 = vmatpush.bf16.msrb.mxu2 %v13284_v11 }
 0x522   : > { %v12193_v22 = vld [vmem:[#allocation2 + $0x1370] sm:$0xf0] }
 0x523   : > { %v15072_v14 = vld [vmem:[#allocation2 + $0x1734] sm:$0xf]  ;;  %v12196_v4 = vor.u32 %v14944_v12, %v12193_v22  ;;  %8018 = vmatpush.bf16.msrb.mxu3 %v13796_v55  ;;  %v16121_v55 = vpop.f32.mrf.mxu3 }
 0x524   : > { %v12705_v28 = vld [vmem:[#allocation2 + $0x1770] sm:$0xf0] }
 0x525   : > { %v15200_v19 = vld [vmem:[#allocation2 + $0x1b34] sm:$0xf]  ;;  %v12708_v31 = vor.u32 %v15072_v14, %v12705_v28  ;;  %7980 = vmatpush.bf16.msrb.mxu0 %v12196_v4 }
 0x526   : > { %v13217_v24 = vld [vmem:[#allocation2 + $0x1b70] sm:$0xf0] }
 0x527   : > { %v15328_v23 = vld [vmem:[#allocation2 + $0x1f34] sm:$0xf]  ;;  %v13220_v33 = vor.u32 %v15200_v19, %v13217_v24  ;;  %7993 = vmatpush.bf16.msrb.mxu1 %v12708_v31 }
 0x528   : > { %v13729_v29 = vld [vmem:[#allocation2 + $0x1f70] sm:$0xf0] }
 0x529   : > { %v14928_v35 = vld [vmem:[#allocation2 + $0x12b4] sm:$0xf]  ;;  %v13732_v41 = vor.u32 %v15328_v23, %v13729_v29  ;;  %8006 = vmatpush.bf16.msrb.mxu2 %v13220_v33  ;;  %v7730_v23 = vpop.f32.mrf.mxu0 }
 0x52a   : > { %v12129_v63 = vld [vmem:[#allocation2 + $0x12f0] sm:$0xf0]  ;;  %v14825_v23 = vld [vmem:[#allocation2 + $0xf74] sm:$0xf0] }
 0x52b   : > { %v15056_v39 = vld [vmem:[#allocation2 + $0x16b4] sm:$0xf]  ;;  %v12132_v46 = vor.u32 %v14928_v35, %v12129_v63  ;;  %8019 = vmatpush.bf16.msrb.mxu3 %v13732_v41  ;;  %v7743_v63 = vpop.f32.mrf.mxu1 }
 0x52c   : > { %v12641_v20 = vld [vmem:[#allocation2 + $0x16f0] sm:$0xf0]  ;;  %v10599_v63 = vld [vmem:[#allocation2 + $0x6b8] sm:$0xf] }
 0x52d   : > { %v15184_v32 = vld [vmem:[#allocation2 + $0x1ab4] sm:$0xf]  ;;  %v12644_v7 = vor.u32 %v15056_v39, %v12641_v20  ;;  %7981 = vmatpush.bf16.msrb.mxu0 %v12132_v46 }
 0x52e   : > { %v13153_v44 = vld [vmem:[#allocation2 + $0x1af0] sm:$0xf0] }
 0x52f   : > { %v15312_v26 = vld [vmem:[#allocation2 + $0x1eb4] sm:$0xf]  ;;  %v13156_v30 = vor.u32 %v15184_v32, %v13153_v44  ;;  %7994 = vmatpush.bf16.msrb.mxu1 %v12644_v7 }
 0x530   : > { %v13665_v45 = vld [vmem:[#allocation2 + $0x1ef0] sm:$0xf0] }
 0x531   : > { %v14912_v54 = vld [vmem:[#allocation2 + $0x1234] sm:$0xf]  ;;  %v13668_v13 = vor.u32 %v15312_v26, %v13665_v45  ;;  %8007 = vmatpush.bf16.msrb.mxu2 %v13156_v30  ;;  %v1434_v45 = vperm.slane %v16099_v16, 3  ;;  %v14457_v16 = vld [vmem:[#allocation2 + $0x3f4] sm:$0xf0] }
 0x532   : > { %v12065_v36 = vld [vmem:[#allocation2 + $0x1270] sm:$0xf0] }
 0x533   : > { %v15040_v47 = vld [vmem:[#allocation2 + $0x1634] sm:$0xf]  ;;  %v12068_v43 = vor.u32 %v14912_v54, %v12065_v36  ;;  %8020 = vmatpush.bf16.msrb.mxu3 %v13668_v13 }
 0x534   : > { %v12577_v48 = vld [vmem:[#allocation2 + $0x1670] sm:$0xf0] }
 0x535   : > { %v15168_v42 = vld [vmem:[#allocation2 + $0x1a34] sm:$0xf]  ;;  %v12580_v51 = vor.u32 %v15040_v47, %v12577_v48  ;;  %7982 = vmatpush.bf16.msrb.mxu0 %v12068_v43 }
 0x536   : > { %v13089_v18 = vld [vmem:[#allocation2 + $0x1a70] sm:$0xf0] }
 0x537   : > { %v15296_v49 = vld [vmem:[#allocation2 + $0x1e34] sm:$0xf]  ;;  %v13092_v21 = vor.u32 %v15168_v42, %v13089_v18  ;;  %7995 = vmatpush.bf16.msrb.mxu1 %v12580_v51  ;;  %v7756_v42 = vpop.f32.mrf.mxu2  ;;  %v7769_v51 = vpop.f32.mrf.mxu3 }
 0x538   : > { %v13601_v17 = vld [vmem:[#allocation2 + $0x1e70] sm:$0xf0]  ;;  %v14665_v42 = vld [vmem:[#allocation2 + $0xa74] sm:$0xf0] }
 0x539   : > { %v14896_v52 = vld [vmem:[#allocation2 + $0x11b4] sm:$0xf]  ;;  %v13604_v58 = vor.u32 %v15296_v49, %v13601_v17  ;;  %8008 = vmatpush.bf16.msrb.mxu2 %v13092_v21  ;;  %v10215_v21 = vld [vmem:[#allocation2 + $0x3b8] sm:$0xf] }
 0x53a   : > { %v12001_v56 = vld [vmem:[#allocation2 + $0x11f0] sm:$0xf0] }
 0x53b   : > { %v15024_v27 = vld [vmem:[#allocation2 + $0x15b4] sm:$0xf]  ;;  %v12004_v0 = vor.u32 %v14896_v52, %v12001_v56  ;;  %8021 = vmatpush.bf16.msrb.mxu3 %v13604_v58  ;;  %v10727_v52 = vld [vmem:[#allocation2 + $0x7b8] sm:$0xf]  ;;  %v7729_v56 = vadd.f32 %v16115_v50, %v1434_v45 }
 0x53c   : > { %v12513_v59 = vld [vmem:[#allocation2 + $0x15f0] sm:$0xf0]  ;;  %v14585_v58 = vld [vmem:[#allocation2 + $0x7f4] sm:$0xf0] }
 0x53d   : > { %v15152_v60 = vld [vmem:[#allocation2 + $0x19b4] sm:$0xf]  ;;  %v12516_v1 = vor.u32 %v15024_v27, %v12513_v59  ;;  %7983 = vmatpush.bf16.msrb.mxu0 %v12004_v0  ;;  %v11239_v59 = vld [vmem:[#allocation2 + $0xbb8] sm:$0xf]  ;;  %v7742_v50 = vadd.f32 %v16117_v57, %v7729_v56 }
 0x53e   : > { %v13025_v53 = vld [vmem:[#allocation2 + $0x19f0] sm:$0xf0]  ;;  %v14841_v0 = vld [vmem:[#allocation2 + $0xff4] sm:$0xf0] }
 0x53f   : > { %v15280_v61 = vld [vmem:[#allocation2 + $0x1db4] sm:$0xf]  ;;  %v13028_v2 = vor.u32 %v15152_v60, %v13025_v53  ;;  %7996 = vmatpush.bf16.msrb.mxu1 %v12516_v1  ;;  %v14713_v60 = vld [vmem:[#allocation2 + $0xbf4] sm:$0xf0] }
 0x540   : > { %v13537_v62 = vld [vmem:[#allocation2 + $0x1df0] sm:$0xf0]  ;;  %v14425_v57 = vld [vmem:[#allocation2 + $0x2f4] sm:$0xf0] }
 0x541   : > { %v14880_v3 = vld [vmem:[#allocation2 + $0x1134] sm:$0xf]  ;;  %v13540_v11 = vor.u32 %v15280_v61, %v13537_v62  ;;  %8009 = vmatpush.bf16.msrb.mxu2 %v13028_v2  ;;  %v11751_v62 = vld [vmem:[#allocation2 + $0xfb8] sm:$0xf]  ;;  %v10216_v2 = vor.u32 %v14457_v16, %v10215_v21 }
 0x542   : > { %v11937_v5 = vld [vmem:[#allocation2 + $0x1170] sm:$0xf0]  ;;  %v9959_v16 = vld [vmem:[#allocation2 + $0x1b8] sm:$0xf] }
 0x543   : > { %v15008_v6 = vld [vmem:[#allocation2 + $0x1534] sm:$0xf]  ;;  %v11940_v24 = vor.u32 %v14880_v3, %v11937_v5  ;;  %8022 = vmatpush.bf16.msrb.mxu3 %v13540_v11  ;;  %v10728_v3 = vor.u32 %v14585_v58, %v10727_v52  ;;  %v11240_v5 = vor.u32 %v14713_v60, %v11239_v59  ;;  %v14441_v11 = vld [vmem:[#allocation2 + $0x374] sm:$0xf0] }
 0x544   : > { %v12449_v12 = vld [vmem:[#allocation2 + $0x1570] sm:$0xf0]  ;;  %v14393_v52 = vld [vmem:[#allocation2 + $0x1f4] sm:$0xf0] }
 0x545   : > { %v15136_v22 = vld [vmem:[#allocation2 + $0x1934] sm:$0xf]  ;;  %v12452_v29 = vor.u32 %v15008_v6, %v12449_v12  ;;  %7984 = vmatpush.bf16.msrb.mxu0 %v11940_v24  ;;  %v10151_v6 = vld [vmem:[#allocation2 + $0x338] sm:$0xf] }
 0x546   : > { %v12961_v14 = vld [vmem:[#allocation2 + $0x1970] sm:$0xf0]  ;;  %v10663_v12 = vld [vmem:[#allocation2 + $0x738] sm:$0xf] }
 0x547   : > { %v15264_v28 = vld [vmem:[#allocation2 + $0x1d34] sm:$0xf]  ;;  %v12964_v4 = vor.u32 %v15136_v22, %v12961_v14  ;;  %7997 = vmatpush.bf16.msrb.mxu1 %v12452_v29  ;;  %v11752_v22 = vor.u32 %v14841_v0, %v11751_v62  ;;  %v14569_v14 = vld [vmem:[#allocation2 + $0x774] sm:$0xf0]  ;;  %v10152_v29 = vor.u32 %v14441_v11, %v10151_v6 }
 0x548   : > { %v13473_v19 = vld [vmem:[#allocation2 + $0x1d70] sm:$0xf0]  ;;  %v11687_v24 = vld [vmem:[#allocation2 + $0xf38] sm:$0xf] }
 0x549   : > { %v14864_v31 = vld [vmem:[#allocation2 + $0x10b4] sm:$0xf]  ;;  %v13476_v39 = vor.u32 %v15264_v28, %v13473_v19  ;;  %8010 = vmatpush.bf16.msrb.mxu2 %v12964_v4  ;;  %v11175_v28 = vld [vmem:[#allocation2 + $0xb38] sm:$0xf]  ;;  %v10664_v4 = vor.u32 %v14569_v14, %v10663_v12  ;;  %v7806_v12 = vpop.f32.mrf.mxu2 }
 0x54a   : > { %v11873_v33 = vld [vmem:[#allocation2 + $0x10f0] sm:$0xf0]  ;;  %v14697_v19 = vld [vmem:[#allocation2 + $0xb74] sm:$0xf0] }
 0x54b   : > { %v14992_v35 = vld [vmem:[#allocation2 + $0x14b4] sm:$0xf]  ;;  %v11876_v46 = vor.u32 %v14864_v31, %v11873_v33  ;;  %8023 = vmatpush.bf16.msrb.mxu3 %v13476_v39  ;;  %v11176_v31 = vor.u32 %v14697_v19, %v11175_v28  ;;  %v7755_v33 = vadd.f32 %v16119_v10, %v7742_v50  ;;  %v11688_v39 = vor.u32 %v14825_v23, %v11687_v24  ;;  %v14521_v59 = vld [vmem:[#allocation2 + $0x5f4] sm:$0xf0]  ;;  %v7819_v24 = vpop.f32.mrf.mxu3 }
 0x54c   : > { %v12385_v41 = vld [vmem:[#allocation2 + $0x14f0] sm:$0xf0]  ;;  %v10983_v60 = vld [vmem:[#allocation2 + $0x9b8] sm:$0xf] }
 0x54d   : > { %v15120_v20 = vld [vmem:[#allocation2 + $0x18b4] sm:$0xf]  ;;  %v12388_v54 = vor.u32 %v14992_v35, %v12385_v41  ;;  %7985 = vmatpush.bf16.msrb.mxu0 %v11876_v46  ;;  %v10087_v35 = vld [vmem:[#allocation2 + $0x2b8] sm:$0xf] }
 0x54e   : > { %v12897_v32 = vld [vmem:[#allocation2 + $0x18f0] sm:$0xf0]  ;;  %v14553_v41 = vld [vmem:[#allocation2 + $0x6f4] sm:$0xf0]  ;;  %v10088_v45 = vor.u32 %v14425_v57, %v10087_v35 }
 0x54f   : > { %v15248_v44 = vld [vmem:[#allocation2 + $0x1cb4] sm:$0xf]  ;;  %v12900_v36 = vor.u32 %v15120_v20, %v12897_v32  ;;  %7998 = vmatpush.bf16.msrb.mxu1 %v12388_v54  ;;  %v11111_v20 = vld [vmem:[#allocation2 + $0xab8] sm:$0xf]  ;;  %v10600_v10 = vor.u32 %v14553_v41, %v10599_v63 }
 0x550   : > { %v13409_v26 = vld [vmem:[#allocation2 + $0x1cf0] sm:$0xf0]  ;;  %v14681_v32 = vld [vmem:[#allocation2 + $0xaf4] sm:$0xf0] }
 0x551   : > { %v14848_v7 = vld [vmem:[#allocation2 + $0x1034] sm:$0xf]  ;;  %v13412_v18 = vor.u32 %v15248_v44, %v13409_v26  ;;  %8011 = vmatpush.bf16.msrb.mxu2 %v12900_v36  ;;  %v11623_v44 = vld [vmem:[#allocation2 + $0xeb8] sm:$0xf]  ;;  %v11112_v46 = vor.u32 %v14681_v32, %v11111_v20 }
 0x552   : > { %v11809_v30 = vld [vmem:[#allocation2 + $0x1070] sm:$0xf0]  ;;  %v14809_v26 = vld [vmem:[#allocation2 + $0xef4] sm:$0xf0] }
 0x553   : > { %v14976_v47 = vld [vmem:[#allocation2 + $0x1434] sm:$0xf]  ;;  %v11812_v27 = vor.u32 %v14848_v7, %v11809_v30  ;;  %8024 = vmatpush.bf16.msrb.mxu3 %v13412_v18  ;;  %v7768_v7 = vadd.f32 %v16121_v55, %v7755_v33  ;;  %v10023_v30 = vld [vmem:[#allocation2 + $0x238] sm:$0xf] }
 0x554   : > { %v12321_v13 = vld [vmem:[#allocation2 + $0x1470] sm:$0xf0]  ;;  %v14409_v54 = vld [vmem:[#allocation2 + $0x274] sm:$0xf0] }
 0x555   : > { %v15104_v48 = vld [vmem:[#allocation2 + $0x1834] sm:$0xf]  ;;  %v12324_v53 = vor.u32 %v14976_v47, %v12321_v13  ;;  %7986 = vmatpush.bf16.msrb.mxu0 %v11812_v27  ;;  %v10535_v36 = vld [vmem:[#allocation2 + $0x638] sm:$0xf]  ;;  %v11624_v47 = vor.u32 %v14809_v26, %v11623_v44  ;;  %v7793_v27 = vpop.f32.mrf.mxu1 }
 0x556   : > { %v12833_v49 = vld [vmem:[#allocation2 + $0x1870] sm:$0xf0]  ;;  %v14537_v13 = vld [vmem:[#allocation2 + $0x674] sm:$0xf0] }
 0x557   : > { %v15232_v17 = vld [vmem:[#allocation2 + $0x1c34] sm:$0xf]  ;;  %v12836_v61 = vor.u32 %v15104_v48, %v12833_v49  ;;  %7999 = vmatpush.bf16.msrb.mxu1 %v12324_v53  ;;  %v11047_v48 = vld [vmem:[#allocation2 + $0xa38] sm:$0xf]  ;;  %v10536_v51 = vor.u32 %v14537_v13, %v10535_v36 }
 0x558   : > { %v13345_v43 = vld [vmem:[#allocation2 + $0x1c70] sm:$0xf0]  ;;  %7987 = vmatmul.bf16.vlgmr.msrb.gmra.mxu0 %v15837_v37  ;;  %v11559_v18 = vld [vmem:[#allocation2 + $0xe38] sm:$0xf]  ;;  %v11048_v21 = vor.u32 %v14665_v42, %v11047_v48 }
 0x559   : > { %v13348_v1 = vor.u32 %v15232_v17, %v13345_v43  ;;  %8012 = vmatpush.bf16.msrb.mxu2 %v12836_v61  ;;  %8031 = vmatpush.bf16.msra.mxu0 %v10216_v2  ;;  %v14793_v49 = vld [vmem:[#allocation2 + $0xe74] sm:$0xf0]  ;;  %v10024_v17 = vor.u32 %v14409_v54, %v10023_v30  ;;  %v7780_v43 = vpop.f32.mrf.mxu0 }
 0x55a   : > { %8000 = vmatmul.bf16.vlgmr.msrb.gmra.mxu1 %v15841_v40  ;;  %v10471_v55 = vld [vmem:[#allocation2 + $0x5b8] sm:$0xf]  ;;  %v7781_v56 = vadd.f32 %v7780_v43, %v7768_v7  ;;  %v11560_v58 = vor.u32 %v14793_v49, %v11559_v18  ;;  %v7808_v49 = vpop.f32.mrf.mxu2 }
 0x55b   : > { %8025 = vmatpush.bf16.msrb.mxu3 %v13348_v1  ;;  %8044 = vmatpush.bf16.msra.mxu1 %v10728_v3  ;;  %v14649_v53 = vld [vmem:[#allocation2 + $0x9f4] sm:$0xf0]  ;;  %v9960_v1 = vor.u32 %v14393_v52, %v9959_v16  ;;  %v10472_v2 = vor.u32 %v14521_v59, %v10471_v55  ;;  %v7821_v16 = vpop.f32.mrf.mxu3 }
 0x55c   : > { %8013 = vmatmul.bf16.vlgmr.msrb.gmra.mxu2 %v15835_v34  ;;  %v11495_v61 = vld [vmem:[#allocation2 + $0xdb8] sm:$0xf]  ;;  %v7794_v0 = vadd.f32 %v7793_v27, %v7781_v56  ;;  %v10984_v3 = vor.u32 %v14649_v53, %v10983_v60 }
 0x55d   : > { %8057 = vmatpush.bf16.msra.mxu2 %v11240_v5  ;;  %8032 = vmatpush.bf16.msra.mxu0 %v10152_v29  ;;  %v14777_v62 = vld [vmem:[#allocation2 + $0xdf4] sm:$0xf0]  ;;  %v7795_v32 = vpop.f32.mrf.mxu1 }
 0x55e   : > { %8026 = vmatmul.bf16.vlgmr.msrb.gmra.mxu3 %v15839_v38  ;;  %v9895_v5 = vld [vmem:[#allocation2 + $0x138] sm:$0xf]  ;;  %v11496_v50 = vor.u32 %v14777_v62, %v11495_v61  ;;  %v7807_v19 = vadd.f32 %v7806_v12, %v7794_v0 }
 0x55f   : > { %8070 = vmatpush.bf16.msra.mxu3 %v11752_v22  ;;  %8045 = vmatpush.bf16.msra.mxu1 %v10664_v4  ;;  %v14377_v6 = vld [vmem:[#allocation2 + $0x174] sm:$0xf0] }
 0x560   : > { %v10407_v11 = vld [vmem:[#allocation2 + $0x538] sm:$0xf]  ;;  %v9896_v4 = vor.u32 %v14377_v6, %v9895_v5  ;;  %v7820_v33 = vadd.f32 %v7819_v24, %v7807_v19 }
 0x561   : > { %8058 = vmatpush.bf16.msra.mxu2 %v11176_v31  ;;  %8033 = vmatpush.bf16.msra.mxu0 %v10088_v45  ;;  %v14505_v22 = vld [vmem:[#allocation2 + $0x574] sm:$0xf0]  ;;  %v7782_v35 = vpop.f32.mrf.mxu0 }
 0x562   : > { %v10919_v14 = vld [vmem:[#allocation2 + $0x938] sm:$0xf]  ;;  %v10408_v57 = vor.u32 %v14505_v22, %v10407_v11 }
 0x563   : > { %8071 = vmatpush.bf16.msra.mxu3 %v11688_v39  ;;  %8046 = vmatpush.bf16.msra.mxu1 %v10600_v10  ;;  %v14633_v28 = vld [vmem:[#allocation2 + $0x974] sm:$0xf0]  ;;  %v8250_v10 = vmax.f32 %v7820_v33, 0.0 }
 0x564   : > { %v11431_v23 = vld [vmem:[#allocation2 + $0xd38] sm:$0xf]  ;;  %v10920_v63 = vor.u32 %v14633_v28, %v10919_v14 }
 0x565   : > { %8059 = vmatpush.bf16.msra.mxu2 %v11112_v46  ;;  %8034 = vmatpush.bf16.msra.mxu0 %v10024_v17  ;;  %v14761_v29 = vld [vmem:[#allocation2 + $0xd74] sm:$0xf0]  ;;  %8266 = vst [vmem:[%s15878_s18 + $0x58] sm:$0xff] %v8250_v10  ;;  %v16139_v16 = vpop.f32.mrf.mxu1 }
 0x566   : > { %v9831_v31 = vld [vmem:[#allocation2 + $0xb8] sm:$0xf]  ;;  %v11432_v44 = vor.u32 %v14761_v29, %v11431_v23 }
 0x567   : > { %8072 = vmatpush.bf16.msra.mxu3 %v11624_v47  ;;  %8047 = vmatpush.bf16.msra.mxu1 %v10536_v51  ;;  %v14361_v39 = vld [vmem:[#allocation2 + $0xf4] sm:$0xf0] }
 0x568   : > { %v10343_v41 = vld [vmem:[#allocation2 + $0x4b8] sm:$0xf]  ;;  %v9832_v30 = vor.u32 %v14361_v39, %v9831_v31 }
 0x569   : > { %8060 = vmatpush.bf16.msra.mxu2 %v11048_v21  ;;  %8035 = vmatpush.bf16.msra.mxu0 %v9960_v1  ;;  %v14489_v20 = vld [vmem:[#allocation2 + $0x4f4] sm:$0xf0] }
 0x56a   : > { %v10855_v26 = vld [vmem:[#allocation2 + $0x8b8] sm:$0xf]  ;;  %v10344_v47 = vor.u32 %v14489_v20, %v10343_v41 }
 0x56b   : > { %8073 = vmatpush.bf16.msra.mxu3 %v11560_v58  ;;  %8048 = vmatpush.bf16.msra.mxu1 %v10472_v2  ;;  %v14617_v45 = vld [vmem:[#allocation2 + $0x8f4] sm:$0xf0] }
 0x56c   : > { %v11367_v46 = vld [vmem:[#allocation2 + $0xcb8] sm:$0xf]  ;;  %v10856_v13 = vor.u32 %v14617_v45, %v10855_v26 }
 0x56d   : > { %8061 = vmatpush.bf16.msra.mxu2 %v10984_v3  ;;  %v14745_v7 = vld [vmem:[#allocation2 + $0xcf4] sm:$0xf0]  ;;  %8036 = vmatpush.bf16.msra.mxu0 %v9896_v4 }
 0x56e   : > { %v9767_v54 = vld [vmem:[#allocation2 + $0x38] sm:$0xf]  ;;  %v11368_v17 = vor.u32 %v14745_v7, %v11367_v46 }
 0x56f   : > { %8074 = vmatpush.bf16.msra.mxu3 %v11496_v50  ;;  %v14345_v36 = vld [vmem:[#allocation2 + $0x74] sm:$0xf0]  ;;  %8049 = vmatpush.bf16.msra.mxu1 %v10408_v57 }
 0x570   : > { %v10279_v48 = vld [vmem:[#allocation2 + $0x438] sm:$0xf]  ;;  %v9768_v27 = vor.u32 %v14345_v36, %v9767_v54 }
 0x571   : > { %8062 = vmatpush.bf16.msra.mxu2 %v10920_v63  ;;  %v14473_v42 = vld [vmem:[#allocation2 + $0x474] sm:$0xf0]  ;;  %8037 = vmatpush.bf16.msra.mxu0 %v9832_v30 }
 0x572   : > { %v10791_v18 = vld [vmem:[#allocation2 + $0x838] sm:$0xf]  ;;  %v10280_v53 = vor.u32 %v14473_v42, %v10279_v48 }
 0x573   : > { %8075 = vmatpush.bf16.msra.mxu3 %v11432_v44  ;;  %v14601_v43 = vld [vmem:[#allocation2 + $0x874] sm:$0xf0]  ;;  %8050 = vmatpush.bf16.msra.mxu1 %v10344_v47 }
 0x574   : > { %v11303_v51 = vld [vmem:[#allocation2 + $0xc38] sm:$0xf]  ;;  %v10792_v61 = vor.u32 %v14601_v43, %v10791_v18  ;;  %v16137_v18 = vpop.f32.mrf.mxu0 }
 0x575   : > { %v14729_v21 = vld [vmem:[#allocation2 + $0xc74] sm:$0xf0]  ;;  %8063 = vmatpush.bf16.msra.mxu2 %v10856_v13  ;;  %8038 = vmatpush.bf16.msra.mxu0 %v9768_v27 }
 0x576   : > { %v12263_v52 = vld [vmem:[#allocation2 + $0x13b8] sm:$0xf]  ;;  %v11304_v1 = vor.u32 %v14729_v21, %v11303_v51 }
 0x577   : > { %v14969_v55 = vld [vmem:[#allocation2 + $0x13f4] sm:$0xf0]  ;;  %8076 = vmatpush.bf16.msra.mxu3 %v11368_v17  ;;  %8051 = vmatpush.bf16.msra.mxu1 %v10280_v53 }
 0x578   : > { %v12775_v56 = vld [vmem:[#allocation2 + $0x17b8] sm:$0xf]  ;;  %v12264_v2 = vor.u32 %v14969_v55, %v12263_v52  ;;  %8039 = vmatmul.bf16.vlgmr.msra.gmra.mxu0 %v15819_v9 }
 0x579   : > { %v15097_v58 = vld [vmem:[#allocation2 + $0x17f4] sm:$0xf0]  ;;  %8064 = vmatpush.bf16.msra.mxu2 %v10792_v61 }
 0x57a   : > { %v13287_v59 = vld [vmem:[#allocation2 + $0x1bb8] sm:$0xf]  ;;  %v12776_v3 = vor.u32 %v15097_v58, %v12775_v56  ;;  %8083 = vmatpush.bf16.msrb.mxu0 %v12264_v2  ;;  %8052 = vmatmul.bf16.vlgmr.msra.gmra.mxu1 %v15828_v25  ;;  %v16141_v2 = vpop.f32.mrf.mxu2 }
 0x57b   : > { %v15225_v60 = vld [vmem:[#allocation2 + $0x1bf4] sm:$0xf0]  ;;  %8077 = vmatpush.bf16.msra.mxu3 %v11304_v1 }
 0x57c   : > { %v13799_v62 = vld [vmem:[#allocation2 + $0x1fb8] sm:$0xf]  ;;  %v13288_v5 = vor.u32 %v15225_v60, %v13287_v59  ;;  %8096 = vmatpush.bf16.msrb.mxu1 %v12776_v3  ;;  %8065 = vmatmul.bf16.vlgmr.msra.gmra.mxu2 %v15817_v8 }
 0x57d   : > { %v15353_v0 = vld [vmem:[#allocation2 + $0x1ff4] sm:$0xf0] }
 0x57e   : > { %v12199_v6 = vld [vmem:[#allocation2 + $0x1338] sm:$0xf]  ;;  %v13800_v50 = vor.u32 %v15353_v0, %v13799_v62  ;;  %8109 = vmatpush.bf16.msrb.mxu2 %v13288_v5  ;;  %8078 = vmatmul.bf16.vlgmr.msra.gmra.mxu3 %v15822_v15 }
 0x57f   : > { %v14953_v11 = vld [vmem:[#allocation2 + $0x1374] sm:$0xf0] }
 0x580   : > { %v12711_v12 = vld [vmem:[#allocation2 + $0x1738] sm:$0xf]  ;;  %v12200_v23 = vor.u32 %v14953_v11, %v12199_v6  ;;  %8122 = vmatpush.bf16.msrb.mxu3 %v13800_v50 }
 0x581   : > { %v15081_v22 = vld [vmem:[#allocation2 + $0x1774] sm:$0xf0] }
 0x582   : > { %v13223_v14 = vld [vmem:[#allocation2 + $0x1b38] sm:$0xf]  ;;  %v12712_v29 = vor.u32 %v15081_v22, %v12711_v12  ;;  %8084 = vmatpush.bf16.msrb.mxu0 %v12200_v23  ;;  %v16143_v12 = vpop.f32.mrf.mxu3 }
 0x583   : > { %v15209_v28 = vld [vmem:[#allocation2 + $0x1b74] sm:$0xf0] }
 0x584   : > { %v13735_v19 = vld [vmem:[#allocation2 + $0x1f38] sm:$0xf]  ;;  %v13224_v4 = vor.u32 %v15209_v28, %v13223_v14  ;;  %8097 = vmatpush.bf16.msrb.mxu1 %v12712_v29  ;;  %v7834_v28 = vpop.f32.mrf.mxu0 }
 0x585   : > { %v15337_v24 = vld [vmem:[#allocation2 + $0x1f74] sm:$0xf0]  ;;  %v14817_v28 = vld [vmem:[#allocation2 + $0xf3c] sm:$0xf] }
 0x586   : > { %v12135_v31 = vld [vmem:[#allocation2 + $0x12b8] sm:$0xf]  ;;  %v13736_v57 = vor.u32 %v15337_v24, %v13735_v19  ;;  %8110 = vmatpush.bf16.msrb.mxu2 %v13224_v4 }
 0x587   : > { %v14937_v33 = vld [vmem:[#allocation2 + $0x12f4] sm:$0xf0] }
 0x588   : > { %v12647_v35 = vld [vmem:[#allocation2 + $0x16b8] sm:$0xf]  ;;  %v12136_v44 = vor.u32 %v14937_v33, %v12135_v31  ;;  %8123 = vmatpush.bf16.msrb.mxu3 %v13736_v57  ;;  %v7847_v31 = vpop.f32.mrf.mxu1 }
 0x589   : > { %v15065_v63 = vld [vmem:[#allocation2 + $0x16f4] sm:$0xf0]  ;;  %v14417_v31 = vld [vmem:[#allocation2 + $0x2bc] sm:$0xf] }
 0x58a   : > { %v13159_v39 = vld [vmem:[#allocation2 + $0x1ab8] sm:$0xf]  ;;  %v12648_v26 = vor.u32 %v15065_v63, %v12647_v35  ;;  %8085 = vmatpush.bf16.msrb.mxu0 %v12136_v44 }
 0x58b   : > { %v15193_v41 = vld [vmem:[#allocation2 + $0x1af4] sm:$0xf0] }
 0x58c   : > { %v13671_v20 = vld [vmem:[#allocation2 + $0x1eb8] sm:$0xf]  ;;  %v13160_v45 = vor.u32 %v15193_v41, %v13159_v39  ;;  %8098 = vmatpush.bf16.msrb.mxu1 %v12648_v26 }
 0x58d   : > { %v15321_v32 = vld [vmem:[#allocation2 + $0x1ef4] sm:$0xf0] }
 0x58e   : > { %v12071_v10 = vld [vmem:[#allocation2 + $0x1238] sm:$0xf]  ;;  %v13672_v30 = vor.u32 %v15321_v32, %v13671_v20  ;;  %8111 = vmatpush.bf16.msrb.mxu2 %v13160_v45  ;;  %v16145_v20 = vld [vmem:[#allocation4 + $0x8] sm:$0xff] }
 0x58f   : > { %v14921_v46 = vld [vmem:[#allocation2 + $0x1274] sm:$0xf0]  ;;  %v1435_v32 = vperm.slane %v16145_v20, 4 }
 0x590   : > { %v12583_v7 = vld [vmem:[#allocation2 + $0x1638] sm:$0xf]  ;;  %v12072_v42 = vor.u32 %v14921_v46, %v12071_v10  ;;  %8124 = vmatpush.bf16.msrb.mxu3 %v13672_v30 }
 0x591   : > { %v15049_v54 = vld [vmem:[#allocation2 + $0x1674] sm:$0xf0] }
 0x592   : > { %v13095_v36 = vld [vmem:[#allocation2 + $0x1a38] sm:$0xf]  ;;  %v12584_v49 = vor.u32 %v15049_v54, %v12583_v7  ;;  %8086 = vmatpush.bf16.msrb.mxu0 %v12072_v42 }
 0x593   : > { %v15177_v47 = vld [vmem:[#allocation2 + $0x1a74] sm:$0xf0] }
 0x594   : > { %v13607_v13 = vld [vmem:[#allocation2 + $0x1e38] sm:$0xf]  ;;  %v13096_v17 = vor.u32 %v15177_v47, %v13095_v36  ;;  %8099 = vmatpush.bf16.msrb.mxu1 %v12584_v49  ;;  %v7860_v36 = vpop.f32.mrf.mxu2  ;;  %v7873_v49 = vpop.f32.mrf.mxu3 }
 0x595   : > { %v15305_v48 = vld [vmem:[#allocation2 + $0x1e74] sm:$0xf0]  ;;  %v14657_v36 = vld [vmem:[#allocation2 + $0xa3c] sm:$0xf]  ;;  %v7884_v49 = vpop.f32.mrf.mxu0 }
 0x596   : > { %v12007_v43 = vld [vmem:[#allocation2 + $0x11b8] sm:$0xf]  ;;  %v13608_v52 = vor.u32 %v15305_v48, %v13607_v13  ;;  %8112 = vmatpush.bf16.msrb.mxu2 %v13096_v17  ;;  %v14449_v17 = vld [vmem:[#allocation2 + $0x3bc] sm:$0xf] }
 0x597   : > { %v14905_v51 = vld [vmem:[#allocation2 + $0x11f4] sm:$0xf0] }
 0x598   : > { %v12519_v21 = vld [vmem:[#allocation2 + $0x15b8] sm:$0xf]  ;;  %v12008_v60 = vor.u32 %v14905_v51, %v12007_v43  ;;  %8125 = vmatpush.bf16.msrb.mxu3 %v13608_v52  ;;  %v10217_v43 = vld [vmem:[#allocation2 + $0x3f8] sm:$0xf0] }
 0x599   : > { %v15033_v55 = vld [vmem:[#allocation2 + $0x15f4] sm:$0xf0]  ;;  %v14577_v51 = vld [vmem:[#allocation2 + $0x7bc] sm:$0xf] }
 0x59a   : > { %v13031_v56 = vld [vmem:[#allocation2 + $0x19b8] sm:$0xf]  ;;  %v12520_v53 = vor.u32 %v15033_v55, %v12519_v21  ;;  %8087 = vmatpush.bf16.msrb.mxu0 %v12008_v60  ;;  %v7833_v21 = vadd.f32 %v16137_v18, %v1435_v32  ;;  %v10729_v55 = vld [vmem:[#allocation2 + $0x7f8] sm:$0xf0] }
 0x59b   : > { %v15161_v27 = vld [vmem:[#allocation2 + $0x19f4] sm:$0xf0]  ;;  %v14833_v60 = vld [vmem:[#allocation2 + $0xfbc] sm:$0xf] }
 0x59c   : > { %v13543_v58 = vld [vmem:[#allocation2 + $0x1db8] sm:$0xf]  ;;  %v13032_v61 = vor.u32 %v15161_v27, %v13031_v56  ;;  %8100 = vmatpush.bf16.msrb.mxu1 %v12520_v53  ;;  %v14705_v56 = vld [vmem:[#allocation2 + $0xbbc] sm:$0xf]  ;;  %v7846_v18 = vadd.f32 %v16139_v16, %v7833_v21 }
 0x59d   : > { %v15289_v59 = vld [vmem:[#allocation2 + $0x1df4] sm:$0xf0]  ;;  %v11241_v27 = vld [vmem:[#allocation2 + $0xbf8] sm:$0xf0] }
 0x59e   : > { %v11943_v62 = vld [vmem:[#allocation2 + $0x1138] sm:$0xf]  ;;  %v13544_v3 = vor.u32 %v15289_v59, %v13543_v58  ;;  %8113 = vmatpush.bf16.msrb.mxu2 %v13032_v61  ;;  %v11753_v53 = vld [vmem:[#allocation2 + $0xff8] sm:$0xf0] }
 0x59f   : > { %v14889_v0 = vld [vmem:[#allocation2 + $0x1174] sm:$0xf0]  ;;  %v10089_v16 = vld [vmem:[#allocation2 + $0x2f8] sm:$0xf0] }
 0x5a0   : > { %v12455_v1 = vld [vmem:[#allocation2 + $0x1538] sm:$0xf]  ;;  %v11944_v14 = vor.u32 %v14889_v0, %v11943_v62  ;;  %8126 = vmatpush.bf16.msrb.mxu3 %v13544_v3  ;;  %v10220_v62 = vor.u32 %v14449_v17, %v10217_v43  ;;  %v10732_v0 = vor.u32 %v14577_v51, %v10729_v55  ;;  %v14433_v3 = vld [vmem:[#allocation2 + $0x33c] sm:$0xf]  ;;  %v7897_v55 = vpop.f32.mrf.mxu1 }
 0x5a1   : > { %v15017_v5 = vld [vmem:[#allocation2 + $0x1574] sm:$0xf0]  ;;  %v11625_v32 = vld [vmem:[#allocation2 + $0xef8] sm:$0xf0] }
 0x5a2   : > { %v12967_v6 = vld [vmem:[#allocation2 + $0x1938] sm:$0xf]  ;;  %v12456_v19 = vor.u32 %v15017_v5, %v12455_v1  ;;  %8088 = vmatpush.bf16.msrb.mxu0 %v11944_v14  ;;  %v11244_v1 = vor.u32 %v14705_v56, %v11241_v27  ;;  %v10153_v5 = vld [vmem:[#allocation2 + $0x378] sm:$0xf0] }
 0x5a3   : > { %v15145_v11 = vld [vmem:[#allocation2 + $0x1974] sm:$0xf0]  ;;  %v11177_v14 = vld [vmem:[#allocation2 + $0xb78] sm:$0xf0] }
 0x5a4   : > { %v13479_v50 = vld [vmem:[#allocation2 + $0x1d38] sm:$0xf]  ;;  %v12968_v24 = vor.u32 %v15145_v11, %v12967_v6  ;;  %8101 = vmatpush.bf16.msrb.mxu1 %v12456_v19  ;;  %v14561_v6 = vld [vmem:[#allocation2 + $0x73c] sm:$0xf]  ;;  %v11756_v11 = vor.u32 %v14833_v60, %v11753_v53 }
 0x5a5   : > { %v15273_v22 = vld [vmem:[#allocation2 + $0x1d74] sm:$0xf0]  ;;  %v11689_v19 = vld [vmem:[#allocation2 + $0xf78] sm:$0xf0] }
 0x5a6   : > { %v11879_v23 = vld [vmem:[#allocation2 + $0x10b8] sm:$0xf]  ;;  %v13480_v33 = vor.u32 %v15273_v22, %v13479_v50  ;;  %8114 = vmatpush.bf16.msrb.mxu2 %v12968_v24  ;;  %v10665_v50 = vld [vmem:[#allocation2 + $0x778] sm:$0xf0]  ;;  %v10156_v24 = vor.u32 %v14433_v3, %v10153_v5 }
 0x5a7   : > { %v14873_v29 = vld [vmem:[#allocation2 + $0x10f4] sm:$0xf0]  ;;  %v14689_v22 = vld [vmem:[#allocation2 + $0xb3c] sm:$0xf] }
 0x5a8   : > { %v12391_v4 = vld [vmem:[#allocation2 + $0x14b8] sm:$0xf]  ;;  %v11880_v44 = vor.u32 %v14873_v29, %v11879_v23  ;;  %8127 = vmatpush.bf16.msrb.mxu3 %v13480_v33  ;;  %v10668_v23 = vor.u32 %v14561_v6, %v10665_v50  ;;  %v11180_v29 = vor.u32 %v14689_v22, %v11177_v14  ;;  %v14545_v33 = vld [vmem:[#allocation2 + $0x6bc] sm:$0xf] }
 0x5a9   : > { %v15001_v35 = vld [vmem:[#allocation2 + $0x14f4] sm:$0xf0]  ;;  %v14385_v51 = vld [vmem:[#allocation2 + $0x1bc] sm:$0xf] }
 0x5aa   : > { %v12903_v57 = vld [vmem:[#allocation2 + $0x18b8] sm:$0xf]  ;;  %v12392_v10 = vor.u32 %v15001_v35, %v12391_v4  ;;  %8089 = vmatpush.bf16.msrb.mxu0 %v11880_v44  ;;  %v7859_v4 = vadd.f32 %v16141_v2, %v7846_v18  ;;  %v11692_v35 = vor.u32 %v14817_v28, %v11689_v19  ;;  %v10092_v44 = vor.u32 %v14417_v31, %v10089_v16  ;;  %v9961_v21 = vld [vmem:[#allocation2 + $0x1f8] sm:$0xf0]  ;;  %v7910_v18 = vpop.f32.mrf.mxu2  ;;  %v7923_v19 = vpop.f32.mrf.mxu3 }
 0x5ab   : > { %v15129_v63 = vld [vmem:[#allocation2 + $0x18f4] sm:$0xf0]  ;;  %v10473_v27 = vld [vmem:[#allocation2 + $0x5f8] sm:$0xf0]  ;;  %v7886_v16 = vpop.f32.mrf.mxu0 }
 0x5ac   : > { %v13415_v39 = vld [vmem:[#allocation2 + $0x1cb8] sm:$0xf]  ;;  %v12904_v46 = vor.u32 %v15129_v63, %v12903_v57  ;;  %8102 = vmatpush.bf16.msrb.mxu1 %v12392_v10  ;;  %v10601_v57 = vld [vmem:[#allocation2 + $0x6f8] sm:$0xf0] }
 0x5ad   : > { %v15257_v41 = vld [vmem:[#allocation2 + $0x1cf4] sm:$0xf0]  ;;  %v14673_v63 = vld [vmem:[#allocation2 + $0xabc] sm:$0xf]  ;;  %v10604_v2 = vor.u32 %v14545_v33, %v10601_v57 }
 0x5ae   : > { %v11815_v26 = vld [vmem:[#allocation2 + $0x1038] sm:$0xf]  ;;  %v13416_v47 = vor.u32 %v15257_v41, %v13415_v39  ;;  %8115 = vmatpush.bf16.msrb.mxu2 %v12904_v46  ;;  %v11113_v39 = vld [vmem:[#allocation2 + $0xaf8] sm:$0xf0] }
 0x5af   : > { %v14857_v45 = vld [vmem:[#allocation2 + $0x1074] sm:$0xf0]  ;;  %v14801_v41 = vld [vmem:[#allocation2 + $0xebc] sm:$0xf] }
 0x5b0   : > { %v12327_v7 = vld [vmem:[#allocation2 + $0x1438] sm:$0xf]  ;;  %v11816_v52 = vor.u32 %v14857_v45, %v11815_v26  ;;  %8128 = vmatpush.bf16.msrb.mxu3 %v13416_v47  ;;  %v11116_v26 = vor.u32 %v14673_v63, %v11113_v39  ;;  %v7872_v45 = vadd.f32 %v16143_v12, %v7859_v4  ;;  %v14401_v10 = vld [vmem:[#allocation2 + $0x23c] sm:$0xf] }
 0x5b1   : > { %v14985_v30 = vld [vmem:[#allocation2 + $0x1474] sm:$0xf0]  ;;  %v10025_v46 = vld [vmem:[#allocation2 + $0x278] sm:$0xf0] }
 0x5b2   : > { %v12839_v54 = vld [vmem:[#allocation2 + $0x1838] sm:$0xf]  ;;  %v12328_v58 = vor.u32 %v14985_v30, %v12327_v7  ;;  %8090 = vmatpush.bf16.msrb.mxu0 %v11816_v52  ;;  %v14529_v7 = vld [vmem:[#allocation2 + $0x63c] sm:$0xf]  ;;  %v11628_v30 = vor.u32 %v14801_v41, %v11625_v32  ;;  %v7885_v52 = vadd.f32 %v7884_v49, %v7872_v45  ;;  %v7899_v41 = vpop.f32.mrf.mxu1 }
 0x5b3   : > { %v15113_v13 = vld [vmem:[#allocation2 + $0x1874] sm:$0xf0]  ;;  %v11049_v47 = vld [vmem:[#allocation2 + $0xa78] sm:$0xf0] }
 0x5b4   : > { %v13351_v48 = vld [vmem:[#allocation2 + $0x1c38] sm:$0xf]  ;;  %v12840_v59 = vor.u32 %v15113_v13, %v12839_v54  ;;  %8103 = vmatpush.bf16.msrb.mxu1 %v12328_v58  ;;  %v10537_v54 = vld [vmem:[#allocation2 + $0x678] sm:$0xf0]  ;;  %v11052_v43 = vor.u32 %v14657_v36, %v11049_v47 }
 0x5b5   : > { %v15241_v42 = vld [vmem:[#allocation2 + $0x1c74] sm:$0xf0]  ;;  %8091 = vmatmul.bf16.vlgmr.msrb.gmra.mxu0 %v15837_v37  ;;  %v14785_v13 = vld [vmem:[#allocation2 + $0xe3c] sm:$0xf]  ;;  %v10540_v17 = vor.u32 %v14529_v7, %v10537_v54 }
 0x5b6   : > { %v13352_v61 = vor.u32 %v15241_v42, %v13351_v48  ;;  %8116 = vmatpush.bf16.msrb.mxu2 %v12840_v59  ;;  %8135 = vmatpush.bf16.msra.mxu0 %v10220_v62  ;;  %v11561_v48 = vld [vmem:[#allocation2 + $0xe78] sm:$0xf0]  ;;  %v10028_v42 = vor.u32 %v14401_v10, %v10025_v46  ;;  %v9964_v62 = vor.u32 %v14385_v51, %v9961_v21  ;;  %v7925_v21 = vpop.f32.mrf.mxu3 }
 0x5b7   : > { %8104 = vmatmul.bf16.vlgmr.msrb.gmra.mxu1 %v15841_v40  ;;  %v14513_v12 = vld [vmem:[#allocation2 + $0x5bc] sm:$0xf]  ;;  %v11564_v56 = vor.u32 %v14785_v13, %v11561_v48 }
 0x5b8   : > { %8129 = vmatpush.bf16.msrb.mxu3 %v13352_v61  ;;  %8148 = vmatpush.bf16.msra.mxu1 %v10732_v0  ;;  %v14641_v58 = vld [vmem:[#allocation2 + $0x9bc] sm:$0xf]  ;;  %v7898_v61 = vadd.f32 %v7897_v55, %v7885_v52  ;;  %v10476_v0 = vor.u32 %v14513_v12, %v10473_v27 }
 0x5b9   : > { %8117 = vmatmul.bf16.vlgmr.msrb.gmra.mxu2 %v15835_v34  ;;  %v10985_v59 = vld [vmem:[#allocation2 + $0x9f8] sm:$0xf0] }
 0x5ba   : > { %8161 = vmatpush.bf16.msra.mxu2 %v11244_v1  ;;  %8136 = vmatpush.bf16.msra.mxu0 %v10156_v24  ;;  %v14769_v60 = vld [vmem:[#allocation2 + $0xdbc] sm:$0xf]  ;;  %v10988_v1 = vor.u32 %v14641_v58, %v10985_v59  ;;  %v7911_v28 = vadd.f32 %v7910_v18, %v7898_v61 }
 0x5bb   : > { %8130 = vmatmul.bf16.vlgmr.msrb.gmra.mxu3 %v15839_v38  ;;  %v11497_v53 = vld [vmem:[#allocation2 + $0xdf8] sm:$0xf0] }
 0x5bc   : > { %8174 = vmatpush.bf16.msra.mxu3 %v11756_v11  ;;  %8149 = vmatpush.bf16.msra.mxu1 %v10668_v23  ;;  %v14369_v3 = vld [vmem:[#allocation2 + $0x13c] sm:$0xf]  ;;  %v11500_v11 = vor.u32 %v14769_v60, %v11497_v53  ;;  %v7924_v31 = vadd.f32 %v7923_v19, %v7911_v28 }
 0x5bd   : > { %v9897_v5 = vld [vmem:[#allocation2 + $0x178] sm:$0xf0] }
 0x5be   : > { %8162 = vmatpush.bf16.msra.mxu2 %v11180_v29  ;;  %8137 = vmatpush.bf16.msra.mxu0 %v10092_v44  ;;  %v14497_v6 = vld [vmem:[#allocation2 + $0x53c] sm:$0xf]  ;;  %v9900_v29 = vor.u32 %v14369_v3, %v9897_v5 }
 0x5bf   : > { %v10409_v50 = vld [vmem:[#allocation2 + $0x578] sm:$0xf0] }
 0x5c0   : > { %8175 = vmatpush.bf16.msra.mxu3 %v11692_v35  ;;  %8150 = vmatpush.bf16.msra.mxu1 %v10604_v2  ;;  %v14625_v22 = vld [vmem:[#allocation2 + $0x93c] sm:$0xf]  ;;  %v10412_v33 = vor.u32 %v14497_v6, %v10409_v50 }
 0x5c1   : > { %v10921_v14 = vld [vmem:[#allocation2 + $0x978] sm:$0xf0] }
 0x5c2   : > { %8163 = vmatpush.bf16.msra.mxu2 %v11116_v26  ;;  %8138 = vmatpush.bf16.msra.mxu0 %v10028_v42  ;;  %v14753_v24 = vld [vmem:[#allocation2 + $0xd3c] sm:$0xf]  ;;  %v10924_v35 = vor.u32 %v14625_v22, %v10921_v14  ;;  %v16156_v26 = vmax.f32 %v7924_v31, 0.0  ;;  %v7912_v42 = vpop.f32.mrf.mxu2 }
 0x5c3   : > { %v11433_v23 = vld [vmem:[#allocation2 + $0xd78] sm:$0xf0] }
 0x5c4   : > { %8176 = vmatpush.bf16.msra.mxu3 %v11628_v30  ;;  %8151 = vmatpush.bf16.msra.mxu1 %v10540_v17  ;;  %v14353_v4 = vld [vmem:[#allocation2 + $0xbc] sm:$0xf]  ;;  %v11436_v32 = vor.u32 %v14753_v24, %v11433_v23  ;;  %8267 = vst [vmem:[%s15878_s18 + $0x60] sm:$0xff] %v16156_v26 }
 0x5c5   : > { %v9833_v57 = vld [vmem:[#allocation2 + $0xf8] sm:$0xf0] }
 0x5c6   : > { %8164 = vmatpush.bf16.msra.mxu2 %v11052_v43  ;;  %8139 = vmatpush.bf16.msra.mxu0 %v9964_v62  ;;  %v14481_v63 = vld [vmem:[#allocation2 + $0x4bc] sm:$0xf]  ;;  %v9836_v46 = vor.u32 %v14353_v4, %v9833_v57 }
 0x5c7   : > { %v10345_v39 = vld [vmem:[#allocation2 + $0x4f8] sm:$0xf0] }
 0x5c8   : > { %8177 = vmatpush.bf16.msra.mxu3 %v11564_v56  ;;  %8152 = vmatpush.bf16.msra.mxu1 %v10476_v0  ;;  %v14609_v44 = vld [vmem:[#allocation2 + $0x8bc] sm:$0xf]  ;;  %v10348_v54 = vor.u32 %v14481_v63, %v10345_v39 }
 0x5c9   : > { %v10857_v2 = vld [vmem:[#allocation2 + $0x8f8] sm:$0xf0] }
 0x5ca   : > { %8165 = vmatpush.bf16.msra.mxu2 %v10988_v1  ;;  %v14737_v45 = vld [vmem:[#allocation2 + $0xcbc] sm:$0xf]  ;;  %8140 = vmatpush.bf16.msra.mxu0 %v9900_v29  ;;  %v10860_v36 = vor.u32 %v14609_v44, %v10857_v2 }
 0x5cb   : > { %v11369_v10 = vld [vmem:[#allocation2 + $0xcf8] sm:$0xf0] }
 0x5cc   : > { %8178 = vmatpush.bf16.msra.mxu3 %v11500_v11  ;;  %v14337_v7 = vld [vmem:[#allocation2 + $0x3c] sm:$0xf]  ;;  %8153 = vmatpush.bf16.msra.mxu1 %v10412_v33  ;;  %v11372_v49 = vor.u32 %v14737_v45, %v11369_v10 }
 0x5cd   : > { %v9769_v30 = vld [vmem:[#allocation2 + $0x78] sm:$0xf0] }
 0x5ce   : > { %8166 = vmatpush.bf16.msra.mxu2 %v10924_v35  ;;  %v14465_v47 = vld [vmem:[#allocation2 + $0x43c] sm:$0xf]  ;;  %8141 = vmatpush.bf16.msra.mxu0 %v9836_v46  ;;  %v9772_v56 = vor.u32 %v14337_v7, %v9769_v30 }
 0x5cf   : > { %v10281_v13 = vld [vmem:[#allocation2 + $0x478] sm:$0xf0] }
 0x5d0   : > { %v14593_v48 = vld [vmem:[#allocation2 + $0x83c] sm:$0xf]  ;;  %8179 = vmatpush.bf16.msra.mxu3 %v11436_v32  ;;  %8154 = vmatpush.bf16.msra.mxu1 %v10348_v54  ;;  %v10284_v60 = vor.u32 %v14465_v47, %v10281_v13  ;;  %v16164_v13 = vpop.f32.mrf.mxu0 }
 0x5d1   : > { %v10793_v17 = vld [vmem:[#allocation2 + $0x878] sm:$0xf0] }
 0x5d2   : > { %v14721_v43 = vld [vmem:[#allocation2 + $0xc3c] sm:$0xf]  ;;  %8167 = vmatpush.bf16.msra.mxu2 %v10860_v36  ;;  %v10796_v53 = vor.u32 %v14593_v48, %v10793_v17  ;;  %8142 = vmatpush.bf16.msra.mxu0 %v9772_v56 }
 0x5d3   : > { %v11305_v51 = vld [vmem:[#allocation2 + $0xc78] sm:$0xf0] }
 0x5d4   : > { %v14961_v12 = vld [vmem:[#allocation2 + $0x13bc] sm:$0xf]  ;;  %8180 = vmatpush.bf16.msra.mxu3 %v11372_v49  ;;  %v11308_v0 = vor.u32 %v14721_v43, %v11305_v51  ;;  %8155 = vmatpush.bf16.msra.mxu1 %v10284_v60  ;;  %v16166_v43 = vpop.f32.mrf.mxu1 }
 0x5d5   : > { %v12265_v52 = vld [vmem:[#allocation2 + $0x13f8] sm:$0xf0]  ;;  %8143 = vmatmul.bf16.vlgmr.msra.gmra.mxu0 %v15819_v9 }
 0x5d6   : > { %v15089_v55 = vld [vmem:[#allocation2 + $0x17bc] sm:$0xf]  ;;  %v12268_v1 = vor.u32 %v14961_v12, %v12265_v52  ;;  %8168 = vmatpush.bf16.msra.mxu2 %v10796_v53 }
 0x5d7   : > { %v12777_v27 = vld [vmem:[#allocation2 + $0x17f8] sm:$0xf0]  ;;  %8156 = vmatmul.bf16.vlgmr.msra.gmra.mxu1 %v15828_v25 }
 0x5d8   : > { %v15217_v58 = vld [vmem:[#allocation2 + $0x1bbc] sm:$0xf]  ;;  %v12780_v3 = vor.u32 %v15089_v55, %v12777_v27  ;;  %8181 = vmatpush.bf16.msra.mxu3 %v11308_v0  ;;  %8187 = vmatpush.bf16.msrb.mxu0 %v12268_v1 }
 0x5d9   : > { %v13289_v59 = vld [vmem:[#allocation2 + $0x1bf8] sm:$0xf0]  ;;  %8169 = vmatmul.bf16.vlgmr.msra.gmra.mxu2 %v15817_v8 }
 0x5da   : > { %v15345_v61 = vld [vmem:[#allocation2 + $0x1fbc] sm:$0xf]  ;;  %v13292_v5 = vor.u32 %v15217_v58, %v13289_v59  ;;  %8200 = vmatpush.bf16.msrb.mxu1 %v12780_v3 }
 0x5db   : > { %v13801_v62 = vld [vmem:[#allocation2 + $0x1ff8] sm:$0xf0]  ;;  %8182 = vmatmul.bf16.vlgmr.msra.gmra.mxu3 %v15822_v15 }
 0x5dc   : > { %v14945_v6 = vld [vmem:[#allocation2 + $0x133c] sm:$0xf]  ;;  %v13804_v50 = vor.u32 %v15345_v61, %v13801_v62  ;;  %8213 = vmatpush.bf16.msrb.mxu2 %v13292_v5  ;;  %v16168_v62 = vpop.f32.mrf.mxu2 }
 0x5dd   : > { %v12201_v18 = vld [vmem:[#allocation2 + $0x1378] sm:$0xf0] }
 0x5de   : > { %v15073_v11 = vld [vmem:[#allocation2 + $0x173c] sm:$0xf]  ;;  %v12204_v23 = vor.u32 %v14945_v6, %v12201_v18  ;;  %8226 = vmatpush.bf16.msrb.mxu3 %v13804_v50  ;;  %v16170_v6 = vpop.f32.mrf.mxu3 }
 0x5df   : > { %v12713_v22 = vld [vmem:[#allocation2 + $0x1778] sm:$0xf0] }
 0x5e0   : > { %v15201_v14 = vld [vmem:[#allocation2 + $0x1b3c] sm:$0xf]  ;;  %v12716_v29 = vor.u32 %v15073_v11, %v12713_v22  ;;  %8188 = vmatpush.bf16.msrb.mxu0 %v12204_v23  ;;  %v7938_v22 = vpop.f32.mrf.mxu0 }
 0x5e1   : > { %v13225_v28 = vld [vmem:[#allocation2 + $0x1b78] sm:$0xf0] }
 0x5e2   : > { %v15329_v19 = vld [vmem:[#allocation2 + $0x1f3c] sm:$0xf]  ;;  %v13228_v4 = vor.u32 %v15201_v14, %v13225_v28  ;;  %8201 = vmatpush.bf16.msrb.mxu1 %v12716_v29  ;;  %v7951_v29 = vpop.f32.mrf.mxu1 }
 0x5e3   : > { %v13737_v24 = vld [vmem:[#allocation2 + $0x1f78] sm:$0xf0] }
 0x5e4   : > { %v14929_v31 = vld [vmem:[#allocation2 + $0x12bc] sm:$0xf]  ;;  %v13740_v35 = vor.u32 %v15329_v19, %v13737_v24  ;;  %8214 = vmatpush.bf16.msrb.mxu2 %v13228_v4 }
 0x5e5   : > { %v12137_v16 = vld [vmem:[#allocation2 + $0x12f8] sm:$0xf0] }
 0x5e6   : > { %v15057_v33 = vld [vmem:[#allocation2 + $0x16bc] sm:$0xf]  ;;  %v12140_v44 = vor.u32 %v14929_v31, %v12137_v16  ;;  %8227 = vmatpush.bf16.msrb.mxu3 %v13740_v35 }
 0x5e7   : > { %v12649_v57 = vld [vmem:[#allocation2 + $0x16f8] sm:$0xf0] }
 0x5e8   : > { %v15185_v63 = vld [vmem:[#allocation2 + $0x1abc] sm:$0xf]  ;;  %v12652_v2 = vor.u32 %v15057_v33, %v12649_v57  ;;  %8189 = vmatpush.bf16.msrb.mxu0 %v12140_v44 }
 0x5e9   : > { %v13161_v39 = vld [vmem:[#allocation2 + $0x1af8] sm:$0xf0] }
 0x5ea   : > { %v15313_v41 = vld [vmem:[#allocation2 + $0x1ebc] sm:$0xf]  ;;  %v13164_v45 = vor.u32 %v15185_v63, %v13161_v39  ;;  %8202 = vmatpush.bf16.msrb.mxu1 %v12652_v2  ;;  %v1436_v63 = vperm.slane %v16145_v20, 5 }
 0x5eb   : > { %v13673_v32 = vld [vmem:[#allocation2 + $0x1ef8] sm:$0xf0] }
 0x5ec   : > { %v14913_v10 = vld [vmem:[#allocation2 + $0x123c] sm:$0xf]  ;;  %v13676_v7 = vor.u32 %v15313_v41, %v13673_v32  ;;  %8215 = vmatpush.bf16.msrb.mxu2 %v13164_v45 }
 0x5ed   : > { %v12073_v46 = vld [vmem:[#allocation2 + $0x1278] sm:$0xf0] }
 0x5ee   : > { %v15041_v8 = vld [vmem:[#allocation2 + $0x163c] sm:$0xf]  ;;  %v12076_v15 = vor.u32 %v14913_v10, %v12073_v46  ;;  %8228 = vmatpush.bf16.msrb.mxu3 %v13676_v7  ;;  %v7964_v10 = vpop.f32.mrf.mxu2 }
 0x5ef   : > { %v12585_v30 = vld [vmem:[#allocation2 + $0x1678] sm:$0xf0] }
 0x5f0   : > { %v15169_v54 = vld [vmem:[#allocation2 + $0x1a3c] sm:$0xf]  ;;  %v12588_v25 = vor.u32 %v15041_v8, %v12585_v30  ;;  %8190 = vmatpush.bf16.msrb.mxu0 %v12076_v15 }
 0x5f1   : > { %v13097_v36 = vld [vmem:[#allocation2 + $0x1a78] sm:$0xf0] }
 0x5f2   : > { %v15297_v47 = vld [vmem:[#allocation2 + $0x1e3c] sm:$0xf]  ;;  %v13100_v48 = vor.u32 %v15169_v54, %v13097_v36  ;;  %8203 = vmatpush.bf16.msrb.mxu1 %v12588_v25  ;;  %v7977_v54 = vpop.f32.mrf.mxu3 }
 0x5f3   : > { %v13609_v9 = vld [vmem:[#allocation2 + $0x1e78] sm:$0xf0]  ;;  %v15392_v54 = vld [vmem:[%s16612_s3 + $0x130] sm:$0xff] }
 0x5f4   : > { %v14897_v42 = vld [vmem:[#allocation2 + $0x11bc] sm:$0xf]  ;;  %v13612_v51 = vor.u32 %v15297_v47, %v13609_v9  ;;  %8216 = vmatpush.bf16.msrb.mxu2 %v13100_v48  ;;  %v7937_v9 = vadd.f32 %v16164_v13, %v1436_v63  ;;  %v15379_v63 = vld [vmem:[%s16612_s3 + $0xc8] sm:$0xff] }
 0x5f5   : > { %v12009_v49 = vld [vmem:[#allocation2 + $0x11f8] sm:$0xf0] }
 0x5f6   : > { %v15025_v17 = vld [vmem:[#allocation2 + $0x15bc] sm:$0xf]  ;;  %v12012_v27 = vor.u32 %v14897_v42, %v12009_v49  ;;  %8229 = vmatpush.bf16.msrb.mxu3 %v13612_v51  ;;  %v7950_v51 = vadd.f32 %v16166_v43, %v7937_v9  ;;  %v15376_v43 = vld [vmem:[%s16612_s3 + $0xb0] sm:$0xff] }
 0x5f7   : > { %v12521_v21 = vld [vmem:[#allocation2 + $0x15f8] sm:$0xf0]  ;;  %v15544_v9 = vld [vmem:[%s15878_s18 + $0x10] sm:$0xff] }
 0x5f8   : > { %v15153_v12 = vld [vmem:[#allocation2 + $0x19bc] sm:$0xf]  ;;  %v12524_v58 = vor.u32 %v15025_v17, %v12521_v21  ;;  %8191 = vmatpush.bf16.msrb.mxu0 %v12012_v27  ;;  %v15359_v27 = vld [vmem:[%s16612_s3 + $0x28] sm:$0xff] }
 0x5f9   : > { %v13033_v52 = vld [vmem:[#allocation2 + $0x19f8] sm:$0xf0] }
 0x5fa   : > { %v15281_v55 = vld [vmem:[#allocation2 + $0x1dbc] sm:$0xf]  ;;  %v13036_v59 = vor.u32 %v15153_v12, %v13033_v52  ;;  %8204 = vmatpush.bf16.msrb.mxu1 %v12524_v58  ;;  %v15360_v12 = vld [vmem:[%s16612_s3 + $0x30] sm:$0xff]  ;;  %v15375_v58 = vld [vmem:[%s16612_s3 + $0xa8] sm:$0xff]  ;;  %v8027_v22 = vpop.f32.mrf.mxu3 }
 0x5fb   : > { %v13545_v56 = vld [vmem:[#allocation2 + $0x1df8] sm:$0xf0]  ;;  %v15368_v52 = vld [vmem:[%s16612_s3 + $0x70] sm:$0xff] }
 0x5fc   : > { %v14881_v60 = vld [vmem:[#allocation2 + $0x113c] sm:$0xf]  ;;  %v13548_v0 = vor.u32 %v15281_v55, %v13545_v56  ;;  %8217 = vmatpush.bf16.msrb.mxu2 %v13036_v59  ;;  %v7963_v55 = vadd.f32 %v16168_v62, %v7950_v51  ;;  %v15384_v56 = vld [vmem:[%s16612_s3 + $0xf0] sm:$0xff]  ;;  %v7988_v59 = vpop.f32.mrf.mxu0  ;;  %v8001_v62 = vpop.f32.mrf.mxu1  ;;  %v15399_v51 = vld [vmem:[%s16612_s3 + $0x168] sm:$0xff] }
 0x5fd   : > { %v11945_v53 = vld [vmem:[#allocation2 + $0x1178] sm:$0xf0] }
 0x5fe   : > { %v15009_v61 = vld [vmem:[#allocation2 + $0x153c] sm:$0xf]  ;;  %v11948_v50 = vor.u32 %v14881_v60, %v11945_v53  ;;  %8230 = vmatpush.bf16.msrb.mxu3 %v13548_v0  ;;  %v15366_v60 = vld [vmem:[%s16612_s3 + $0x60] sm:$0xff] }
 0x5ff   : > { %v12457_v1 = vld [vmem:[#allocation2 + $0x1578] sm:$0xf0]  ;;  %v15374_v53 = vld [vmem:[%s16612_s3 + $0xa0] sm:$0xff] }
 0x600   : > { %v15137_v3 = vld [vmem:[#allocation2 + $0x193c] sm:$0xf]  ;;  %v12460_v14 = vor.u32 %v15009_v61, %v12457_v1  ;;  %8192 = vmatpush.bf16.msrb.mxu0 %v11948_v50  ;;  %v15382_v0 = vld [vmem:[%s16612_s3 + $0xe0] sm:$0xff] }
 0x601   : > { %v12969_v5 = vld [vmem:[#allocation2 + $0x1978] sm:$0xf0] }
 0x602   : > { %v15265_v18 = vld [vmem:[#allocation2 + $0x1d3c] sm:$0xf]  ;;  %v12972_v28 = vor.u32 %v15137_v3, %v12969_v5  ;;  %8205 = vmatpush.bf16.msrb.mxu1 %v12460_v14  ;;  %v15356_v14 = vld [vmem:[%s16612_s3 + $0x10] sm:$0xff] }
 0x603   : > { %v13481_v11 = vld [vmem:[#allocation2 + $0x1d78] sm:$0xf0] }
 0x604   : > { %v14865_v19 = vld [vmem:[#allocation2 + $0x10bc] sm:$0xf]  ;;  %v13484_v4 = vor.u32 %v15265_v18, %v13481_v11  ;;  %8218 = vmatpush.bf16.msrb.mxu2 %v12972_v28  ;;  %v8014_v18 = vpop.f32.mrf.mxu2  ;;  %v8003_v29 = vpop.f32.mrf.mxu1 }
 0x605   : > { %v11881_v24 = vld [vmem:[#allocation2 + $0x10f8] sm:$0xf0] }
 0x606   : > { %v14993_v23 = vld [vmem:[#allocation2 + $0x14bc] sm:$0xf]  ;;  %v11884_v39 = vor.u32 %v14865_v19, %v11881_v24  ;;  %8231 = vmatpush.bf16.msrb.mxu3 %v13484_v4  ;;  %v7990_v19 = vpop.f32.mrf.mxu0  ;;  %v15364_v24 = vld [vmem:[%s16612_s3 + $0x50] sm:$0xff] }
 0x607   : > { %v12393_v31 = vld [vmem:[#allocation2 + $0x14f8] sm:$0xf0]  ;;  %v15380_v4 = vld [vmem:[%s16612_s3 + $0xd0] sm:$0xff]  ;;  %v15394_v19 = vld [vmem:[%s16612_s3 + $0x140] sm:$0xff] }
 0x608   : > { %v15121_v16 = vld [vmem:[#allocation2 + $0x18bc] sm:$0xf]  ;;  %v12396_v41 = vor.u32 %v14993_v23, %v12393_v31  ;;  %8193 = vmatpush.bf16.msrb.mxu0 %v11884_v39  ;;  %v15372_v23 = vld [vmem:[%s16612_s3 + $0x90] sm:$0xff]  ;;  %v8029_v39 = vpop.f32.mrf.mxu3 }
 0x609   : > { %v12905_v33 = vld [vmem:[#allocation2 + $0x18f8] sm:$0xf0]  ;;  %v15424_v39 = vld [vmem:[%s16612_s3 + $0x230] sm:$0xff] }
 0x60a   : > { %v15249_v35 = vld [vmem:[#allocation2 + $0x1cbc] sm:$0xf]  ;;  %v12908_v32 = vor.u32 %v15121_v16, %v12905_v33  ;;  %8206 = vmatpush.bf16.msrb.mxu1 %v12396_v41  ;;  %v15355_v16 = vld [vmem:[%s16612_s3 + $0x8] sm:$0xff]  ;;  %v15354_v41 = vld [vmem:[%s16612_s3] sm:$0xff] }
 0x60b   : > { %v13417_v57 = vld [vmem:[#allocation2 + $0x1cf8] sm:$0xf0]  ;;  %v15363_v33 = vld [vmem:[%s16612_s3 + $0x48] sm:$0xff] }
 0x60c   : > { %v14849_v44 = vld [vmem:[#allocation2 + $0x103c] sm:$0xf]  ;;  %v13420_v46 = vor.u32 %v15249_v35, %v13417_v57  ;;  %8219 = vmatpush.bf16.msrb.mxu2 %v12908_v32  ;;  %v15371_v35 = vld [vmem:[%s16612_s3 + $0x88] sm:$0xff]  ;;  %v8016_v57 = vpop.f32.mrf.mxu2  ;;  %v15362_v32 = vld [vmem:[%s16612_s3 + $0x40] sm:$0xff] }
 0x60d   : > { %v11817_v2 = vld [vmem:[#allocation2 + $0x1078] sm:$0xf0]  ;;  %v15546_v57 = vld [vmem:[%s15878_s18 + $0x20] sm:$0xff] }
 0x60e   : > { %v14977_v45 = vld [vmem:[#allocation2 + $0x143c] sm:$0xf]  ;;  %v11820_v15 = vor.u32 %v14849_v44, %v11817_v2  ;;  %8232 = vmatpush.bf16.msrb.mxu3 %v13420_v46  ;;  %v15370_v44 = vld [vmem:[%s16612_s3 + $0x80] sm:$0xff] }
 0x60f   : > { %v12329_v8 = vld [vmem:[#allocation2 + $0x1478] sm:$0xf0]  ;;  %v15378_v2 = vld [vmem:[%s16612_s3 + $0xc0] sm:$0xff] }
 0x610   : > { %v15105_v7 = vld [vmem:[#allocation2 + $0x183c] sm:$0xf]  ;;  %v12332_v25 = vor.u32 %v14977_v45, %v12329_v8  ;;  %8194 = vmatpush.bf16.msrb.mxu0 %v11820_v15  ;;  %v8273_v15 = vpack.c.bf16 %v15544_v9, %v15544_v9 }
 0x611   : > { %v12841_v30 = vld [vmem:[#allocation2 + $0x1878] sm:$0xf0] }
 0x612   : > { %v15233_v36 = vld [vmem:[#allocation2 + $0x1c3c] sm:$0xf]  ;;  %v12844_v48 = vor.u32 %v15105_v7, %v12841_v30  ;;  %8207 = vmatpush.bf16.msrb.mxu1 %v12332_v25  ;;  %v15542_v7 = vld [vmem:[%s15878_s18] sm:$0xff]  ;;  %v15400_v25 = vld [vmem:[%s16612_s3 + $0x170] sm:$0xff] }
 0x613   : > { %v13353_v47 = vld [vmem:[#allocation2 + $0x1c78] sm:$0xf0]  ;;  %8195 = vmatmul.bf16.vlgmr.msrb.gmra.mxu0 %v15837_v37  ;;  %v15367_v37 = vld [vmem:[%s16612_s3 + $0x68] sm:$0xff]  ;;  %v8271_v30 = vpack.c.bf16 %v15542_v7, %v15542_v7 }
 0x614   : > { %v13356_v42 = vor.u32 %v15233_v36, %v13353_v47  ;;  %v15361_v49 = vld [vmem:[%s16612_s3 + $0x38] sm:$0xff]  ;;  %8220 = vmatpush.bf16.msrb.mxu2 %v12844_v48  ;;  %v15543_v36 = vld [vmem:[%s15878_s18 + $0x8] sm:$0xff]  ;;  %v15408_v48 = vld [vmem:[%s16612_s3 + $0x1b0] sm:$0xff] }
 0x615   : > { %v15369_v17 = vld [vmem:[%s16612_s3 + $0x78] sm:$0xff]  ;;  %9315 = vmatpush.bf16.msra.mxu0 %v15361_v49  ;;  %8208 = vmatmul.bf16.vlgmr.msrb.gmra.mxu1 %v15841_v40  ;;  %v7976_v40 = vadd.f32 %v16170_v6, %v7963_v55  ;;  %v8272_v47 = vpack.c.bf16 %v15543_v36, %v15543_v36  ;;  %v15398_v55 = vld [vmem:[%s16612_s3 + $0x160] sm:$0xff]  ;;  %v15431_v36 = vld [vmem:[%s16612_s3 + $0x268] sm:$0xff] }
 0x616   : > { %v15377_v13 = vld [vmem:[%s16612_s3 + $0xb8] sm:$0xff]  ;;  %8233 = vmatpush.bf16.msrb.mxu3 %v13356_v42  ;;  %9328 = vmatpush.bf16.msra.mxu1 %v15369_v17  ;;  %v15416_v17 = vld [vmem:[%s16612_s3 + $0x1f0] sm:$0xff] }
 0x617   : > { %v15385_v21 = vld [vmem:[%s16612_s3 + $0xf8] sm:$0xff]  ;;  %8221 = vmatmul.bf16.vlgmr.msrb.gmra.mxu2 %v15835_v34  ;;  %v15383_v34 = vld [vmem:[%s16612_s3 + $0xe8] sm:$0xff]  ;;  %v7989_v61 = vadd.f32 %v7988_v59, %v7976_v40 }
 0x618   : > { %9341 = vmatpush.bf16.msra.mxu2 %v15377_v13  ;;  %v15357_v3 = vld [vmem:[%s16612_s3 + $0x18] sm:$0xff]  ;;  %v15391_v13 = vld [vmem:[%s16612_s3 + $0x128] sm:$0xff] }
 0x619   : > { %8234 = vmatmul.bf16.vlgmr.msrb.gmra.mxu3 %v15839_v38  ;;  %9316 = vmatpush.bf16.msra.mxu0 %v15360_v12  ;;  %v15358_v38 = vld [vmem:[%s16612_s3 + $0x20] sm:$0xff]  ;;  %v8002_v1 = vadd.f32 %v8001_v62, %v7989_v61  ;;  %v15365_v5 = vld [vmem:[%s16612_s3 + $0x58] sm:$0xff]  ;;  %v15415_v12 = vld [vmem:[%s16612_s3 + $0x1e8] sm:$0xff] }
 0x61a   : > { %9354 = vmatpush.bf16.msra.mxu3 %v15385_v21  ;;  %9329 = vmatpush.bf16.msra.mxu1 %v15368_v52  ;;  %v15373_v6 = vld [vmem:[%s16612_s3 + $0x98] sm:$0xff]  ;;  %v15407_v21 = vld [vmem:[%s16612_s3 + $0x1a8] sm:$0xff]  ;;  %v15390_v52 = vld [vmem:[%s16612_s3 + $0x120] sm:$0xff] }
 0x61b   : > { %v15381_v11 = vld [vmem:[%s16612_s3 + $0xd8] sm:$0xff]  ;;  %v8015_v50 = vadd.f32 %v8014_v18, %v8002_v1  ;;  %v15396_v62 = vld [vmem:[%s16612_s3 + $0x150] sm:$0xff]  ;;  %v15395_v18 = vld [vmem:[%s16612_s3 + $0x148] sm:$0xff] }
 0x61c   : > { %9342 = vmatpush.bf16.msra.mxu2 %v15376_v43  ;;  %v15393_v45 = vld [vmem:[%s16612_s3 + $0x138] sm:$0xff]  ;;  %v8040_v43 = vpop.f32.mrf.mxu0 }
 0x61d   : > { %9317 = vmatpush.bf16.msra.mxu0 %v15359_v27  ;;  %v8028_v28 = vadd.f32 %v8027_v22, %v8015_v50  ;;  %v15401_v10 = vld [vmem:[%s16612_s3 + $0x178] sm:$0xff]  ;;  %v8053_v27 = vpop.f32.mrf.mxu1 }
 0x61e   : > { %9355 = vmatpush.bf16.msra.mxu3 %v15384_v56  ;;  %9330 = vmatpush.bf16.msra.mxu1 %v15367_v37  ;;  %v15409_v46 = vld [vmem:[%s16612_s3 + $0x1b8] sm:$0xff]  ;;  %v15406_v56 = vld [vmem:[%s16612_s3 + $0x1a0] sm:$0xff] }
 0x61f   : > { %v16253_v31 = vmax.f32 %v8028_v28, 0.0  ;;  %v15417_v8 = vld [vmem:[%s16612_s3 + $0x1f8] sm:$0xff]  ;;  %v15414_v37 = vld [vmem:[%s16612_s3 + $0x1e0] sm:$0xff] }
 0x620   : > { %9343 = vmatpush.bf16.msra.mxu2 %v15375_v58  ;;  %v15545_v42 = vld [vmem:[%s15878_s18 + $0x18] sm:$0xff]  ;;  %v15386_v28 = vld [vmem:[%s16612_s3 + $0x100] sm:$0xff] }
 0x621   : > { %9318 = vmatpush.bf16.msra.mxu0 %v15358_v38  ;;  %8268 = vst [vmem:[%s15878_s18 + $0x68] sm:$0xff] %v16253_v31  ;;  %v8274_v49 = vpack.c.bf16 %v15545_v42, %v15545_v42  ;;  %v15389_v58 = vld [vmem:[%s16612_s3 + $0x118] sm:$0xff]  ;;  %v8066_v38 = vpop.f32.mrf.mxu2  ;;  %v15430_v42 = vld [vmem:[%s16612_s3 + $0x260] sm:$0xff] }
 0x622   : > { %9356 = vmatpush.bf16.msra.mxu3 %v15383_v34  ;;  %9331 = vmatpush.bf16.msra.mxu1 %v15366_v60  ;;  %v15397_v40 = vld [vmem:[%s16612_s3 + $0x158] sm:$0xff]  ;;  %v16345_v60 = vpop.f32.mrf.mxu3 }
 0x623   : > { %v15405_v34 = vld [vmem:[%s16612_s3 + $0x198] sm:$0xff] }
 0x624   : > { %9344 = vmatpush.bf16.msra.mxu2 %v15374_v53  ;;  %v15413_v59 = vld [vmem:[%s16612_s3 + $0x1d8] sm:$0xff]  ;;  %v15388_v53 = vld [vmem:[%s16612_s3 + $0x110] sm:$0xff]  ;;  %v8042_v61 = vpop.f32.mrf.mxu0 }
 0x625   : > { %9319 = vmatpush.bf16.msra.mxu0 %v15357_v3  ;;  %v8055_v1 = vpop.f32.mrf.mxu1  ;;  %v15412_v3 = vld [vmem:[%s16612_s3 + $0x1d0] sm:$0xff]  ;;  %v15425_v29 = vld [vmem:[%s16612_s3 + $0x238] sm:$0xff] }
 0x626   : > { %9357 = vmatpush.bf16.msra.mxu3 %v15382_v0  ;;  %9332 = vmatpush.bf16.msra.mxu1 %v15365_v5  ;;  %v15404_v0 = vld [vmem:[%s16612_s3 + $0x190] sm:$0xff]  ;;  %v1437_v5 = vperm.slane %v16145_v20, 6  ;;  %v15411_v20 = vld [vmem:[%s16612_s3 + $0x1c8] sm:$0xff] }
 0x627   : > { %v15435_v1 = vld [vmem:[%s16612_s3 + $0x288] sm:$0xff] }
 0x628   : > { %9345 = vmatpush.bf16.msra.mxu2 %v15373_v6  ;;  %v15387_v6 = vld [vmem:[%s16612_s3 + $0x108] sm:$0xff] }
 0x629   : > { %9320 = vmatpush.bf16.msra.mxu0 %v15356_v14  ;;  %v8068_v50 = vpop.f32.mrf.mxu2  ;;  %v8041_v14 = vadd.f32 %v8040_v43, %v1437_v5  ;;  %v15437_v43 = vld [vmem:[%s16612_s3 + $0x298] sm:$0xff]  ;;  %v15443_v5 = vld [vmem:[%s16612_s3 + $0x2c8] sm:$0xff] }
 0x62a   : > { %9358 = vmatpush.bf16.msra.mxu3 %v15381_v11  ;;  %9333 = vmatpush.bf16.msra.mxu1 %v15364_v24  ;;  %v15403_v11 = vld [vmem:[%s16612_s3 + $0x188] sm:$0xff]  ;;  %v8081_v22 = vpop.f32.mrf.mxu3  ;;  %v15402_v24 = vld [vmem:[%s16612_s3 + $0x180] sm:$0xff] }
 0x62b   : > { %v15434_v50 = vld [vmem:[%s16612_s3 + $0x280] sm:$0xff]  ;;  %v15457_v22 = vld [vmem:[%s16612_s3 + $0x338] sm:$0xff] }
 0x62c   : > { %9346 = vmatpush.bf16.msra.mxu2 %v15372_v23  ;;  %v15410_v23 = vld [vmem:[%s16612_s3 + $0x1c0] sm:$0xff] }
 0x62d   : > { %9321 = vmatpush.bf16.msra.mxu0 %v15355_v16  ;;  %v15441_v16 = vld [vmem:[%s16612_s3 + $0x2b8] sm:$0xff] }
 0x62e   : > { %9359 = vmatpush.bf16.msra.mxu3 %v15380_v4  ;;  %9334 = vmatpush.bf16.msra.mxu1 %v15363_v33  ;;  %v15433_v4 = vld [vmem:[%s16612_s3 + $0x278] sm:$0xff]  ;;  %v8054_v33 = vadd.f32 %v8053_v27, %v8041_v14 }
 0x62f   : > { %v15465_v14 = vld [vmem:[%s16612_s3 + $0x378] sm:$0xff] }
 0x630   : > { %9347 = vmatpush.bf16.msra.mxu2 %v15371_v35  ;;  %v15449_v35 = vld [vmem:[%s16612_s3 + $0x2f8] sm:$0xff] }
 0x631   : > { %9322 = vmatpush.bf16.msra.mxu0 %v15354_v41  ;;  %v15547_v41 = vld [vmem:[%s15878_s18 + $0x28] sm:$0xff] }
 0x632   : > { %9360 = vmatpush.bf16.msra.mxu3 %v15379_v63  ;;  %9335 = vmatpush.bf16.msra.mxu1 %v15362_v32  ;;  %v8275_v63 = vpack.c.bf16 %v15546_v57, %v15546_v57  ;;  %v8276_v32 = vpack.c.bf16 %v15547_v41, %v15547_v41  ;;  %v15553_v57 = vld [vmem:[%s15878_s18 + $0x58] sm:$0xff]  ;;  %v15472_v41 = vld [vmem:[%s16612_s3 + $0x3b0] sm:$0xff] }
 0x634   : > { %9348 = vmatpush.bf16.msra.mxu2 %v15370_v44  ;;  %9323 = vmatmul.bf16.vlgmr.msra.gmra.mxu0 %v8271_v30  ;;  %v15548_v44 = vld [vmem:[%s15878_s18 + $0x30] sm:$0xff] }
 0x635   : > { %9367 = vmatpush.bf16.msrb.mxu0 %v15393_v45  ;;  %9336 = vmatmul.bf16.vlgmr.msra.gmra.mxu1 %v8272_v47  ;;  %v15432_v45 = vld [vmem:[%s16612_s3 + $0x270] sm:$0xff]  ;;  %v15439_v47 = vld [vmem:[%s16612_s3 + $0x2a8] sm:$0xff] }
 0x636   : > { %9361 = vmatpush.bf16.msra.mxu3 %v15378_v2  ;;  %9380 = vmatpush.bf16.msrb.mxu1 %v15401_v10  ;;  %v8277_v2 = vpack.c.bf16 %v15548_v44, %v15548_v44  ;;  %v15440_v10 = vld [vmem:[%s16612_s3 + $0x2b0] sm:$0xff] }
 0x637   : > { %9349 = vmatmul.bf16.vlgmr.msra.gmra.mxu2 %v8273_v15  ;;  %v15448_v30 = vld [vmem:[%s16612_s3 + $0x2f0] sm:$0xff]  ;;  %v15447_v15 = vld [vmem:[%s16612_s3 + $0x2e8] sm:$0xff] }
 0x638   : > { %9393 = vmatpush.bf16.msrb.mxu2 %v15409_v46  ;;  %v8067_v46 = vadd.f32 %v8066_v38, %v8054_v33  ;;  %v15428_v38 = vld [vmem:[%s16612_s3 + $0x250] sm:$0xff] }
 0x639   : > { %9362 = vmatmul.bf16.vlgmr.msra.gmra.mxu3 %v8274_v49  ;;  %9368 = vmatpush.bf16.msrb.mxu0 %v15392_v54  ;;  %v15423_v54 = vld [vmem:[%s16612_s3 + $0x228] sm:$0xff]  ;;  %v15438_v49 = vld [vmem:[%s16612_s3 + $0x2a0] sm:$0xff]  ;;  %v15552_v33 = vld [vmem:[%s15878_s18 + $0x50] sm:$0xff] }
 0x63a   : > { %9406 = vmatpush.bf16.msrb.mxu3 %v15417_v8  ;;  %9381 = vmatpush.bf16.msrb.mxu1 %v15400_v25  ;;  %v15549_v8 = vld [vmem:[%s15878_s18 + $0x38] sm:$0xff]  ;;  %v8080_v9 = vadd.f32 %v16345_v60, %v8067_v46  ;;  %v15422_v25 = vld [vmem:[%s16612_s3 + $0x220] sm:$0xff]  ;;  %v15480_v44 = vld [vmem:[%s16612_s3 + $0x3f0] sm:$0xff] }
 0x63b   : > { %v8278_v7 = vpack.c.bf16 %v15549_v8, %v15549_v8  ;;  %v15479_v8 = vld [vmem:[%s16612_s3 + $0x3e8] sm:$0xff] }
 0x63c   : > { %9394 = vmatpush.bf16.msrb.mxu2 %v15408_v48  ;;  %v8092_v48 = vpop.f32.mrf.mxu0 }
 0x63d   : > { %9369 = vmatpush.bf16.msrb.mxu0 %v15391_v13  ;;  %v8105_v13 = vpop.f32.mrf.mxu1 }
 0x63e   : > { %9407 = vmatpush.bf16.msrb.mxu3 %v15416_v17  ;;  %9382 = vmatpush.bf16.msrb.mxu1 %v15399_v51  ;;  %v8093_v17 = vadd.f32 %v8092_v48, %v8080_v9  ;;  %v15446_v51 = vld [vmem:[%s16612_s3 + $0x2e0] sm:$0xff]  ;;  %v15461_v9 = vld [vmem:[%s16612_s3 + $0x358] sm:$0xff] }
 0x640   : > { %9395 = vmatpush.bf16.msrb.mxu2 %v15407_v21  ;;  %v8106_v21 = vadd.f32 %v8105_v13, %v8093_v17  ;;  %v15477_v17 = vld [vmem:[%s16612_s3 + $0x3d8] sm:$0xff]  ;;  %v15460_v13 = vld [vmem:[%s16612_s3 + $0x350] sm:$0xff] }
 0x641   : > { %9370 = vmatpush.bf16.msrb.mxu0 %v15390_v52  ;;  %v15429_v52 = vld [vmem:[%s16612_s3 + $0x258] sm:$0xff] }
 0x642   : > { %9408 = vmatpush.bf16.msrb.mxu3 %v15415_v12  ;;  %9383 = vmatpush.bf16.msrb.mxu1 %v15398_v55  ;;  %v15421_v12 = vld [vmem:[%s16612_s3 + $0x218] sm:$0xff]  ;;  %v8118_v55 = vpop.f32.mrf.mxu2 }
 0x643   : > { %v8119_v27 = vadd.f32 %v8118_v55, %v8106_v21 }
 0x644   : > { %9396 = vmatpush.bf16.msrb.mxu2 %v15406_v56  ;;  %v15445_v56 = vld [vmem:[%s16612_s3 + $0x2d8] sm:$0xff] }
 0x645   : > { %9371 = vmatpush.bf16.msrb.mxu0 %v15389_v58  ;;  %v15420_v58 = vld [vmem:[%s16612_s3 + $0x210] sm:$0xff]  ;;  %v8107_v60 = vpop.f32.mrf.mxu1 }
 0x646   : > { %9409 = vmatpush.bf16.msrb.mxu3 %v15414_v37  ;;  %9384 = vmatpush.bf16.msrb.mxu1 %v15397_v40  ;;  %v8131_v37 = vpop.f32.mrf.mxu3  ;;  %v15466_v60 = vld [vmem:[%s16612_s3 + $0x380] sm:$0xff] }
 0x647   : > { %v8132_v40 = vadd.f32 %v8131_v37, %v8119_v27  ;;  %v15467_v27 = vld [vmem:[%s16612_s3 + $0x388] sm:$0xff] }
 0x648   : > { %9397 = vmatpush.bf16.msrb.mxu2 %v15405_v34  ;;  %v8094_v34 = vpop.f32.mrf.mxu0 }
 0x649   : > { %9372 = vmatpush.bf16.msrb.mxu0 %v15388_v53  ;;  %v15444_v53 = vld [vmem:[%s16612_s3 + $0x2d0] sm:$0xff]  ;;  %v16461_v61 = vmax.f32 %v8132_v40, 0.0  ;;  %v15450_v40 = vld [vmem:[%s16612_s3 + $0x300] sm:$0xff]  ;;  %v15475_v34 = vld [vmem:[%s16612_s3 + $0x3c8] sm:$0xff] }
 0x64a   : > { %9410 = vmatpush.bf16.msrb.mxu3 %v15413_v59  ;;  %9385 = vmatpush.bf16.msrb.mxu1 %v15396_v62  ;;  %v15436_v59 = vld [vmem:[%s16612_s3 + $0x290] sm:$0xff]  ;;  %v15419_v62 = vld [vmem:[%s16612_s3 + $0x208] sm:$0xff] }
 0x64b   : > { %8269 = vst [vmem:[%s15878_s18 + $0x70] sm:$0xff] %v16461_v61 }
 0x64c   : > { %9398 = vmatpush.bf16.msrb.mxu2 %v15404_v0  ;;  %v15427_v0 = vld [vmem:[%s16612_s3 + $0x248] sm:$0xff] }
 0x64d   : > { %9373 = vmatpush.bf16.msrb.mxu0 %v15387_v6 }
 0x64e   : > { %9411 = vmatpush.bf16.msrb.mxu3 %v15412_v3  ;;  %9386 = vmatpush.bf16.msrb.mxu1 %v15395_v18  ;;  %v8120_v3 = vpop.f32.mrf.mxu2  ;;  %v8133_v6 = vpop.f32.mrf.mxu3  ;;  %v15418_v18 = vld [vmem:[%s16612_s3 + $0x200] sm:$0xff] }
 0x64f   : > { %v8285_v3 = vpack.c.bf16 %v16461_v61, %v16461_v61 }
 0x650   : > { %9399 = vmatpush.bf16.msrb.mxu2 %v15403_v11  ;;  %v15426_v11 = vld [vmem:[%s16612_s3 + $0x240] sm:$0xff] }
 0x651   : > { %9374 = vmatpush.bf16.msrb.mxu0 %v15386_v28  ;;  %v15473_v28 = vld [vmem:[%s16612_s3 + $0x3b8] sm:$0xff] }
 0x652   : > { %9412 = vmatpush.bf16.msrb.mxu3 %v15411_v20  ;;  %9387 = vmatpush.bf16.msrb.mxu1 %v15394_v19  ;;  %v15442_v20 = vld [vmem:[%s16612_s3 + $0x2c0] sm:$0xff]  ;;  %v8144_v46 = vpop.f32.mrf.mxu0 }
 0x653   : > { %v15550_v19 = vld [vmem:[%s15878_s18 + $0x40] sm:$0xff] }
 0x654   : > { %9400 = vmatpush.bf16.msrb.mxu2 %v15402_v24  ;;  %9375 = vmatmul.bf16.vlgmr.msrb.gmra.mxu0 %v8275_v63  ;;  %v8279_v24 = vpack.c.bf16 %v15550_v19, %v15550_v19  ;;  %v8282_v63 = vpack.c.bf16 %v15553_v57, %v15553_v57 }
 0x655   : > { %9419 = vmatpush.bf16.msra.mxu0 %v15425_v29  ;;  %9388 = vmatmul.bf16.vlgmr.msrb.gmra.mxu1 %v8276_v32  ;;  %v15455_v32 = vld [vmem:[%s16612_s3 + $0x328] sm:$0xff] }
 0x656   : > { %9413 = vmatpush.bf16.msrb.mxu3 %v15410_v23  ;;  %9432 = vmatpush.bf16.msra.mxu1 %v15433_v4  ;;  %v15551_v23 = vld [vmem:[%s15878_s18 + $0x48] sm:$0xff]  ;;  %v15456_v4 = vld [vmem:[%s16612_s3 + $0x330] sm:$0xff] }
 0x657   : > { %9401 = vmatmul.bf16.vlgmr.msrb.gmra.mxu2 %v8277_v2  ;;  %v8280_v29 = vpack.c.bf16 %v15551_v23, %v15551_v23  ;;  %v15463_v2 = vld [vmem:[%s16612_s3 + $0x368] sm:$0xff] }
 0x658   : > { %9445 = vmatpush.bf16.msra.mxu2 %v15441_v16  ;;  %v15481_v16 = vld [vmem:[%s16612_s3 + $0x3f8] sm:$0xff] }
 0x659   : > { %9414 = vmatmul.bf16.vlgmr.msrb.gmra.mxu3 %v8278_v7  ;;  %9420 = vmatpush.bf16.msra.mxu0 %v15424_v39  ;;  %v15464_v39 = vld [vmem:[%s16612_s3 + $0x370] sm:$0xff]  ;;  %v15462_v7 = vld [vmem:[%s16612_s3 + $0x360] sm:$0xff] }
 0x65a   : > { %9458 = vmatpush.bf16.msra.mxu3 %v15449_v35  ;;  %9433 = vmatpush.bf16.msra.mxu1 %v15432_v45  ;;  %v8281_v35 = vpack.c.bf16 %v15552_v33, %v15552_v33  ;;  %v15471_v45 = vld [vmem:[%s16612_s3 + $0x3a8] sm:$0xff] }
 0x65c   : > { %9446 = vmatpush.bf16.msra.mxu2 %v15440_v10  ;;  %v15454_v10 = vld [vmem:[%s16612_s3 + $0x320] sm:$0xff] }
 0x65d   : > { %9421 = vmatpush.bf16.msra.mxu0 %v15423_v54  ;;  %v8157_v54 = vpop.f32.mrf.mxu1 }
 0x65e   : > { %9459 = vmatpush.bf16.msra.mxu3 %v15448_v30  ;;  %9434 = vmatpush.bf16.msra.mxu1 %v15431_v36  ;;  %v15470_v30 = vld [vmem:[%s16612_s3 + $0x3a0] sm:$0xff]  ;;  %v15453_v36 = vld [vmem:[%s16612_s3 + $0x318] sm:$0xff]  ;;  %v8183_v48 = vpop.f32.mrf.mxu3 }
 0x660   : > { %9447 = vmatpush.bf16.msra.mxu2 %v15439_v47  ;;  %v15478_v47 = vld [vmem:[%s16612_s3 + $0x3e0] sm:$0xff] }
 0x661   : > { %9422 = vmatpush.bf16.msra.mxu0 %v15422_v25  ;;  %v8170_v25 = vpop.f32.mrf.mxu2 }
 0x662   : > { %9460 = vmatpush.bf16.msra.mxu3 %v15447_v15  ;;  %9435 = vmatpush.bf16.msra.mxu1 %v15430_v42  ;;  %v15469_v15 = vld [vmem:[%s16612_s3 + $0x398] sm:$0xff]  ;;  %v15452_v42 = vld [vmem:[%s16612_s3 + $0x310] sm:$0xff] }
 0x664   : > { %9448 = vmatpush.bf16.msra.mxu2 %v15438_v49  ;;  %v8146_v49 = vpop.f32.mrf.mxu0 }
 0x665   : > { %9423 = vmatpush.bf16.msra.mxu0 %v15421_v12  ;;  %v8159_v21 = vpop.f32.mrf.mxu1  ;;  %v15451_v12 = vld [vmem:[%s16612_s3 + $0x308] sm:$0xff] }
 0x666   : > { %9461 = vmatpush.bf16.msra.mxu3 %v15446_v51  ;;  %9436 = vmatpush.bf16.msra.mxu1 %v15429_v52  ;;  %v15468_v51 = vld [vmem:[%s16612_s3 + $0x390] sm:$0xff]  ;;  %v15483_v21 = vld [vmem:[%s16614_s5 + $0x8] sm:$0xff] }
 0x667   : > { %v15476_v52 = vld [vmem:[%s16612_s3 + $0x3d0] sm:$0xff] }
 0x668   : > { %9449 = vmatpush.bf16.msra.mxu2 %v15437_v43  ;;  %v15554_v43 = vld [vmem:[#allocation4 + $0x8] sm:$0xff] }
 0x669   : > { %9424 = vmatpush.bf16.msra.mxu0 %v15420_v58  ;;  %v1438_v55 = vperm.slane %v15554_v43, 7  ;;  %v8172_v37 = vpop.f32.mrf.mxu2  ;;  %v8185_v58 = vpop.f32.mrf.mxu3 }
 0x66a   : > { %9462 = vmatpush.bf16.msra.mxu3 %v15445_v56  ;;  %9437 = vmatpush.bf16.msra.mxu1 %v15428_v38  ;;  %v15459_v56 = vld [vmem:[%s16612_s3 + $0x348] sm:$0xff] }
 0x66b   : > { %v8145_v38 = vadd.f32 %v8144_v46, %v1438_v55 }
 0x66c   : > { %9450 = vmatpush.bf16.msra.mxu2 %v15436_v59  ;;  %v15458_v59 = vld [vmem:[%s16612_s3 + $0x340] sm:$0xff] }
 0x66d   : > { %9425 = vmatpush.bf16.msra.mxu0 %v15419_v62  ;;  %v8158_v62 = vadd.f32 %v8157_v54, %v8145_v38 }
 0x66e   : > { %9463 = vmatpush.bf16.msra.mxu3 %v15444_v53  ;;  %9438 = vmatpush.bf16.msra.mxu1 %v15427_v0  ;;  %v8283_v53 = vpack.c.bf16 %v16156_v26, %v16156_v26  ;;  %v15474_v0 = vld [vmem:[%s16612_s3 + $0x3c0] sm:$0xff] }
 0x670   : > { %9451 = vmatpush.bf16.msra.mxu2 %v15435_v1  ;;  %v8284_v1 = vpack.c.bf16 %v16253_v31, %v16253_v31 }
 0x671   : > { %9426 = vmatpush.bf16.msra.mxu0 %v15418_v18 }
 0x672   : > { %9464 = vmatpush.bf16.msra.mxu3 %v15443_v5  ;;  %9439 = vmatpush.bf16.msra.mxu1 %v15426_v11  ;;  %v8171_v5 = vadd.f32 %v8170_v25, %v8158_v62 }
 0x674   : > { %9452 = vmatpush.bf16.msra.mxu2 %v15434_v50  ;;  %9427 = vmatmul.bf16.vlgmr.msra.gmra.mxu0 %v8279_v24  ;;  %v8184_v26 = vadd.f32 %v8183_v48, %v8171_v5 }
 0x675   : > { %9471 = vmatpush.bf16.msrb.mxu0 %v15457_v22  ;;  %9440 = vmatmul.bf16.vlgmr.msra.gmra.mxu1 %v8280_v29 }
 0x676   : > { %9465 = vmatpush.bf16.msra.mxu3 %v15442_v20  ;;  %9484 = vmatpush.bf16.msrb.mxu1 %v15465_v14 }
 0x677   : > { %9453 = vmatmul.bf16.vlgmr.msra.gmra.mxu2 %v8281_v35 }
 0x678   : > { %9497 = vmatpush.bf16.msrb.mxu2 %v15473_v28 }
 0x679   : > { %9466 = vmatmul.bf16.vlgmr.msra.gmra.mxu3 %v8282_v63  ;;  %9472 = vmatpush.bf16.msrb.mxu0 %v15456_v4  ;;  %v15535_v4 = vld [vmem:[#allocation6] ss:$0 sm:$0xff] }
 0x67a   : > { %9510 = vmatpush.bf16.msrb.mxu3 %v15481_v16  ;;  %9485 = vmatpush.bf16.msrb.mxu1 %v15464_v39 }
 0x67c   : > { %9498 = vmatpush.bf16.msrb.mxu2 %v15472_v41 }
 0x67d   : > { %9473 = vmatpush.bf16.msrb.mxu0 %v15455_v32 }
 0x67e   : > { %9511 = vmatpush.bf16.msrb.mxu3 %v15480_v44  ;;  %9486 = vmatpush.bf16.msrb.mxu1 %v15463_v2 }
 0x680   : > { %9499 = vmatpush.bf16.msrb.mxu2 %v15471_v45 }
 0x681   : > { %9474 = vmatpush.bf16.msrb.mxu0 %v15454_v10 }
 0x682   : > { %9512 = vmatpush.bf16.msrb.mxu3 %v15479_v8  ;;  %9487 = vmatpush.bf16.msrb.mxu1 %v15462_v7 }
 0x684   : > { %9500 = vmatpush.bf16.msrb.mxu2 %v15470_v30 }
 0x685   : > { %9475 = vmatpush.bf16.msrb.mxu0 %v15453_v36 }
 0x686   : > { %9513 = vmatpush.bf16.msrb.mxu3 %v15478_v47  ;;  %9488 = vmatpush.bf16.msrb.mxu1 %v15461_v9 }
 0x688   : > { %9501 = vmatpush.bf16.msrb.mxu2 %v15469_v15 }
 0x689   : > { %9476 = vmatpush.bf16.msrb.mxu0 %v15452_v42 }
 0x68a   : > { %9514 = vmatpush.bf16.msrb.mxu3 %v15477_v17  ;;  %9489 = vmatpush.bf16.msrb.mxu1 %v15460_v13 }
 0x68c   : > { %9502 = vmatpush.bf16.msrb.mxu2 %v15468_v51 }
 0x68d   : > { %9477 = vmatpush.bf16.msrb.mxu0 %v15451_v12  ;;  %v15482_v12 = vld [vmem:[%s16614_s5] sm:$0xff] }
 0x68e   : > { %9515 = vmatpush.bf16.msrb.mxu3 %v15476_v52  ;;  %9490 = vmatpush.bf16.msrb.mxu1 %v15459_v56 }
 0x690   : > { %9503 = vmatpush.bf16.msrb.mxu2 %v15467_v27  ;;  %v8196_v6 = vpop.f32.mrf.mxu0 }
 0x691   : > { %9478 = vmatpush.bf16.msrb.mxu0 %v15450_v40  ;;  %v8197_v11 = vadd.f32 %v8196_v6, %v8184_v26 }
 0x692   : > { %9516 = vmatpush.bf16.msrb.mxu3 %v15475_v34  ;;  %9491 = vmatpush.bf16.msrb.mxu1 %v15458_v59  ;;  %v8209_v18 = vpop.f32.mrf.mxu1 }
 0x693   : > { %v8210_v50 = vadd.f32 %v8209_v18, %v8197_v11 }
 0x694   : > { %9504 = vmatpush.bf16.msrb.mxu2 %v15466_v60  ;;  %9479 = vmatmul.bf16.vlgmr.msrb.gmra.mxu0 %v8283_v53 }
 0x695   : > { %9492 = vmatmul.bf16.vlgmr.msrb.gmra.mxu1 %v8284_v1  ;;  %9555 = vmatpush.bf16.msra.mxu0 %v15483_v21 }
 0x696   : > { %9517 = vmatpush.bf16.msrb.mxu3 %v15474_v0 }
 0x697   : > { %9505 = vmatmul.bf16.vlgmr.msrb.gmra.mxu2 %v8285_v3 }
 0x698   : > { %v8198_v28 = vpop.f32.mrf.mxu0 }
 0x699   : > { %9556 = vmatpush.bf16.msra.mxu0 %v15482_v12 }
 0x69a   : > { %v8222_v20 = vpop.f32.mrf.mxu2  ;;  %v8211_v19 = vpop.f32.mrf.mxu1 }
 0x69b   : > { %v8223_v22 = vadd.f32 %v8222_v20, %v8210_v50  ;;  %v15536_v50 = vld [vmem:[#allocation7] ss:$0 sm:$0xff] }
 0x69c   : > { %v8235_v14 = vpop.f32.mrf.mxu3 }
 0x69d   : > { %v8236_v31 = vadd.f32 %v8235_v14, %v8223_v22 }
 0x69f   : > { %v8254_v24 = vmax.f32 %v8236_v31, 0.0 }
 0x6a1   : > { %8270 = vst [vmem:[%s15878_s18 + $0x78] sm:$0xff] %v8254_v24  ;;  %v8286_v61 = vpack.c.bf16 %v8254_v24, %v8254_v24 }
 0x6a2   : > { %v8224_v23 = vpop.f32.mrf.mxu2 }
 0x6a3   : > { %9518 = vmatmul.bf16.vlgmr.msrb.gmra.mxu3 %v8286_v61 }
 0x6a4   : > { %v8237_v29 = vpop.f32.mrf.mxu3 }
 0x6b1   : > { %v9324_v16 = vpop.f32.mrf.mxu0 }
 0x6b2   : > { %v9325_v33 = vadd.f32 %v15535_v4, %v9324_v16  ;;  %v9337_v35 = vpop.f32.mrf.mxu1 }
 0x6b4   : > { %v9338_v57 = vadd.f32 %v9337_v35, %v9325_v33 }
 0x6b9   : > { %v9326_v32 = vpop.f32.mrf.mxu0 }
 0x6ba   : > { %v9350_v63 = vpop.f32.mrf.mxu2  ;;  %v9339_v44 = vpop.f32.mrf.mxu1 }
 0x6bb   : > { %v9351_v39 = vadd.f32 %v9350_v63, %v9338_v57 }
 0x6bc   : > { %v9363_v41 = vpop.f32.mrf.mxu3 }
 0x6bd   : > { %v9364_v2 = vadd.f32 %v9363_v41, %v9351_v39 }
 0x6c2   : > { %v9352_v45 = vpop.f32.mrf.mxu2 }
 0x6c4   : > { %v9365_v10 = vpop.f32.mrf.mxu3 }
 0x6d1   : > { %v9376_v46 = vpop.f32.mrf.mxu0 }
 0x6d2   : > { %v9377_v8 = vadd.f32 %v9376_v46, %v9364_v2  ;;  %v9389_v7 = vpop.f32.mrf.mxu1 }
 0x6d4   : > { %v9390_v30 = vadd.f32 %v9389_v7, %v9377_v8 }
 0x6d9   : > { %v9378_v47 = vpop.f32.mrf.mxu0 }
 0x6da   : > { %v9402_v54 = vpop.f32.mrf.mxu2  ;;  %v9391_v9 = vpop.f32.mrf.mxu1 }
 0x6db   : > { %v9403_v27 = vadd.f32 %v9402_v54, %v9390_v30 }
 0x6dc   : > { %v9415_v36 = vpop.f32.mrf.mxu3 }
 0x6dd   : > { %v9416_v37 = vadd.f32 %v9415_v36, %v9403_v27 }
 0x6e2   : > { %v9404_v15 = vpop.f32.mrf.mxu2 }
 0x6e4   : > { %v9417_v25 = vpop.f32.mrf.mxu3 }
 0x6f1   : > { %v9428_v48 = vpop.f32.mrf.mxu0 }
 0x6f2   : > { %v9441_v42 = vpop.f32.mrf.mxu1  ;;  %v9429_v34 = vadd.f32 %v9428_v48, %v9416_v37 }
 0x6f4   : > { %v9442_v59 = vadd.f32 %v9441_v42, %v9429_v34 }
 0x6f9   : > { %v9430_v13 = vpop.f32.mrf.mxu0 }
 0x6fa   : > { %v9454_v49 = vpop.f32.mrf.mxu2  ;;  %v9443_v51 = vpop.f32.mrf.mxu1 }
 0x6fb   : > { %v9455_v60 = vadd.f32 %v9454_v49, %v9442_v59 }
 0x6fc   : > { %v9467_v17 = vpop.f32.mrf.mxu3 }
 0x6fd   : > { %v9468_v62 = vadd.f32 %v9467_v17, %v9455_v60 }
 0x702   : > { %v9456_v52 = vpop.f32.mrf.mxu2 }
 0x704   : > { %v9469_v43 = vpop.f32.mrf.mxu3 }
 0x711   : > { %v9480_v55 = vpop.f32.mrf.mxu0 }
 0x712   : > { %v9493_v56 = vpop.f32.mrf.mxu1  ;;  %v9481_v0 = vadd.f32 %v9480_v55, %v9468_v62 }
 0x714   : > { %v9494_v1 = vadd.f32 %v9493_v56, %v9481_v0 }
 0x719   : > { %v9482_v40 = vpop.f32.mrf.mxu0 }
 0x71a   : > { %v9506_v58 = vpop.f32.mrf.mxu2  ;;  %v9495_v38 = vpop.f32.mrf.mxu1 }
 0x71b   : > { %v9507_v3 = vadd.f32 %v9506_v58, %v9494_v1 }
 0x722   : > { %v9508_v53 = vpop.f32.mrf.mxu2 }
 0x726   : > { %v9519_v5 = vpop.f32.mrf.mxu3 }
 0x727   : > { %v9520_v26 = vadd.f32 %v9519_v5, %v9507_v3 }
 0x729   : > { %v9523_v6 = vmax.f32 %v9520_v26, 0.0 }
 0x72b   : > { %v9524_v18 = vpack.c.bf16 %v9523_v6, %v9523_v6 }
 0x72d   : > { %14325 = vmatmul.msk.bf16.vlgmr.msra.gmra.mxu0 %vm9545_vm0, %v9524_v18 }
 0x72e   : > { %v9521_v11 = vpop.f32.mrf.mxu3 }
 0x7aa   : > { %v9558_v20 = vpop.f32.mrf.mxu0 }
 0x7ab   : > { %v9559_v22 = vadd.f32 %v15536_v50, %v9558_v20 }
 0x7ad   : > { %9563 = vst.msk [vmem:[%s377_s14] sm:$0xff] %vm9562_vm1, %v9559_v22 }
 0x7b2   : > { %v9560_v14 = vpop.f32.mrf.mxu0 }
 0x7b3 PF: > { %s22_s27 = sadd.s32 1, %s15693_s27  }
 0x7b4   : > { %p19_p7 = scmp.ge.s32.totalorder %s22_s27, 4  }
 0x7b6   :  { %21 = sbr.rel (!%p19_p7) target bundleno = 3 (0x3), region = 107 }
 0x7bb   :  { %9599 = vsyncpa [#allocation3], 1 }
 0x7bc   :  { %9601 = vsyncpa [#allocation3 + $0x1], 1 }
 0x7bd   :  { %9602 = vsyncpa [#allocation5], 1 }
 0x7be   :  { %9603 = vsyncpa [#allocation8], 1 }

</bundles_post_ra>
